<compile_context>
chip_gen: v7x
topology: tpu7x:2x2x1
jax: 0.10.0
libtpu: 0.0.40
codegen_flags: <defaults>
</compile_context>

<pallas_src>
import functools

import jax
import jax.numpy as jnp
from jax import lax
from jax.experimental import pallas as pl
from jax.experimental.pallas import tpu as pltpu

EPS = 1e-5
LANE = 128                # channel / K axes padded to a multiple of this
TILE_M = 512              # flattened-spatial rows per grid step
W_OFF = 8                 # sublane-aligned column offset of the image inside
                          # the conv scratch (left zero-halo lives at col W_OFF-1)


def _round_up(a, m):
    return (a + m - 1) // m * m


def _vmem_limit_bytes():
    """Generation-aware scoped-VMEM limit (~56 MiB v7x, ~112 MiB v5e/v6e)."""
    try:
        cap = int(pltpu.get_tpu_info().vmem_capacity_bytes)
    except Exception:
        cap = 64 * 1024 * 1024
    return max(32 * 1024 * 1024, min(cap - 8 * 1024 * 1024, 112 * 1024 * 1024))


_VMEM_LIMIT = _vmem_limit_bytes()


# --------------------------------------------------------------------------- kernels
def _matmul_stats_kernel(x_ref, w_ref, z_ref, sum_ref, sq_ref):
    """z = x @ w (bf16 operands, f32 accum) + per-channel sum / sum-of-squares.

    M-padding rows of x are zero (wrapper pads with zeros) so stats stay clean.
    z is stored in bf16; stats stay f32."""
    @pl.when(pl.program_id(0) == 0)
    def _():
        sum_ref[...] = jnp.zeros_like(sum_ref)
        sq_ref[...] = jnp.zeros_like(sq_ref)

    z = jnp.dot(x_ref[...], w_ref[...], preferred_element_type=jnp.float32)
    z_ref[...] = z.astype(z_ref.dtype)
    sum_ref[...] += jnp.sum(z, axis=0, keepdims=True)
    sq_ref[...] += jnp.sum(z * z, axis=0, keepdims=True)


def _bn_matmul_stats_kernel(x_ref, sc_ref, sh_ref, w_ref, z_ref, sum_ref, sq_ref,
                            *, count, tile_m):
    """Fused: y = relu(x*scale + shift), rows >= count masked to 0, then
    z = y @ w + per-channel stats of z.  (Replaces the old BN epilogue pass.)"""
    @pl.when(pl.program_id(0) == 0)
    def _():
        sum_ref[...] = jnp.zeros_like(sum_ref)
        sq_ref[...] = jnp.zeros_like(sq_ref)

    y = x_ref[...].astype(jnp.float32) * sc_ref[...] + sh_ref[...]
    y = jnp.maximum(y, 0.0)
    row = (lax.broadcasted_iota(jnp.int32, (tile_m, 1), 0)
           + pl.program_id(0) * tile_m)
    y = jnp.where(row < count, y, 0.0)       # keep this stage's stats clean
    z = jnp.dot(y.astype(jnp.bfloat16), w_ref[...],
                preferred_element_type=jnp.float32)
    z_ref[...] = z.astype(z_ref.dtype)
    sum_ref[...] += jnp.sum(z, axis=0, keepdims=True)
    sq_ref[...] += jnp.sum(z * z, axis=0, keepdims=True)


def _bn_matmul2_stats_kernel(x_ref, sc_ref, sh_ref, w_ref, xs_ref, ws_ref,
                             z_ref, sum_ref, sq_ref, zs_ref, ssum_ref, ssq_ref,
                             *, count, tile_m):
    """Stage-3 main matmul (fused input BN/ReLU) + projection-shortcut matmul
    in one M-tiled pass; two z outputs + two stats pairs."""
    @pl.when(pl.program_id(0) == 0)
    def _():
        sum_ref[...] = jnp.zeros_like(sum_ref)
        sq_ref[...] = jnp.zeros_like(sq_ref)
        ssum_ref[...] = jnp.zeros_like(ssum_ref)
        ssq_ref[...] = jnp.zeros_like(ssq_ref)

    y = x_ref[...].astype(jnp.float32) * sc_ref[...] + sh_ref[...]
    y = jnp.maximum(y, 0.0)
    row = (lax.broadcasted_iota(jnp.int32, (tile_m, 1), 0)
           + pl.program_id(0) * tile_m)
    y = jnp.where(row < count, y, 0.0)
    z = jnp.dot(y.astype(jnp.bfloat16), w_ref[...],
                preferred_element_type=jnp.float32)
    z_ref[...] = z.astype(z_ref.dtype)
    sum_ref[...] += jnp.sum(z, axis=0, keepdims=True)
    sq_ref[...] += jnp.sum(z * z, axis=0, keepdims=True)

    # shortcut: raw (already zero-padded) input, no BN on the conv input
    zs = jnp.dot(xs_ref[...], ws_ref[...], preferred_element_type=jnp.float32)
    zs_ref[...] = zs.astype(zs_ref.dtype)
    ssum_ref[...] += jnp.sum(zs, axis=0, keepdims=True)
    ssq_ref[...] += jnp.sum(zs * zs, axis=0, keepdims=True)


def _bn_conv3x3_stats_kernel(x_ref, sc_ref, sh_ref, w_ref,
                             z_ref, sum_ref, sq_ref,
                             xpad_ref, acc_ref, *, H, W):
    """3x3 stride-1 'same' conv of one image with the previous stage's BN/ReLU
    fused into the load path + BN statistics of the conv output.

    * x_ref is the raw flat (H*W, C) pre-BN activation block of image i (bf16).
    * Spatial zero padding happens in VMEM: the normalized image is written at
      a sublane-ALIGNED column offset (W_OFF=8) into a persistent scratch whose
      halo is zeroed once at step 0 -> no wrapper jnp.pad HBM round trip and no
      misaligned stores.
    * im2col uses only 3 dw-shifted slice+reshape copies; the dh shifts are
      contiguous row windows of those copies.
    * The f32 accumulator lives in a VMEM scratch, not in vregs."""
    @pl.when(pl.program_id(0) == 0)
    def _():
        sum_ref[...] = jnp.zeros_like(sum_ref)
        sq_ref[...] = jnp.zeros_like(sq_ref)
        xpad_ref[...] = jnp.zeros_like(xpad_ref)   # halo stays zero for all steps

    c = x_ref.shape[-1]
    y = x_ref[...].astype(jnp.float32) * sc_ref[...] + sh_ref[...]
    y = jnp.maximum(y, 0.0)
    # image occupies rows [1, H+1) and columns [W_OFF, W_OFF+W) of the scratch
    xpad_ref[1:H + 1, W_OFF:W_OFF + W, :] = y.reshape(H, W, c).astype(jnp.bfloat16)

    first = True
    for dw in range(3):
        # input column ow+dw-1 == scratch column ow + (W_OFF - 1 + dw)
        xs = xpad_ref[:, W_OFF - 1 + dw:W_OFF - 1 + dw + W, :]      # (H+2, W, C)
        xs = xs.reshape((H + 2) * W, c)
        for dh in range(3):
            part = jnp.dot(xs[dh * W:dh * W + H * W, :], w_ref[dh, dw],
                           preferred_element_type=jnp.float32)
            if first:
                acc_ref[...] = part
                first = False
            else:
                acc_ref[...] += part

    acc = acc_ref[...]
    z_ref[...] = acc.astype(z_ref.dtype)
    sum_ref[...] += jnp.sum(acc, axis=0, keepdims=True)
    sq_ref[...] += jnp.sum(acc * acc, axis=0, keepdims=True)


def _scale_shift_relu_kernel(z_ref, sc_ref, sh_ref, o_ref, *, count, tile_m):
    """Standalone BN(scale/shift)+ReLU epilogue (only for the stride!=1
    fallback); zeroes M-padding rows so downstream stats stay clean."""
    y = jnp.maximum(z_ref[...].astype(jnp.float32) * sc_ref[...] + sh_ref[...], 0.0)
    row = (lax.broadcasted_iota(jnp.int32, (tile_m, 1), 0)
           + pl.program_id(0) * tile_m)
    o_ref[...] = jnp.where(row < count, y, 0.0).astype(o_ref.dtype)


def _final_proj_kernel(z3_ref, sc3_ref, sh3_ref, zs_ref, scs_ref, shs_ref, o_ref):
    main = z3_ref[...].astype(jnp.float32) * sc3_ref[...] + sh3_ref[...]
    sc = zs_ref[...].astype(jnp.float32) * scs_ref[...] + shs_ref[...]
    o_ref[...] = jnp.maximum(main + sc, 0.0).astype(o_ref.dtype)


def _final_id_kernel(z3_ref, sc3_ref, sh3_ref, x_ref, o_ref):
    main = z3_ref[...].astype(jnp.float32) * sc3_ref[...] + sh3_ref[...]
    o_ref[...] = jnp.maximum(main + x_ref[...].astype(jnp.float32),
                             0.0).astype(o_ref.dtype)


# --------------------------------------------------------------------------- pallas_call wrappers
def _row_spec(tile_m, c):
    return pl.BlockSpec((tile_m, c), lambda i: (i, 0))


def _vec_spec(c):
    return pl.BlockSpec((1, c), lambda i: (0, 0))


def _full_spec(shape):
    nd = len(shape)
    return pl.BlockSpec(shape, lambda i: (0,) * nd)


def _matmul_stats(x, w):
    mp, k = x.shape
    c = w.shape[1]
    return pl.pallas_call(
        _matmul_stats_kernel,
        grid=(mp // TILE_M,),
        in_specs=[_row_spec(TILE_M, k), _full_spec((k, c))],
        out_specs=[_row_spec(TILE_M, c), _vec_spec(c), _vec_spec(c)],
        out_shape=[jax.ShapeDtypeStruct((mp, c), jnp.bfloat16),
                   jax.ShapeDtypeStruct((1, c), jnp.float32),
                   jax.ShapeDtypeStruct((1, c), jnp.float32)],
        compiler_params=pltpu.CompilerParams(
            dimension_semantics=("arbitrary",),     # stats reduce across the grid
            vmem_limit_bytes=_VMEM_LIMIT),
        cost_estimate=pl.CostEstimate(
            flops=2 * mp * k * c, transcendentals=0,
            bytes_accessed=mp * k * 2 + k * c * 2 + mp * c * 2),
    )(x, w)


def _bn_matmul_stats(x, scale, shift, w, *, count):
    mp, k = x.shape
    c = w.shape[1]
    kernel = functools.partial(_bn_matmul_stats_kernel, count=count, tile_m=TILE_M)
    return pl.pallas_call(
        kernel,
        grid=(mp // TILE_M,),
        in_specs=[_row_spec(TILE_M, k), _vec_spec(k), _vec_spec(k),
                  _full_spec((k, c))],
        out_specs=[_row_spec(TILE_M, c), _vec_spec(c), _vec_spec(c)],
        out_shape=[jax.ShapeDtypeStruct((mp, c), jnp.bfloat16),
                   jax.ShapeDtypeStruct((1, c), jnp.float32),
                   jax.ShapeDtypeStruct((1, c), jnp.float32)],
        compiler_params=pltpu.CompilerParams(
            dimension_semantics=("arbitrary",),
            vmem_limit_bytes=_VMEM_LIMIT),
        cost_estimate=pl.CostEstimate(
            flops=2 * mp * k * c, transcendentals=0,
            bytes_accessed=mp * k * 2 + k * c * 2 + mp * c * 2),
    )(x, scale, shift, w)


def _bn_matmul2_stats(x, scale, shift, w, xs, ws, *, count):
    mp, k = x.shape
    ks = xs.shape[1]
    c = w.shape[1]
    kernel = functools.partial(_bn_matmul2_stats_kernel, count=count, tile_m=TILE_M)
    return pl.pallas_call(
        kernel,
        grid=(mp // TILE_M,),
        in_specs=[_row_spec(TILE_M, k), _vec_spec(k), _vec_spec(k),
                  _full_spec((k, c)),
                  _row_spec(TILE_M, ks), _full_spec((ks, c))],
        out_specs=[_row_spec(TILE_M, c), _vec_spec(c), _vec_spec(c),
                   _row_spec(TILE_M, c), _vec_spec(c), _vec_spec(c)],
        out_shape=[jax.ShapeDtypeStruct((mp, c), jnp.bfloat16),
                   jax.ShapeDtypeStruct((1, c), jnp.float32),
                   jax.ShapeDtypeStruct((1, c), jnp.float32),
                   jax.ShapeDtypeStruct((mp, c), jnp.bfloat16),
                   jax.ShapeDtypeStruct((1, c), jnp.float32),
                   jax.ShapeDtypeStruct((1, c), jnp.float32)],
        compiler_params=pltpu.CompilerParams(
            dimension_semantics=("arbitrary",),
            vmem_limit_bytes=_VMEM_LIMIT),
        cost_estimate=pl.CostEstimate(
            flops=2 * mp * (k + ks) * c, transcendentals=0,
            bytes_accessed=(mp * (k + ks) * 2 + (k + ks) * c * 2
                            + 2 * mp * c * 2)),
    )(x, scale, shift, w, xs, ws)


def _bn_conv3x3_stats(z_flat, scale, shift, w2, *, n, h, w):
    c = w2.shape[2]
    cout = w2.shape[3]
    kernel = functools.partial(_bn_conv3x3_stats_kernel, H=h, W=w)
    return pl.pallas_call(
        kernel,
        grid=(n,),
        in_specs=[pl.BlockSpec((h * w, c), lambda i: (i, 0)),
                  _vec_spec(c), _vec_spec(c),
                  _full_spec((3, 3, c, cout))],
        out_specs=[pl.BlockSpec((h * w, cout), lambda i: (i, 0)),
                   _vec_spec(cout), _vec_spec(cout)],
        out_shape=[jax.ShapeDtypeStruct((n * h * w, cout), jnp.bfloat16),
                   jax.ShapeDtypeStruct((1, cout), jnp.float32),
                   jax.ShapeDtypeStruct((1, cout), jnp.float32)],
        scratch_shapes=[pltpu.VMEM((h + 2, w + 2 * W_OFF, c), jnp.bfloat16),
                        pltpu.VMEM((h * w, cout), jnp.float32)],
        compiler_params=pltpu.CompilerParams(
            dimension_semantics=("arbitrary",),
            vmem_limit_bytes=_VMEM_LIMIT),
        cost_estimate=pl.CostEstimate(
            flops=2 * n * h * w * 9 * c * cout, transcendentals=0,
            bytes_accessed=(n * h * w * c * 2 + 9 * c * cout * 2
                            + n * h * w * cout * 2)),
    )(z_flat, scale, shift, w2)


def _scale_shift_act(z, scale, shift, *, count):
    mp, c = z.shape
    kernel = functools.partial(_scale_shift_relu_kernel, count=count, tile_m=TILE_M)
    return pl.pallas_call(
        kernel,
        grid=(mp // TILE_M,),
        in_specs=[_row_spec(TILE_M, c), _vec_spec(c), _vec_spec(c)],
        out_specs=_row_spec(TILE_M, c),
        out_shape=jax.ShapeDtypeStruct((mp, c), jnp.bfloat16),
        compiler_params=pltpu.CompilerParams(
            dimension_semantics=("parallel",),
            vmem_limit_bytes=_VMEM_LIMIT),
    )(z, scale, shift)


def _final_proj(z3, sc3, sh3, zs, scs, shs):
    mp, c = z3.shape
    return pl.pallas_call(
        _final_proj_kernel,
        grid=(mp // TILE_M,),
        in_specs=[_row_spec(TILE_M, c), _vec_spec(c), _vec_spec(c),
                  _row_spec(TILE_M, c), _vec_spec(c), _vec_spec(c)],
        out_specs=_row_spec(TILE_M, c),
        out_shape=jax.ShapeDtypeStruct((mp, c), jnp.bfloat16),
        compiler_params=pltpu.CompilerParams(
            dimension_semantics=("parallel",),
            vmem_limit_bytes=_VMEM_LIMIT),
    )(z3, sc3, sh3, zs, scs, shs)


def _final_id(z3, sc3, sh3, x_sc):
    mp, c = z3.shape
    return pl.pallas_call(
        _final_id_kernel,
        grid=(mp // TILE_M,),
        in_specs=[_row_spec(TILE_M, c), _vec_spec(c), _vec_spec(c),
                  _row_spec(TILE_M, c)],
        out_specs=_row_spec(TILE_M, c),
        out_shape=jax.ShapeDtypeStruct((mp, c), jnp.bfloat16),
        compiler_params=pltpu.CompilerParams(
            dimension_semantics=("parallel",),
            vmem_limit_bytes=_VMEM_LIMIT),
    )(z3, sc3, sh3, x_sc)


# --------------------------------------------------------------------------- JAX glue
def _bn_scale_shift(ssum, ssq, gamma, beta, count):
    """Per-channel scale/shift of train-mode BN from the kernel's f32 stats."""
    mean = ssum / count
    var = jnp.maximum(ssq / count - mean * mean, 0.0)   # clamp f32 cancellation
    scale = gamma * lax.rsqrt(var + EPS)
    return scale, beta - mean * scale


def _im2col3x3(x_nhwc, stride):
    """(N,H,W,C) -> (N*Ho*Wo, 9*C) patches (stride!=1 fallback only)."""
    n, h, w, c = x_nhwc.shape
    xp = jnp.pad(x_nhwc, ((0, 0), (1, 1), (1, 1), (0, 0)))
    pats = [xp[:, dh:dh + h, dw:dw + w, :][:, ::stride, ::stride, :]
            for dh in range(3) for dw in range(3)]
    p = jnp.stack(pats, axis=3)                     # (N, Ho, Wo, 9, C)
    ho, wo = p.shape[1], p.shape[2]
    return p.reshape(n * ho * wo, 9 * c), ho, wo


def init_bottleneck_params(key, in_channels, bottleneck_channels, out_channels,
                           stride=1):
    cin, cb, cout = in_channels, bottleneck_channels, out_channels
    ks = jax.random.split(key, 8)
    p = {
        "w1": 0.1 * jax.random.normal(ks[0], (cin, cb), jnp.float32),
        "b1": 0.05 * jax.random.normal(ks[1], (1, cb), jnp.float32),
        "g1": jnp.ones((1, cb), jnp.float32), "be1": jnp.zeros((1, cb), jnp.float32),
        "w2": 0.1 * jax.random.normal(ks[2], (3, 3, cb, cb), jnp.float32),   # HWIO
        "b2": 0.05 * jax.random.normal(ks[3], (1, cb), jnp.float32),
        "g2": jnp.ones((1, cb), jnp.float32), "be2": jnp.zeros((1, cb), jnp.float32),
        "w3": 0.1 * jax.random.normal(ks[4], (cb, cout), jnp.float32),
        "b3": 0.05 * jax.random.normal(ks[5], (1, cout), jnp.float32),
        "g3": jnp.ones((1, cout), jnp.float32), "be3": jnp.zeros((1, cout), jnp.float32),
    }
    if stride != 1 or cin != cout:
        p.update({
            "ws": 0.1 * jax.random.normal(ks[6], (cin, cout), jnp.float32),
            "bs": 0.05 * jax.random.normal(ks[7], (1, cout), jnp.float32),
            "gs": jnp.ones((1, cout), jnp.float32),
            "bes": jnp.zeros((1, cout), jnp.float32),
        })
    return p


@functools.partial(jax.jit, static_argnames=("stride",))
def bottleneck_block_forward(x_nchw, params, stride=1):
    x = jnp.transpose(x_nchw, (0, 2, 3, 1)).astype(jnp.float32)   # NHWC
    n, h, w, cin = x.shape
    cb = params["w1"].shape[1]
    cout = params["w3"].shape[1]
    project = (stride != 1) or (cin != cout)
    ho = (h - 1) // stride + 1
    wo = (w - 1) // stride + 1

    cin_p = _round_up(cin, LANE)
    cb_p = _round_up(cb, LANE)
    cout_p = _round_up(cout, LANE)

    xb = x.astype(jnp.bfloat16)        # bf16 MXU operands; stats/epilogues in f32

    def pad_vec(v, c_p):
        return jnp.pad(v, ((0, 0), (0, c_p - v.shape[1])))

    # ---- stage 1: z1 = conv1_1x1(x) + stats   (conv bias cancels in train BN)
    m1 = n * h * w
    m1p = _round_up(m1, TILE_M)
    x_flat = jnp.pad(xb.reshape(m1, cin), ((0, m1p - m1), (0, cin_p - cin)))
    w1p = jnp.pad(params["w1"], ((0, cin_p - cin), (0, cb_p - cb))).astype(jnp.bfloat16)
    z1, s1, q1 = _matmul_stats(x_flat, w1p)
    sc1, sh1 = _bn_scale_shift(s1, q1, pad_vec(params["g1"], cb_p),
                               pad_vec(params["be1"], cb_p), m1)

    # ---- stage 2: z2 = conv2_3x3(relu(bn1(z1)), stride) + stats
    m2 = n * ho * wo
    m2p = _round_up(m2, TILE_M)
    w2p = jnp.pad(params["w2"],
                  ((0, 0), (0, 0), (0, cb_p - cb), (0, cb_p - cb))).astype(jnp.bfloat16)
    if stride == 1:
        # BN/ReLU + zero-padding + im2col all in-kernel; flat bf16 output
        z2_flat, s2, q2 = _bn_conv3x3_stats(z1[:m1], sc1, sh1, w2p, n=n, h=h, w=w)
        z2 = jnp.pad(z2_flat, ((0, m2p - m2), (0, 0)))
    else:
        # TODO(synk): stride!=1 3x3 conv still materializes y1 + im2col patches
        # in HBM; an in-kernel strided-slice gather would remove that traffic.
        y1 = _scale_shift_act(z1, sc1, sh1, count=m1)
        y1_img = y1[:m1].reshape(n, h, w, cb_p)
        p2, _, _ = _im2col3x3(y1_img, stride)
        p2 = jnp.pad(p2, ((0, m2p - m2), (0, 0)))
        z2, s2, q2 = _matmul_stats(p2, w2p.reshape(9 * cb_p, cb_p))
    sc2, sh2 = _bn_scale_shift(s2, q2, pad_vec(params["g2"], cb_p),
                               pad_vec(params["be2"], cb_p), m2)

    # ---- stage 3: z3 = conv3_1x1(relu(bn2(z2))) (+ shortcut conv) + stats
    w3p = jnp.pad(params["w3"], ((0, cb_p - cb), (0, cout_p - cout))).astype(jnp.bfloat16)
    g3p, be3p = pad_vec(params["g3"], cout_p), pad_vec(params["be3"], cout_p)

    if project:
        xs = jnp.pad(xb[:, ::stride, ::stride, :].reshape(m2, cin),
                     ((0, m2p - m2), (0, cin_p - cin)))
        wsp = jnp.pad(params["ws"],
                      ((0, cin_p - cin), (0, cout_p - cout))).astype(jnp.bfloat16)
        z3, s3, q3, zs, ss, qs = _bn_matmul2_stats(z2, sc2, sh2, w3p, xs, wsp,
                                                   count=m2)
        sc3, sh3 = _bn_scale_shift(s3, q3, g3p, be3p, m2)
        scs, shs = _bn_scale_shift(ss, qs, pad_vec(params["gs"], cout_p),
                                   pad_vec(params["bes"], cout_p), m2)
        out = _final_proj(z3, sc3, sh3, zs, scs, shs)
    else:
        z3, s3, q3 = _bn_matmul_stats(z2, sc2, sh2, w3p, count=m2)
        sc3, sh3 = _bn_scale_shift(s3, q3, g3p, be3p, m2)
        x_sc = jnp.pad(xb.reshape(m2, cout), ((0, m2p - m2), (0, cout_p - cout)))
        out = _final_id(z3, sc3, sh3, x_sc)

    out = out[:m2, :cout].reshape(n, ho, wo, cout).astype(jnp.float32)
    return jnp.transpose(out, (0, 3, 1, 2))     # back to NCHW


# --------------------------------------------------------------------------- pure-JAX reference
def _ref_forward(x_nchw, params, stride=1):
    """PyTorch train-mode BN semantics.  Conv operands are cast to bf16 and the
    conv outputs (z) are rounded to bf16 to mirror the kernel's MXU / bf16 HBM
    storage; BN statistics and element-wise math stay in f32."""
    x = jnp.transpose(x_nchw, (0, 2, 3, 1)).astype(jnp.float32)
    xb = x.astype(jnp.bfloat16).astype(jnp.float32)
    cin = x.shape[-1]
    cb = params["w1"].shape[1]
    cout = params["w3"].shape[1]
    project = (stride != 1) or (cin != cout)

    def conv(inp, w_hwio, b, s, pad):
        y = lax.conv_general_dilated(
            inp.astype(jnp.bfloat16), w_hwio.astype(jnp.bfloat16), (s, s), pad,
            dimension_numbers=("NHWC", "HWIO", "NHWC"),
            preferred_element_type=jnp.float32)
        y = y.astype(jnp.bfloat16).astype(jnp.float32)   # mirror bf16 z storage
        return y + b.reshape(1, 1, 1, -1)                # bias cancels in BN

    def bn(z, g, be):
        mean = z.mean(axis=(0, 1, 2), keepdims=True)
        var = ((z - mean) ** 2).mean(axis=(0, 1, 2), keepdims=True)
        return ((z - mean) / jnp.sqrt(var + EPS) * g.reshape(1, 1, 1, -1)
                + be.reshape(1, 1, 1, -1))

    if project:
        sc = bn(conv(xb, params["ws"].reshape(1, 1, cin, cout), params["bs"],
                     stride, [(0, 0), (0, 0)]),
                params["gs"], params["bes"])
    else:
        sc = xb
    h1 = jax.nn.relu(bn(conv(xb, params["w1"].reshape(1, 1, cin, cb),
                             params["b1"], 1, [(0, 0), (0, 0)]),
                        params["g1"], params["be1"]))
    h2 = jax.nn.relu(bn(conv(h1, params["w2"], params["b2"], stride,
                             [(1, 1), (1, 1)]),
                        params["g2"], params["be2"]))
    h3 = bn(conv(h2, params["w3"].reshape(1, 1, cb, cout), params["b3"],
                 1, [(0, 0), (0, 0)]),
            params["g3"], params["be3"])
    out = jax.nn.relu(h3 + sc)
    out = out.astype(jnp.bfloat16).astype(jnp.float32)   # mirror bf16 output
    return jnp.transpose(out, (0, 3, 1, 2))


# --------------------------------------------------------------------------- main
if __name__ == "__main__":
    N, C_IN, C_B, C_OUT, H, W = 2, 4, 8, 16, 16, 16
    # bf16 MXU operands + bf16 z/out storage (mirrored in the reference);
    # residual differences come from accumulation order near bf16 rounding
    # boundaries, amplified by batch-norm on the toy (poorly conditioned) shapes.
    TOL = dict(atol=5e-2, rtol=5e-2)

    key = jax.random.PRNGKey(0)
    kx, kp1, kp2 = jax.random.split(key, 3)
    x = jax.random.normal(kx, (N, C_IN, H, W), jnp.float32)

    # case 1: stride=1, in != out -> projection shortcut + fused in-kernel 3x3 conv
    params1 = init_bottleneck_params(kp1, C_IN, C_B, C_OUT, stride=1)
    out1 = jax.block_until_ready(bottleneck_block_forward(x, params1, stride=1))
    ref1 = _ref_forward(x, params1, stride=1)
    assert out1.shape == ref1.shape == (N, C_OUT, H, W)
    assert jnp.allclose(out1, ref1, **TOL), "stride=1 projection mismatch"

    # case 2: stride=2 -> projection shortcut + wrapper im2col fallback for conv2
    params2 = init_bottleneck_params(kp2, C_IN, C_B, C_OUT, stride=2)
    out2 = jax.block_until_ready(bottleneck_block_forward(x, params2, stride=2))
    ref2 = _ref_forward(x, params2, stride=2)
    assert out2.shape == ref2.shape == (N, C_OUT, H // 2, W // 2)
    assert jnp.allclose(out2, ref2, **TOL), "stride=2 projection mismatch"

    # case 3: identity shortcut (in == out, stride 1)
    params3 = init_bottleneck_params(kp1, C_OUT, C_B, C_OUT, stride=1)
    x3 = jax.random.normal(kx, (N, C_OUT, H, W), jnp.float32)
    out3 = jax.block_until_ready(bottleneck_block_forward(x3, params3, stride=1))
    ref3 = _ref_forward(x3, params3, stride=1)
    assert jnp.allclose(out3, ref3, **TOL), "identity shortcut mismatch"

    print("KERNEL_OK")
</pallas_src>

<mosaic_0001>
module attributes {stable_mosaic.version = 11 : i64} {
  func.func @_matmul_stats_kernel(%arg0: i32, %arg1: memref<512x128xbf16, #tpu.memory_space<vmem>>, %arg2: memref<128x128xbf16, #tpu.memory_space<vmem>>, %arg3: memref<512x128xbf16, #tpu.memory_space<vmem>>, %arg4: memref<1x128xf32, #tpu.memory_space<vmem>>, %arg5: memref<1x128xf32, #tpu.memory_space<vmem>>) attributes {dimension_semantics = [#tpu.dimension_semantics<arbitrary>], iteration_bounds = array<i64: 1>, scalar_prefetch = 0 : i64, scratch_operands = 0 : i64, tpu.core_type = #tpu.core_type<tc>, window_params = [{transform_indices = @transform_0, window_bounds = array<i64: 512, 128>}, {pipeline_mode = #tpu.pipeline_mode<synchronous>, transform_indices = @transform_1, window_bounds = array<i64: 128, 128>}, {transform_indices = @transform_2, window_bounds = array<i64: 512, 128>}, {pipeline_mode = #tpu.pipeline_mode<synchronous>, transform_indices = @transform_3, window_bounds = array<i64: 1, 128>}, {pipeline_mode = #tpu.pipeline_mode<synchronous>, transform_indices = @transform_4, window_bounds = array<i64: 1, 128>}]} {
    %c0_i32 = arith.constant 0 : i32
    %0 = arith.cmpi eq, %arg0, %c0_i32 : i32
    %1 = arith.extui %0 : i1 to i32
    %c0_i32_0 = arith.constant 0 : i32
    %2 = arith.cmpi ne, %1, %c0_i32_0 : i32
    scf.if %2 {
      %cst_16 = arith.constant 0.000000e+00 : f32
      %19 = vector.broadcast %cst_16 : f32 to vector<1x128xf32>
      %c0_17 = arith.constant 0 : index
      %c0_18 = arith.constant 0 : index
      %20 = vector.load %arg4[%c0_17, %c0_18] : memref<1x128xf32, #tpu.memory_space<vmem>>, vector<1x128xf32>
      tpu.vector_store %arg4[%c0_17, %c0_18], %19 {strides = array<i32>} : memref<1x128xf32, #tpu.memory_space<vmem>>, vector<1x128xf32>,
      %cst_19 = arith.constant 0.000000e+00 : f32
      %21 = vector.broadcast %cst_19 : f32 to vector<1x128xf32>
      %c0_20 = arith.constant 0 : index
      %c0_21 = arith.constant 0 : index
      %22 = vector.load %arg5[%c0_20, %c0_21] : memref<1x128xf32, #tpu.memory_space<vmem>>, vector<1x128xf32>
      tpu.vector_store %arg5[%c0_20, %c0_21], %21 {strides = array<i32>} : memref<1x128xf32, #tpu.memory_space<vmem>>, vector<1x128xf32>,
    } else {
    }
    %c0 = arith.constant 0 : index
    %c0_1 = arith.constant 0 : index
    %3 = vector.load %arg1[%c0, %c0_1] : memref<512x128xbf16, #tpu.memory_space<vmem>>, vector<512x128xbf16>
    %c0_2 = arith.constant 0 : index
    %c0_3 = arith.constant 0 : index
    %4 = vector.load %arg2[%c0_2, %c0_3] : memref<128x128xbf16, #tpu.memory_space<vmem>>, vector<128x128xbf16>
    %cst = arith.constant dense<0.000000e+00> : vector<512x128xf32>
    %5 = tpu.matmul %3, %4, %cst {dimension_numbers = #tpu.dot_dimension_numbers<[1], [0], [0], [1], [0, 0, 1, 1], [], []>} : vector<512x128xbf16>, vector<128x128xbf16>, vector<512x128xf32> -> vector<512x128xf32>
    %6 = arith.truncf %5 : vector<512x128xf32> to vector<512x128xbf16>
    %c0_4 = arith.constant 0 : index
    %c0_5 = arith.constant 0 : index
    %7 = vector.load %arg3[%c0_4, %c0_5] : memref<512x128xbf16, #tpu.memory_space<vmem>>, vector<512x128xbf16>
    tpu.vector_store %arg3[%c0_4, %c0_5], %6 {strides = array<i32>} : memref<512x128xbf16, #tpu.memory_space<vmem>>, vector<512x128xbf16>,
    %c0_6 = arith.constant 0 : index
    %c0_7 = arith.constant 0 : index
    %8 = vector.load %arg4[%c0_6, %c0_7] : memref<1x128xf32, #tpu.memory_space<vmem>>, vector<1x128xf32>
    %cst_8 = arith.constant dense<0.000000e+00> : vector<128xf32>
    %9 = vector.multi_reduction <add>, %5, %cst_8 [0] : vector<512x128xf32> to vector<128xf32>
    %10 = vector.shape_cast %9 : vector<128xf32> to vector<1x128xf32>
    %11 = arith.addf %8, %10 : vector<1x128xf32>
    %c0_9 = arith.constant 0 : index
    %c0_10 = arith.constant 0 : index
    %12 = vector.load %arg4[%c0_9, %c0_10] : memref<1x128xf32, #tpu.memory_space<vmem>>, vector<1x128xf32>
    tpu.vector_store %arg4[%c0_9, %c0_10], %11 {strides = array<i32>} : memref<1x128xf32, #tpu.memory_space<vmem>>, vector<1x128xf32>,
    %c0_11 = arith.constant 0 : index
    %c0_12 = arith.constant 0 : index
    %13 = vector.load %arg5[%c0_11, %c0_12] : memref<1x128xf32, #tpu.memory_space<vmem>>, vector<1x128xf32>
    %14 = arith.mulf %5, %5 : vector<512x128xf32>
    %cst_13 = arith.constant dense<0.000000e+00> : vector<128xf32>
    %15 = vector.multi_reduction <add>, %14, %cst_13 [0] : vector<512x128xf32> to vector<128xf32>
    %16 = vector.shape_cast %15 : vector<128xf32> to vector<1x128xf32>
    %17 = arith.addf %13, %16 : vector<1x128xf32>
    %c0_14 = arith.constant 0 : index
    %c0_15 = arith.constant 0 : index
    %18 = vector.load %arg5[%c0_14, %c0_15] : memref<1x128xf32, #tpu.memory_space<vmem>>, vector<1x128xf32>
    tpu.vector_store %arg5[%c0_14, %c0_15], %17 {strides = array<i32>} : memref<1x128xf32, #tpu.memory_space<vmem>>, vector<1x128xf32>,
    return
  }
  func.func @transform_0(%arg0: i32) -> (i32, i32) {
    %c0_i32 = arith.constant 0 : i32
    %c0_i32_0 = arith.constant 0 : i32
    return %arg0, %c0_i32 : i32, i32
  }
  func.func @transform_1(%arg0: i32) -> (i32, i32) {
    %c0_i32 = arith.constant 0 : i32
    %c0_i32_0 = arith.constant 0 : i32
    %c0_i32_1 = arith.constant 0 : i32
    return %c0_i32, %c0_i32_0 : i32, i32
  }
  func.func @transform_2(%arg0: i32) -> (i32, i32) {
    %c0_i32 = arith.constant 0 : i32
    %c0_i32_0 = arith.constant 0 : i32
    return %arg0, %c0_i32 : i32, i32
  }
  func.func @transform_3(%arg0: i32) -> (i32, i32) {
    %c0_i32 = arith.constant 0 : i32
    %c0_i32_0 = arith.constant 0 : i32
    %c0_i32_1 = arith.constant 0 : i32
    return %c0_i32, %c0_i32_0 : i32, i32
  }
  func.func @transform_4(%arg0: i32) -> (i32, i32) {
    %c0_i32 = arith.constant 0 : i32
    %c0_i32_0 = arith.constant 0 : i32
    %c0_i32_1 = arith.constant 0 : i32
    return %c0_i32, %c0_i32_0 : i32, i32
  }
}

module attributes {stable_mosaic.version = 11 : i64} {
  func.func @_bn_conv3x3_stats_kernel(%arg0: i32, %arg1: memref<256x128xbf16, #tpu.memory_space<vmem>>, %arg2: memref<1x128xf32, #tpu.memory_space<vmem>>, %arg3: memref<1x128xf32, #tpu.memory_space<vmem>>, %arg4: memref<3x3x128x128xbf16, #tpu.memory_space<vmem>>, %arg5: memref<256x128xbf16, #tpu.memory_space<vmem>>, %arg6: memref<1x128xf32, #tpu.memory_space<vmem>>, %arg7: memref<1x128xf32, #tpu.memory_space<vmem>>, %arg8: memref<18x32x128xbf16, #tpu.memory_space<vmem>>, %arg9: memref<256x128xf32, #tpu.memory_space<vmem>>) attributes {dimension_semantics = [#tpu.dimension_semantics<arbitrary>], iteration_bounds = array<i64: 2>, scalar_prefetch = 0 : i64, scratch_operands = 2 : i64, tpu.core_type = #tpu.core_type<tc>, window_params = [{transform_indices = @transform_0, window_bounds = array<i64: 256, 128>}, {pipeline_mode = #tpu.pipeline_mode<synchronous>, transform_indices = @transform_1, window_bounds = array<i64: 1, 128>}, {pipeline_mode = #tpu.pipeline_mode<synchronous>, transform_indices = @transform_2, window_bounds = array<i64: 1, 128>}, {pipeline_mode = #tpu.pipeline_mode<synchronous>, transform_indices = @transform_3, window_bounds = array<i64: 3, 3, 128, 128>}, {transform_indices = @transform_4, window_bounds = array<i64: 256, 128>}, {pipeline_mode = #tpu.pipeline_mode<synchronous>, transform_indices = @transform_5, window_bounds = array<i64: 1, 128>}, {pipeline_mode = #tpu.pipeline_mode<synchronous>, transform_indices = @transform_6, window_bounds = array<i64: 1, 128>}]} {
    %c0_i32 = arith.constant 0 : i32
    %0 = arith.cmpi eq, %arg0, %c0_i32 : i32
    %1 = arith.extui %0 : i1 to i32
    %c0_i32_0 = arith.constant 0 : i32
    %2 = arith.cmpi ne, %1, %c0_i32_0 : i32
    scf.if %2 {
      %cst_106 = arith.constant 0.000000e+00 : f32
      %97 = vector.broadcast %cst_106 : f32 to vector<1x128xf32>
      %c0_107 = arith.constant 0 : index
      %c0_108 = arith.constant 0 : index
      %98 = vector.load %arg6[%c0_107, %c0_108] : memref<1x128xf32, #tpu.memory_space<vmem>>, vector<1x128xf32>
      tpu.vector_store %arg6[%c0_107, %c0_108], %97 {strides = array<i32>} : memref<1x128xf32, #tpu.memory_space<vmem>>, vector<1x128xf32>,
      %cst_109 = arith.constant 0.000000e+00 : f32
      %99 = vector.broadcast %cst_109 : f32 to vector<1x128xf32>
      %c0_110 = arith.constant 0 : index
      %c0_111 = arith.constant 0 : index
      %100 = vector.load %arg7[%c0_110, %c0_111] : memref<1x128xf32, #tpu.memory_space<vmem>>, vector<1x128xf32>
      tpu.vector_store %arg7[%c0_110, %c0_111], %99 {strides = array<i32>} : memref<1x128xf32, #tpu.memory_space<vmem>>, vector<1x128xf32>,
      %cst_112 = arith.constant 0.000000e+00 : bf16
      %101 = vector.broadcast %cst_112 : bf16 to vector<18x32x128xbf16>
      %c0_113 = arith.constant 0 : index
      %c0_114 = arith.constant 0 : index
      %c0_115 = arith.constant 0 : index
      %102 = vector.load %arg8[%c0_113, %c0_114, %c0_115] : memref<18x32x128xbf16, #tpu.memory_space<vmem>>, vector<18x32x128xbf16>
      tpu.vector_store %arg8[%c0_113, %c0_114, %c0_115], %101 {strides = array<i32>} : memref<18x32x128xbf16, #tpu.memory_space<vmem>>, vector<18x32x128xbf16>,
    } else {
    }
    %c0 = arith.constant 0 : index
    %c0_1 = arith.constant 0 : index
    %3 = vector.load %arg1[%c0, %c0_1] : memref<256x128xbf16, #tpu.memory_space<vmem>>, vector<256x128xbf16>
    %4 = arith.extf %3 : vector<256x128xbf16> to vector<256x128xf32>
    %c0_2 = arith.constant 0 : index
    %c0_3 = arith.constant 0 : index
    %5 = vector.load %arg2[%c0_2, %c0_3] : memref<1x128xf32, #tpu.memory_space<vmem>>, vector<1x128xf32>
    %6 = vector.broadcast %5 : vector<1x128xf32> to vector<256x128xf32>
    %7 = arith.mulf %4, %6 : vector<256x128xf32>
    %c0_4 = arith.constant 0 : index
    %c0_5 = arith.constant 0 : index
    %8 = vector.load %arg3[%c0_4, %c0_5] : memref<1x128xf32, #tpu.memory_space<vmem>>, vector<1x128xf32>
    %9 = vector.broadcast %8 : vector<1x128xf32> to vector<256x128xf32>
    %10 = arith.addf %7, %9 : vector<256x128xf32>
    %cst = arith.constant 0.000000e+00 : f32
    %11 = vector.broadcast %cst : f32 to vector<256x128xf32>
    %12 = arith.maximumf %10, %11 : vector<256x128xf32>
    %13 = vector.shape_cast %12 : vector<256x128xf32> to vector<16x16x128xf32>
    %14 = arith.truncf %13 : vector<16x16x128xf32> to vector<16x16x128xbf16>
    %c1 = arith.constant 1 : index
    %c8 = arith.constant 8 : index
    %c0_6 = arith.constant 0 : index
    %15 = vector.load %arg8[%c1, %c8, %c0_6] : memref<18x32x128xbf16, #tpu.memory_space<vmem>>, vector<16x16x128xbf16>
    tpu.vector_store %arg8[%c1, %c8, %c0_6], %14 {strides = array<i32>} : memref<18x32x128xbf16, #tpu.memory_space<vmem>>, vector<16x16x128xbf16>,
    %c0_7 = arith.constant 0 : index
    %c7 = arith.constant 7 : index
    %c0_8 = arith.constant 0 : index
    %16 = vector.load %arg8[%c0_7, %c7, %c0_8] : memref<18x32x128xbf16, #tpu.memory_space<vmem>>, vector<18x16x128xbf16>
    %17 = vector.shape_cast %16 : vector<18x16x128xbf16> to vector<288x128xbf16>
    %18 = vector.extract_strided_slice %17 {offsets = [0, 0], sizes = [256, 128], strides = [1, 1]} : vector<288x128xbf16> to vector<256x128xbf16>
    %c0_9 = arith.constant 0 : index
    %c0_10 = arith.constant 0 : index
    %c0_11 = arith.constant 0 : index
    %c0_12 = arith.constant 0 : index
    %19 = vector.load %arg4[%c0_9, %c0_10, %c0_11, %c0_12] : memref<3x3x128x128xbf16, #tpu.memory_space<vmem>>, vector<1x1x128x128xbf16>
    %20 = vector.shape_cast %19 : vector<1x1x128x128xbf16> to vector<128x128xbf16>
    %cst_13 = arith.constant dense<0.000000e+00> : vector<256x128xf32>
    %21 = tpu.matmul %18, %20, %cst_13 {dimension_numbers = #tpu.dot_dimension_numbers<[1], [0], [0], [1], [0, 0, 1, 1], [], []>} : vector<256x128xbf16>, vector<128x128xbf16>, vector<256x128xf32> -> vector<256x128xf32>
    %c0_14 = arith.constant 0 : index
    %c0_15 = arith.constant 0 : index
    %22 = vector.load %arg9[%c0_14, %c0_15] : memref<256x128xf32, #tpu.memory_space<vmem>>, vector<256x128xf32>
    tpu.vector_store %arg9[%c0_14, %c0_15], %21 {strides = array<i32>} : memref<256x128xf32, #tpu.memory_space<vmem>>, vector<256x128xf32>,
    %23 = vector.extract_strided_slice %17 {offsets = [16, 0], sizes = [256, 128], strides = [1, 1]} : vector<288x128xbf16> to vector<256x128xbf16>
    %c1_16 = arith.constant 1 : index
    %c0_17 = arith.constant 0 : index
    %c0_18 = arith.constant 0 : index
    %c0_19 = arith.constant 0 : index
    %24 = vector.load %arg4[%c1_16, %c0_17, %c0_18, %c0_19] : memref<3x3x128x128xbf16, #tpu.memory_space<vmem>>, vector<1x1x128x128xbf16>
    %25 = vector.shape_cast %24 : vector<1x1x128x128xbf16> to vector<128x128xbf16>
    %cst_20 = arith.constant dense<0.000000e+00> : vector<256x128xf32>
    %26 = tpu.matmul %23, %25, %cst_20 {dimension_numbers = #tpu.dot_dimension_numbers<[1], [0], [0], [1], [0, 0, 1, 1], [], []>} : vector<256x128xbf16>, vector<128x128xbf16>, vector<256x128xf32> -> vector<256x128xf32>
    %c0_21 = arith.constant 0 : index
    %c0_22 = arith.constant 0 : index
    %27 = vector.load %arg9[%c0_21, %c0_22] : memref<256x128xf32, #tpu.memory_space<vmem>>, vector<256x128xf32>
    %28 = arith.addf %27, %26 : vector<256x128xf32>
    %c0_23 = arith.constant 0 : index
    %c0_24 = arith.constant 0 : index
    %29 = vector.load %arg9[%c0_23, %c0_24] : memref<256x128xf32, #tpu.memory_space<vmem>>, vector<256x128xf32>
    tpu.vector_store %arg9[%c0_23, %c0_24], %28 {strides = array<i32>} : memref<256x128xf32, #tpu.memory_space<vmem>>, vector<256x128xf32>,
    %30 = vector.extract_strided_slice %17 {offsets = [32, 0], sizes = [256, 128], strides = [1, 1]} : vector<288x128xbf16> to vector<256x128xbf16>
    %c2 = arith.constant 2 : index
    %c0_25 = arith.constant 0 : index
    %c0_26 = arith.constant 0 : index
    %c0_27 = arith.constant 0 : index
    %31 = vector.load %arg4[%c2, %c0_25, %c0_26, %c0_27] : memref<3x3x128x128xbf16, #tpu.memory_space<vmem>>, vector<1x1x128x128xbf16>
    %32 = vector.shape_cast %31 : vector<1x1x128x128xbf16> to vector<128x128xbf16>
    %cst_28 = arith.constant dense<0.000000e+00> : vector<256x128xf32>
    %33 = tpu.matmul %30, %32, %cst_28 {dimension_numbers = #tpu.dot_dimension_numbers<[1], [0], [0], [1], [0, 0, 1, 1], [], []>} : vector<256x128xbf16>, vector<128x128xbf16>, vector<256x128xf32> -> vector<256x128xf32>
    %c0_29 = arith.constant 0 : index
    %c0_30 = arith.constant 0 : index
    %34 = vector.load %arg9[%c0_29, %c0_30] : memref<256x128xf32, #tpu.memory_space<vmem>>, vector<256x128xf32>
    %35 = arith.addf %34, %33 : vector<256x128xf32>
    %c0_31 = arith.constant 0 : index
    %c0_32 = arith.constant 0 : index
    %36 = vector.load %arg9[%c0_31, %c0_32] : memref<256x128xf32, #tpu.memory_space<vmem>>, vector<256x128xf32>
    tpu.vector_store %arg9[%c0_31, %c0_32], %35 {strides = array<i32>} : memref<256x128xf32, #tpu.memory_space<vmem>>, vector<256x128xf32>,
    %c0_33 = arith.constant 0 : index
    %c8_34 = arith.constant 8 : index
    %c0_35 = arith.constant 0 : index
    %37 = vector.load %arg8[%c0_33, %c8_34, %c0_35] : memref<18x32x128xbf16, #tpu.memory_space<vmem>>, vector<18x16x128xbf16>
    %38 = vector.shape_cast %37 : vector<18x16x128xbf16> to vector<288x128xbf16>
    %39 = vector.extract_strided_slice %38 {offsets = [0, 0], sizes = [256, 128], strides = [1, 1]} : vector<288x128xbf16> to vector<256x128xbf16>
    %c0_36 = arith.constant 0 : index
    %c1_37 = arith.constant 1 : index
    %c0_38 = arith.constant 0 : index
    %c0_39 = arith.constant 0 : index
    %40 = vector.load %arg4[%c0_36, %c1_37, %c0_38, %c0_39] : memref<3x3x128x128xbf16, #tpu.memory_space<vmem>>, vector<1x1x128x128xbf16>
    %41 = vector.shape_cast %40 : vector<1x1x128x128xbf16> to vector<128x128xbf16>
    %cst_40 = arith.constant dense<0.000000e+00> : vector<256x128xf32>
    %42 = tpu.matmul %39, %41, %cst_40 {dimension_numbers = #tpu.dot_dimension_numbers<[1], [0], [0], [1], [0, 0, 1, 1], [], []>} : vector<256x128xbf16>, vector<128x128xbf16>, vector<256x128xf32> -> vector<256x128xf32>
    %c0_41 = arith.constant 0 : index
    %c0_42 = arith.constant 0 : index
    %43 = vector.load %arg9[%c0_41, %c0_42] : memref<256x128xf32, #tpu.memory_space<vmem>>, vector<256x128xf32>
    %44 = arith.addf %43, %42 : vector<256x128xf32>
    %c0_43 = arith.constant 0 : index
    %c0_44 = arith.constant 0 : index
    %45 = vector.load %arg9[%c0_43, %c0_44] : memref<256x128xf32, #tpu.memory_space<vmem>>, vector<256x128xf32>
    tpu.vector_store %arg9[%c0_43, %c0_44], %44 {strides = array<i32>} : memref<256x128xf32, #tpu.memory_space<vmem>>, vector<256x128xf32>,
    %46 = vector.extract_strided_slice %38 {offsets = [16, 0], sizes = [256, 128], strides = [1, 1]} : vector<288x128xbf16> to vector<256x128xbf16>
    %c1_45 = arith.constant 1 : index
    %c1_46 = arith.constant 1 : index
    %c0_47 = arith.constant 0 : index
    %c0_48 = arith.constant 0 : index
    %47 = vector.load %arg4[%c1_45, %c1_46, %c0_47, %c0_48] : memref<3x3x128x128xbf16, #tpu.memory_space<vmem>>, vector<1x1x128x128xbf16>
    %48 = vector.shape_cast %47 : vector<1x1x128x128xbf16> to vector<128x128xbf16>
    %cst_49 = arith.constant dense<0.000000e+00> : vector<256x128xf32>
    %49 = tpu.matmul %46, %48, %cst_49 {dimension_numbers = #tpu.dot_dimension_numbers<[1], [0], [0], [1], [0, 0, 1, 1], [], []>} : vector<256x128xbf16>, vector<128x128xbf16>, vector<256x128xf32> -> vector<256x128xf32>
    %c0_50 = arith.constant 0 : index
    %c0_51 = arith.constant 0 : index
    %50 = vector.load %arg9[%c0_50, %c0_51] : memref<256x128xf32, #tpu.memory_space<vmem>>, vector<256x128xf32>
    %51 = arith.addf %50, %49 : vector<256x128xf32>
    %c0_52 = arith.constant 0 : index
    %c0_53 = arith.constant 0 : index
    %52 = vector.load %arg9[%c0_52, %c0_53] : memref<256x128xf32, #tpu.memory_space<vmem>>, vector<256x128xf32>
    tpu.vector_store %arg9[%c0_52, %c0_53], %51 {strides = array<i32>} : memref<256x128xf32, #tpu.memory_space<vmem>>, vector<256x128xf32>,
    %53 = vector.extract_strided_slice %38 {offsets = [32, 0], sizes = [256, 128], strides = [1, 1]} : vector<288x128xbf16> to vector<256x128xbf16>
    %c2_54 = arith.constant 2 : index
    %c1_55 = arith.constant 1 : index
    %c0_56 = arith.constant 0 : index
    %c0_57 = arith.constant 0 : index
    %54 = vector.load %arg4[%c2_54, %c1_55, %c0_56, %c0_57] : memref<3x3x128x128xbf16, #tpu.memory_space<vmem>>, vector<1x1x128x128xbf16>
    %55 = vector.shape_cast %54 : vector<1x1x128x128xbf16> to vector<128x128xbf16>
    %cst_58 = arith.constant dense<0.000000e+00> : vector<256x128xf32>
    %56 = tpu.matmul %53, %55, %cst_58 {dimension_numbers = #tpu.dot_dimension_numbers<[1], [0], [0], [1], [0, 0, 1, 1], [], []>} : vector<256x128xbf16>, vector<128x128xbf16>, vector<256x128xf32> -> vector<256x128xf32>
    %c0_59 = arith.constant 0 : index
    %c0_60 = arith.constant 0 : index
    %57 = vector.load %arg9[%c0_59, %c0_60] : memref<256x128xf32, #tpu.memory_space<vmem>>, vector<256x128xf32>
    %58 = arith.addf %57, %56 : vector<256x128xf32>
    %c0_61 = arith.constant 0 : index
    %c0_62 = arith.constant 0 : index
    %59 = vector.load %arg9[%c0_61, %c0_62] : memref<256x128xf32, #tpu.memory_space<vmem>>, vector<256x128xf32>
    tpu.vector_store %arg9[%c0_61, %c0_62], %58 {strides = array<i32>} : memref<256x128xf32, #tpu.memory_space<vmem>>, vector<256x128xf32>,
    %c0_63 = arith.constant 0 : index
    %c9 = arith.constant 9 : index
    %c0_64 = arith.constant 0 : index
    %60 = vector.load %arg8[%c0_63, %c9, %c0_64] : memref<18x32x128xbf16, #tpu.memory_space<vmem>>, vector<18x16x128xbf16>
    %61 = vector.shape_cast %60 : vector<18x16x128xbf16> to vector<288x128xbf16>
    %62 = vector.extract_strided_slice %61 {offsets = [0, 0], sizes = [256, 128], strides = [1, 1]} : vector<288x128xbf16> to vector<256x128xbf16>
    %c0_65 = arith.constant 0 : index
    %c2_66 = arith.constant 2 : index
    %c0_67 = arith.constant 0 : index
    %c0_68 = arith.constant 0 : index
    %63 = vector.load %arg4[%c0_65, %c2_66, %c0_67, %c0_68] : memref<3x3x128x128xbf16, #tpu.memory_space<vmem>>, vector<1x1x128x128xbf16>
    %64 = vector.shape_cast %63 : vector<1x1x128x128xbf16> to vector<128x128xbf16>
    %cst_69 = arith.constant dense<0.000000e+00> : vector<256x128xf32>
    %65 = tpu.matmul %62, %64, %cst_69 {dimension_numbers = #tpu.dot_dimension_numbers<[1], [0], [0], [1], [0, 0, 1, 1], [], []>} : vector<256x128xbf16>, vector<128x128xbf16>, vector<256x128xf32> -> vector<256x128xf32>
    %c0_70 = arith.constant 0 : index
    %c0_71 = arith.constant 0 : index
    %66 = vector.load %arg9[%c0_70, %c0_71] : memref<256x128xf32, #tpu.memory_space<vmem>>, vector<256x128xf32>
    %67 = arith.addf %66, %65 : vector<256x128xf32>
    %c0_72 = arith.constant 0 : index
    %c0_73 = arith.constant 0 : index
    %68 = vector.load %arg9[%c0_72, %c0_73] : memref<256x128xf32, #tpu.memory_space<vmem>>, vector<256x128xf32>
    tpu.vector_store %arg9[%c0_72, %c0_73], %67 {strides = array<i32>} : memref<256x128xf32, #tpu.memory_space<vmem>>, vector<256x128xf32>,
    %69 = vector.extract_strided_slice %61 {offsets = [16, 0], sizes = [256, 128], strides = [1, 1]} : vector<288x128xbf16> to vector<256x128xbf16>
    %c1_74 = arith.constant 1 : index
    %c2_75 = arith.constant 2 : index
    %c0_76 = arith.constant 0 : index
    %c0_77 = arith.constant 0 : index
    %70 = vector.load %arg4[%c1_74, %c2_75, %c0_76, %c0_77] : memref<3x3x128x128xbf16, #tpu.memory_space<vmem>>, vector<1x1x128x128xbf16>
    %71 = vector.shape_cast %70 : vector<1x1x128x128xbf16> to vector<128x128xbf16>
    %cst_78 = arith.constant dense<0.000000e+00> : vector<256x128xf32>
    %72 = tpu.matmul %69, %71, %cst_78 {dimension_numbers = #tpu.dot_dimension_numbers<[1], [0], [0], [1], [0, 0, 1, 1], [], []>} : vector<256x128xbf16>, vector<128x128xbf16>, vector<256x128xf32> -> vector<256x128xf32>
    %c0_79 = arith.constant 0 : index
    %c0_80 = arith.constant 0 : index
    %73 = vector.load %arg9[%c0_79, %c0_80] : memref<256x128xf32, #tpu.memory_space<vmem>>, vector<256x128xf32>
    %74 = arith.addf %73, %72 : vector<256x128xf32>
    %c0_81 = arith.constant 0 : index
    %c0_82 = arith.constant 0 : index
    %75 = vector.load %arg9[%c0_81, %c0_82] : memref<256x128xf32, #tpu.memory_space<vmem>>, vector<256x128xf32>
    tpu.vector_store %arg9[%c0_81, %c0_82], %74 {strides = array<i32>} : memref<256x128xf32, #tpu.memory_space<vmem>>, vector<256x128xf32>,
    %76 = vector.extract_strided_slice %61 {offsets = [32, 0], sizes = [256, 128], strides = [1, 1]} : vector<288x128xbf16> to vector<256x128xbf16>
    %c2_83 = arith.constant 2 : index
    %c2_84 = arith.constant 2 : index
    %c0_85 = arith.constant 0 : index
    %c0_86 = arith.constant 0 : index
    %77 = vector.load %arg4[%c2_83, %c2_84, %c0_85, %c0_86] : memref<3x3x128x128xbf16, #tpu.memory_space<vmem>>, vector<1x1x128x128xbf16>
    %78 = vector.shape_cast %77 : vector<1x1x128x128xbf16> to vector<128x128xbf16>
    %cst_87 = arith.constant dense<0.000000e+00> : vector<256x128xf32>
    %79 = tpu.matmul %76, %78, %cst_87 {dimension_numbers = #tpu.dot_dimension_numbers<[1], [0], [0], [1], [0, 0, 1, 1], [], []>} : vector<256x128xbf16>, vector<128x128xbf16>, vector<256x128xf32> -> vector<256x128xf32>
    %c0_88 = arith.constant 0 : index
    %c0_89 = arith.constant 0 : index
    %80 = vector.load %arg9[%c0_88, %c0_89] : memref<256x128xf32, #tpu.memory_space<vmem>>, vector<256x128xf32>
    %81 = arith.addf %80, %79 : vector<256x128xf32>
    %c0_90 = arith.constant 0 : index
    %c0_91 = arith.constant 0 : index
    %82 = vector.load %arg9[%c0_90, %c0_91] : memref<256x128xf32, #tpu.memory_space<vmem>>, vector<256x128xf32>
    tpu.vector_store %arg9[%c0_90, %c0_91], %81 {strides = array<i32>} : memref<256x128xf32, #tpu.memory_space<vmem>>, vector<256x128xf32>,
    %c0_92 = arith.constant 0 : index
    %c0_93 = arith.constant 0 : index
    %83 = vector.load %arg9[%c0_92, %c0_93] : memref<256x128xf32, #tpu.memory_space<vmem>>, vector<256x128xf32>
    %84 = arith.truncf %83 : vector<256x128xf32> to vector<256x128xbf16>
    %c0_94 = arith.constant 0 : index
    %c0_95 = arith.constant 0 : index
    %85 = vector.load %arg5[%c0_94, %c0_95] : memref<256x128xbf16, #tpu.memory_space<vmem>>, vector<256x128xbf16>
    tpu.vector_store %arg5[%c0_94, %c0_95], %84 {strides = array<i32>} : memref<256x128xbf16, #tpu.memory_space<vmem>>, vector<256x128xbf16>,
    %c0_96 = arith.constant 0 : index
    %c0_97 = arith.constant 0 : index
    %86 = vector.load %arg6[%c0_96, %c0_97] : memref<1x128xf32, #tpu.memory_space<vmem>>, vector<1x128xf32>
    %cst_98 = arith.constant dense<0.000000e+00> : vector<128xf32>
    %87 = vector.multi_reduction <add>, %83, %cst_98 [0] : vector<256x128xf32> to vector<128xf32>
    %88 = vector.shape_cast %87 : vector<128xf32> to vector<1x128xf32>
    %89 = arith.addf %86, %88 : vector<1x128xf32>
    %c0_99 = arith.constant 0 : index
    %c0_100 = arith.constant 0 : index
    %90 = vector.load %arg6[%c0_99, %c0_100] : memref<1x128xf32, #tpu.memory_space<vmem>>, vector<1x128xf32>
    tpu.vector_store %arg6[%c0_99, %c0_100], %89 {strides = array<i32>} : memref<1x128xf32, #tpu.memory_space<vmem>>, vector<1x128xf32>,
    %c0_101 = arith.constant 0 : index
    %c0_102 = arith.constant 0 : index
    %91 = vector.load %arg7[%c0_101, %c0_102] : memref<1x128xf32, #tpu.memory_space<vmem>>, vector<1x128xf32>
    %92 = arith.mulf %83, %83 : vector<256x128xf32>
    %cst_103 = arith.constant dense<0.000000e+00> : vector<128xf32>
    %93 = vector.multi_reduction <add>, %92, %cst_103 [0] : vector<256x128xf32> to vector<128xf32>
    %94 = vector.shape_cast %93 : vector<128xf32> to vector<1x128xf32>
    %95 = arith.addf %91, %94 : vector<1x128xf32>
    %c0_104 = arith.constant 0 : index
    %c0_105 = arith.constant 0 : index
    %96 = vector.load %arg7[%c0_104, %c0_105] : memref<1x128xf32, #tpu.memory_space<vmem>>, vector<1x128xf32>
    tpu.vector_store %arg7[%c0_104, %c0_105], %95 {strides = array<i32>} : memref<1x128xf32, #tpu.memory_space<vmem>>, vector<1x128xf32>,
    return
  }
  func.func @transform_0(%arg0: i32) -> (i32, i32) {
    %c0_i32 = arith.constant 0 : i32
    %c0_i32_0 = arith.constant 0 : i32
    return %arg0, %c0_i32 : i32, i32
  }
  func.func @transform_1(%arg0: i32) -> (i32, i32) {
    %c0_i32 = arith.constant 0 : i32
    %c0_i32_0 = arith.constant 0 : i32
    %c0_i32_1 = arith.constant 0 : i32
    return %c0_i32, %c0_i32_0 : i32, i32
  }
  func.func @transform_2(%arg0: i32) -> (i32, i32) {
    %c0_i32 = arith.constant 0 : i32
    %c0_i32_0 = arith.constant 0 : i32
    %c0_i32_1 = arith.constant 0 : i32
    return %c0_i32, %c0_i32_0 : i32, i32
  }
  func.func @transform_3(%arg0: i32) -> (i32, i32, i32, i32) {
    %c0_i32 = arith.constant 0 : i32
    %c0_i32_0 = arith.constant 0 : i32
    %c0_i32_1 = arith.constant 0 : i32
    %c0_i32_2 = arith.constant 0 : i32
    %c0_i32_3 = arith.constant 0 : i32
    return %c0_i32, %c0_i32_0, %c0_i32_1, %c0_i32_2 : i32, i32, i32, i32
  }
  func.func @transform_4(%arg0: i32) -> (i32, i32) {
    %c0_i32 = arith.constant 0 : i32
    %c0_i32_0 = arith.constant 0 : i32
    return %arg0, %c0_i32 : i32, i32
  }
  func.func @transform_5(%arg0: i32) -> (i32, i32) {
    %c0_i32 = arith.constant 0 : i32
    %c0_i32_0 = arith.constant 0 : i32
    %c0_i32_1 = arith.constant 0 : i32
    return %c0_i32, %c0_i32_0 : i32, i32
  }
  func.func @transform_6(%arg0: i32) -> (i32, i32) {
    %c0_i32 = arith.constant 0 : i32
    %c0_i32_0 = arith.constant 0 : i32
    %c0_i32_1 = arith.constant 0 : i32
    return %c0_i32, %c0_i32_0 : i32, i32
  }
}

module attributes {stable_mosaic.version = 11 : i64} {
  func.func @_bn_matmul2_stats_kernel(%arg0: i32, %arg1: memref<512x128xbf16, #tpu.memory_space<vmem>>, %arg2: memref<1x128xf32, #tpu.memory_space<vmem>>, %arg3: memref<1x128xf32, #tpu.memory_space<vmem>>, %arg4: memref<128x128xbf16, #tpu.memory_space<vmem>>, %arg5: memref<512x128xbf16, #tpu.memory_space<vmem>>, %arg6: memref<128x128xbf16, #tpu.memory_space<vmem>>, %arg7: memref<512x128xbf16, #tpu.memory_space<vmem>>, %arg8: memref<1x128xf32, #tpu.memory_space<vmem>>, %arg9: memref<1x128xf32, #tpu.memory_space<vmem>>, %arg10: memref<512x128xbf16, #tpu.memory_space<vmem>>, %arg11: memref<1x128xf32, #tpu.memory_space<vmem>>, %arg12: memref<1x128xf32, #tpu.memory_space<vmem>>) attributes {dimension_semantics = [#tpu.dimension_semantics<arbitrary>], iteration_bounds = array<i64: 1>, scalar_prefetch = 0 : i64, scratch_operands = 0 : i64, tpu.core_type = #tpu.core_type<tc>, window_params = [{transform_indices = @transform_0, window_bounds = array<i64: 512, 128>}, {pipeline_mode = #tpu.pipeline_mode<synchronous>, transform_indices = @transform_1, window_bounds = array<i64: 1, 128>}, {pipeline_mode = #tpu.pipeline_mode<synchronous>, transform_indices = @transform_2, window_bounds = array<i64: 1, 128>}, {pipeline_mode = #tpu.pipeline_mode<synchronous>, transform_indices = @transform_3, window_bounds = array<i64: 128, 128>}, {transform_indices = @transform_4, window_bounds = array<i64: 512, 128>}, {pipeline_mode = #tpu.pipeline_mode<synchronous>, transform_indices = @transform_5, window_bounds = array<i64: 128, 128>}, {transform_indices = @transform_6, window_bounds = array<i64: 512, 128>}, {pipeline_mode = #tpu.pipeline_mode<synchronous>, transform_indices = @transform_7, window_bounds = array<i64: 1, 128>}, {pipeline_mode = #tpu.pipeline_mode<synchronous>, transform_indices = @transform_8, window_bounds = array<i64: 1, 128>}, {transform_indices = @transform_9, window_bounds = array<i64: 512, 128>}, {pipeline_mode = #tpu.pipeline_mode<synchronous>, transform_indices = @transform_10, window_bounds = array<i64: 1, 128>}, {pipeline_mode = #tpu.pipeline_mode<synchronous>, transform_indices = @transform_11, window_bounds = array<i64: 1, 128>}]} {
    %c0_i32 = arith.constant 0 : i32
    %0 = arith.cmpi eq, %arg0, %c0_i32 : i32
    %1 = arith.extui %0 : i1 to i32
    %c0_i32_0 = arith.constant 0 : i32
    %2 = arith.cmpi ne, %1, %c0_i32_0 : i32
    scf.if %2 {
      %cst_40 = arith.constant 0.000000e+00 : f32
      %55 = vector.broadcast %cst_40 : f32 to vector<1x128xf32>
      %c0_41 = arith.constant 0 : index
      %c0_42 = arith.constant 0 : index
      %56 = vector.load %arg8[%c0_41, %c0_42] : memref<1x128xf32, #tpu.memory_space<vmem>>, vector<1x128xf32>
      tpu.vector_store %arg8[%c0_41, %c0_42], %55 {strides = array<i32>} : memref<1x128xf32, #tpu.memory_space<vmem>>, vector<1x128xf32>,
      %cst_43 = arith.constant 0.000000e+00 : f32
      %57 = vector.broadcast %cst_43 : f32 to vector<1x128xf32>
      %c0_44 = arith.constant 0 : index
      %c0_45 = arith.constant 0 : index
      %58 = vector.load %arg9[%c0_44, %c0_45] : memref<1x128xf32, #tpu.memory_space<vmem>>, vector<1x128xf32>
      tpu.vector_store %arg9[%c0_44, %c0_45], %57 {strides = array<i32>} : memref<1x128xf32, #tpu.memory_space<vmem>>, vector<1x128xf32>,
      %cst_46 = arith.constant 0.000000e+00 : f32
      %59 = vector.broadcast %cst_46 : f32 to vector<1x128xf32>
      %c0_47 = arith.constant 0 : index
      %c0_48 = arith.constant 0 : index
      %60 = vector.load %arg11[%c0_47, %c0_48] : memref<1x128xf32, #tpu.memory_space<vmem>>, vector<1x128xf32>
      tpu.vector_store %arg11[%c0_47, %c0_48], %59 {strides = array<i32>} : memref<1x128xf32, #tpu.memory_space<vmem>>, vector<1x128xf32>,
      %cst_49 = arith.constant 0.000000e+00 : f32
      %61 = vector.broadcast %cst_49 : f32 to vector<1x128xf32>
      %c0_50 = arith.constant 0 : index
      %c0_51 = arith.constant 0 : index
      %62 = vector.load %arg12[%c0_50, %c0_51] : memref<1x128xf32, #tpu.memory_space<vmem>>, vector<1x128xf32>
      tpu.vector_store %arg12[%c0_50, %c0_51], %61 {strides = array<i32>} : memref<1x128xf32, #tpu.memory_space<vmem>>, vector<1x128xf32>,
    } else {
    }
    %c0 = arith.constant 0 : index
    %c0_1 = arith.constant 0 : index
    %3 = vector.load %arg1[%c0, %c0_1] : memref<512x128xbf16, #tpu.memory_space<vmem>>, vector<512x128xbf16>
    %4 = arith.extf %3 : vector<512x128xbf16> to vector<512x128xf32>
    %c0_2 = arith.constant 0 : index
    %c0_3 = arith.constant 0 : index
    %5 = vector.load %arg2[%c0_2, %c0_3] : memref<1x128xf32, #tpu.memory_space<vmem>>, vector<1x128xf32>
    %6 = vector.broadcast %5 : vector<1x128xf32> to vector<512x128xf32>
    %7 = arith.mulf %4, %6 : vector<512x128xf32>
    %c0_4 = arith.constant 0 : index
    %c0_5 = arith.constant 0 : index
    %8 = vector.load %arg3[%c0_4, %c0_5] : memref<1x128xf32, #tpu.memory_space<vmem>>, vector<1x128xf32>
    %9 = vector.broadcast %8 : vector<1x128xf32> to vector<512x128xf32>
    %10 = arith.addf %7, %9 : vector<512x128xf32>
    %cst = arith.constant 0.000000e+00 : f32
    %11 = vector.broadcast %cst : f32 to vector<512x128xf32>
    %12 = arith.maximumf %10, %11 : vector<512x128xf32>
    %13 = tpu.iota {dimensions = array<i32: 0>} : vector<512x1xi32>
    %c512_i32 = arith.constant 512 : i32
    %14 = arith.muli %arg0, %c512_i32 : i32
    %15 = vector.broadcast %14 : i32 to vector<512x1xi32>
    %16 = arith.addi %13, %15 : vector<512x1xi32>
    %c512_i32_6 = arith.constant 512 : i32
    %17 = vector.broadcast %c512_i32_6 : i32 to vector<512x1xi32>
    %18 = arith.cmpi slt, %16, %17 : vector<512x1xi32>
    %cst_7 = arith.constant 0.000000e+00 : f32
    %19 = vector.shape_cast %18 : vector<512x1xi1> to vector<512x1xi1>
    %20 = vector.broadcast %19 : vector<512x1xi1> to vector<512x128xi1>
    %21 = vector.broadcast %cst_7 : f32 to vector<512x128xf32>
    %22 = arith.select %20, %12, %21 : vector<512x128xi1>, vector<512x128xf32>
    %23 = arith.truncf %22 : vector<512x128xf32> to vector<512x128xbf16>
    %c0_8 = arith.constant 0 : index
    %c0_9 = arith.constant 0 : index
    %24 = vector.load %arg4[%c0_8, %c0_9] : memref<128x128xbf16, #tpu.memory_space<vmem>>, vector<128x128xbf16>
    %cst_10 = arith.constant dense<0.000000e+00> : vector<512x128xf32>
    %25 = tpu.matmul %23, %24, %cst_10 {dimension_numbers = #tpu.dot_dimension_numbers<[1], [0], [0], [1], [0, 0, 1, 1], [], []>} : vector<512x128xbf16>, vector<128x128xbf16>, vector<512x128xf32> -> vector<512x128xf32>
    %26 = arith.truncf %25 : vector<512x128xf32> to vector<512x128xbf16>
    %c0_11 = arith.constant 0 : index
    %c0_12 = arith.constant 0 : index
    %27 = vector.load %arg7[%c0_11, %c0_12] : memref<512x128xbf16, #tpu.memory_space<vmem>>, vector<512x128xbf16>
    tpu.vector_store %arg7[%c0_11, %c0_12], %26 {strides = array<i32>} : memref<512x128xbf16, #tpu.memory_space<vmem>>, vector<512x128xbf16>,
    %c0_13 = arith.constant 0 : index
    %c0_14 = arith.constant 0 : index
    %28 = vector.load %arg8[%c0_13, %c0_14] : memref<1x128xf32, #tpu.memory_space<vmem>>, vector<1x128xf32>
    %cst_15 = arith.constant dense<0.000000e+00> : vector<128xf32>
    %29 = vector.multi_reduction <add>, %25, %cst_15 [0] : vector<512x128xf32> to vector<128xf32>
    %30 = vector.shape_cast %29 : vector<128xf32> to vector<1x128xf32>
    %31 = arith.addf %28, %30 : vector<1x128xf32>
    %c0_16 = arith.constant 0 : index
    %c0_17 = arith.constant 0 : index
    %32 = vector.load %arg8[%c0_16, %c0_17] : memref<1x128xf32, #tpu.memory_space<vmem>>, vector<1x128xf32>
    tpu.vector_store %arg8[%c0_16, %c0_17], %31 {strides = array<i32>} : memref<1x128xf32, #tpu.memory_space<vmem>>, vector<1x128xf32>,
    %c0_18 = arith.constant 0 : index
    %c0_19 = arith.constant 0 : index
    %33 = vector.load %arg9[%c0_18, %c0_19] : memref<1x128xf32, #tpu.memory_space<vmem>>, vector<1x128xf32>
    %34 = arith.mulf %25, %25 : vector<512x128xf32>
    %cst_20 = arith.constant dense<0.000000e+00> : vector<128xf32>
    %35 = vector.multi_reduction <add>, %34, %cst_20 [0] : vector<512x128xf32> to vector<128xf32>
    %36 = vector.shape_cast %35 : vector<128xf32> to vector<1x128xf32>
    %37 = arith.addf %33, %36 : vector<1x128xf32>
    %c0_21 = arith.constant 0 : index
    %c0_22 = arith.constant 0 : index
    %38 = vector.load %arg9[%c0_21, %c0_22] : memref<1x128xf32, #tpu.memory_space<vmem>>, vector<1x128xf32>
    tpu.vector_store %arg9[%c0_21, %c0_22], %37 {strides = array<i32>} : memref<1x128xf32, #tpu.memory_space<vmem>>, vector<1x128xf32>,
    %c0_23 = arith.constant 0 : index
    %c0_24 = arith.constant 0 : index
    %39 = vector.load %arg5[%c0_23, %c0_24] : memref<512x128xbf16, #tpu.memory_space<vmem>>, vector<512x128xbf16>
    %c0_25 = arith.constant 0 : index
    %c0_26 = arith.constant 0 : index
    %40 = vector.load %arg6[%c0_25, %c0_26] : memref<128x128xbf16, #tpu.memory_space<vmem>>, vector<128x128xbf16>
    %cst_27 = arith.constant dense<0.000000e+00> : vector<512x128xf32>
    %41 = tpu.matmul %39, %40, %cst_27 {dimension_numbers = #tpu.dot_dimension_numbers<[1], [0], [0], [1], [0, 0, 1, 1], [], []>} : vector<512x128xbf16>, vector<128x128xbf16>, vector<512x128xf32> -> vector<512x128xf32>
    %42 = arith.truncf %41 : vector<512x128xf32> to vector<512x128xbf16>
    %c0_28 = arith.constant 0 : index
    %c0_29 = arith.constant 0 : index
    %43 = vector.load %arg10[%c0_28, %c0_29] : memref<512x128xbf16, #tpu.memory_space<vmem>>, vector<512x128xbf16>
    tpu.vector_store %arg10[%c0_28, %c0_29], %42 {strides = array<i32>} : memref<512x128xbf16, #tpu.memory_space<vmem>>, vector<512x128xbf16>,
    %c0_30 = arith.constant 0 : index
    %c0_31 = arith.constant 0 : index
    %44 = vector.load %arg11[%c0_30, %c0_31] : memref<1x128xf32, #tpu.memory_space<vmem>>, vector<1x128xf32>
    %cst_32 = arith.constant dense<0.000000e+00> : vector<128xf32>
    %45 = vector.multi_reduction <add>, %41, %cst_32 [0] : vector<512x128xf32> to vector<128xf32>
    %46 = vector.shape_cast %45 : vector<128xf32> to vector<1x128xf32>
    %47 = arith.addf %44, %46 : vector<1x128xf32>
    %c0_33 = arith.constant 0 : index
    %c0_34 = arith.constant 0 : index
    %48 = vector.load %arg11[%c0_33, %c0_34] : memref<1x128xf32, #tpu.memory_space<vmem>>, vector<1x128xf32>
    tpu.vector_store %arg11[%c0_33, %c0_34], %47 {strides = array<i32>} : memref<1x128xf32, #tpu.memory_space<vmem>>, vector<1x128xf32>,
    %c0_35 = arith.constant 0 : index
    %c0_36 = arith.constant 0 : index
    %49 = vector.load %arg12[%c0_35, %c0_36] : memref<1x128xf32, #tpu.memory_space<vmem>>, vector<1x128xf32>
    %50 = arith.mulf %41, %41 : vector<512x128xf32>
    %cst_37 = arith.constant dense<0.000000e+00> : vector<128xf32>
    %51 = vector.multi_reduction <add>, %50, %cst_37 [0] : vector<512x128xf32> to vector<128xf32>
    %52 = vector.shape_cast %51 : vector<128xf32> to vector<1x128xf32>
    %53 = arith.addf %49, %52 : vector<1x128xf32>
    %c0_38 = arith.constant 0 : index
    %c0_39 = arith.constant 0 : index
    %54 = vector.load %arg12[%c0_38, %c0_39] : memref<1x128xf32, #tpu.memory_space<vmem>>, vector<1x128xf32>
    tpu.vector_store %arg12[%c0_38, %c0_39], %53 {strides = array<i32>} : memref<1x128xf32, #tpu.memory_space<vmem>>, vector<1x128xf32>,
    return
  }
  func.func @transform_0(%arg0: i32) -> (i32, i32) {
    %c0_i32 = arith.constant 0 : i32
    %c0_i32_0 = arith.constant 0 : i32
    return %arg0, %c0_i32 : i32, i32
  }
  func.func @transform_1(%arg0: i32) -> (i32, i32) {
    %c0_i32 = arith.constant 0 : i32
    %c0_i32_0 = arith.constant 0 : i32
    %c0_i32_1 = arith.constant 0 : i32
    return %c0_i32, %c0_i32_0 : i32, i32
  }
  func.func @transform_2(%arg0: i32) -> (i32, i32) {
    %c0_i32 = arith.constant 0 : i32
    %c0_i32_0 = arith.constant 0 : i32
    %c0_i32_1 = arith.constant 0 : i32
    return %c0_i32, %c0_i32_0 : i32, i32
  }
  func.func @transform_3(%arg0: i32) -> (i32, i32) {
    %c0_i32 = arith.constant 0 : i32
    %c0_i32_0 = arith.constant 0 : i32
    %c0_i32_1 = arith.constant 0 : i32
    return %c0_i32, %c0_i32_0 : i32, i32
  }
  func.func @transform_4(%arg0: i32) -> (i32, i32) {
    %c0_i32 = arith.constant 0 : i32
    %c0_i32_0 = arith.constant 0 : i32
    return %arg0, %c0_i32 : i32, i32
  }
  func.func @transform_5(%arg0: i32) -> (i32, i32) {
    %c0_i32 = arith.constant 0 : i32
    %c0_i32_0 = arith.constant 0 : i32
    %c0_i32_1 = arith.constant 0 : i32
    return %c0_i32, %c0_i32_0 : i32, i32
  }
  func.func @transform_6(%arg0: i32) -> (i32, i32) {
    %c0_i32 = arith.constant 0 : i32
    %c0_i32_0 = arith.constant 0 : i32
    return %arg0, %c0_i32 : i32, i32
  }
  func.func @transform_7(%arg0: i32) -> (i32, i32) {
    %c0_i32 = arith.constant 0 : i32
    %c0_i32_0 = arith.constant 0 : i32
    %c0_i32_1 = arith.constant 0 : i32
    return %c0_i32, %c0_i32_0 : i32, i32
  }
  func.func @transform_8(%arg0: i32) -> (i32, i32) {
    %c0_i32 = arith.constant 0 : i32
    %c0_i32_0 = arith.constant 0 : i32
    %c0_i32_1 = arith.constant 0 : i32
    return %c0_i32, %c0_i32_0 : i32, i32
  }
  func.func @transform_9(%arg0: i32) -> (i32, i32) {
    %c0_i32 = arith.constant 0 : i32
    %c0_i32_0 = arith.constant 0 : i32
    return %arg0, %c0_i32 : i32, i32
  }
  func.func @transform_10(%arg0: i32) -> (i32, i32) {
    %c0_i32 = arith.constant 0 : i32
    %c0_i32_0 = arith.constant 0 : i32
    %c0_i32_1 = arith.constant 0 : i32
    return %c0_i32, %c0_i32_0 : i32, i32
  }
  func.func @transform_11(%arg0: i32) -> (i32, i32) {
    %c0_i32 = arith.constant 0 : i32
    %c0_i32_0 = arith.constant 0 : i32
    %c0_i32_1 = arith.constant 0 : i32
    return %c0_i32, %c0_i32_0 : i32, i32
  }
}

module attributes {stable_mosaic.version = 11 : i64} {
  func.func @_final_proj_kernel(%arg0: i32, %arg1: memref<512x128xbf16, #tpu.memory_space<vmem>>, %arg2: memref<1x128xf32, #tpu.memory_space<vmem>>, %arg3: memref<1x128xf32, #tpu.memory_space<vmem>>, %arg4: memref<512x128xbf16, #tpu.memory_space<vmem>>, %arg5: memref<1x128xf32, #tpu.memory_space<vmem>>, %arg6: memref<1x128xf32, #tpu.memory_space<vmem>>, %arg7: memref<512x128xbf16, #tpu.memory_space<vmem>>) attributes {dimension_semantics = [#tpu.dimension_semantics<parallel>], iteration_bounds = array<i64: 1>, scalar_prefetch = 0 : i64, scratch_operands = 0 : i64, tpu.core_type = #tpu.core_type<tc>, window_params = [{transform_indices = @transform_0, window_bounds = array<i64: 512, 128>}, {pipeline_mode = #tpu.pipeline_mode<synchronous>, transform_indices = @transform_1, window_bounds = array<i64: 1, 128>}, {pipeline_mode = #tpu.pipeline_mode<synchronous>, transform_indices = @transform_2, window_bounds = array<i64: 1, 128>}, {transform_indices = @transform_3, window_bounds = array<i64: 512, 128>}, {pipeline_mode = #tpu.pipeline_mode<synchronous>, transform_indices = @transform_4, window_bounds = array<i64: 1, 128>}, {pipeline_mode = #tpu.pipeline_mode<synchronous>, transform_indices = @transform_5, window_bounds = array<i64: 1, 128>}, {transform_indices = @transform_6, window_bounds = array<i64: 512, 128>}]} {
    %c0 = arith.constant 0 : index
    %c0_0 = arith.constant 0 : index
    %0 = vector.load %arg1[%c0, %c0_0] : memref<512x128xbf16, #tpu.memory_space<vmem>>, vector<512x128xbf16>
    %1 = arith.extf %0 : vector<512x128xbf16> to vector<512x128xf32>
    %c0_1 = arith.constant 0 : index
    %c0_2 = arith.constant 0 : index
    %2 = vector.load %arg2[%c0_1, %c0_2] : memref<1x128xf32, #tpu.memory_space<vmem>>, vector<1x128xf32>
    %3 = vector.broadcast %2 : vector<1x128xf32> to vector<512x128xf32>
    %4 = arith.mulf %1, %3 : vector<512x128xf32>
    %c0_3 = arith.constant 0 : index
    %c0_4 = arith.constant 0 : index
    %5 = vector.load %arg3[%c0_3, %c0_4] : memref<1x128xf32, #tpu.memory_space<vmem>>, vector<1x128xf32>
    %6 = vector.broadcast %5 : vector<1x128xf32> to vector<512x128xf32>
    %7 = arith.addf %4, %6 : vector<512x128xf32>
    %c0_5 = arith.constant 0 : index
    %c0_6 = arith.constant 0 : index
    %8 = vector.load %arg4[%c0_5, %c0_6] : memref<512x128xbf16, #tpu.memory_space<vmem>>, vector<512x128xbf16>
    %9 = arith.extf %8 : vector<512x128xbf16> to vector<512x128xf32>
    %c0_7 = arith.constant 0 : index
    %c0_8 = arith.constant 0 : index
    %10 = vector.load %arg5[%c0_7, %c0_8] : memref<1x128xf32, #tpu.memory_space<vmem>>, vector<1x128xf32>
    %11 = vector.broadcast %10 : vector<1x128xf32> to vector<512x128xf32>
    %12 = arith.mulf %9, %11 : vector<512x128xf32>
    %c0_9 = arith.constant 0 : index
    %c0_10 = arith.constant 0 : index
    %13 = vector.load %arg6[%c0_9, %c0_10] : memref<1x128xf32, #tpu.memory_space<vmem>>, vector<1x128xf32>
    %14 = vector.broadcast %13 : vector<1x128xf32> to vector<512x128xf32>
    %15 = arith.addf %12, %14 : vector<512x128xf32>
    %16 = arith.addf %7, %15 : vector<512x128xf32>
    %cst = arith.constant 0.000000e+00 : f32
    %17 = vector.broadcast %cst : f32 to vector<512x128xf32>
    %18 = arith.maximumf %16, %17 : vector<512x128xf32>
    %19 = arith.truncf %18 : vector<512x128xf32> to vector<512x128xbf16>
    %c0_11 = arith.constant 0 : index
    %c0_12 = arith.constant 0 : index
    %20 = vector.load %arg7[%c0_11, %c0_12] : memref<512x128xbf16, #tpu.memory_space<vmem>>, vector<512x128xbf16>
    tpu.vector_store %arg7[%c0_11, %c0_12], %19 {strides = array<i32>} : memref<512x128xbf16, #tpu.memory_space<vmem>>, vector<512x128xbf16>,
    return
  }
  func.func @transform_0(%arg0: i32) -> (i32, i32) {
    %c0_i32 = arith.constant 0 : i32
    %c0_i32_0 = arith.constant 0 : i32
    return %arg0, %c0_i32 : i32, i32
  }
  func.func @transform_1(%arg0: i32) -> (i32, i32) {
    %c0_i32 = arith.constant 0 : i32
    %c0_i32_0 = arith.constant 0 : i32
    %c0_i32_1 = arith.constant 0 : i32
    return %c0_i32, %c0_i32_0 : i32, i32
  }
  func.func @transform_2(%arg0: i32) -> (i32, i32) {
    %c0_i32 = arith.constant 0 : i32
    %c0_i32_0 = arith.constant 0 : i32
    %c0_i32_1 = arith.constant 0 : i32
    return %c0_i32, %c0_i32_0 : i32, i32
  }
  func.func @transform_3(%arg0: i32) -> (i32, i32) {
    %c0_i32 = arith.constant 0 : i32
    %c0_i32_0 = arith.constant 0 : i32
    return %arg0, %c0_i32 : i32, i32
  }
  func.func @transform_4(%arg0: i32) -> (i32, i32) {
    %c0_i32 = arith.constant 0 : i32
    %c0_i32_0 = arith.constant 0 : i32
    %c0_i32_1 = arith.constant 0 : i32
    return %c0_i32, %c0_i32_0 : i32, i32
  }
  func.func @transform_5(%arg0: i32) -> (i32, i32) {
    %c0_i32 = arith.constant 0 : i32
    %c0_i32_0 = arith.constant 0 : i32
    %c0_i32_1 = arith.constant 0 : i32
    return %c0_i32, %c0_i32_0 : i32, i32
  }
  func.func @transform_6(%arg0: i32) -> (i32, i32) {
    %c0_i32 = arith.constant 0 : i32
    %c0_i32_0 = arith.constant 0 : i32
    return %arg0, %c0_i32 : i32, i32
  }
}

</mosaic_0001>

<bundles_post_ra>
// kernel: bottleneck_block_forward.4
= control target key start
LH: loop header
LB: loop body
LE: loop exit
PB: predicated region body
PF: predicated region fallthrough
CT: control target
= control target key end

     0   :  { %v1706_v40 = vmov 0.0   ;;  %s2158_s1 = inlined_call_operand.vmem [shape: bf16[128,128], index: 1, kind: input, shape index: {}]   ;;  %s2159_s0 = inlined_call_operand.vmem [shape: bf16[512,128], index: 0, kind: input, shape index: {}]   ;;  %s2160_s3 = inlined_call_operand.vmem [shape: f32[1,128], index: 3, kind: output, shape index: {1}]   ;;  %s2161_s4 = inlined_call_operand.vmem [shape: f32[1,128], index: 4, kind: output, shape index: {2}]   ;;  %s2162_s2 = inlined_call_operand.vmem [shape: bf16[512,128], index: 2, kind: output, shape index: {0}]  }
   0x1   :  { %v1666_v0 = vld [vmem:[%s2158_s1] sm:$0xff]   ;;  %v1667_v1 = vld [vmem:[%s2158_s1 + $0x8] sm:$0xff]   ;;  %v1668_v2 = vld [vmem:[%s2158_s1 + $0x10] sm:$0xff]   ;;  %19 = vst [vmem:[%s2160_s3] sm:$0x1] %v1706_v40 }
   0x2   :  { %1569 = vmatprep.subr.bf16.mxu0 %v1666_v0  ;;  %1649 = vmatprep.subr.bf16.mxu1 %v1666_v0  ;;  %v1669_v3 = vld [vmem:[%s2158_s1 + $0x18] sm:$0xff]   ;;  %v1674_v4 = vld [vmem:[%s2159_s0] sm:$0xff]   ;;  %v1671_v6 = vld [vmem:[%s2158_s1 + $0x28] sm:$0xff]   ;;  %20 = vst [vmem:[%s2161_s4] sm:$0x1] %v1706_v40 }
   0x3   :  { %1570 = vmatpush3.bf16.msra.mxu0 %v1666_v0  ;;  %1657 = vmatpush3.bf16.msra.mxu1 %v1666_v0  ;;  %v1670_v5 = vld [vmem:[%s2158_s1 + $0x20] sm:$0xff]   ;;  %v1672_v7 = vld [vmem:[%s2158_s1 + $0x30] sm:$0xff]   ;;  %v1673_v8 = vld [vmem:[%s2158_s1 + $0x38] sm:$0xff]  }
   0x4   :  { %1571 = vmatprep.subr.bf16.mxu0 %v1667_v1  ;;  %1650 = vmatprep.subr.bf16.mxu1 %v1667_v1  ;;  %v1690_v9 = vld [vmem:[%s2159_s0 + $0x80] sm:$0xff]   ;;  %v1675_v10 = vld [vmem:[%s2159_s0 + $0x8] sm:$0xff]   ;;  %v1676_v11 = vld [vmem:[%s2159_s0 + $0x10] sm:$0xff]  }
   0x5   :  { %1585 = vmatprep.mubr.bf16.mxu0 %v1674_v4  ;;  %1617 = vmatprep.mubr.bf16.mxu1 %v1690_v9  ;;  %v1691_v12 = vld [vmem:[%s2159_s0 + $0x88] sm:$0xff]   ;;  %v1692_v13 = vld [vmem:[%s2159_s0 + $0x90] sm:$0xff]   ;;  %v1677_v14 = vld [vmem:[%s2159_s0 + $0x18] sm:$0xff]  }
   0x6   :  { %v1678_v15 = vld [vmem:[%s2159_s0 + $0x20] sm:$0xff]   ;;  %v1693_v16 = vld [vmem:[%s2159_s0 + $0x98] sm:$0xff]   ;;  %v1679_v18 = vld [vmem:[%s2159_s0 + $0x28] sm:$0xff]  }
   0x7   :  { %1572 = vmatpush3.bf16.msra.mxu0 %v1667_v1  ;;  %1658 = vmatpush3.bf16.msra.mxu1 %v1667_v1  ;;  %v1694_v17 = vld [vmem:[%s2159_s0 + $0xa0] sm:$0xff]   ;;  %v1695_v19 = vld [vmem:[%s2159_s0 + $0xa8] sm:$0xff]   ;;  %v1680_v20 = vld [vmem:[%s2159_s0 + $0x30] sm:$0xff]  }
   0x8   :  { %1573 = vmatprep.subr.bf16.mxu0 %v1668_v2  ;;  %1651 = vmatprep.subr.bf16.mxu1 %v1668_v2  ;;  %v1696_v21 = vld [vmem:[%s2159_s0 + $0xb0] sm:$0xff]   ;;  %v1681_v22 = vld [vmem:[%s2159_s0 + $0x38] sm:$0xff]   ;;  %v1682_v24 = vld [vmem:[%s2159_s0 + $0x40] sm:$0xff]  }
   0x9   :  { %v1697_v23 = vld [vmem:[%s2159_s0 + $0xb8] sm:$0xff]   ;;  %v1698_v25 = vld [vmem:[%s2159_s0 + $0xc0] sm:$0xff]   ;;  %v1683_v26 = vld [vmem:[%s2159_s0 + $0x48] sm:$0xff]  }
   0xa   :  { %v1699_v27 = vld [vmem:[%s2159_s0 + $0xc8] sm:$0xff]   ;;  %v1684_v28 = vld [vmem:[%s2159_s0 + $0x50] sm:$0xff]   ;;  %v1685_v30 = vld [vmem:[%s2159_s0 + $0x58] sm:$0xff]  }
   0xb   :  { %1574 = vmatpush3.bf16.msra.mxu0 %v1668_v2  ;;  %1659 = vmatpush3.bf16.msra.mxu1 %v1668_v2  ;;  %v1700_v29 = vld [vmem:[%s2159_s0 + $0xd0] sm:$0xff]   ;;  %v1701_v31 = vld [vmem:[%s2159_s0 + $0xd8] sm:$0xff]   ;;  %v1686_v32 = vld [vmem:[%s2159_s0 + $0x60] sm:$0xff]  }
   0xc   :  { %1575 = vmatprep.subr.bf16.mxu0 %v1669_v3  ;;  %1652 = vmatprep.subr.bf16.mxu1 %v1669_v3  ;;  %v1702_v33 = vld [vmem:[%s2159_s0 + $0xe0] sm:$0xff]   ;;  %v1687_v34 = vld [vmem:[%s2159_s0 + $0x68] sm:$0xff]   ;;  %v1688_v36 = vld [vmem:[%s2159_s0 + $0x70] sm:$0xff]  }
   0xd   :  { %v1703_v35 = vld [vmem:[%s2159_s0 + $0xe8] sm:$0xff]   ;;  %v1704_v37 = vld [vmem:[%s2159_s0 + $0xf0] sm:$0xff]   ;;  %v1689_v38 = vld [vmem:[%s2159_s0 + $0x78] sm:$0xff]  }
   0xe   :  { %v1705_v39 = vld [vmem:[%s2159_s0 + $0xf8] sm:$0xff]  }
   0xf   :  { %1576 = vmatpush3.bf16.msra.mxu0 %v1669_v3  ;;  %1660 = vmatpush3.bf16.msra.mxu1 %v1669_v3 }
  0x10   :  { %1577 = vmatprep.subr.bf16.mxu0 %v1670_v5  ;;  %1653 = vmatprep.subr.bf16.mxu1 %v1670_v5 }
  0x13   :  { %1578 = vmatpush3.bf16.msra.mxu0 %v1670_v5  ;;  %1661 = vmatpush3.bf16.msra.mxu1 %v1670_v5 }
  0x14   :  { %1579 = vmatprep.subr.bf16.mxu0 %v1671_v6  ;;  %1654 = vmatprep.subr.bf16.mxu1 %v1671_v6 }
  0x17   :  { %1580 = vmatpush3.bf16.msra.mxu0 %v1671_v6  ;;  %1662 = vmatpush3.bf16.msra.mxu1 %v1671_v6 }
  0x18   :  { %1581 = vmatprep.subr.bf16.mxu0 %v1672_v7  ;;  %1655 = vmatprep.subr.bf16.mxu1 %v1672_v7 }
  0x1b   :  { %1582 = vmatpush3.bf16.msra.mxu0 %v1672_v7  ;;  %1663 = vmatpush3.bf16.msra.mxu1 %v1672_v7 }
  0x1c   :  { %1583 = vmatprep.subr.bf16.mxu0 %v1673_v8  ;;  %1656 = vmatprep.subr.bf16.mxu1 %v1673_v8 }
  0x1f   :  { %1584 = vmatpush3.bf16.msra.mxu0 %v1673_v8  ;;  %1664 = vmatpush3.bf16.msra.mxu1 %v1673_v8 }
  0x22   :  { %1586 = vmatmul.mubr.bf16.vlgmr.msra.gmra.mrb[0].mxu0 %v1675_v10  ;;  %1618 = vmatmul.mubr.bf16.vlgmr.msra.gmra.mrb[0].mxu1 %v1691_v12 }
  0x23   :  { %1589 = vmatprep.mubr.bf16.mxu0 %v1676_v11  ;;  %1621 = vmatprep.mubr.bf16.mxu1 %v1692_v13 }
  0x2a   :  { %1590 = vmatmul.mubr.bf16.gmra.mrb[4].mxu0 %v1677_v14  ;;  %1622 = vmatmul.mubr.bf16.gmra.mrb[4].mxu1 %v1693_v16 }
  0x2b   :  { %1593 = vmatprep.mubr.bf16.mxu0 %v1678_v15  ;;  %1625 = vmatprep.mubr.bf16.mxu1 %v1694_v17 }
  0x32   :  { %1594 = vmatmul.mubr.bf16.gmra.mrb[8].mxu0 %v1679_v18  ;;  %1626 = vmatmul.mubr.bf16.gmra.mrb[8].mxu1 %v1695_v19 }
  0x33   :  { %1597 = vmatprep.mubr.bf16.mxu0 %v1680_v20  ;;  %1629 = vmatprep.mubr.bf16.mxu1 %v1696_v21 }
  0x3a   :  { %1598 = vmatmul.mubr.bf16.gmra.mrb[12].mxu0 %v1681_v22  ;;  %1630 = vmatmul.mubr.bf16.gmra.mrb[12].mxu1 %v1697_v23 }
  0x3b   :  { %1601 = vmatprep.mubr.bf16.mxu0 %v1682_v24  ;;  %1633 = vmatprep.mubr.bf16.mxu1 %v1698_v25 }
  0x42   :  { %1602 = vmatmul.mubr.bf16.gmra.mrb[16].mxu0 %v1683_v26  ;;  %1634 = vmatmul.mubr.bf16.gmra.mrb[16].mxu1 %v1699_v27 }
  0x43   :  { %1605 = vmatprep.mubr.bf16.mxu0 %v1684_v28  ;;  %1637 = vmatprep.mubr.bf16.mxu1 %v1700_v29 }
  0x4a   :  { %1606 = vmatmul.mubr.bf16.gmra.mrb[20].mxu0 %v1685_v30  ;;  %1638 = vmatmul.mubr.bf16.gmra.mrb[20].mxu1 %v1701_v31 }
  0x4b   :  { %1609 = vmatprep.mubr.bf16.mxu0 %v1686_v32  ;;  %1641 = vmatprep.mubr.bf16.mxu1 %v1702_v33 }
  0x52   :  { %1610 = vmatmul.mubr.bf16.gmra.mrb[24].mxu0 %v1687_v34  ;;  %1642 = vmatmul.mubr.bf16.gmra.mrb[24].mxu1 %v1703_v35 }
  0x53   :  { %1613 = vmatprep.mubr.bf16.mxu0 %v1688_v36  ;;  %1645 = vmatprep.mubr.bf16.mxu1 %v1704_v37 }
  0x5a   :  { %1614 = vmatmul.mubr.bf16.gmra.mrb[28].mxu0 %v1689_v38  ;;  %1646 = vmatmul.mubr.bf16.gmra.mrb[28].mxu1 %v1705_v39 }
  0xf5   :  { %v1587_v41 = vpop.f32.mrb[0].mxu0  ;;  %v1858_v42 = vpop.f32.mrb[0].mxu1 }
  0xf6   :  { %v375_v43 = vpop.f32.mrb[1].mxu0  ;;  %v1860_v44 = vpop.f32.mrb[1].mxu1  ;;  %v1025_v56 = vmul.f32 %v1587_v41, %v1587_v41 }
  0xf7   :  { %v1588_v45 = vpop.f32.mrb[2].mxu0  ;;  %v1862_v46 = vpop.f32.mrb[2].mxu1  ;;  %v1023_v47 = vmul.f32 %v375_v43, %v375_v43 }
  0xf8   :  { %v1346_v48 = vpack.c.bf16 %v1588_v45, %v1587_v41  ;;  %v378_v49 = vpop.f32.mrb[3].mxu0  ;;  %v1426_v50 = vpack.c.bf16 %v1862_v46, %v1858_v42  ;;  %v1866_v51 = vpop.f32.mrb[3].mxu1  ;;  %v1026_v59 = vmul.f32 %v1588_v45, %v1588_v45 }
  0xf9   :  { %v1341_v52 = vpack.c.bf16 %v378_v49, %v375_v43  ;;  %v951_v53 = vadd.f32 %v378_v49, %v375_v43  ;;  %v1024_v54 = vmul.f32 %v378_v49, %v378_v49  ;;  %v1421_v55 = vpack.c.bf16 %v1866_v51, %v1860_v44 }
  0xfa   :  { %1498 = vst [vmem:[%s2162_s2 + $0x8] sm:$0xff] %v1346_v48   ;;  %1514 = vst [vmem:[%s2162_s2 + $0x88] sm:$0xff] %v1426_v50  }
  0xfb   :  { %1342 = vst [vmem:[%s2162_s2] sm:$0xff] %v1341_v52   ;;  %v952_v57 = vadd.f32 %v1587_v41, %v951_v53  ;;  %v1087_v58 = vadd.f32 %v1024_v54, %v1023_v47  ;;  %1513 = vst [vmem:[%s2162_s2 + $0x80] sm:$0xff] %v1421_v55  }
  0xfd   :  { %v1088_v60 = vadd.f32 %v1087_v58, %v1025_v56  ;;  %v1591_v61 = vpop.f32.mrb[4].mxu0  ;;  %v953_v62 = vadd.f32 %v1588_v45, %v952_v57  ;;  %v1882_v63 = vpop.f32.mrb[4].mxu1 }
  0xfe   :  { %v391_v0 = vpop.f32.mrb[5].mxu0  ;;  %v1884_v1 = vpop.f32.mrb[5].mxu1  ;;  %v1029_v16 = vmul.f32 %v1591_v61, %v1591_v61 }
  0xff   :  { %v954_v2 = vadd.f32 %v953_v62, %v391_v0  ;;  %v1027_v3 = vmul.f32 %v391_v0, %v391_v0  ;;  %v1089_v4 = vadd.f32 %v1088_v60, %v1026_v59  ;;  %v1592_v5 = vpop.f32.mrb[6].mxu0  ;;  %v1886_v6 = vpop.f32.mrb[6].mxu1 }
 0x100   :  { %v1356_v7 = vpack.c.bf16 %v1592_v5, %v1591_v61  ;;  %v394_v8 = vpop.f32.mrb[7].mxu0  ;;  %v1436_v9 = vpack.c.bf16 %v1886_v6, %v1882_v63  ;;  %v1890_v10 = vpop.f32.mrb[7].mxu1  ;;  %v1030_v19 = vmul.f32 %v1592_v5, %v1592_v5 }
 0x101   :  { %v1090_v11 = vadd.f32 %v1089_v4, %v1027_v3  ;;  %v1351_v12 = vpack.c.bf16 %v394_v8, %v391_v0  ;;  %v955_v13 = vadd.f32 %v954_v2, %v394_v8  ;;  %v1028_v14 = vmul.f32 %v394_v8, %v394_v8 }
 0x102   :  { %1500 = vst [vmem:[%s2162_s2 + $0x18] sm:$0xff] %v1356_v7   ;;  %1516 = vst [vmem:[%s2162_s2 + $0x98] sm:$0xff] %v1436_v9   ;;  %v1431_v15 = vpack.c.bf16 %v1890_v10, %v1884_v1 }
 0x103   :  { %1499 = vst [vmem:[%s2162_s2 + $0x10] sm:$0xff] %v1351_v12   ;;  %v956_v17 = vadd.f32 %v1591_v61, %v955_v13  ;;  %v1091_v18 = vadd.f32 %v1090_v11, %v1028_v14 }
 0x104   :  { %1515 = vst [vmem:[%s2162_s2 + $0x90] sm:$0xff] %v1431_v15  }
 0x105   :  { %v1092_v20 = vadd.f32 %v1091_v18, %v1029_v16  ;;  %v1595_v21 = vpop.f32.mrb[8].mxu0  ;;  %v957_v22 = vadd.f32 %v1592_v5, %v956_v17  ;;  %v1906_v23 = vpop.f32.mrb[8].mxu1 }
 0x106   :  { %v407_v24 = vpop.f32.mrb[9].mxu0  ;;  %v1908_v25 = vpop.f32.mrb[9].mxu1  ;;  %v1033_v40 = vmul.f32 %v1595_v21, %v1595_v21 }
 0x107   :  { %v958_v26 = vadd.f32 %v957_v22, %v407_v24  ;;  %v1031_v27 = vmul.f32 %v407_v24, %v407_v24  ;;  %v1093_v28 = vadd.f32 %v1092_v20, %v1030_v19  ;;  %v1596_v29 = vpop.f32.mrb[10].mxu0  ;;  %v1910_v30 = vpop.f32.mrb[10].mxu1 }
 0x108   :  { %v1366_v31 = vpack.c.bf16 %v1596_v29, %v1595_v21  ;;  %v410_v32 = vpop.f32.mrb[11].mxu0  ;;  %v1446_v33 = vpack.c.bf16 %v1910_v30, %v1906_v23  ;;  %v1914_v34 = vpop.f32.mrb[11].mxu1  ;;  %v1034_v45 = vmul.f32 %v1596_v29, %v1596_v29 }
 0x109   :  { %v1094_v35 = vadd.f32 %v1093_v28, %v1031_v27  ;;  %v1361_v36 = vpack.c.bf16 %v410_v32, %v407_v24  ;;  %v959_v37 = vadd.f32 %v958_v26, %v410_v32  ;;  %v1032_v38 = vmul.f32 %v410_v32, %v410_v32 }
 0x10a   :  { %1502 = vst [vmem:[%s2162_s2 + $0x28] sm:$0xff] %v1366_v31   ;;  %1518 = vst [vmem:[%s2162_s2 + $0xa8] sm:$0xff] %v1446_v33   ;;  %v1441_v39 = vpack.c.bf16 %v1914_v34, %v1908_v25 }
 0x10b   :  { %1501 = vst [vmem:[%s2162_s2 + $0x20] sm:$0xff] %v1361_v36   ;;  %v960_v41 = vadd.f32 %v1595_v21, %v959_v37  ;;  %v1095_v43 = vadd.f32 %v1094_v35, %v1032_v38 }
 0x10c   :  { %1517 = vst [vmem:[%s2162_s2 + $0xa0] sm:$0xff] %v1441_v39  }
 0x10d   :  { %v1096_v47 = vadd.f32 %v1095_v43, %v1033_v40  ;;  %v1599_v48 = vpop.f32.mrb[12].mxu0  ;;  %v961_v49 = vadd.f32 %v1596_v29, %v960_v41  ;;  %v1930_v50 = vpop.f32.mrb[12].mxu1 }
 0x10e   :  { %v423_v52 = vpop.f32.mrb[13].mxu0  ;;  %v1932_v53 = vpop.f32.mrb[13].mxu1  ;;  %v1037_v7 = vmul.f32 %v1599_v48, %v1599_v48 }
 0x10f   :  { %v962_v54 = vadd.f32 %v961_v49, %v423_v52  ;;  %v1035_v55 = vmul.f32 %v423_v52, %v423_v52  ;;  %v1097_v56 = vadd.f32 %v1096_v47, %v1034_v45  ;;  %v1600_v57 = vpop.f32.mrb[14].mxu0  ;;  %v1934_v58 = vpop.f32.mrb[14].mxu1 }
 0x110   :  { %v1376_v59 = vpack.c.bf16 %v1600_v57, %v1599_v48  ;;  %v426_v60 = vpop.f32.mrb[15].mxu0  ;;  %v1456_v61 = vpack.c.bf16 %v1934_v58, %v1930_v50  ;;  %v1938_v62 = vpop.f32.mrb[15].mxu1  ;;  %v1038_v11 = vmul.f32 %v1600_v57, %v1600_v57 }
 0x111   :  { %v1098_v0 = vadd.f32 %v1097_v56, %v1035_v55  ;;  %v1371_v2 = vpack.c.bf16 %v426_v60, %v423_v52  ;;  %v963_v3 = vadd.f32 %v962_v54, %v426_v60  ;;  %v1036_v4 = vmul.f32 %v426_v60, %v426_v60 }
 0x112   :  { %1504 = vst [vmem:[%s2162_s2 + $0x38] sm:$0xff] %v1376_v59   ;;  %1520 = vst [vmem:[%s2162_s2 + $0xb8] sm:$0xff] %v1456_v61   ;;  %v1451_v5 = vpack.c.bf16 %v1938_v62, %v1932_v53 }
 0x113   :  { %1503 = vst [vmem:[%s2162_s2 + $0x30] sm:$0xff] %v1371_v2   ;;  %v964_v8 = vadd.f32 %v1599_v48, %v963_v3  ;;  %v1099_v9 = vadd.f32 %v1098_v0, %v1036_v4 }
 0x114   :  { %1519 = vst [vmem:[%s2162_s2 + $0xb0] sm:$0xff] %v1451_v5  }
 0x115   :  { %v1100_v12 = vadd.f32 %v1099_v9, %v1037_v7  ;;  %v1603_v13 = vpop.f32.mrb[16].mxu0  ;;  %v965_v14 = vadd.f32 %v1600_v57, %v964_v8  ;;  %v1954_v15 = vpop.f32.mrb[16].mxu1 }
 0x116   :  { %v439_v16 = vpop.f32.mrb[17].mxu0  ;;  %v1956_v17 = vpop.f32.mrb[17].mxu1  ;;  %v1041_v36 = vmul.f32 %v1603_v13, %v1603_v13 }
 0x117   :  { %v966_v18 = vadd.f32 %v965_v14, %v439_v16  ;;  %v1039_v19 = vmul.f32 %v439_v16, %v439_v16  ;;  %v1101_v20 = vadd.f32 %v1100_v12, %v1038_v11  ;;  %v1604_v21 = vpop.f32.mrb[18].mxu0  ;;  %v1958_v22 = vpop.f32.mrb[18].mxu1 }
 0x118   :  { %v1386_v24 = vpack.c.bf16 %v1604_v21, %v1603_v13  ;;  %v442_v26 = vpop.f32.mrb[19].mxu0  ;;  %v1466_v27 = vpack.c.bf16 %v1958_v22, %v1954_v15  ;;  %v1962_v28 = vpop.f32.mrb[19].mxu1  ;;  %v1042_v39 = vmul.f32 %v1604_v21, %v1604_v21 }
 0x119   :  { %v1102_v29 = vadd.f32 %v1101_v20, %v1039_v19  ;;  %v1381_v31 = vpack.c.bf16 %v442_v26, %v439_v16  ;;  %v967_v32 = vadd.f32 %v966_v18, %v442_v26  ;;  %v1040_v33 = vmul.f32 %v442_v26, %v442_v26 }
 0x11a   :  { %1506 = vst [vmem:[%s2162_s2 + $0x48] sm:$0xff] %v1386_v24   ;;  %1522 = vst [vmem:[%s2162_s2 + $0xc8] sm:$0xff] %v1466_v27   ;;  %v1461_v35 = vpack.c.bf16 %v1962_v28, %v1956_v17 }
 0x11b   :  { %1505 = vst [vmem:[%s2162_s2 + $0x40] sm:$0xff] %v1381_v31   ;;  %v968_v37 = vadd.f32 %v1603_v13, %v967_v32  ;;  %v1103_v38 = vadd.f32 %v1102_v29, %v1040_v33 }
 0x11c   :  { %1521 = vst [vmem:[%s2162_s2 + $0xc0] sm:$0xff] %v1461_v35  }
 0x11d   :  { %v1104_v40 = vadd.f32 %v1103_v38, %v1041_v36  ;;  %v1607_v41 = vpop.f32.mrb[20].mxu0  ;;  %v969_v43 = vadd.f32 %v1604_v21, %v968_v37  ;;  %v1978_v45 = vpop.f32.mrb[20].mxu1 }
 0x11e   :  { %v455_v47 = vpop.f32.mrb[21].mxu0  ;;  %v1980_v48 = vpop.f32.mrb[21].mxu1  ;;  %v1045_v7 = vmul.f32 %v1607_v41, %v1607_v41 }
 0x11f   :  { %v970_v49 = vadd.f32 %v969_v43, %v455_v47  ;;  %v1043_v52 = vmul.f32 %v455_v47, %v455_v47  ;;  %v1105_v54 = vadd.f32 %v1104_v40, %v1042_v39  ;;  %v1608_v55 = vpop.f32.mrb[22].mxu0  ;;  %v1982_v56 = vpop.f32.mrb[22].mxu1 }
 0x120   :  { %v1396_v57 = vpack.c.bf16 %v1608_v55, %v1607_v41  ;;  %v458_v59 = vpop.f32.mrb[23].mxu0  ;;  %v1476_v60 = vpack.c.bf16 %v1982_v56, %v1978_v45  ;;  %v1986_v61 = vpop.f32.mrb[23].mxu1  ;;  %v1046_v11 = vmul.f32 %v1608_v55, %v1608_v55 }
 0x121   :  { %v1106_v0 = vadd.f32 %v1105_v54, %v1043_v52  ;;  %v1391_v2 = vpack.c.bf16 %v458_v59, %v455_v47  ;;  %v971_v3 = vadd.f32 %v970_v49, %v458_v59  ;;  %v1044_v4 = vmul.f32 %v458_v59, %v458_v59 }
 0x122   :  { %1508 = vst [vmem:[%s2162_s2 + $0x58] sm:$0xff] %v1396_v57   ;;  %1524 = vst [vmem:[%s2162_s2 + $0xd8] sm:$0xff] %v1476_v60   ;;  %v1471_v5 = vpack.c.bf16 %v1986_v61, %v1980_v48 }
 0x123   :  { %1507 = vst [vmem:[%s2162_s2 + $0x50] sm:$0xff] %v1391_v2   ;;  %v972_v8 = vadd.f32 %v1607_v41, %v971_v3  ;;  %v1107_v9 = vadd.f32 %v1106_v0, %v1044_v4 }
 0x124   :  { %1523 = vst [vmem:[%s2162_s2 + $0xd0] sm:$0xff] %v1471_v5  }
 0x125   :  { %v1108_v12 = vadd.f32 %v1107_v9, %v1045_v7  ;;  %v1611_v13 = vpop.f32.mrb[24].mxu0  ;;  %v973_v14 = vadd.f32 %v1608_v55, %v972_v8  ;;  %v2002_v16 = vpop.f32.mrb[24].mxu1 }
 0x126   :  { %v471_v18 = vpop.f32.mrb[25].mxu0  ;;  %v2004_v19 = vpop.f32.mrb[25].mxu1  ;;  %v1049_v40 = vmul.f32 %v1611_v13, %v1611_v13 }
 0x127   :  { %v974_v20 = vadd.f32 %v973_v14, %v471_v18  ;;  %v1047_v21 = vmul.f32 %v471_v18, %v471_v18  ;;  %v1109_v24 = vadd.f32 %v1108_v12, %v1046_v11  ;;  %v1612_v26 = vpop.f32.mrb[26].mxu0  ;;  %v2006_v27 = vpop.f32.mrb[26].mxu1 }
 0x128   :  { %v1406_v29 = vpack.c.bf16 %v1612_v26, %v1611_v13  ;;  %v474_v31 = vpop.f32.mrb[27].mxu0  ;;  %v1486_v32 = vpack.c.bf16 %v2006_v27, %v2002_v16  ;;  %v2010_v33 = vpop.f32.mrb[27].mxu1  ;;  %v1050_v47 = vmul.f32 %v1612_v26, %v1612_v26 }
 0x129   :  { %v1110_v35 = vadd.f32 %v1109_v24, %v1047_v21  ;;  %v1401_v36 = vpack.c.bf16 %v474_v31, %v471_v18  ;;  %v975_v37 = vadd.f32 %v974_v20, %v474_v31  ;;  %v1048_v38 = vmul.f32 %v474_v31, %v474_v31 }
 0x12a   :  { %1510 = vst [vmem:[%s2162_s2 + $0x68] sm:$0xff] %v1406_v29   ;;  %1526 = vst [vmem:[%s2162_s2 + $0xe8] sm:$0xff] %v1486_v32   ;;  %v1481_v39 = vpack.c.bf16 %v2010_v33, %v2004_v19  ;;  %v1055_v32 = vmul.f32 %v1860_v44, %v1860_v44 }
 0x12b   :  { %1509 = vst [vmem:[%s2162_s2 + $0x60] sm:$0xff] %v1401_v36   ;;  %v976_v41 = vadd.f32 %v1611_v13, %v975_v37  ;;  %v1111_v43 = vadd.f32 %v1110_v35, %v1048_v38 }
 0x12c   :  { %1525 = vst [vmem:[%s2162_s2 + $0xe0] sm:$0xff] %v1481_v39   ;;  %v1056_v39 = vmul.f32 %v1866_v51, %v1866_v51 }
 0x12d   :  { %v1112_v49 = vadd.f32 %v1111_v43, %v1049_v40  ;;  %v1615_v52 = vpop.f32.mrb[28].mxu0  ;;  %v977_v54 = vadd.f32 %v1612_v26, %v976_v41  ;;  %v2026_v55 = vpop.f32.mrb[28].mxu1  ;;  %v1057_v40 = vmul.f32 %v1858_v42, %v1858_v42 }
 0x12e   :  { %v487_v57 = vpop.f32.mrb[29].mxu0  ;;  %v2028_v59 = vpop.f32.mrb[29].mxu1  ;;  %v1053_v20 = vmul.f32 %v1615_v52, %v1615_v52 }
 0x12f   :  { %v978_v60 = vadd.f32 %v977_v54, %v487_v57  ;;  %v1051_v0 = vmul.f32 %v487_v57, %v487_v57  ;;  %v1113_v2 = vadd.f32 %v1112_v49, %v1050_v47  ;;  %v1616_v3 = vpop.f32.mrb[30].mxu0  ;;  %v2030_v4 = vpop.f32.mrb[30].mxu1  ;;  %v1058_v47 = vmul.f32 %v1862_v46, %v1862_v46 }
 0x130   :  { %v1416_v5 = vpack.c.bf16 %v1616_v3, %v1615_v52  ;;  %v490_v7 = vpop.f32.mrb[31].mxu0  ;;  %v1496_v8 = vpack.c.bf16 %v2030_v4, %v2026_v55  ;;  %v2034_v9 = vpop.f32.mrb[31].mxu1  ;;  %v1054_v26 = vmul.f32 %v1616_v3, %v1616_v3 }
 0x131   :  { %v1114_v11 = vadd.f32 %v1113_v2, %v1051_v0  ;;  %v1411_v12 = vpack.c.bf16 %v490_v7, %v487_v57  ;;  %v979_v13 = vadd.f32 %v978_v60, %v490_v7  ;;  %v1052_v14 = vmul.f32 %v490_v7, %v490_v7 }
 0x132   :  { %1512 = vst [vmem:[%s2162_s2 + $0x78] sm:$0xff] %v1416_v5   ;;  %1528 = vst [vmem:[%s2162_s2 + $0xf8] sm:$0xff] %v1496_v8   ;;  %v1491_v18 = vpack.c.bf16 %v2034_v9, %v2028_v59  ;;  %v1060_v0 = vmul.f32 %v1890_v10, %v1890_v10 }
 0x133   :  { %1511 = vst [vmem:[%s2162_s2 + $0x70] sm:$0xff] %v1411_v12   ;;  %v980_v21 = vadd.f32 %v1615_v52, %v979_v13  ;;  %v1115_v24 = vadd.f32 %v1114_v11, %v1052_v14  ;;  %v1064_v13 = vmul.f32 %v1914_v34, %v1914_v34 }
 0x134   :  { %1527 = vst [vmem:[%s2162_s2 + $0xf0] sm:$0xff] %v1491_v18  }
 0x135   :  { %v1116_v29 = vadd.f32 %v1115_v24, %v1053_v20  ;;  %v981_v31 = vadd.f32 %v1616_v3, %v980_v21 }
 0x137   :  { %v982_v35 = vadd.f32 %v981_v31, %v1860_v44  ;;  %v1117_v36 = vadd.f32 %v1116_v29, %v1054_v26  ;;  %v1059_v44 = vmul.f32 %v1884_v1, %v1884_v1  ;;  %v1068_v31 = vmul.f32 %v1938_v62, %v1938_v62 }
 0x139   :  { %v1118_v37 = vadd.f32 %v1117_v36, %v1055_v32  ;;  %v983_v38 = vadd.f32 %v982_v35, %v1866_v51 }
 0x13b   :  { %v984_v41 = vadd.f32 %v1858_v42, %v983_v38  ;;  %v1119_v43 = vadd.f32 %v1118_v37, %v1056_v39  ;;  %v1061_v42 = vmul.f32 %v1882_v63, %v1882_v63 }
 0x13d   :  { %v1120_v49 = vadd.f32 %v1119_v43, %v1057_v40  ;;  %v985_v52 = vadd.f32 %v1862_v46, %v984_v41  ;;  %v1062_v46 = vmul.f32 %v1886_v6, %v1886_v6  ;;  %v1072_v41 = vmul.f32 %v1962_v28, %v1962_v28 }
 0x13f   :  { %v986_v54 = vadd.f32 %v985_v52, %v1884_v1  ;;  %v1121_v57 = vadd.f32 %v1120_v49, %v1058_v47  ;;  %v1063_v1 = vmul.f32 %v1908_v25, %v1908_v25 }
 0x141   :  { %v1122_v60 = vadd.f32 %v1121_v57, %v1059_v44  ;;  %v987_v51 = vadd.f32 %v986_v54, %v1890_v10 }
 0x143   :  { %v988_v2 = vadd.f32 %v1882_v63, %v987_v51  ;;  %v1123_v3 = vadd.f32 %v1122_v60, %v1060_v0  ;;  %v1065_v63 = vmul.f32 %v1906_v23, %v1906_v23  ;;  %v1076_v60 = vmul.f32 %v1986_v61, %v1986_v61 }
 0x145   :  { %v1124_v5 = vadd.f32 %v1123_v3, %v1061_v42  ;;  %v989_v7 = vadd.f32 %v1886_v6, %v988_v2  ;;  %v1066_v6 = vmul.f32 %v1910_v30, %v1910_v30 }
 0x147   :  { %v990_v8 = vadd.f32 %v989_v7, %v1908_v25  ;;  %v1125_v11 = vadd.f32 %v1124_v5, %v1062_v46  ;;  %v1067_v25 = vmul.f32 %v1932_v53, %v1932_v53  ;;  %v1080_v7 = vmul.f32 %v2010_v33, %v2010_v33 }
 0x149   :  { %v1126_v12 = vadd.f32 %v1125_v11, %v1063_v1  ;;  %v991_v10 = vadd.f32 %v990_v8, %v1914_v34 }
 0x14b   :  { %v992_v14 = vadd.f32 %v1906_v23, %v991_v10  ;;  %v1127_v18 = vadd.f32 %v1126_v12, %v1064_v13  ;;  %v1069_v23 = vmul.f32 %v1930_v50, %v1930_v50 }
 0x14d   :  { %v1128_v20 = vadd.f32 %v1127_v18, %v1065_v63  ;;  %v993_v21 = vadd.f32 %v1910_v30, %v992_v14  ;;  %v1070_v30 = vmul.f32 %v1934_v58, %v1934_v58  ;;  %v1084_v14 = vmul.f32 %v2034_v9, %v2034_v9 }
 0x14f   :  { %v994_v24 = vadd.f32 %v993_v21, %v1932_v53  ;;  %v1129_v26 = vadd.f32 %v1128_v20, %v1066_v6  ;;  %v1071_v53 = vmul.f32 %v1956_v17, %v1956_v17 }
 0x151   :  { %v1130_v29 = vadd.f32 %v1129_v26, %v1067_v25  ;;  %v995_v34 = vadd.f32 %v994_v24, %v1938_v62 }
 0x153   :  { %v996_v32 = vadd.f32 %v1930_v50, %v995_v34  ;;  %v1131_v35 = vadd.f32 %v1130_v29, %v1068_v31  ;;  %v1073_v50 = vmul.f32 %v1954_v15, %v1954_v15 }
 0x155   :  { %v1132_v36 = vadd.f32 %v1131_v35, %v1069_v23  ;;  %v997_v37 = vadd.f32 %v1934_v58, %v996_v32  ;;  %v1074_v58 = vmul.f32 %v1958_v22, %v1958_v22 }
 0x157   :  { %v998_v38 = vadd.f32 %v997_v37, %v1956_v17  ;;  %v1133_v39 = vadd.f32 %v1132_v36, %v1070_v30  ;;  %v1075_v17 = vmul.f32 %v1980_v48, %v1980_v48 }
 0x159   :  { %v1134_v40 = vadd.f32 %v1133_v39, %v1071_v53  ;;  %v999_v62 = vadd.f32 %v998_v38, %v1962_v28 }
 0x15b   :  { %v1000_v43 = vadd.f32 %v1954_v15, %v999_v62  ;;  %v1135_v47 = vadd.f32 %v1134_v40, %v1072_v41  ;;  %v1077_v15 = vmul.f32 %v1978_v45, %v1978_v45 }
 0x15d   :  { %v1136_v49 = vadd.f32 %v1135_v47, %v1073_v50  ;;  %v1001_v52 = vadd.f32 %v1958_v22, %v1000_v43  ;;  %v1078_v22 = vmul.f32 %v1982_v56, %v1982_v56 }
 0x15f   :  { %v1002_v44 = vadd.f32 %v1001_v52, %v1980_v48  ;;  %v1137_v54 = vadd.f32 %v1136_v49, %v1074_v58  ;;  %v1079_v48 = vmul.f32 %v2004_v19, %v2004_v19 }
 0x161   :  { %v1138_v57 = vadd.f32 %v1137_v54, %v1075_v17  ;;  %v1003_v28 = vadd.f32 %v1002_v44, %v1986_v61 }
 0x163   :  { %v1004_v51 = vadd.f32 %v1978_v45, %v1003_v28  ;;  %v1139_v0 = vadd.f32 %v1138_v57, %v1076_v60  ;;  %v1081_v45 = vmul.f32 %v2002_v16, %v2002_v16 }
 0x165   :  { %v1140_v42 = vadd.f32 %v1139_v0, %v1077_v15  ;;  %v1005_v2 = vadd.f32 %v1982_v56, %v1004_v51  ;;  %v1082_v56 = vmul.f32 %v2006_v27, %v2006_v27 }
 0x167   :  { %v1006_v3 = vadd.f32 %v1005_v2, %v2004_v19  ;;  %v1141_v46 = vadd.f32 %v1140_v42, %v1078_v22  ;;  %v1083_v19 = vmul.f32 %v2028_v59, %v2028_v59 }
 0x169   :  { %v1142_v5 = vadd.f32 %v1141_v46, %v1079_v48  ;;  %v1007_v61 = vadd.f32 %v1006_v3, %v2010_v33 }
 0x16b   :  { %v1008_v1 = vadd.f32 %v2002_v16, %v1007_v61  ;;  %v1143_v8 = vadd.f32 %v1142_v5, %v1080_v7  ;;  %v1085_v16 = vmul.f32 %v2026_v55, %v2026_v55 }
 0x16d   :  { %v1144_v11 = vadd.f32 %v1143_v8, %v1081_v45  ;;  %v1009_v12 = vadd.f32 %v2006_v27, %v1008_v1  ;;  %v1086_v27 = vmul.f32 %v2030_v4, %v2030_v4 }
 0x16f   :  { %v1010_v10 = vadd.f32 %v1009_v12, %v2028_v59  ;;  %v1145_v13 = vadd.f32 %v1144_v11, %v1082_v56 }
 0x171   :  { %v1146_v63 = vadd.f32 %v1145_v13, %v1083_v19  ;;  %v1011_v33 = vadd.f32 %v1010_v10, %v2034_v9 }
 0x173   :  { %v1012_v18 = vadd.f32 %v2026_v55, %v1011_v33  ;;  %v1147_v6 = vadd.f32 %v1146_v63, %v1084_v14  ;;  %v950_v55 = vld [vmem:[%s2160_s3] sm:$0x1] }
 0x175   :  { %v1013_v20 = vadd.f32 %v2030_v4, %v1012_v18  ;;  %v1148_v21 = vadd.f32 %v1147_v6, %v1085_v16  ;;  %v1022_v4 = vld [vmem:[%s2161_s4] sm:$0x1] }
 0x177   :  { %v1014_v59 = vrot.slane %v1013_v20, 4  ;;  %v1149_v25 = vadd.f32 %v1148_v21, %v1086_v27 }
 0x179   :  { %v1015_v24 = vadd.f32 %v1014_v59, %v1013_v20  ;;  %v1150_v26 = vrot.slane %v1149_v25, 4 }
 0x17b   :  { %v1016_v29 = vrot.slane %v1015_v24, 2  ;;  %v1151_v34 = vadd.f32 %v1150_v26, %v1149_v25 }
 0x17d   :  { %v1017_v31 = vadd.f32 %v1016_v29, %v1015_v24  ;;  %v1152_v9 = vrot.slane %v1151_v34, 2 }
 0x17f   :  { %v1018_v23 = vrot.slane %v1017_v31, 1  ;;  %v1153_v32 = vadd.f32 %v1152_v9, %v1151_v34 }
 0x181   :  { %v1019_v35 = vadd.f32 %v1018_v23, %v1017_v31  ;;  %v1154_v30 = vrot.slane %v1153_v32, 1 }
 0x183   :  { %v1020_v36 = vadd.f32 %v1019_v35, %v950_v55  ;;  %v1155_v37 = vadd.f32 %v1154_v30, %v1153_v32 }
 0x185   :  { %1021 = vst [vmem:[%s2160_s3] sm:$0x1] %v1020_v36  ;;  %v1156_v53 = vadd.f32 %v1155_v37, %v1022_v4 }
 0x187   :  { %1157 = vst [vmem:[%s2161_s4] sm:$0x1] %v1156_v53 }

// kernel: bottleneck_block_forward.7
= control target key start
LH: loop header
LB: loop body
LE: loop exit
PB: predicated region body
PF: predicated region fallthrough
CT: control target
= control target key end

     0   :  { %s2279_s0 = inlined_call_operand.vmem [shape: bf16[512,128], index: 0, kind: input, shape index: {}]   ;;  %s2280_s1 = inlined_call_operand.vmem [shape: f32[1,128], index: 1, kind: input, shape index: {}]   ;;  %s2281_s2 = inlined_call_operand.vmem [shape: f32[1,128], index: 2, kind: input, shape index: {}]   ;;  %s2282_s3 = inlined_call_operand.vmem [shape: bf16[512,128], index: 3, kind: input, shape index: {}]   ;;  %s2283_s4 = inlined_call_operand.vmem [shape: f32[1,128], index: 4, kind: input, shape index: {}]   ;;  %s2284_s5 = inlined_call_operand.vmem [shape: f32[1,128], index: 5, kind: input, shape index: {}]   ;;  %s2285_s6 = inlined_call_operand.vmem [shape: bf16[512,128], index: 6, kind: output, shape index: {}]  }
   0x1   :  { %v1148_v0 = vld [vmem:[%s2279_s0] sm:$0xff]   ;;  %v1563_v9 = vld [vmem:[%s2279_s0 + $0x8] sm:$0xff]   ;;  %v1564_v20 = vld [vmem:[%s2279_s0 + $0x10] sm:$0xff]  }
   0x2   :  { %v1701_v1 = vld [vmem:[%s2280_s1] ss:$0 sm:$0xff]  ;;  %v1149_v2 = vunpack.c.l.bf16 %v1148_v0  ;;  %v1150_v3 = vunpack.c.h.bf16 %v1148_v0  ;;  %v1594_v10 = vld [vmem:[%s2282_s3 + $0x8] sm:$0xff]   ;;  %v1153_v14 = vunpack.c.l.bf16 %v1563_v9  ;;  %v1154_v15 = vunpack.c.h.bf16 %v1563_v9  ;;  %v1595_v29 = vld [vmem:[%s2282_s3 + $0x10] sm:$0xff]  }
   0x3   :  { %v1276_v4 = vld [vmem:[%s2282_s3] sm:$0xff]   ;;  %v1281_v18 = vunpack.c.l.bf16 %v1594_v10  ;;  %v1282_v19 = vunpack.c.h.bf16 %v1594_v10  ;;  %v1157_v32 = vunpack.c.l.bf16 %v1564_v20  ;;  %v1158_v33 = vunpack.c.h.bf16 %v1564_v20  ;;  %v1565_v42 = vld [vmem:[%s2279_s0 + $0x18] sm:$0xff]  }
   0x4   :  { %v1709_v5 = vld [vmem:[%s2283_s4] ss:$0 sm:$0xff]  ;;  %v1277_v7 = vunpack.c.l.bf16 %v1276_v4  ;;  %v1278_v8 = vunpack.c.h.bf16 %v1276_v4  ;;  %v158_v11 = vmul.f32 %v1149_v2, %v1701_v1  ;;  %v159_v12 = vmul.f32 %v1150_v3, %v1701_v1  ;;  %v1596_v47 = vld [vmem:[%s2282_s3 + $0x18] sm:$0xff]  }
   0x5   :  { %v1714_v6 = vld [vmem:[%s2281_s2] ss:$0 sm:$0xff]  ;;  %v160_v23 = vmul.f32 %v1153_v14, %v1701_v1  ;;  %v161_v24 = vmul.f32 %v1154_v15, %v1701_v1  ;;  %v430_v27 = vmul.f32 %v1281_v18, %v1709_v5  ;;  %v431_v28 = vmul.f32 %v1282_v19, %v1709_v5  ;;  %v1567_v14 = vld [vmem:[%s2279_s0 + $0x28] sm:$0xff]  }
   0x6   :  { %v1727_v13 = vld [vmem:[%s2284_s5] ss:$0 sm:$0xff]  ;;  %v428_v16 = vmul.f32 %v1277_v7, %v1709_v5  ;;  %v429_v17 = vmul.f32 %v1278_v8, %v1709_v5  ;;  %v229_v21 = vadd.f32 %v1714_v6, %v158_v11  ;;  %v230_v22 = vadd.f32 %v1714_v6, %v159_v12 }
   0x7   :  { %v231_v30 = vadd.f32 %v1714_v6, %v160_v23  ;;  %v232_v31 = vadd.f32 %v1714_v6, %v161_v24  ;;  %v501_v36 = vadd.f32 %v1727_v13, %v430_v27  ;;  %v502_v37 = vadd.f32 %v1727_v13, %v431_v28  ;;  %v1566_v52 = vld [vmem:[%s2279_s0 + $0x20] sm:$0xff]   ;;  %v1598_v23 = vld [vmem:[%s2282_s3 + $0x28] sm:$0xff]  }
   0x8   :  { %v499_v25 = vadd.f32 %v1727_v13, %v428_v16  ;;  %v500_v26 = vadd.f32 %v1727_v13, %v429_v17  ;;  %v162_v38 = vmul.f32 %v1157_v32, %v1701_v1  ;;  %v163_v39 = vmul.f32 %v1158_v33, %v1701_v1  ;;  %v1597_v8 = vld [vmem:[%s2282_s3 + $0x20] sm:$0xff]   ;;  %v1568_v32 = vld [vmem:[%s2279_s0 + $0x30] sm:$0xff]  }
   0x9   :  { %v1285_v40 = vunpack.c.l.bf16 %v1595_v29  ;;  %v1286_v41 = vunpack.c.h.bf16 %v1595_v29  ;;  %v565_v45 = vadd.f32 %v501_v36, %v231_v30  ;;  %v566_v46 = vadd.f32 %v502_v37, %v232_v31 }
   0xa   :  { %v563_v34 = vadd.f32 %v499_v25, %v229_v21  ;;  %v564_v35 = vadd.f32 %v500_v26, %v230_v22  ;;  %v233_v48 = vadd.f32 %v1714_v6, %v162_v38  ;;  %v234_v49 = vadd.f32 %v1714_v6, %v163_v39 }
   0xb   :  { %v432_v50 = vmul.f32 %v1285_v40, %v1709_v5  ;;  %v433_v51 = vmul.f32 %v1286_v41, %v1709_v5  ;;  %v629_v54 = vmax.f32 %v565_v45, 0.0  ;;  %v630_v55 = vmax.f32 %v566_v46, 0.0  ;;  %v1599_v45 = vld [vmem:[%s2282_s3 + $0x30] sm:$0xff]  }
   0xc   :  { %v627_v43 = vmax.f32 %v563_v34, 0.0  ;;  %v628_v44 = vmax.f32 %v564_v35, 0.0  ;;  %v1161_v56 = vunpack.c.l.bf16 %v1565_v42  ;;  %v1162_v59 = vunpack.c.h.bf16 %v1565_v42 }
   0xd   :  { %v503_v57 = vadd.f32 %v1727_v13, %v432_v50  ;;  %v504_v58 = vadd.f32 %v1727_v13, %v433_v51  ;;  %v1289_v60 = vunpack.c.l.bf16 %v1596_v47  ;;  %v1411_v61 = vpack.c.bf16 %v630_v55, %v629_v54  ;;  %v1569_v54 = vld [vmem:[%s2279_s0 + $0x38] sm:$0xff]  }
   0xe   :  { %v1406_v53 = vpack.c.bf16 %v628_v44, %v627_v43  ;;  %v164_v62 = vmul.f32 %v1161_v56, %v1701_v1  ;;  %v1290_v63 = vunpack.c.h.bf16 %v1596_v47  ;;  %v1165_v0 = vunpack.c.l.bf16 %v1566_v52 }
   0xf   :  { %v567_v2 = vadd.f32 %v503_v57, %v233_v48  ;;  %v568_v3 = vadd.f32 %v504_v58, %v234_v49  ;;  %v165_v4 = vmul.f32 %v1162_v59, %v1701_v1  ;;  %v434_v7 = vmul.f32 %v1289_v60, %v1709_v5  ;;  %1625 = vst [vmem:[%s2285_s6 + $0x8] sm:$0xff] %v1411_v61  }
  0x10   :  { %1407 = vst [vmem:[%s2285_s6] sm:$0xff] %v1406_v53   ;;  %v235_v9 = vadd.f32 %v1714_v6, %v164_v62  ;;  %v435_v10 = vmul.f32 %v1290_v63, %v1709_v5  ;;  %v1166_v11 = vunpack.c.h.bf16 %v1566_v52  ;;  %v166_v12 = vmul.f32 %v1165_v0, %v1701_v1 }
  0x11   :  { %v631_v15 = vmax.f32 %v567_v2, 0.0  ;;  %v632_v16 = vmax.f32 %v568_v3, 0.0  ;;  %v236_v17 = vadd.f32 %v1714_v6, %v165_v4  ;;  %v505_v18 = vadd.f32 %v1727_v13, %v434_v7  ;;  %v1600_v4 = vld [vmem:[%s2282_s3 + $0x38] sm:$0xff]   ;;  %v1570_v7 = vld [vmem:[%s2279_s0 + $0x40] sm:$0xff]  }
  0x12   :  { %v506_v19 = vadd.f32 %v1727_v13, %v435_v10  ;;  %v167_v20 = vmul.f32 %v1166_v11, %v1701_v1  ;;  %v237_v21 = vadd.f32 %v1714_v6, %v166_v12  ;;  %v1293_v22 = vunpack.c.l.bf16 %v1597_v8 }
  0x13   :  { %v1416_v24 = vpack.c.bf16 %v632_v16, %v631_v15  ;;  %v569_v25 = vadd.f32 %v505_v18, %v235_v9  ;;  %v1294_v26 = vunpack.c.h.bf16 %v1597_v8  ;;  %v1169_v27 = vunpack.c.l.bf16 %v1567_v14 }
  0x14   :  { %v570_v28 = vadd.f32 %v506_v19, %v236_v17  ;;  %v238_v29 = vadd.f32 %v1714_v6, %v167_v20  ;;  %v436_v30 = vmul.f32 %v1293_v22, %v1709_v5  ;;  %v1170_v31 = vunpack.c.h.bf16 %v1567_v14 }
  0x15   :  { %1626 = vst [vmem:[%s2285_s6 + $0x10] sm:$0xff] %v1416_v24   ;;  %v633_v33 = vmax.f32 %v569_v25, 0.0  ;;  %v437_v34 = vmul.f32 %v1294_v26, %v1709_v5  ;;  %v168_v35 = vmul.f32 %v1169_v27, %v1701_v1  ;;  %v1297_v36 = vunpack.c.l.bf16 %v1598_v23 }
  0x16   :  { %v634_v37 = vmax.f32 %v570_v28, 0.0  ;;  %v507_v38 = vadd.f32 %v1727_v13, %v436_v30  ;;  %v169_v39 = vmul.f32 %v1170_v31, %v1701_v1  ;;  %v1298_v40 = vunpack.c.h.bf16 %v1598_v23  ;;  %v1571_v30 = vld [vmem:[%s2279_s0 + $0x48] sm:$0xff]  }
  0x17   :  { %v508_v41 = vadd.f32 %v1727_v13, %v437_v34  ;;  %v239_v42 = vadd.f32 %v1714_v6, %v168_v35  ;;  %v438_v43 = vmul.f32 %v1297_v36, %v1709_v5  ;;  %v1173_v44 = vunpack.c.l.bf16 %v1568_v32 }
  0x18   :  { %v1421_v46 = vpack.c.bf16 %v634_v37, %v633_v33  ;;  %v571_v47 = vadd.f32 %v507_v38, %v237_v21  ;;  %v240_v48 = vadd.f32 %v1714_v6, %v169_v39  ;;  %v439_v49 = vmul.f32 %v1298_v40, %v1709_v5  ;;  %v1601_v21 = vld [vmem:[%s2282_s3 + $0x40] sm:$0xff]   ;;  %v1602_v39 = vld [vmem:[%s2282_s3 + $0x48] sm:$0xff]  }
  0x19   :  { %v572_v50 = vadd.f32 %v508_v41, %v238_v29  ;;  %v509_v51 = vadd.f32 %v1727_v13, %v438_v43  ;;  %v1174_v52 = vunpack.c.h.bf16 %v1568_v32  ;;  %v170_v53 = vmul.f32 %v1173_v44, %v1701_v1 }
  0x1a   :  { %1627 = vst [vmem:[%s2285_s6 + $0x18] sm:$0xff] %v1421_v46   ;;  %v635_v55 = vmax.f32 %v571_v47, 0.0  ;;  %v510_v56 = vadd.f32 %v1727_v13, %v439_v49  ;;  %v1301_v57 = vunpack.c.l.bf16 %v1599_v45  ;;  %v1302_v58 = vunpack.c.h.bf16 %v1599_v45 }
  0x1b   :  { %v636_v59 = vmax.f32 %v572_v50, 0.0  ;;  %v573_v60 = vadd.f32 %v509_v51, %v239_v42  ;;  %v171_v61 = vmul.f32 %v1174_v52, %v1701_v1  ;;  %v241_v62 = vadd.f32 %v1714_v6, %v170_v53  ;;  %v1572_v52 = vld [vmem:[%s2279_s0 + $0x50] sm:$0xff]  }
  0x1c   :  { %v574_v63 = vadd.f32 %v510_v56, %v240_v48  ;;  %v440_v0 = vmul.f32 %v1301_v57, %v1709_v5  ;;  %v441_v2 = vmul.f32 %v1302_v58, %v1709_v5  ;;  %v1177_v3 = vunpack.c.l.bf16 %v1569_v54 }
  0x1d   :  { %v1426_v8 = vpack.c.bf16 %v636_v59, %v635_v55  ;;  %v637_v9 = vmax.f32 %v573_v60, 0.0  ;;  %v242_v10 = vadd.f32 %v1714_v6, %v171_v61  ;;  %v1178_v11 = vunpack.c.h.bf16 %v1569_v54  ;;  %v1603_v61 = vld [vmem:[%s2282_s3 + $0x50] sm:$0xff]  }
  0x1e   :  { %v638_v12 = vmax.f32 %v574_v63, 0.0  ;;  %v511_v14 = vadd.f32 %v1727_v13, %v440_v0  ;;  %v512_v15 = vadd.f32 %v1727_v13, %v441_v2  ;;  %v172_v16 = vmul.f32 %v1177_v3, %v1701_v1  ;;  %v1573_v3 = vld [vmem:[%s2279_s0 + $0x58] sm:$0xff]  }
  0x1f   :  { %1628 = vst [vmem:[%s2285_s6 + $0x20] sm:$0xff] %v1426_v8   ;;  %v173_v17 = vmul.f32 %v1178_v11, %v1701_v1  ;;  %v1305_v18 = vunpack.c.l.bf16 %v1600_v4  ;;  %v1306_v19 = vunpack.c.h.bf16 %v1600_v4  ;;  %v1181_v20 = vunpack.c.l.bf16 %v1570_v7 }
  0x20   :  { %v1431_v22 = vpack.c.bf16 %v638_v12, %v637_v9  ;;  %v575_v23 = vadd.f32 %v511_v14, %v241_v62  ;;  %v576_v24 = vadd.f32 %v512_v15, %v242_v10  ;;  %v243_v25 = vadd.f32 %v1714_v6, %v172_v16 }
  0x21   :  { %v244_v26 = vadd.f32 %v1714_v6, %v173_v17  ;;  %v442_v27 = vmul.f32 %v1305_v18, %v1709_v5  ;;  %v443_v28 = vmul.f32 %v1306_v19, %v1709_v5  ;;  %v1182_v29 = vunpack.c.h.bf16 %v1570_v7  ;;  %v1604_v19 = vld [vmem:[%s2282_s3 + $0x58] sm:$0xff]  }
  0x22   :  { %1629 = vst [vmem:[%s2285_s6 + $0x28] sm:$0xff] %v1431_v22   ;;  %v639_v31 = vmax.f32 %v575_v23, 0.0  ;;  %v640_v32 = vmax.f32 %v576_v24, 0.0  ;;  %v174_v33 = vmul.f32 %v1181_v20, %v1701_v1  ;;  %v1309_v34 = vunpack.c.l.bf16 %v1601_v21  ;;  %v1574_v24 = vld [vmem:[%s2279_s0 + $0x60] sm:$0xff]  }
  0x23   :  { %v513_v35 = vadd.f32 %v1727_v13, %v442_v27  ;;  %v514_v36 = vadd.f32 %v1727_v13, %v443_v28  ;;  %v175_v37 = vmul.f32 %v1182_v29, %v1701_v1  ;;  %v1310_v38 = vunpack.c.h.bf16 %v1601_v21 }
  0x24   :  { %v1436_v40 = vpack.c.bf16 %v640_v32, %v639_v31  ;;  %v245_v41 = vadd.f32 %v1714_v6, %v174_v33  ;;  %v444_v42 = vmul.f32 %v1309_v34, %v1709_v5  ;;  %v1185_v43 = vunpack.c.l.bf16 %v1571_v30 }
  0x25   :  { %v577_v44 = vadd.f32 %v513_v35, %v243_v25  ;;  %v578_v45 = vadd.f32 %v514_v36, %v244_v26  ;;  %v246_v46 = vadd.f32 %v1714_v6, %v175_v37  ;;  %v445_v47 = vmul.f32 %v1310_v38, %v1709_v5  ;;  %v1605_v37 = vld [vmem:[%s2282_s3 + $0x60] sm:$0xff]  }
  0x26   :  { %1630 = vst [vmem:[%s2285_s6 + $0x30] sm:$0xff] %v1436_v40   ;;  %v515_v48 = vadd.f32 %v1727_v13, %v444_v42  ;;  %v1186_v49 = vunpack.c.h.bf16 %v1571_v30  ;;  %v176_v50 = vmul.f32 %v1185_v43, %v1701_v1  ;;  %v1313_v51 = vunpack.c.l.bf16 %v1602_v39 }
  0x27   :  { %v641_v53 = vmax.f32 %v577_v44, 0.0  ;;  %v642_v54 = vmax.f32 %v578_v45, 0.0  ;;  %v516_v55 = vadd.f32 %v1727_v13, %v445_v47  ;;  %v1314_v56 = vunpack.c.h.bf16 %v1602_v39 }
  0x28   :  { %v579_v57 = vadd.f32 %v515_v48, %v245_v41  ;;  %v177_v58 = vmul.f32 %v1186_v49, %v1701_v1  ;;  %v247_v59 = vadd.f32 %v1714_v6, %v176_v50  ;;  %v446_v60 = vmul.f32 %v1313_v51, %v1709_v5 }
  0x29   :  { %v1441_v62 = vpack.c.bf16 %v642_v54, %v641_v53  ;;  %v580_v63 = vadd.f32 %v516_v55, %v246_v46  ;;  %v447_v0 = vmul.f32 %v1314_v56, %v1709_v5  ;;  %v1189_v2 = vunpack.c.l.bf16 %v1572_v52  ;;  %v1575_v46 = vld [vmem:[%s2279_s0 + $0x68] sm:$0xff]  }
  0x2a   :  { %v643_v4 = vmax.f32 %v579_v57, 0.0  ;;  %v248_v7 = vadd.f32 %v1714_v6, %v177_v58  ;;  %v517_v8 = vadd.f32 %v1727_v13, %v446_v60  ;;  %v1190_v9 = vunpack.c.h.bf16 %v1572_v52 }
  0x2b   :  { %1631 = vst [vmem:[%s2285_s6 + $0x38] sm:$0xff] %v1441_v62   ;;  %v644_v10 = vmax.f32 %v580_v63, 0.0  ;;  %v518_v11 = vadd.f32 %v1727_v13, %v447_v0  ;;  %v178_v12 = vmul.f32 %v1189_v2, %v1701_v1  ;;  %v1317_v14 = vunpack.c.l.bf16 %v1603_v61  ;;  %v1576_v0 = vld [vmem:[%s2279_s0 + $0x70] sm:$0xff]  }
  0x2c   :  { %v581_v15 = vadd.f32 %v517_v8, %v247_v59  ;;  %v179_v16 = vmul.f32 %v1190_v9, %v1701_v1  ;;  %v1318_v17 = vunpack.c.h.bf16 %v1603_v61  ;;  %v1193_v18 = vunpack.c.l.bf16 %v1573_v3  ;;  %v1606_v59 = vld [vmem:[%s2282_s3 + $0x68] sm:$0xff]  }
  0x2d   :  { %v1446_v20 = vpack.c.bf16 %v644_v10, %v643_v4  ;;  %v582_v21 = vadd.f32 %v518_v11, %v248_v7  ;;  %v249_v22 = vadd.f32 %v1714_v6, %v178_v12  ;;  %v448_v23 = vmul.f32 %v1317_v14, %v1709_v5 }
  0x2e   :  { %v645_v25 = vmax.f32 %v581_v15, 0.0  ;;  %v250_v26 = vadd.f32 %v1714_v6, %v179_v16  ;;  %v449_v27 = vmul.f32 %v1318_v17, %v1709_v5  ;;  %v1194_v28 = vunpack.c.h.bf16 %v1573_v3  ;;  %v1607_v17 = vld [vmem:[%s2282_s3 + $0x70] sm:$0xff]  }
  0x2f   :  { %1632 = vst [vmem:[%s2285_s6 + $0x40] sm:$0xff] %v1446_v20   ;;  %v646_v29 = vmax.f32 %v582_v21, 0.0  ;;  %v519_v30 = vadd.f32 %v1727_v13, %v448_v23  ;;  %v180_v31 = vmul.f32 %v1193_v18, %v1701_v1  ;;  %v1321_v32 = vunpack.c.l.bf16 %v1604_v19 }
  0x30   :  { %v520_v33 = vadd.f32 %v1727_v13, %v449_v27  ;;  %v181_v34 = vmul.f32 %v1194_v28, %v1701_v1  ;;  %v1322_v35 = vunpack.c.h.bf16 %v1604_v19  ;;  %v1197_v36 = vunpack.c.l.bf16 %v1574_v24 }
  0x31   :  { %v1451_v38 = vpack.c.bf16 %v646_v29, %v645_v25  ;;  %v583_v39 = vadd.f32 %v519_v30, %v249_v22  ;;  %v251_v40 = vadd.f32 %v1714_v6, %v180_v31  ;;  %v450_v41 = vmul.f32 %v1321_v32, %v1709_v5  ;;  %v1577_v22 = vld [vmem:[%s2279_s0 + $0x78] sm:$0xff]  }
  0x32   :  { %v584_v42 = vadd.f32 %v520_v33, %v250_v26  ;;  %v252_v43 = vadd.f32 %v1714_v6, %v181_v34  ;;  %v451_v44 = vmul.f32 %v1322_v35, %v1709_v5  ;;  %v1198_v45 = vunpack.c.h.bf16 %v1574_v24  ;;  %v1608_v35 = vld [vmem:[%s2282_s3 + $0x78] sm:$0xff]  }
  0x33   :  { %1633 = vst [vmem:[%s2285_s6 + $0x48] sm:$0xff] %v1451_v38   ;;  %v647_v47 = vmax.f32 %v583_v39, 0.0  ;;  %v521_v48 = vadd.f32 %v1727_v13, %v450_v41  ;;  %v182_v49 = vmul.f32 %v1197_v36, %v1701_v1  ;;  %v1325_v50 = vunpack.c.l.bf16 %v1605_v37 }
  0x34   :  { %v648_v51 = vmax.f32 %v584_v42, 0.0  ;;  %v522_v52 = vadd.f32 %v1727_v13, %v451_v44  ;;  %v183_v53 = vmul.f32 %v1198_v45, %v1701_v1  ;;  %v1326_v54 = vunpack.c.h.bf16 %v1605_v37  ;;  %v1578_v44 = vld [vmem:[%s2279_s0 + $0x80] sm:$0xff]  }
  0x35   :  { %v585_v55 = vadd.f32 %v521_v48, %v251_v40  ;;  %v253_v56 = vadd.f32 %v1714_v6, %v182_v49  ;;  %v452_v57 = vmul.f32 %v1325_v50, %v1709_v5  ;;  %v1201_v58 = vunpack.c.l.bf16 %v1575_v46 }
  0x36   :  { %v1456_v60 = vpack.c.bf16 %v648_v51, %v647_v47  ;;  %v586_v61 = vadd.f32 %v522_v52, %v252_v43  ;;  %v254_v62 = vadd.f32 %v1714_v6, %v183_v53  ;;  %v453_v63 = vmul.f32 %v1326_v54, %v1709_v5  ;;  %v1609_v53 = vld [vmem:[%s2282_s3 + $0x80] sm:$0xff]  }
  0x37   :  { %v649_v2 = vmax.f32 %v585_v55, 0.0  ;;  %v523_v3 = vadd.f32 %v1727_v13, %v452_v57  ;;  %v1202_v4 = vunpack.c.h.bf16 %v1575_v46  ;;  %v184_v7 = vmul.f32 %v1201_v58, %v1701_v1 }
  0x38   :  { %1634 = vst [vmem:[%s2285_s6 + $0x50] sm:$0xff] %v1456_v60   ;;  %v650_v8 = vmax.f32 %v586_v61, 0.0  ;;  %v524_v9 = vadd.f32 %v1727_v13, %v453_v63  ;;  %v1329_v10 = vunpack.c.l.bf16 %v1606_v59  ;;  %v1330_v11 = vunpack.c.h.bf16 %v1606_v59 }
  0x39   :  { %v587_v12 = vadd.f32 %v523_v3, %v253_v56  ;;  %v185_v14 = vmul.f32 %v1202_v4, %v1701_v1  ;;  %v255_v15 = vadd.f32 %v1714_v6, %v184_v7  ;;  %v1205_v16 = vunpack.c.l.bf16 %v1576_v0 }
  0x3a   :  { %v1461_v18 = vpack.c.bf16 %v650_v8, %v649_v2  ;;  %v588_v19 = vadd.f32 %v524_v9, %v254_v62  ;;  %v454_v20 = vmul.f32 %v1329_v10, %v1709_v5  ;;  %v455_v21 = vmul.f32 %v1330_v11, %v1709_v5  ;;  %v1579_v62 = vld [vmem:[%s2279_s0 + $0x88] sm:$0xff]  }
  0x3b   :  { %v651_v23 = vmax.f32 %v587_v12, 0.0  ;;  %v256_v24 = vadd.f32 %v1714_v6, %v185_v14  ;;  %v1206_v25 = vunpack.c.h.bf16 %v1576_v0  ;;  %v186_v26 = vmul.f32 %v1205_v16, %v1701_v1 }
  0x3c   :  { %1635 = vst [vmem:[%s2285_s6 + $0x58] sm:$0xff] %v1461_v18   ;;  %v652_v27 = vmax.f32 %v588_v19, 0.0  ;;  %v525_v28 = vadd.f32 %v1727_v13, %v454_v20  ;;  %v526_v29 = vadd.f32 %v1727_v13, %v455_v21  ;;  %v1333_v30 = vunpack.c.l.bf16 %v1607_v17  ;;  %v1580_v20 = vld [vmem:[%s2279_s0 + $0x90] sm:$0xff]  }
  0x3d   :  { %v187_v31 = vmul.f32 %v1206_v25, %v1701_v1  ;;  %v257_v32 = vadd.f32 %v1714_v6, %v186_v26  ;;  %v1334_v33 = vunpack.c.h.bf16 %v1607_v17  ;;  %v1209_v34 = vunpack.c.l.bf16 %v1577_v22 }
  0x3e   :  { %v1466_v36 = vpack.c.bf16 %v652_v27, %v651_v23  ;;  %v589_v37 = vadd.f32 %v525_v28, %v255_v15  ;;  %v590_v38 = vadd.f32 %v526_v29, %v256_v24  ;;  %v456_v39 = vmul.f32 %v1333_v30, %v1709_v5  ;;  %v1610_v15 = vld [vmem:[%s2282_s3 + $0x88] sm:$0xff]  }
  0x3f   :  { %v258_v40 = vadd.f32 %v1714_v6, %v187_v31  ;;  %v457_v41 = vmul.f32 %v1334_v33, %v1709_v5  ;;  %v1210_v42 = vunpack.c.h.bf16 %v1577_v22  ;;  %v188_v43 = vmul.f32 %v1209_v34, %v1701_v1  ;;  %v1611_v33 = vld [vmem:[%s2282_s3 + $0x90] sm:$0xff]  }
  0x40   :  { %1636 = vst [vmem:[%s2285_s6 + $0x60] sm:$0xff] %v1466_v36   ;;  %v653_v45 = vmax.f32 %v589_v37, 0.0  ;;  %v654_v46 = vmax.f32 %v590_v38, 0.0  ;;  %v527_v47 = vadd.f32 %v1727_v13, %v456_v39  ;;  %v1337_v48 = vunpack.c.l.bf16 %v1608_v35  ;;  %v1581_v38 = vld [vmem:[%s2279_s0 + $0x98] sm:$0xff]  }
  0x41   :  { %v528_v49 = vadd.f32 %v1727_v13, %v457_v41  ;;  %v189_v50 = vmul.f32 %v1210_v42, %v1701_v1  ;;  %v259_v51 = vadd.f32 %v1714_v6, %v188_v43  ;;  %v1338_v52 = vunpack.c.h.bf16 %v1608_v35 }
  0x42   :  { %v1471_v54 = vpack.c.bf16 %v654_v46, %v653_v45  ;;  %v591_v55 = vadd.f32 %v527_v47, %v257_v32  ;;  %v458_v56 = vmul.f32 %v1337_v48, %v1709_v5  ;;  %v1213_v57 = vunpack.c.l.bf16 %v1578_v44 }
  0x43   :  { %v592_v58 = vadd.f32 %v528_v49, %v258_v40  ;;  %v260_v59 = vadd.f32 %v1714_v6, %v189_v50  ;;  %v459_v60 = vmul.f32 %v1338_v52, %v1709_v5  ;;  %v1214_v61 = vunpack.c.h.bf16 %v1578_v44 }
  0x44   :  { %1637 = vst [vmem:[%s2285_s6 + $0x68] sm:$0xff] %v1471_v54   ;;  %v655_v63 = vmax.f32 %v591_v55, 0.0  ;;  %v529_v0 = vadd.f32 %v1727_v13, %v458_v56  ;;  %v190_v2 = vmul.f32 %v1213_v57, %v1701_v1  ;;  %v1341_v3 = vunpack.c.l.bf16 %v1609_v53 }
  0x45   :  { %v656_v4 = vmax.f32 %v592_v58, 0.0  ;;  %v530_v7 = vadd.f32 %v1727_v13, %v459_v60  ;;  %v191_v8 = vmul.f32 %v1214_v61, %v1701_v1  ;;  %v1342_v9 = vunpack.c.h.bf16 %v1609_v53  ;;  %v1582_v60 = vld [vmem:[%s2279_s0 + $0xa0] sm:$0xff]  }
  0x46   :  { %v593_v10 = vadd.f32 %v529_v0, %v259_v51  ;;  %v261_v11 = vadd.f32 %v1714_v6, %v190_v2  ;;  %v460_v12 = vmul.f32 %v1341_v3, %v1709_v5  ;;  %v1217_v14 = vunpack.c.l.bf16 %v1579_v62  ;;  %v1612_v51 = vld [vmem:[%s2282_s3 + $0x98] sm:$0xff]  }
  0x47   :  { %v1476_v16 = vpack.c.bf16 %v656_v4, %v655_v63  ;;  %v594_v17 = vadd.f32 %v530_v7, %v260_v59  ;;  %v262_v18 = vadd.f32 %v1714_v6, %v191_v8  ;;  %v461_v19 = vmul.f32 %v1342_v9, %v1709_v5  ;;  %v1613_v8 = vld [vmem:[%s2282_s3 + $0xa0] sm:$0xff]  }
  0x48   :  { %v657_v21 = vmax.f32 %v593_v10, 0.0  ;;  %v531_v22 = vadd.f32 %v1727_v13, %v460_v12  ;;  %v1218_v23 = vunpack.c.h.bf16 %v1579_v62  ;;  %v192_v24 = vmul.f32 %v1217_v14, %v1701_v1 }
  0x49   :  { %1638 = vst [vmem:[%s2285_s6 + $0x70] sm:$0xff] %v1476_v16   ;;  %v658_v25 = vmax.f32 %v594_v17, 0.0  ;;  %v532_v26 = vadd.f32 %v1727_v13, %v461_v19  ;;  %v1345_v27 = vunpack.c.l.bf16 %v1610_v15  ;;  %v1346_v28 = vunpack.c.h.bf16 %v1610_v15 }
  0x4a   :  { %v595_v29 = vadd.f32 %v531_v22, %v261_v11  ;;  %v193_v30 = vmul.f32 %v1218_v23, %v1701_v1  ;;  %v263_v31 = vadd.f32 %v1714_v6, %v192_v24  ;;  %v1221_v32 = vunpack.c.l.bf16 %v1580_v20 }
  0x4b   :  { %v1481_v34 = vpack.c.bf16 %v658_v25, %v657_v21  ;;  %v596_v35 = vadd.f32 %v532_v26, %v262_v18  ;;  %v462_v36 = vmul.f32 %v1345_v27, %v1709_v5  ;;  %v463_v37 = vmul.f32 %v1346_v28, %v1709_v5  ;;  %v1583_v18 = vld [vmem:[%s2279_s0 + $0xa8] sm:$0xff]  }
  0x4c   :  { %v659_v39 = vmax.f32 %v595_v29, 0.0  ;;  %v264_v40 = vadd.f32 %v1714_v6, %v193_v30  ;;  %v1222_v41 = vunpack.c.h.bf16 %v1580_v20  ;;  %v194_v42 = vmul.f32 %v1221_v32, %v1701_v1 }
  0x4d   :  { %1639 = vst [vmem:[%s2285_s6 + $0x78] sm:$0xff] %v1481_v34   ;;  %v660_v43 = vmax.f32 %v596_v35, 0.0  ;;  %v533_v44 = vadd.f32 %v1727_v13, %v462_v36  ;;  %v534_v45 = vadd.f32 %v1727_v13, %v463_v37  ;;  %v1349_v46 = vunpack.c.l.bf16 %v1611_v33  ;;  %v1584_v36 = vld [vmem:[%s2279_s0 + $0xb0] sm:$0xff]  }
  0x4e   :  { %v195_v47 = vmul.f32 %v1222_v41, %v1701_v1  ;;  %v265_v48 = vadd.f32 %v1714_v6, %v194_v42  ;;  %v1350_v49 = vunpack.c.h.bf16 %v1611_v33  ;;  %v1225_v50 = vunpack.c.l.bf16 %v1581_v38 }
  0x4f   :  { %v1486_v52 = vpack.c.bf16 %v660_v43, %v659_v39  ;;  %v597_v53 = vadd.f32 %v533_v44, %v263_v31  ;;  %v598_v54 = vadd.f32 %v534_v45, %v264_v40  ;;  %v464_v55 = vmul.f32 %v1349_v46, %v1709_v5  ;;  %v1614_v31 = vld [vmem:[%s2282_s3 + $0xa8] sm:$0xff]  }
  0x50   :  { %v266_v56 = vadd.f32 %v1714_v6, %v195_v47  ;;  %v465_v57 = vmul.f32 %v1350_v49, %v1709_v5  ;;  %v1226_v58 = vunpack.c.h.bf16 %v1581_v38  ;;  %v196_v59 = vmul.f32 %v1225_v50, %v1701_v1  ;;  %v1615_v49 = vld [vmem:[%s2282_s3 + $0xb0] sm:$0xff]  }
  0x51   :  { %1640 = vst [vmem:[%s2285_s6 + $0x80] sm:$0xff] %v1486_v52   ;;  %v661_v61 = vmax.f32 %v597_v53, 0.0  ;;  %v662_v62 = vmax.f32 %v598_v54, 0.0  ;;  %v535_v63 = vadd.f32 %v1727_v13, %v464_v55  ;;  %v1353_v0 = vunpack.c.l.bf16 %v1612_v51  ;;  %v1585_v54 = vld [vmem:[%s2279_s0 + $0xb8] sm:$0xff]  }
  0x52   :  { %v536_v2 = vadd.f32 %v1727_v13, %v465_v57  ;;  %v197_v3 = vmul.f32 %v1226_v58, %v1701_v1  ;;  %v267_v4 = vadd.f32 %v1714_v6, %v196_v59  ;;  %v1354_v7 = vunpack.c.h.bf16 %v1612_v51 }
  0x53   :  { %v1491_v9 = vpack.c.bf16 %v662_v62, %v661_v61  ;;  %v599_v10 = vadd.f32 %v535_v63, %v265_v48  ;;  %v466_v11 = vmul.f32 %v1353_v0, %v1709_v5  ;;  %v1229_v12 = vunpack.c.l.bf16 %v1582_v60 }
  0x54   :  { %v600_v14 = vadd.f32 %v536_v2, %v266_v56  ;;  %v268_v15 = vadd.f32 %v1714_v6, %v197_v3  ;;  %v467_v16 = vmul.f32 %v1354_v7, %v1709_v5  ;;  %v1230_v17 = vunpack.c.h.bf16 %v1582_v60 }
  0x55   :  { %1641 = vst [vmem:[%s2285_s6 + $0x88] sm:$0xff] %v1491_v9   ;;  %v663_v19 = vmax.f32 %v599_v10, 0.0  ;;  %v537_v20 = vadd.f32 %v1727_v13, %v466_v11  ;;  %v198_v21 = vmul.f32 %v1229_v12, %v1701_v1  ;;  %v1357_v22 = vunpack.c.l.bf16 %v1613_v8 }
  0x56   :  { %v664_v23 = vmax.f32 %v600_v14, 0.0  ;;  %v538_v24 = vadd.f32 %v1727_v13, %v467_v16  ;;  %v199_v25 = vmul.f32 %v1230_v17, %v1701_v1  ;;  %v1358_v26 = vunpack.c.h.bf16 %v1613_v8  ;;  %v1586_v16 = vld [vmem:[%s2279_s0 + $0xc0] sm:$0xff]  }
  0x57   :  { %v601_v27 = vadd.f32 %v537_v20, %v267_v4  ;;  %v269_v28 = vadd.f32 %v1714_v6, %v198_v21  ;;  %v468_v29 = vmul.f32 %v1357_v22, %v1709_v5  ;;  %v1233_v30 = vunpack.c.l.bf16 %v1583_v18  ;;  %v1616_v4 = vld [vmem:[%s2282_s3 + $0xb8] sm:$0xff]  }
  0x58   :  { %v1496_v32 = vpack.c.bf16 %v664_v23, %v663_v19  ;;  %v602_v33 = vadd.f32 %v538_v24, %v268_v15  ;;  %v270_v34 = vadd.f32 %v1714_v6, %v199_v25  ;;  %v469_v35 = vmul.f32 %v1358_v26, %v1709_v5  ;;  %v1617_v25 = vld [vmem:[%s2282_s3 + $0xc0] sm:$0xff]  }
  0x59   :  { %v665_v37 = vmax.f32 %v601_v27, 0.0  ;;  %v539_v38 = vadd.f32 %v1727_v13, %v468_v29  ;;  %v1234_v39 = vunpack.c.h.bf16 %v1583_v18  ;;  %v200_v40 = vmul.f32 %v1233_v30, %v1701_v1 }
  0x5a   :  { %1642 = vst [vmem:[%s2285_s6 + $0x90] sm:$0xff] %v1496_v32   ;;  %v666_v41 = vmax.f32 %v602_v33, 0.0  ;;  %v540_v42 = vadd.f32 %v1727_v13, %v469_v35  ;;  %v1361_v43 = vunpack.c.l.bf16 %v1614_v31  ;;  %v1362_v44 = vunpack.c.h.bf16 %v1614_v31 }
  0x5b   :  { %v603_v45 = vadd.f32 %v539_v38, %v269_v28  ;;  %v201_v46 = vmul.f32 %v1234_v39, %v1701_v1  ;;  %v271_v47 = vadd.f32 %v1714_v6, %v200_v40  ;;  %v1237_v48 = vunpack.c.l.bf16 %v1584_v36 }
  0x5c   :  { %v1501_v50 = vpack.c.bf16 %v666_v41, %v665_v37  ;;  %v604_v51 = vadd.f32 %v540_v42, %v270_v34  ;;  %v470_v52 = vmul.f32 %v1361_v43, %v1709_v5  ;;  %v471_v53 = vmul.f32 %v1362_v44, %v1709_v5  ;;  %v1587_v34 = vld [vmem:[%s2279_s0 + $0xc8] sm:$0xff]  }
  0x5d   :  { %v667_v55 = vmax.f32 %v603_v45, 0.0  ;;  %v272_v56 = vadd.f32 %v1714_v6, %v201_v46  ;;  %v1238_v57 = vunpack.c.h.bf16 %v1584_v36  ;;  %v202_v58 = vmul.f32 %v1237_v48, %v1701_v1 }
  0x5e   :  { %1643 = vst [vmem:[%s2285_s6 + $0x98] sm:$0xff] %v1501_v50   ;;  %v668_v59 = vmax.f32 %v604_v51, 0.0  ;;  %v541_v60 = vadd.f32 %v1727_v13, %v470_v52  ;;  %v542_v61 = vadd.f32 %v1727_v13, %v471_v53  ;;  %v1365_v62 = vunpack.c.l.bf16 %v1615_v49  ;;  %v1588_v52 = vld [vmem:[%s2279_s0 + $0xd0] sm:$0xff]  }
  0x5f   :  { %v203_v63 = vmul.f32 %v1238_v57, %v1701_v1  ;;  %v273_v0 = vadd.f32 %v1714_v6, %v202_v58  ;;  %v1366_v2 = vunpack.c.h.bf16 %v1615_v49  ;;  %v1241_v3 = vunpack.c.l.bf16 %v1585_v54 }
  0x60   :  { %v1506_v7 = vpack.c.bf16 %v668_v59, %v667_v55  ;;  %v605_v8 = vadd.f32 %v541_v60, %v271_v47  ;;  %v606_v9 = vadd.f32 %v542_v61, %v272_v56  ;;  %v472_v10 = vmul.f32 %v1365_v62, %v1709_v5  ;;  %v1618_v47 = vld [vmem:[%s2282_s3 + $0xc8] sm:$0xff]  }
  0x61   :  { %v274_v11 = vadd.f32 %v1714_v6, %v203_v63  ;;  %v473_v12 = vmul.f32 %v1366_v2, %v1709_v5  ;;  %v1242_v14 = vunpack.c.h.bf16 %v1585_v54  ;;  %v204_v15 = vmul.f32 %v1241_v3, %v1701_v1  ;;  %v1619_v2 = vld [vmem:[%s2282_s3 + $0xd0] sm:$0xff]  }
  0x62   :  { %1644 = vst [vmem:[%s2285_s6 + $0xa0] sm:$0xff] %v1506_v7   ;;  %v669_v17 = vmax.f32 %v605_v8, 0.0  ;;  %v670_v18 = vmax.f32 %v606_v9, 0.0  ;;  %v543_v19 = vadd.f32 %v1727_v13, %v472_v10  ;;  %v1369_v20 = vunpack.c.l.bf16 %v1616_v4  ;;  %v1589_v9 = vld [vmem:[%s2279_s0 + $0xd8] sm:$0xff]  }
  0x63   :  { %v544_v21 = vadd.f32 %v1727_v13, %v473_v12  ;;  %v205_v22 = vmul.f32 %v1242_v14, %v1701_v1  ;;  %v275_v23 = vadd.f32 %v1714_v6, %v204_v15  ;;  %v1370_v24 = vunpack.c.h.bf16 %v1616_v4  ;;  %v2158_v12 = vld [vmem:[%s2280_s1] ss:$0 sm:$0xff] }
  0x64   :  { %v1511_v26 = vpack.c.bf16 %v670_v18, %v669_v17  ;;  %v607_v27 = vadd.f32 %v543_v19, %v273_v0  ;;  %v474_v28 = vmul.f32 %v1369_v20, %v1709_v5  ;;  %v1245_v29 = vunpack.c.l.bf16 %v1586_v16  ;;  %v2170_v18 = vld [vmem:[%s2281_s2] ss:$0 sm:$0xff] }
  0x65   :  { %v608_v30 = vadd.f32 %v544_v21, %v274_v11  ;;  %v276_v31 = vadd.f32 %v1714_v6, %v205_v22  ;;  %v475_v32 = vmul.f32 %v1370_v24, %v1709_v5  ;;  %v1246_v33 = vunpack.c.h.bf16 %v1586_v16  ;;  %v1620_v22 = vld [vmem:[%s2282_s3 + $0xd8] sm:$0xff]  }
  0x66   :  { %1645 = vst [vmem:[%s2285_s6 + $0xa8] sm:$0xff] %v1511_v26   ;;  %v671_v35 = vmax.f32 %v607_v27, 0.0  ;;  %v545_v36 = vadd.f32 %v1727_v13, %v474_v28  ;;  %v206_v37 = vmul.f32 %v1245_v29, %v1701_v1  ;;  %v1373_v38 = vunpack.c.l.bf16 %v1617_v25 }
  0x67   :  { %v672_v39 = vmax.f32 %v608_v30, 0.0  ;;  %v546_v40 = vadd.f32 %v1727_v13, %v475_v32  ;;  %v207_v41 = vmul.f32 %v1246_v33, %v1701_v1  ;;  %v1374_v42 = vunpack.c.h.bf16 %v1617_v25 }
  0x68   :  { %v609_v43 = vadd.f32 %v545_v36, %v275_v23  ;;  %v277_v44 = vadd.f32 %v1714_v6, %v206_v37  ;;  %v476_v45 = vmul.f32 %v1373_v38, %v1709_v5  ;;  %v1249_v46 = vunpack.c.l.bf16 %v1587_v34 }
  0x69   :  { %v1516_v48 = vpack.c.bf16 %v672_v39, %v671_v35  ;;  %v610_v49 = vadd.f32 %v546_v40, %v276_v31  ;;  %v278_v50 = vadd.f32 %v1714_v6, %v207_v41  ;;  %v477_v51 = vmul.f32 %v1374_v42, %v1709_v5  ;;  %v1590_v31 = vld [vmem:[%s2279_s0 + $0xe0] sm:$0xff]  }
  0x6a   :  { %v673_v53 = vmax.f32 %v609_v43, 0.0  ;;  %v547_v54 = vadd.f32 %v1727_v13, %v476_v45  ;;  %v1250_v55 = vunpack.c.h.bf16 %v1587_v34  ;;  %v208_v56 = vmul.f32 %v1249_v46, %v1701_v1  ;;  %v2194_v34 = vld [vmem:[%s2284_s5] ss:$0 sm:$0xff] }
  0x6b   :  { %1646 = vst [vmem:[%s2285_s6 + $0xb0] sm:$0xff] %v1516_v48   ;;  %v674_v57 = vmax.f32 %v610_v49, 0.0  ;;  %v548_v58 = vadd.f32 %v1727_v13, %v477_v51  ;;  %v1377_v59 = vunpack.c.l.bf16 %v1618_v47  ;;  %v1378_v60 = vunpack.c.h.bf16 %v1618_v47  ;;  %v1621_v41 = vld [vmem:[%s2282_s3 + $0xe0] sm:$0xff]  }
  0x6c   :  { %v611_v61 = vadd.f32 %v547_v54, %v277_v44  ;;  %v209_v62 = vmul.f32 %v1250_v55, %v1701_v1  ;;  %v279_v63 = vadd.f32 %v1714_v6, %v208_v56  ;;  %v1253_v0 = vunpack.c.l.bf16 %v1588_v52 }
  0x6d   :  { %v1521_v3 = vpack.c.bf16 %v674_v57, %v673_v53  ;;  %v612_v4 = vadd.f32 %v548_v58, %v278_v50  ;;  %v478_v7 = vmul.f32 %v1377_v59, %v1709_v5  ;;  %v479_v8 = vmul.f32 %v1378_v60, %v1709_v5  ;;  %v1591_v50 = vld [vmem:[%s2279_s0 + $0xe8] sm:$0xff]  }
  0x6e   :  { %v675_v10 = vmax.f32 %v611_v61, 0.0  ;;  %v280_v1 = vadd.f32 %v1714_v6, %v209_v62  ;;  %v1254_v11 = vunpack.c.h.bf16 %v1588_v52  ;;  %v210_v14 = vmul.f32 %v2158_v12, %v1253_v0 }
  0x6f   :  { %1647 = vst [vmem:[%s2285_s6 + $0xb8] sm:$0xff] %v1521_v3   ;;  %v676_v5 = vmax.f32 %v612_v4, 0.0  ;;  %v549_v15 = vadd.f32 %v1727_v13, %v478_v7  ;;  %v550_v16 = vadd.f32 %v1727_v13, %v479_v8  ;;  %v1381_v17 = vunpack.c.l.bf16 %v1619_v2  ;;  %v2179_v13 = vld [vmem:[%s2283_s4] ss:$0 sm:$0xff]  ;;  %v1592_v7 = vld [vmem:[%s2279_s0 + $0xf0] sm:$0xff]  }
  0x70   :  { %v211_v6 = vmul.f32 %v2158_v12, %v1254_v11  ;;  %v281_v19 = vadd.f32 %v2170_v18, %v210_v14  ;;  %v1382_v20 = vunpack.c.h.bf16 %v1619_v2  ;;  %v1257_v21 = vunpack.c.l.bf16 %v1589_v9 }
  0x71   :  { %v1526_v23 = vpack.c.bf16 %v676_v5, %v675_v10  ;;  %v613_v24 = vadd.f32 %v549_v15, %v279_v63  ;;  %v614_v25 = vadd.f32 %v550_v16, %v280_v1  ;;  %v480_v26 = vmul.f32 %v2179_v13, %v1381_v17  ;;  %v1622_v63 = vld [vmem:[%s2282_s3 + $0xe8] sm:$0xff]  }
  0x72   :  { %v282_v27 = vadd.f32 %v2170_v18, %v211_v6  ;;  %v481_v28 = vmul.f32 %v2179_v13, %v1382_v20  ;;  %v1258_v29 = vunpack.c.h.bf16 %v1589_v9  ;;  %v212_v30 = vmul.f32 %v2158_v12, %v1257_v21  ;;  %v1623_v20 = vld [vmem:[%s2282_s3 + $0xf0] sm:$0xff]  }
  0x73   :  { %1648 = vst [vmem:[%s2285_s6 + $0xc0] sm:$0xff] %v1526_v23   ;;  %v677_v32 = vmax.f32 %v613_v24, 0.0  ;;  %v678_v33 = vmax.f32 %v614_v25, 0.0  ;;  %v551_v35 = vadd.f32 %v2194_v34, %v480_v26  ;;  %v1385_v36 = vunpack.c.l.bf16 %v1620_v22  ;;  %v1593_v25 = vld [vmem:[%s2279_s0 + $0xf8] sm:$0xff]  }
  0x74   :  { %v552_v37 = vadd.f32 %v2194_v34, %v481_v28  ;;  %v213_v38 = vmul.f32 %v2158_v12, %v1258_v29  ;;  %v283_v39 = vadd.f32 %v2170_v18, %v212_v30  ;;  %v1386_v40 = vunpack.c.h.bf16 %v1620_v22 }
  0x75   :  { %v1531_v42 = vpack.c.bf16 %v678_v33, %v677_v32  ;;  %v615_v43 = vadd.f32 %v551_v35, %v281_v19  ;;  %v482_v44 = vmul.f32 %v2179_v13, %v1385_v36  ;;  %v1261_v45 = vunpack.c.l.bf16 %v1590_v31 }
  0x76   :  { %v616_v46 = vadd.f32 %v552_v37, %v282_v27  ;;  %v284_v47 = vadd.f32 %v2170_v18, %v213_v38  ;;  %v483_v48 = vmul.f32 %v2179_v13, %v1386_v40  ;;  %v1262_v49 = vunpack.c.h.bf16 %v1590_v31 }
  0x77   :  { %1649 = vst [vmem:[%s2285_s6 + $0xc8] sm:$0xff] %v1531_v42   ;;  %v679_v51 = vmax.f32 %v615_v43, 0.0  ;;  %v553_v52 = vadd.f32 %v2194_v34, %v482_v44  ;;  %v214_v53 = vmul.f32 %v2158_v12, %v1261_v45  ;;  %v1389_v54 = vunpack.c.l.bf16 %v1621_v41 }
  0x78   :  { %v680_v55 = vmax.f32 %v616_v46, 0.0  ;;  %v554_v56 = vadd.f32 %v2194_v34, %v483_v48  ;;  %v215_v57 = vmul.f32 %v2158_v12, %v1262_v49  ;;  %v1390_v58 = vunpack.c.h.bf16 %v1621_v41 }
  0x79   :  { %v617_v59 = vadd.f32 %v553_v52, %v283_v39  ;;  %v285_v60 = vadd.f32 %v2170_v18, %v214_v53  ;;  %v484_v61 = vmul.f32 %v2179_v13, %v1389_v54  ;;  %v1265_v62 = vunpack.c.l.bf16 %v1591_v50  ;;  %v1624_v39 = vld [vmem:[%s2282_s3 + $0xf8] sm:$0xff]  }
  0x7a   :  { %v1536_v0 = vpack.c.bf16 %v680_v55, %v679_v51  ;;  %v618_v2 = vadd.f32 %v554_v56, %v284_v47  ;;  %v286_v3 = vadd.f32 %v2170_v18, %v215_v57  ;;  %v485_v4 = vmul.f32 %v2179_v13, %v1390_v58 }
  0x7b   :  { %v681_v8 = vmax.f32 %v617_v59, 0.0  ;;  %v555_v9 = vadd.f32 %v2194_v34, %v484_v61  ;;  %v1266_v10 = vunpack.c.h.bf16 %v1591_v50  ;;  %v216_v1 = vmul.f32 %v2158_v12, %v1265_v62 }
  0x7c   :  { %1650 = vst [vmem:[%s2285_s6 + $0xd0] sm:$0xff] %v1536_v0   ;;  %v682_v11 = vmax.f32 %v618_v2, 0.0  ;;  %v556_v14 = vadd.f32 %v2194_v34, %v485_v4  ;;  %v1393_v5 = vunpack.c.l.bf16 %v1622_v63  ;;  %v1394_v15 = vunpack.c.h.bf16 %v1622_v63 }
  0x7d   :  { %v619_v16 = vadd.f32 %v555_v9, %v285_v60  ;;  %v217_v17 = vmul.f32 %v2158_v12, %v1266_v10  ;;  %v287_v6 = vadd.f32 %v2170_v18, %v216_v1  ;;  %v1269_v19 = vunpack.c.l.bf16 %v1592_v7 }
  0x7e   :  { %v1541_v21 = vpack.c.bf16 %v682_v11, %v681_v8  ;;  %v620_v22 = vadd.f32 %v556_v14, %v286_v3  ;;  %v486_v23 = vmul.f32 %v2179_v13, %v1393_v5  ;;  %v487_v24 = vmul.f32 %v2179_v13, %v1394_v15 }
  0x7f   :  { %v683_v26 = vmax.f32 %v619_v16, 0.0  ;;  %v288_v27 = vadd.f32 %v2170_v18, %v217_v17  ;;  %v1270_v28 = vunpack.c.h.bf16 %v1592_v7  ;;  %v218_v29 = vmul.f32 %v2158_v12, %v1269_v19 }
  0x80   :  { %1651 = vst [vmem:[%s2285_s6 + $0xd8] sm:$0xff] %v1541_v21   ;;  %v684_v30 = vmax.f32 %v620_v22, 0.0  ;;  %v557_v31 = vadd.f32 %v2194_v34, %v486_v23  ;;  %v558_v32 = vadd.f32 %v2194_v34, %v487_v24  ;;  %v1397_v33 = vunpack.c.l.bf16 %v1623_v20 }
  0x81   :  { %v219_v35 = vmul.f32 %v2158_v12, %v1270_v28  ;;  %v289_v36 = vadd.f32 %v2170_v18, %v218_v29  ;;  %v1398_v37 = vunpack.c.h.bf16 %v1623_v20  ;;  %v1273_v38 = vunpack.c.l.bf16 %v1593_v25 }
  0x82   :  { %v1546_v40 = vpack.c.bf16 %v684_v30, %v683_v26  ;;  %v621_v41 = vadd.f32 %v557_v31, %v287_v6  ;;  %v622_v42 = vadd.f32 %v558_v32, %v288_v27  ;;  %v488_v43 = vmul.f32 %v2179_v13, %v1397_v33 }
  0x83   :  { %v290_v44 = vadd.f32 %v2170_v18, %v219_v35  ;;  %v489_v45 = vmul.f32 %v2179_v13, %v1398_v37  ;;  %v1274_v46 = vunpack.c.h.bf16 %v1593_v25  ;;  %v220_v47 = vmul.f32 %v2158_v12, %v1273_v38 }
  0x84   :  { %1652 = vst [vmem:[%s2285_s6 + $0xe0] sm:$0xff] %v1546_v40   ;;  %v685_v48 = vmax.f32 %v621_v41, 0.0  ;;  %v686_v49 = vmax.f32 %v622_v42, 0.0  ;;  %v559_v50 = vadd.f32 %v2194_v34, %v488_v43  ;;  %v1401_v51 = vunpack.c.l.bf16 %v1624_v39 }
  0x85   :  { %v560_v52 = vadd.f32 %v2194_v34, %v489_v45  ;;  %v221_v53 = vmul.f32 %v2158_v12, %v1274_v46  ;;  %v1402_v54 = vunpack.c.h.bf16 %v1624_v39  ;;  %v291_v57 = vadd.f32 %v2170_v18, %v220_v47 }
  0x86   :  { %v1551_v55 = vpack.c.bf16 %v686_v49, %v685_v48  ;;  %v623_v56 = vadd.f32 %v559_v50, %v289_v36  ;;  %v490_v58 = vmul.f32 %v2179_v13, %v1401_v51 }
  0x87   :  { %v624_v59 = vadd.f32 %v560_v52, %v290_v44  ;;  %v292_v60 = vadd.f32 %v2170_v18, %v221_v53  ;;  %v491_v61 = vmul.f32 %v2179_v13, %v1402_v54 }
  0x88   :  { %1653 = vst [vmem:[%s2285_s6 + $0xe8] sm:$0xff] %v1551_v55   ;;  %v687_v62 = vmax.f32 %v623_v56, 0.0  ;;  %v561_v63 = vadd.f32 %v2194_v34, %v490_v58 }
  0x89   :  { %v688_v12 = vmax.f32 %v624_v59, 0.0  ;;  %v562_v0 = vadd.f32 %v2194_v34, %v491_v61 }
  0x8a   :  { %v625_v2 = vadd.f32 %v561_v63, %v291_v57 }
  0x8b   :  { %v1556_v3 = vpack.c.bf16 %v688_v12, %v687_v62  ;;  %v626_v4 = vadd.f32 %v562_v0, %v292_v60 }
  0x8c   :  { %v689_v7 = vmax.f32 %v625_v2, 0.0 }
  0x8d   :  { %1654 = vst [vmem:[%s2285_s6 + $0xf0] sm:$0xff] %v1556_v3   ;;  %v690_v18 = vmax.f32 %v626_v4, 0.0 }
  0x8f   :  { %v1561_v13 = vpack.c.bf16 %v690_v18, %v689_v7 }
  0x91   :  { %1655 = vst [vmem:[%s2285_s6 + $0xf8] sm:$0xff] %v1561_v13  }

// kernel: bottleneck_block_forward.6
= control target key start
LH: loop header
LB: loop body
LE: loop exit
PB: predicated region body
PF: predicated region fallthrough
CT: control target
= control target key end

     0   :  { %s4636_s3 = inlined_call_operand.vmem [shape: bf16[128,128], index: 3, kind: input, shape index: {}]   ;;  %s4637_s5 = inlined_call_operand.vmem [shape: bf16[128,128], index: 5, kind: input, shape index: {}]   ;;  %s4638_s0 = inlined_call_operand.vmem [shape: bf16[512,128], index: 0, kind: input, shape index: {}]   ;;  %s4639_s1 = inlined_call_operand.vmem [shape: f32[1,128], index: 1, kind: input, shape index: {}]   ;;  %s4640_s2 = inlined_call_operand.vmem [shape: f32[1,128], index: 2, kind: input, shape index: {}]   ;;  %s4641_s4 = inlined_call_operand.vmem [shape: bf16[512,128], index: 4, kind: input, shape index: {}]   ;;  %s4642_s7 = inlined_call_operand.vmem [shape: f32[1,128], index: 7, kind: output, shape index: {1}]   ;;  %s4643_s8 = inlined_call_operand.vmem [shape: f32[1,128], index: 8, kind: output, shape index: {2}]   ;;  %s4644_s6 = inlined_call_operand.vmem [shape: bf16[512,128], index: 6, kind: output, shape index: {0}]   ;;  %s4645_s9 = inlined_call_operand.vmem [shape: bf16[512,128], index: 9, kind: output, shape index: {3}]   ;;  %s4646_s10 = inlined_call_operand.vmem [shape: f32[1,128], index: 10, kind: output, shape index: {4}]   ;;  %s4647_s11 = inlined_call_operand.vmem [shape: f32[1,128], index: 11, kind: output, shape index: {5}]  }
   0x1   :  { %v3921_v0 = vld [vmem:[%s4636_s3] sm:$0xff]   ;;  %v3923_v2 = vld [vmem:[%s4636_s3 + $0x8] sm:$0xff]   ;;  %v3925_v4 = vld [vmem:[%s4636_s3 + $0x10] sm:$0xff]  }
   0x2   :  { %v3922_v1 = vld [vmem:[%s4637_s5] sm:$0xff]   ;;  %3760 = vmatprep.subr.bf16.mxu0 %v3921_v0  ;;  %v3924_v3 = vld [vmem:[%s4637_s5 + $0x8] sm:$0xff]   ;;  %v3926_v5 = vld [vmem:[%s4637_s5 + $0x10] sm:$0xff]  }
   0x3   :  { %3840 = vmatprep.subr.bf16.mxu1 %v3922_v1  ;;  %3761 = vmatpush3.bf16.msra.mxu0 %v3921_v0  ;;  %v3927_v6 = vld [vmem:[%s4636_s3 + $0x18] sm:$0xff]   ;;  %v3929_v8 = vld [vmem:[%s4636_s3 + $0x20] sm:$0xff]   ;;  %v3931_v10 = vld [vmem:[%s4636_s3 + $0x28] sm:$0xff]  }
   0x4   :  { %3841 = vmatpush3.bf16.msra.mxu1 %v3922_v1  ;;  %3762 = vmatprep.subr.bf16.mxu0 %v3923_v2  ;;  %v3928_v7 = vld [vmem:[%s4637_s5 + $0x18] sm:$0xff]   ;;  %v3930_v9 = vld [vmem:[%s4637_s5 + $0x20] sm:$0xff]   ;;  %v3932_v11 = vld [vmem:[%s4637_s5 + $0x28] sm:$0xff]  }
   0x5   :  { %3842 = vmatprep.subr.bf16.mxu1 %v3924_v3  ;;  %v3140_v12 = vld [vmem:[%s4638_s0] sm:$0xff]   ;;  %v3587_v18 = vld [vmem:[%s4638_s0 + $0x8] sm:$0xff]   ;;  %v3588_v23 = vld [vmem:[%s4638_s0 + $0x10] sm:$0xff]  }
   0x6   :  { %v4072_v13 = vld [vmem:[%s4639_s1] ss:$0 sm:$0xff]  ;;  %v3141_v15 = vunpack.c.l.bf16 %v3140_v12  ;;  %v3142_v16 = vunpack.c.h.bf16 %v3140_v12  ;;  %v3145_v21 = vunpack.c.l.bf16 %v3587_v18  ;;  %v3146_v22 = vunpack.c.h.bf16 %v3587_v18  ;;  %v3933_v24 = vld [vmem:[%s4636_s3 + $0x30] sm:$0xff]   ;;  %v3589_v27 = vld [vmem:[%s4638_s0 + $0x18] sm:$0xff]  }
   0x7   :  { %3763 = vmatpush3.bf16.msra.mxu0 %v3923_v2  ;;  %v4077_v14 = vld [vmem:[%s4640_s2] ss:$0 sm:$0xff]  ;;  %v3149_v25 = vunpack.c.l.bf16 %v3588_v23  ;;  %v3150_v26 = vunpack.c.h.bf16 %v3588_v23  ;;  %v3934_v28 = vld [vmem:[%s4637_s5 + $0x30] sm:$0xff]   ;;  %v3153_v35 = vunpack.c.l.bf16 %v3589_v27  ;;  %v3154_v36 = vunpack.c.h.bf16 %v3589_v27  ;;  %v3935_v42 = vld [vmem:[%s4636_s3 + $0x38] sm:$0xff]  }
   0x8   :  { %3843 = vmatpush3.bf16.msra.mxu1 %v3924_v3  ;;  %3764 = vmatprep.subr.bf16.mxu0 %v3925_v4  ;;  %v3937_v17 = vld [vmem:[%s4641_s4] sm:$0xff]   ;;  %v173_v19 = vmul.f32 %v3141_v15, %v4072_v13  ;;  %v174_v20 = vmul.f32 %v3142_v16, %v4072_v13  ;;  %v175_v31 = vmul.f32 %v3145_v21, %v4072_v13  ;;  %v3936_v43 = vld [vmem:[%s4637_s5 + $0x38] sm:$0xff]   ;;  %v3591_v55 = vld [vmem:[%s4638_s0 + $0x28] sm:$0xff]  }
   0x9   :  { %3844 = vmatprep.subr.bf16.mxu1 %v3926_v5  ;;  %3856 = vmatprep.mubr.bf16.mxu1 %v3937_v17  ;;  %v176_v32 = vmul.f32 %v3146_v22, %v4072_v13  ;;  %v177_v33 = vmul.f32 %v3149_v25, %v4072_v13  ;;  %v178_v34 = vmul.f32 %v3150_v26, %v4072_v13  ;;  %v3590_v37 = vld [vmem:[%s4638_s0 + $0x20] sm:$0xff]   ;;  %v3592_v58 = vld [vmem:[%s4638_s0 + $0x30] sm:$0xff]   ;;  %v3161_v60 = vunpack.c.l.bf16 %v3591_v55  ;;  %v3938_v1 = vld [vmem:[%s4641_s4 + $0x8] sm:$0xff]  }
   0xa   :  { %v244_v29 = vadd.f32 %v4077_v14, %v173_v19  ;;  %v245_v30 = vadd.f32 %v4077_v14, %v174_v20  ;;  %v246_v40 = vadd.f32 %v4077_v14, %v175_v31  ;;  %v3157_v46 = vunpack.c.l.bf16 %v3590_v37  ;;  %v3594_v18 = vld [vmem:[%s4638_s0 + $0x40] sm:$0xff]   ;;  %v3940_v25 = vld [vmem:[%s4641_s4 + $0x18] sm:$0xff]  }
   0xb   :  { %3765 = vmatpush3.bf16.msra.mxu0 %v3925_v4  ;;  %v247_v41 = vadd.f32 %v4077_v14, %v176_v32  ;;  %v248_v44 = vadd.f32 %v4077_v14, %v177_v33  ;;  %v249_v45 = vadd.f32 %v4077_v14, %v178_v34  ;;  %v179_v50 = vmul.f32 %v3153_v35, %v4072_v13 }
   0xc   :  { %3845 = vmatpush3.bf16.msra.mxu1 %v3926_v5  ;;  %3766 = vmatprep.subr.bf16.mxu0 %v3927_v6  ;;  %v308_v38 = vmax.f32 %v244_v29, 0.0  ;;  %v309_v39 = vmax.f32 %v245_v30, 0.0  ;;  %v310_v48 = vmax.f32 %v246_v40, 0.0  ;;  %v180_v53 = vmul.f32 %v3154_v36, %v4072_v13  ;;  %v3941_v30 = vld [vmem:[%s4641_s4 + $0x20] sm:$0xff]   ;;  %v3595_v36 = vld [vmem:[%s4638_s0 + $0x48] sm:$0xff]   ;;  %v3596_v40 = vld [vmem:[%s4638_s0 + $0x50] sm:$0xff]  }
   0xd   :  { %3846 = vmatprep.subr.bf16.mxu1 %v3928_v7  ;;  %v311_v49 = vmax.f32 %v247_v41, 0.0  ;;  %v312_v51 = vmax.f32 %v248_v44, 0.0  ;;  %v313_v52 = vmax.f32 %v249_v45, 0.0  ;;  %v3158_v54 = vunpack.c.h.bf16 %v3590_v37 }
   0xe   :  { %v759_v47 = vpack.c.bf16 %v309_v39, %v308_v38  ;;  %v181_v56 = vmul.f32 %v3157_v46, %v4072_v13  ;;  %v250_v59 = vadd.f32 %v4077_v14, %v179_v50  ;;  %v251_v63 = vadd.f32 %v4077_v14, %v180_v53 }
   0xf   :  { %3767 = vmatpush3.bf16.msra.mxu0 %v3927_v6  ;;  %v182_v57 = vmul.f32 %v3158_v54, %v4072_v13  ;;  %v760_v61 = vpack.c.bf16 %v311_v49, %v310_v48  ;;  %v761_v62 = vpack.c.bf16 %v313_v52, %v312_v51  ;;  %v3162_v0 = vunpack.c.h.bf16 %v3591_v55  ;;  %v3939_v6 = vld [vmem:[%s4641_s4 + $0x10] sm:$0xff]  }
  0x10   :  { %3847 = vmatpush3.bf16.msra.mxu1 %v3928_v7  ;;  %3768 = vmatprep.subr.bf16.mxu0 %v3929_v8  ;;  %v252_v2 = vadd.f32 %v4077_v14, %v181_v56  ;;  %v3165_v4 = vunpack.c.l.bf16 %v3592_v58  ;;  %v3166_v5 = vunpack.c.h.bf16 %v3592_v58  ;;  %v183_v7 = vmul.f32 %v3161_v60, %v4072_v13  ;;  %v3943_v52 = vld [vmem:[%s4641_s4 + $0x30] sm:$0xff]  }
  0x11   :  { %3848 = vmatprep.subr.bf16.mxu1 %v3930_v9  ;;  %3776 = vmatprep.mubr.bf16.mxu0 %v759_v47  ;;  %v253_v3 = vadd.f32 %v4077_v14, %v182_v57  ;;  %v3174_v29 = vunpack.c.h.bf16 %v3594_v18  ;;  %v3177_v41 = vunpack.c.l.bf16 %v3595_v36  ;;  %v3942_v47 = vld [vmem:[%s4641_s4 + $0x28] sm:$0xff]   ;;  %v3181_v50 = vunpack.c.l.bf16 %v3596_v40  ;;  %v3597_v57 = vld [vmem:[%s4638_s0 + $0x58] sm:$0xff]  }
  0x12   :  { %v316_v12 = vmax.f32 %v252_v2, 0.0  ;;  %v185_v16 = vmul.f32 %v3165_v4, %v4072_v13  ;;  %v186_v17 = vmul.f32 %v3166_v5, %v4072_v13  ;;  %v254_v19 = vadd.f32 %v4077_v14, %v183_v7  ;;  %v3944_v5 = vld [vmem:[%s4641_s4 + $0x38] sm:$0xff]  }
  0x13   :  { %3769 = vmatpush3.bf16.msra.mxu0 %v3929_v8  ;;  %v314_v8 = vmax.f32 %v250_v59, 0.0  ;;  %v317_v15 = vmax.f32 %v253_v3, 0.0  ;;  %v190_v39 = vmul.f32 %v3174_v29, %v4072_v13  ;;  %v3182_v51 = vunpack.c.h.bf16 %v3596_v40  ;;  %v3946_v29 = vld [vmem:[%s4641_s4 + $0x48] sm:$0xff]  }
  0x14   :  { %3849 = vmatpush3.bf16.msra.mxu1 %v3930_v9  ;;  %3770 = vmatprep.subr.bf16.mxu0 %v3931_v10  ;;  %v315_v9 = vmax.f32 %v251_v63, 0.0  ;;  %v256_v27 = vadd.f32 %v4077_v14, %v185_v16  ;;  %v318_v31 = vmax.f32 %v254_v19, 0.0  ;;  %v191_v53 = vmul.f32 %v3177_v41, %v4072_v13 }
  0x15   :  { %3850 = vmatprep.subr.bf16.mxu1 %v3932_v11  ;;  %v763_v26 = vpack.c.bf16 %v317_v15, %v316_v12  ;;  %v261_v49 = vadd.f32 %v4077_v14, %v190_v39  ;;  %v193_v60 = vmul.f32 %v3181_v50, %v4072_v13  ;;  %v3186_v3 = vunpack.c.h.bf16 %v3597_v57  ;;  %v3601_v39 = vld [vmem:[%s4638_s0 + $0x78] sm:$0xff]  }
  0x16   :  { %v762_v21 = vpack.c.bf16 %v315_v9, %v314_v8  ;;  %v320_v37 = vmax.f32 %v256_v27, 0.0  ;;  %v262_v63 = vadd.f32 %v4077_v14, %v191_v53 }
  0x17   :  { %3771 = vmatpush3.bf16.msra.mxu0 %v3931_v10  ;;  %v184_v10 = vmul.f32 %v3162_v0, %v4072_v13  ;;  %v325_v59 = vmax.f32 %v261_v49, 0.0  ;;  %v264_v7 = vadd.f32 %v4077_v14, %v193_v60  ;;  %v196_v16 = vmul.f32 %v3186_v3, %v4072_v13 }
  0x18   :  { %3851 = vmatpush3.bf16.msra.mxu1 %v3932_v11  ;;  %3772 = vmatprep.subr.bf16.mxu0 %v3933_v24  ;;  %v3593_v11 = vld [vmem:[%s4638_s0 + $0x38] sm:$0xff]  }
  0x19   :  { %3852 = vmatprep.subr.bf16.mxu1 %v3934_v28  ;;  %v3169_v20 = vunpack.c.l.bf16 %v3593_v11  ;;  %v255_v22 = vadd.f32 %v4077_v14, %v184_v10  ;;  %v3170_v23 = vunpack.c.h.bf16 %v3593_v11  ;;  %v3945_v10 = vld [vmem:[%s4641_s4 + $0x40] sm:$0xff]   ;;  %v326_v11 = vmax.f32 %v262_v63, 0.0 }
  0x1b   :  { %3773 = vmatpush3.bf16.msra.mxu0 %v3933_v24  ;;  %v3173_v24 = vunpack.c.l.bf16 %v3594_v18  ;;  %v319_v32 = vmax.f32 %v255_v22, 0.0  ;;  %v187_v33 = vmul.f32 %v3169_v20, %v4072_v13  ;;  %v188_v34 = vmul.f32 %v3170_v23, %v4072_v13  ;;  %v3600_v22 = vld [vmem:[%s4638_s0 + $0x70] sm:$0xff]  }
  0x1c   :  { %3853 = vmatpush3.bf16.msra.mxu1 %v3934_v28  ;;  %3774 = vmatprep.subr.bf16.mxu0 %v3935_v42  ;;  %v257_v28 = vadd.f32 %v4077_v14, %v186_v17  ;;  %v328_v18 = vmax.f32 %v264_v7, 0.0 }
  0x1d   :  { %3854 = vmatprep.subr.bf16.mxu1 %v3936_v43  ;;  %v189_v35 = vmul.f32 %v3173_v24, %v4072_v13  ;;  %v258_v44 = vadd.f32 %v4077_v14, %v187_v33  ;;  %v259_v45 = vadd.f32 %v4077_v14, %v188_v34  ;;  %v3198_v33 = vunpack.c.h.bf16 %v3600_v22  ;;  %v3947_v34 = vld [vmem:[%s4641_s4 + $0x50] sm:$0xff]  }
  0x1e   :  { %v321_v38 = vmax.f32 %v257_v28, 0.0 }
  0x1f   :  { %3775 = vmatpush3.bf16.msra.mxu0 %v3935_v42  ;;  %v3178_v42 = vunpack.c.h.bf16 %v3595_v36  ;;  %v260_v46 = vadd.f32 %v4077_v14, %v189_v35  ;;  %v322_v55 = vmax.f32 %v258_v44, 0.0  ;;  %v323_v56 = vmax.f32 %v259_v45, 0.0  ;;  %v3602_v44 = vld [vmem:[%s4638_s0 + $0x80] sm:$0xff]  }
  0x20   :  { %3855 = vmatpush3.bf16.msra.mxu1 %v3936_v43  ;;  %v764_v43 = vpack.c.bf16 %v319_v32, %v318_v31  ;;  %v765_v48 = vpack.c.bf16 %v321_v38, %v320_v37  ;;  %v3197_v32 = vunpack.c.l.bf16 %v3600_v22  ;;  %v3201_v45 = vunpack.c.l.bf16 %v3601_v39 }
  0x21   :  { %v192_v54 = vmul.f32 %v3178_v42, %v4072_v13  ;;  %v324_v58 = vmax.f32 %v260_v46, 0.0  ;;  %v766_v2 = vpack.c.bf16 %v323_v56, %v322_v55  ;;  %v3202_v46 = vunpack.c.h.bf16 %v3601_v39  ;;  %v3949_v56 = vld [vmem:[%s4641_s4 + $0x60] sm:$0xff]  }
  0x22   :  { %3777 = vmatmul.mubr.bf16.vlgmr.msra.gmra.mrb[0].mxu0 %v760_v61  ;;  %v194_v61 = vmul.f32 %v3182_v51, %v4072_v13  ;;  %v201_v42 = vmul.f32 %v3197_v32, %v4072_v13  ;;  %v3205_v50 = vunpack.c.l.bf16 %v3602_v44  ;;  %v3948_v51 = vld [vmem:[%s4641_s4 + $0x58] sm:$0xff]   ;;  %v3206_v55 = vunpack.c.h.bf16 %v3602_v44  ;;  %v3607_v44 = vld [vmem:[%s4638_s0 + $0xa8] sm:$0xff]  }
  0x23   :  { %3857 = vmatmul.mubr.bf16.vlgmr.msra.gmra.mrb[0].mxu1 %v3938_v1  ;;  %3780 = vmatprep.mubr.bf16.mxu0 %v761_v62  ;;  %v3598_v62 = vld [vmem:[%s4638_s0 + $0x60] sm:$0xff]   ;;  %v263_v0 = vadd.f32 %v4077_v14, %v192_v54  ;;  %v3185_v1 = vunpack.c.l.bf16 %v3597_v57  ;;  %v203_v57 = vmul.f32 %v3201_v45, %v4072_v13 }
  0x24   :  { %3860 = vmatprep.mubr.bf16.mxu1 %v3939_v6  ;;  %v3189_v4 = vunpack.c.l.bf16 %v3598_v62  ;;  %v767_v6 = vpack.c.bf16 %v325_v59, %v324_v58  ;;  %v265_v8 = vadd.f32 %v4077_v14, %v194_v61  ;;  %v3190_v9 = vunpack.c.h.bf16 %v3598_v62  ;;  %v3603_v62 = vld [vmem:[%s4638_s0 + $0x88] sm:$0xff]  }
  0x25   :  { %v327_v12 = vmax.f32 %v263_v0, 0.0  ;;  %v195_v15 = vmul.f32 %v3185_v1, %v4072_v13  ;;  %v272_v53 = vadd.f32 %v4077_v14, %v201_v42  ;;  %v204_v58 = vmul.f32 %v3202_v46, %v4072_v13 }
  0x26   :  { %v197_v17 = vmul.f32 %v3189_v4, %v4072_v13  ;;  %v329_v19 = vmax.f32 %v265_v8, 0.0  ;;  %v198_v20 = vmul.f32 %v3190_v9, %v4072_v13  ;;  %v205_v61 = vmul.f32 %v3205_v50, %v4072_v13  ;;  %v3950_v9 = vld [vmem:[%s4641_s4 + $0x68] sm:$0xff]  }
  0x27   :  { %v768_v23 = vpack.c.bf16 %v327_v12, %v326_v11  ;;  %v266_v24 = vadd.f32 %v4077_v14, %v195_v15  ;;  %v336_v63 = vmax.f32 %v272_v53, 0.0  ;;  %v206_v1 = vmul.f32 %v3206_v55, %v4072_v13  ;;  %v3954_v55 = vld [vmem:[%s4641_s4 + $0x88] sm:$0xff]  }
  0x28   :  { %v269_v31 = vadd.f32 %v4077_v14, %v198_v20  ;;  %v274_v3 = vadd.f32 %v4077_v14, %v203_v57  ;;  %v275_v4 = vadd.f32 %v4077_v14, %v204_v58  ;;  %v276_v7 = vadd.f32 %v4077_v14, %v205_v61 }
  0x29   :  { %v330_v35 = vmax.f32 %v266_v24, 0.0  ;;  %v3210_v8 = vunpack.c.h.bf16 %v3603_v62  ;;  %v277_v11 = vadd.f32 %v4077_v14, %v206_v1  ;;  %v3226_v50 = vunpack.c.h.bf16 %v3607_v44  ;;  %v3609_v1 = vld [vmem:[%s4638_s0 + $0xb8] sm:$0xff]  }
  0x2a   :  { %3781 = vmatmul.mubr.bf16.gmra.mrb[4].mxu0 %v762_v21  ;;  %v3599_v21 = vld [vmem:[%s4638_s0 + $0x68] sm:$0xff]   ;;  %v333_v41 = vmax.f32 %v269_v31, 0.0 }
  0x2b   :  { %3861 = vmatmul.mubr.bf16.gmra.mrb[4].mxu1 %v3940_v25  ;;  %3784 = vmatprep.mubr.bf16.mxu0 %v763_v26  ;;  %v267_v25 = vadd.f32 %v4077_v14, %v196_v16  ;;  %v268_v26 = vadd.f32 %v4077_v14, %v197_v17  ;;  %v3193_v27 = vunpack.c.l.bf16 %v3599_v21  ;;  %v3194_v28 = vunpack.c.h.bf16 %v3599_v21  ;;  %v3951_v16 = vld [vmem:[%s4641_s4 + $0x70] sm:$0xff]  }
  0x2c   :  { %3864 = vmatprep.mubr.bf16.mxu1 %v3941_v30  ;;  %v769_v30 = vpack.c.bf16 %v329_v19, %v328_v18  ;;  %v338_v17 = vmax.f32 %v274_v3, 0.0  ;;  %v339_v18 = vmax.f32 %v275_v4, 0.0  ;;  %v208_v20 = vmul.f32 %v3210_v8, %v4072_v13 }
  0x2d   :  { %v331_v36 = vmax.f32 %v267_v25, 0.0  ;;  %v199_v37 = vmul.f32 %v3193_v27, %v4072_v13  ;;  %v200_v38 = vmul.f32 %v3194_v28, %v4072_v13  ;;  %v332_v40 = vmax.f32 %v268_v26, 0.0  ;;  %v3605_v25 = vld [vmem:[%s4638_s0 + $0x98] sm:$0xff]   ;;  %v3606_v26 = vld [vmem:[%s4638_s0 + $0xa0] sm:$0xff]  }
  0x2e   :  { %v340_v21 = vmax.f32 %v276_v7, 0.0  ;;  %v341_v22 = vmax.f32 %v277_v11, 0.0  ;;  %v774_v27 = vpack.c.bf16 %v339_v18, %v338_v17  ;;  %v3218_v31 = vunpack.c.h.bf16 %v3605_v25 }
  0x2f   :  { %v271_v49 = vadd.f32 %v4077_v14, %v200_v38  ;;  %v3221_v32 = vunpack.c.l.bf16 %v3606_v26  ;;  %v3953_v38 = vld [vmem:[%s4641_s4 + $0x80] sm:$0xff]   ;;  %v3234_v11 = vunpack.c.h.bf16 %v3609_v1 }
  0x30   :  { %v212_v42 = vmul.f32 %v3218_v31, %v4072_v13 }
  0x31   :  { %v335_v60 = vmax.f32 %v271_v49, 0.0  ;;  %v3225_v49 = vunpack.c.l.bf16 %v3607_v44 }
  0x32   :  { %3785 = vmatmul.mubr.bf16.gmra.mrb[8].mxu0 %v764_v43  ;;  %v202_v43 = vmul.f32 %v3198_v33, %v4072_v13  ;;  %v3952_v33 = vld [vmem:[%s4641_s4 + $0x78] sm:$0xff]   ;;  %v283_v53 = vadd.f32 %v4077_v14, %v212_v42  ;;  %v3959_v42 = vld [vmem:[%s4641_s4 + $0xb0] sm:$0xff]  }
  0x33   :  { %3865 = vmatmul.mubr.bf16.gmra.mrb[8].mxu1 %v3942_v47  ;;  %3788 = vmatprep.mubr.bf16.mxu0 %v765_v48  ;;  %v770_v47 = vpack.c.bf16 %v331_v36, %v330_v35  ;;  %v270_v48 = vadd.f32 %v4077_v14, %v199_v37  ;;  %v3222_v37 = vunpack.c.h.bf16 %v3606_v26  ;;  %v215_v61 = vmul.f32 %v3225_v49, %v4072_v13 }
  0x34   :  { %3868 = vmatprep.mubr.bf16.mxu1 %v3943_v52  ;;  %v771_v52 = vpack.c.bf16 %v333_v41, %v332_v40  ;;  %v273_v54 = vadd.f32 %v4077_v14, %v202_v43  ;;  %v213_v43 = vmul.f32 %v3221_v32, %v4072_v13 }
  0x35   :  { %v334_v59 = vmax.f32 %v270_v48, 0.0  ;;  %v3608_v48 = vld [vmem:[%s4638_s0 + $0xb0] sm:$0xff]   ;;  %v286_v7 = vadd.f32 %v4077_v14, %v215_v61 }
  0x36   :  { %v337_v0 = vmax.f32 %v273_v54, 0.0  ;;  %v284_v54 = vadd.f32 %v4077_v14, %v213_v43  ;;  %v3229_v58 = vunpack.c.l.bf16 %v3608_v48 }
  0x38   :  { %v217_v4 = vmul.f32 %v3229_v58, %v4072_v13 }
  0x3a   :  { %3789 = vmatmul.mubr.bf16.gmra.mrb[12].mxu0 %v766_v2  ;;  %v3604_v2 = vld [vmem:[%s4638_s0 + $0x90] sm:$0xff]   ;;  %v288_v17 = vadd.f32 %v4077_v14, %v217_v4 }
  0x3b   :  { %3869 = vmatmul.mubr.bf16.gmra.mrb[12].mxu1 %v3944_v5  ;;  %3792 = vmatprep.mubr.bf16.mxu0 %v767_v6  ;;  %v3209_v5 = vunpack.c.l.bf16 %v3603_v62  ;;  %v772_v6 = vpack.c.bf16 %v335_v60, %v334_v59  ;;  %v3213_v12 = vunpack.c.l.bf16 %v3604_v2  ;;  %v3214_v15 = vunpack.c.h.bf16 %v3604_v2  ;;  %v3955_v60 = vld [vmem:[%s4641_s4 + $0x90] sm:$0xff]  }
  0x3c   :  { %3872 = vmatprep.mubr.bf16.mxu1 %v3945_v10  ;;  %v773_v10 = vpack.c.bf16 %v337_v0, %v336_v63  ;;  %v3230_v59 = vunpack.c.h.bf16 %v3608_v48  ;;  %v216_v62 = vmul.f32 %v3226_v50, %v4072_v13  ;;  %v347_v0 = vmax.f32 %v283_v53, 0.0 }
  0x3d   :  { %v207_v19 = vmul.f32 %v3209_v5, %v4072_v13  ;;  %v210_v24 = vmul.f32 %v3214_v15, %v4072_v13  ;;  %v348_v2 = vmax.f32 %v284_v54, 0.0  ;;  %v3956_v15 = vld [vmem:[%s4641_s4 + $0x98] sm:$0xff]   ;;  %v352_v26 = vmax.f32 %v288_v17, 0.0 }
  0x3e   :  { %v218_v5 = vmul.f32 %v3230_v59, %v4072_v13  ;;  %v287_v8 = vadd.f32 %v4077_v14, %v216_v62  ;;  %v3960_v59 = vld [vmem:[%s4641_s4 + $0xb8] sm:$0xff]  }
  0x3f   :  { %v278_v28 = vadd.f32 %v4077_v14, %v207_v19  ;;  %v281_v36 = vadd.f32 %v4077_v14, %v210_v24  ;;  %v220_v24 = vmul.f32 %v3234_v11, %v4072_v13 }
  0x40   :  { %v289_v18 = vadd.f32 %v4077_v14, %v218_v5 }
  0x41   :  { %v342_v39 = vmax.f32 %v278_v28, 0.0  ;;  %v345_v46 = vmax.f32 %v281_v36, 0.0 }
  0x42   :  { %3793 = vmatmul.mubr.bf16.gmra.mrb[16].mxu0 %v768_v23  ;;  %v209_v23 = vmul.f32 %v3213_v12, %v4072_v13 }
  0x43   :  { %3873 = vmatmul.mubr.bf16.gmra.mrb[16].mxu1 %v3946_v29  ;;  %3796 = vmatprep.mubr.bf16.mxu0 %v769_v30  ;;  %v279_v29 = vadd.f32 %v4077_v14, %v208_v20  ;;  %v3217_v30 = vunpack.c.l.bf16 %v3605_v25  ;;  %v3957_v20 = vld [vmem:[%s4641_s4 + $0xa0] sm:$0xff]  }
  0x44   :  { %3876 = vmatprep.mubr.bf16.mxu1 %v3947_v34  ;;  %v775_v34 = vpack.c.bf16 %v341_v22, %v340_v21  ;;  %v280_v35 = vadd.f32 %v4077_v14, %v209_v23  ;;  %v350_v21 = vmax.f32 %v286_v7, 0.0  ;;  %v351_v22 = vmax.f32 %v287_v8, 0.0 }
  0x45   :  { %v343_v40 = vmax.f32 %v279_v29, 0.0  ;;  %v211_v41 = vmul.f32 %v3217_v30, %v4072_v13  ;;  %v3611_v29 = vld [vmem:[%s4638_s0 + $0xc8] sm:$0xff]   ;;  %v3612_v30 = vld [vmem:[%s4638_s0 + $0xd0] sm:$0xff]  }
  0x46   :  { %v344_v45 = vmax.f32 %v280_v35, 0.0  ;;  %v780_v31 = vpack.c.bf16 %v351_v22, %v350_v21  ;;  %v3241_v35 = vunpack.c.l.bf16 %v3611_v29  ;;  %v3242_v36 = vunpack.c.h.bf16 %v3611_v29 }
  0x4a   :  { %3797 = vmatmul.mubr.bf16.gmra.mrb[20].mxu0 %v770_v47  ;;  %v214_v47 = vmul.f32 %v3222_v37, %v4072_v13  ;;  %v3958_v37 = vld [vmem:[%s4641_s4 + $0xa8] sm:$0xff]  }
  0x4b   :  { %3877 = vmatmul.mubr.bf16.gmra.mrb[20].mxu1 %v3948_v51  ;;  %3800 = vmatprep.mubr.bf16.mxu0 %v771_v52  ;;  %v776_v51 = vpack.c.bf16 %v343_v40, %v342_v39  ;;  %v282_v52 = vadd.f32 %v4077_v14, %v211_v41  ;;  %v3245_v40 = vunpack.c.l.bf16 %v3612_v30  ;;  %v3246_v41 = vunpack.c.h.bf16 %v3612_v30 }
  0x4c   :  { %3880 = vmatprep.mubr.bf16.mxu1 %v3949_v56  ;;  %v777_v56 = vpack.c.bf16 %v345_v46, %v344_v45  ;;  %v285_v57 = vadd.f32 %v4077_v14, %v214_v47  ;;  %v223_v45 = vmul.f32 %v3241_v35, %v4072_v13  ;;  %v224_v46 = vmul.f32 %v3242_v36, %v4072_v13  ;;  %v3613_v47 = vld [vmem:[%s4638_s0 + $0xd8] sm:$0xff]  }
  0x4d   :  { %v346_v63 = vmax.f32 %v282_v52, 0.0  ;;  %v225_v50 = vmul.f32 %v3245_v40, %v4072_v13  ;;  %v3614_v52 = vld [vmem:[%s4638_s0 + $0xe0] sm:$0xff]   ;;  %v3249_v53 = vunpack.c.l.bf16 %v3613_v47  ;;  %v3250_v54 = vunpack.c.h.bf16 %v3613_v47 }
  0x4e   :  { %v349_v3 = vmax.f32 %v285_v57, 0.0  ;;  %v295_v57 = vadd.f32 %v4077_v14, %v224_v46  ;;  %v3253_v58 = vunpack.c.l.bf16 %v3614_v52 }
  0x4f   :  { %v296_v61 = vadd.f32 %v4077_v14, %v225_v50 }
  0x50   :  { %v359_v4 = vmax.f32 %v295_v57, 0.0  ;;  %v229_v5 = vmul.f32 %v3253_v58, %v4072_v13 }
  0x52   :  { %3801 = vmatmul.mubr.bf16.gmra.mrb[24].mxu0 %v772_v6  ;;  %v3610_v6 = vld [vmem:[%s4638_s0 + $0xc0] sm:$0xff]  }
  0x53   :  { %3881 = vmatmul.mubr.bf16.gmra.mrb[24].mxu1 %v3950_v9  ;;  %3804 = vmatprep.mubr.bf16.mxu0 %v773_v10  ;;  %v3233_v9 = vunpack.c.l.bf16 %v3609_v1  ;;  %v778_v10 = vpack.c.bf16 %v347_v0, %v346_v63  ;;  %v3237_v12 = vunpack.c.l.bf16 %v3610_v6  ;;  %v3238_v19 = vunpack.c.h.bf16 %v3610_v6  ;;  %v3961_v0 = vld [vmem:[%s4641_s4 + $0xc0] sm:$0xff]  }
  0x54   :  { %3884 = vmatprep.mubr.bf16.mxu1 %v3951_v16  ;;  %v779_v16 = vpack.c.bf16 %v349_v3, %v348_v2  ;;  %v3254_v63 = vunpack.c.h.bf16 %v3614_v52  ;;  %v227_v1 = vmul.f32 %v3249_v53, %v4072_v13  ;;  %v228_v2 = vmul.f32 %v3250_v54, %v4072_v13  ;;  %v3966_v53 = vld [vmem:[%s4641_s4 + $0xe8] sm:$0xff]  }
  0x55   :  { %v219_v23 = vmul.f32 %v3233_v9, %v4072_v13  ;;  %v221_v25 = vmul.f32 %v3237_v12, %v4072_v13  ;;  %v222_v28 = vmul.f32 %v3238_v19, %v4072_v13  ;;  %v360_v6 = vmax.f32 %v296_v61, 0.0  ;;  %v3615_v9 = vld [vmem:[%s4638_s0 + $0xe8] sm:$0xff]  }
  0x56   :  { %v230_v8 = vmul.f32 %v3254_v63, %v4072_v13  ;;  %v298_v11 = vadd.f32 %v4077_v14, %v227_v1  ;;  %v299_v12 = vadd.f32 %v4077_v14, %v228_v2  ;;  %v3257_v17 = vunpack.c.l.bf16 %v3615_v9  ;;  %v3962_v19 = vld [vmem:[%s4641_s4 + $0xc8] sm:$0xff]  }
  0x57   :  { %v290_v32 = vadd.f32 %v4077_v14, %v219_v23  ;;  %v293_v39 = vadd.f32 %v4077_v14, %v222_v28 }
  0x58   :  { %v301_v21 = vadd.f32 %v4077_v14, %v230_v8 }
  0x59   :  { %v354_v43 = vmax.f32 %v290_v32, 0.0  ;;  %v357_v49 = vmax.f32 %v293_v39, 0.0  ;;  %v3964_v39 = vld [vmem:[%s4641_s4 + $0xd8] sm:$0xff]  }
  0x5a   :  { %3805 = vmatmul.mubr.bf16.gmra.mrb[28].mxu0 %v774_v27  ;;  %v353_v27 = vmax.f32 %v289_v18, 0.0  ;;  %v3258_v18 = vunpack.c.h.bf16 %v3615_v9  ;;  %v365_v30 = vmax.f32 %v301_v21, 0.0 }
  0x5b   :  { %3885 = vmatmul.mubr.bf16.gmra.mrb[28].mxu1 %v3952_v33  ;;  %3808 = vmatprep.mubr.bf16.mxu0 %v775_v34  ;;  %v291_v33 = vadd.f32 %v4077_v14, %v220_v24  ;;  %v292_v34 = vadd.f32 %v4077_v14, %v221_v25  ;;  %v3963_v24 = vld [vmem:[%s4641_s4 + $0xd0] sm:$0xff]   ;;  %v362_v25 = vmax.f32 %v298_v11, 0.0 }
  0x5c   :  { %3888 = vmatprep.mubr.bf16.mxu1 %v3953_v38  ;;  %v781_v38 = vpack.c.bf16 %v353_v27, %v352_v26  ;;  %v363_v26 = vmax.f32 %v299_v12, 0.0  ;;  %v231_v27 = vmul.f32 %v3257_v17, %v4072_v13  ;;  %v232_v28 = vmul.f32 %v3258_v18, %v4072_v13 }
  0x5d   :  { %v355_v44 = vmax.f32 %v291_v33, 0.0  ;;  %v356_v48 = vmax.f32 %v292_v34, 0.0  ;;  %v3617_v33 = vld [vmem:[%s4638_s0 + $0xf8] sm:$0xff]  }
  0x5e   :  { %v786_v34 = vpack.c.bf16 %v363_v26, %v362_v25  ;;  %v302_v35 = vadd.f32 %v4077_v14, %v231_v27  ;;  %v303_v36 = vadd.f32 %v4077_v14, %v232_v28 }
  0x62   :  { %3809 = vmatmul.mubr.bf16.gmra.mrb[32].mxu0 %v776_v51  ;;  %v226_v51 = vmul.f32 %v3246_v41, %v4072_v13 }
  0x63   :  { %3889 = vmatmul.mubr.bf16.gmra.mrb[32].mxu1 %v3954_v55  ;;  %3812 = vmatprep.mubr.bf16.mxu0 %v777_v56  ;;  %v782_v55 = vpack.c.bf16 %v355_v44, %v354_v43  ;;  %v294_v56 = vadd.f32 %v4077_v14, %v223_v45  ;;  %v3965_v43 = vld [vmem:[%s4641_s4 + $0xe0] sm:$0xff]   ;;  %v366_v44 = vmax.f32 %v302_v35, 0.0  ;;  %v367_v45 = vmax.f32 %v303_v36, 0.0 }
  0x64   :  { %3892 = vmatprep.mubr.bf16.mxu1 %v3955_v60  ;;  %v783_v60 = vpack.c.bf16 %v357_v49, %v356_v48  ;;  %v297_v62 = vadd.f32 %v4077_v14, %v226_v51 }
  0x65   :  { %v358_v3 = vmax.f32 %v294_v56, 0.0  ;;  %v788_v50 = vpack.c.bf16 %v367_v45, %v366_v44 }
  0x66   :  { %v361_v7 = vmax.f32 %v297_v62, 0.0 }
  0x6a   :  { %3813 = vmatmul.mubr.bf16.gmra.mrb[36].mxu0 %v778_v10  ;;  %v3616_v10 = vld [vmem:[%s4638_s0 + $0xf0] sm:$0xff]  }
  0x6b   :  { %3893 = vmatmul.mubr.bf16.gmra.mrb[36].mxu1 %v3956_v15  ;;  %3816 = vmatprep.mubr.bf16.mxu0 %v779_v16  ;;  %v784_v15 = vpack.c.bf16 %v359_v4, %v358_v3  ;;  %v300_v16 = vadd.f32 %v4077_v14, %v229_v5  ;;  %v3261_v22 = vunpack.c.l.bf16 %v3616_v10  ;;  %v3262_v23 = vunpack.c.h.bf16 %v3616_v10 }
  0x6c   :  { %3896 = vmatprep.mubr.bf16.mxu1 %v3957_v20  ;;  %v785_v20 = vpack.c.bf16 %v361_v7, %v360_v6 }
  0x6d   :  { %v364_v29 = vmax.f32 %v300_v16, 0.0  ;;  %v234_v32 = vmul.f32 %v3262_v23, %v4072_v13 }
  0x6f   :  { %v787_v40 = vpack.c.bf16 %v365_v30, %v364_v29 }
  0x72   :  { %3817 = vmatmul.mubr.bf16.gmra.mrb[40].mxu0 %v780_v31  ;;  %v233_v31 = vmul.f32 %v3261_v22, %v4072_v13 }
  0x73   :  { %3897 = vmatmul.mubr.bf16.gmra.mrb[40].mxu1 %v3958_v37  ;;  %3820 = vmatprep.mubr.bf16.mxu0 %v781_v38  ;;  %v3265_v37 = vunpack.c.l.bf16 %v3617_v33  ;;  %v3266_v38 = vunpack.c.h.bf16 %v3617_v33 }
  0x74   :  { %3900 = vmatprep.mubr.bf16.mxu1 %v3959_v42  ;;  %v304_v41 = vadd.f32 %v4077_v14, %v233_v31  ;;  %v305_v42 = vadd.f32 %v4077_v14, %v234_v32 }
  0x75   :  { %v235_v46 = vmul.f32 %v3265_v37, %v4072_v13  ;;  %v236_v47 = vmul.f32 %v3266_v38, %v4072_v13 }
  0x76   :  { %v368_v48 = vmax.f32 %v304_v41, 0.0  ;;  %v369_v49 = vmax.f32 %v305_v42, 0.0 }
  0x77   :  { %v306_v51 = vadd.f32 %v4077_v14, %v235_v46  ;;  %v307_v52 = vadd.f32 %v4077_v14, %v236_v47  ;;  %v3968_v14 = vld [vmem:[%s4641_s4 + $0xf8] sm:$0xff]  }
  0x78   :  { %v789_v54 = vpack.c.bf16 %v369_v49, %v368_v48 }
  0x79   :  { %v370_v13 = vmax.f32 %v306_v51, 0.0  ;;  %v371_v56 = vmax.f32 %v307_v52, 0.0 }
  0x7a   :  { %3821 = vmatmul.mubr.bf16.gmra.mrb[44].mxu0 %v782_v55  ;;  %v3967_v55 = vld [vmem:[%s4641_s4 + $0xf0] sm:$0xff]  }
  0x7b   :  { %3901 = vmatmul.mubr.bf16.gmra.mrb[44].mxu1 %v3960_v59  ;;  %3824 = vmatprep.mubr.bf16.mxu0 %v783_v60  ;;  %v790_v57 = vpack.c.bf16 %v371_v56, %v370_v13  ;;  %v3969_v59 = vmov 0.0  }
  0x7c   :  { %3904 = vmatprep.mubr.bf16.mxu1 %v3961_v0  ;;  %34 = vst [vmem:[%s4642_s7] sm:$0x1] %v3969_v59  ;;  %35 = vst [vmem:[%s4643_s8] sm:$0x1] %v3969_v59 }
  0x7d   :  { %36 = vst [vmem:[%s4646_s10] sm:$0x1] %v3969_v59  ;;  %37 = vst [vmem:[%s4647_s11] sm:$0x1] %v3969_v59 }
  0x82   :  { %3825 = vmatmul.mubr.bf16.gmra.mrb[48].mxu0 %v784_v15 }
  0x83   :  { %3905 = vmatmul.mubr.bf16.gmra.mrb[48].mxu1 %v3962_v19  ;;  %3828 = vmatprep.mubr.bf16.mxu0 %v785_v20 }
  0x84   :  { %3908 = vmatprep.mubr.bf16.mxu1 %v3963_v24 }
  0x8a   :  { %3829 = vmatmul.mubr.bf16.gmra.mrb[52].mxu0 %v786_v34 }
  0x8b   :  { %3909 = vmatmul.mubr.bf16.gmra.mrb[52].mxu1 %v3964_v39  ;;  %3832 = vmatprep.mubr.bf16.mxu0 %v787_v40 }
  0x8c   :  { %3912 = vmatprep.mubr.bf16.mxu1 %v3965_v43 }
  0x92   :  { %3833 = vmatmul.mubr.bf16.gmra.mrb[56].mxu0 %v788_v50 }
  0x93   :  { %3913 = vmatmul.mubr.bf16.gmra.mrb[56].mxu1 %v3966_v53  ;;  %3836 = vmatprep.mubr.bf16.mxu0 %v789_v54 }
  0x94   :  { %3916 = vmatprep.mubr.bf16.mxu1 %v3967_v55 }
  0x9a   :  { %3837 = vmatmul.mubr.bf16.gmra.mrb[60].mxu0 %v790_v57 }
  0x9b   :  { %3917 = vmatmul.mubr.bf16.gmra.mrb[60].mxu1 %v3968_v14 }
  0xf5   :  { %v3778_v58 = vpop.f32.mrb[0].mxu0 }
  0xf6   :  { %v3858_v60 = vpop.f32.mrb[0].mxu1  ;;  %v889_v61 = vpop.f32.mrb[1].mxu0  ;;  %v1539_v15 = vmul.f32 %v3778_v58, %v3778_v58 }
  0xf7   :  { %v2026_v62 = vpop.f32.mrb[1].mxu1  ;;  %v3779_v63 = vpop.f32.mrb[2].mxu0  ;;  %v1537_v0 = vmul.f32 %v889_v61, %v889_v61  ;;  %v2676_v17 = vmul.f32 %v3858_v60, %v3858_v60 }
  0xf8   :  { %v3275_v1 = vpack.c.bf16 %v3779_v63, %v3778_v58  ;;  %v3859_v2 = vpop.f32.mrb[2].mxu1  ;;  %v892_v3 = vpop.f32.mrb[3].mxu0  ;;  %v2674_v4 = vmul.f32 %v2026_v62, %v2026_v62  ;;  %v1540_v21 = vmul.f32 %v3779_v63, %v3779_v63 }
  0xf9   :  { %v3435_v5 = vpack.c.bf16 %v3859_v2, %v3858_v60  ;;  %v3270_v6 = vpack.c.bf16 %v892_v3, %v889_v61  ;;  %v1465_v7 = vadd.f32 %v892_v3, %v889_v61  ;;  %v2029_v8 = vpop.f32.mrb[3].mxu1  ;;  %v1538_v9 = vmul.f32 %v892_v3, %v892_v3 }
  0xfa   :  { %3618 = vst [vmem:[%s4644_s6 + $0x8] sm:$0xff] %v3275_v1   ;;  %v3430_v10 = vpack.c.bf16 %v2029_v8, %v2026_v62  ;;  %v2602_v11 = vadd.f32 %v2029_v8, %v2026_v62  ;;  %v2675_v12 = vmul.f32 %v2029_v8, %v2029_v8  ;;  %v2677_v24 = vmul.f32 %v3859_v2, %v3859_v2 }
  0xfb   :  { %3649 = vst [vmem:[%s4645_s9 + $0x8] sm:$0xff] %v3435_v5   ;;  %3271 = vst [vmem:[%s4644_s6] sm:$0xff] %v3270_v6   ;;  %v1466_v16 = vadd.f32 %v3778_v58, %v1465_v7  ;;  %v1601_v18 = vadd.f32 %v1538_v9, %v1537_v0 }
  0xfc   :  { %3431 = vst [vmem:[%s4645_s9] sm:$0xff] %v3430_v10   ;;  %v2603_v19 = vadd.f32 %v3858_v60, %v2602_v11  ;;  %v2738_v20 = vadd.f32 %v2675_v12, %v2674_v4 }
  0xfd   :  { %v3782_v22 = vpop.f32.mrb[4].mxu0  ;;  %v1467_v23 = vadd.f32 %v3779_v63, %v1466_v16  ;;  %v1602_v25 = vadd.f32 %v1601_v18, %v1539_v15 }
  0xfe   :  { %v2739_v26 = vadd.f32 %v2738_v20, %v2676_v17  ;;  %v3862_v27 = vpop.f32.mrb[4].mxu1  ;;  %v905_v28 = vpop.f32.mrb[5].mxu0  ;;  %v2604_v29 = vadd.f32 %v3859_v2, %v2603_v19  ;;  %v1543_v51 = vmul.f32 %v3782_v22, %v3782_v22 }
  0xff   :  { %v1468_v30 = vadd.f32 %v1467_v23, %v905_v28  ;;  %v1541_v31 = vmul.f32 %v905_v28, %v905_v28  ;;  %v2042_v32 = vpop.f32.mrb[5].mxu1  ;;  %v3783_v33 = vpop.f32.mrb[6].mxu0  ;;  %v1603_v34 = vadd.f32 %v1602_v25, %v1540_v21  ;;  %v2680_v53 = vmul.f32 %v3862_v27, %v3862_v27 }
 0x100   :  { %v2605_v35 = vadd.f32 %v2604_v29, %v2042_v32  ;;  %v2678_v36 = vmul.f32 %v2042_v32, %v2042_v32  ;;  %v2740_v37 = vadd.f32 %v2739_v26, %v2677_v24  ;;  %v3863_v38 = vpop.f32.mrb[6].mxu1  ;;  %v908_v39 = vpop.f32.mrb[7].mxu0  ;;  %v3285_v40 = vpack.c.bf16 %v3783_v33, %v3782_v22 }
 0x101   :  { %v3445_v41 = vpack.c.bf16 %v3863_v38, %v3862_v27  ;;  %v2045_v42 = vpop.f32.mrb[7].mxu1  ;;  %v1604_v43 = vadd.f32 %v1603_v34, %v1541_v31  ;;  %v3280_v45 = vpack.c.bf16 %v908_v39, %v905_v28  ;;  %v1469_v46 = vadd.f32 %v1468_v30, %v908_v39 }
 0x102   :  { %v2741_v44 = vadd.f32 %v2740_v37, %v2678_v36  ;;  %3620 = vst [vmem:[%s4644_s6 + $0x18] sm:$0xff] %v3285_v40   ;;  %v1542_v47 = vmul.f32 %v908_v39, %v908_v39  ;;  %v3440_v48 = vpack.c.bf16 %v2045_v42, %v2042_v32  ;;  %v2606_v49 = vadd.f32 %v2605_v35, %v2045_v42 }
 0x103   :  { %3651 = vst [vmem:[%s4645_s9 + $0x18] sm:$0xff] %v3445_v41   ;;  %v2679_v50 = vmul.f32 %v2045_v42, %v2045_v42  ;;  %3619 = vst [vmem:[%s4644_s6 + $0x10] sm:$0xff] %v3280_v45   ;;  %v1470_v52 = vadd.f32 %v3782_v22, %v1469_v46  ;;  %v1544_v57 = vmul.f32 %v3783_v33, %v3783_v33 }
 0x104   :  { %v1605_v54 = vadd.f32 %v1604_v43, %v1542_v47  ;;  %3650 = vst [vmem:[%s4645_s9 + $0x10] sm:$0xff] %v3440_v48   ;;  %v2607_v55 = vadd.f32 %v3862_v27, %v2606_v49  ;;  %v2681_v60 = vmul.f32 %v3863_v38, %v3863_v38 }
 0x105   :  { %v2742_v13 = vadd.f32 %v2741_v44, %v2679_v50  ;;  %v3786_v56 = vpop.f32.mrb[8].mxu0  ;;  %v1471_v59 = vadd.f32 %v3783_v33, %v1470_v52 }
 0x106   :  { %v3866_v14 = vpop.f32.mrb[8].mxu1  ;;  %v921_v58 = vpop.f32.mrb[9].mxu0  ;;  %v1606_v61 = vadd.f32 %v1605_v54, %v1543_v51  ;;  %v2608_v3 = vadd.f32 %v3863_v38, %v2607_v55  ;;  %v1547_v24 = vmul.f32 %v3786_v56, %v3786_v56 }
 0x107   :  { %v2743_v62 = vadd.f32 %v2742_v13, %v2680_v53  ;;  %v1545_v63 = vmul.f32 %v921_v58, %v921_v58  ;;  %v2058_v0 = vpop.f32.mrb[9].mxu1  ;;  %v3787_v1 = vpop.f32.mrb[10].mxu0  ;;  %v1472_v2 = vadd.f32 %v1471_v59, %v921_v58  ;;  %v2684_v27 = vmul.f32 %v3866_v14, %v3866_v14 }
 0x108   :  { %v2682_v4 = vmul.f32 %v2058_v0, %v2058_v0  ;;  %v3295_v5 = vpack.c.bf16 %v3787_v1, %v3786_v56  ;;  %v3867_v6 = vpop.f32.mrb[10].mxu1  ;;  %v924_v7 = vpop.f32.mrb[11].mxu0  ;;  %v1607_v8 = vadd.f32 %v1606_v61, %v1544_v57  ;;  %v2609_v12 = vadd.f32 %v2608_v3, %v2058_v0 }
 0x109   :  { %v2744_v9 = vadd.f32 %v2743_v62, %v2681_v60  ;;  %v3455_v10 = vpack.c.bf16 %v3867_v6, %v3866_v14  ;;  %v2061_v11 = vpop.f32.mrb[11].mxu1  ;;  %v3290_v15 = vpack.c.bf16 %v924_v7, %v921_v58  ;;  %v1473_v16 = vadd.f32 %v1472_v2, %v924_v7 }
 0x10a   :  { %3622 = vst [vmem:[%s4644_s6 + $0x28] sm:$0xff] %v3295_v5   ;;  %v1608_v17 = vadd.f32 %v1607_v8, %v1545_v63  ;;  %v1546_v19 = vmul.f32 %v924_v7, %v924_v7  ;;  %v3450_v20 = vpack.c.bf16 %v2061_v11, %v2058_v0  ;;  %v2610_v22 = vadd.f32 %v2609_v12, %v2061_v11 }
 0x10b   :  { %v2745_v18 = vadd.f32 %v2744_v9, %v2682_v4  ;;  %3653 = vst [vmem:[%s4645_s9 + $0x28] sm:$0xff] %v3455_v10   ;;  %3621 = vst [vmem:[%s4644_s6 + $0x20] sm:$0xff] %v3290_v15   ;;  %v1474_v21 = vadd.f32 %v3786_v56, %v1473_v16  ;;  %v2683_v23 = vmul.f32 %v2061_v11, %v2061_v11 }
 0x10c   :  { %v1609_v25 = vadd.f32 %v1608_v17, %v1546_v19  ;;  %3652 = vst [vmem:[%s4645_s9 + $0x20] sm:$0xff] %v3450_v20   ;;  %v2611_v28 = vadd.f32 %v3866_v14, %v2610_v22  ;;  %v1548_v33 = vmul.f32 %v3787_v1, %v3787_v1  ;;  %v2685_v34 = vmul.f32 %v3867_v6, %v3867_v6 }
 0x10d   :  { %v3790_v26 = vpop.f32.mrb[12].mxu0  ;;  %v2746_v29 = vadd.f32 %v2745_v18, %v2683_v23  ;;  %v1475_v32 = vadd.f32 %v3787_v1, %v1474_v21 }
 0x10e   :  { %v3870_v30 = vpop.f32.mrb[12].mxu1  ;;  %v937_v31 = vpop.f32.mrb[13].mxu0  ;;  %v1610_v35 = vadd.f32 %v1609_v25, %v1547_v24  ;;  %v2612_v41 = vadd.f32 %v3867_v6, %v2611_v28  ;;  %v1551_v14 = vmul.f32 %v3790_v26, %v3790_v26 }
 0x10f   :  { %v1549_v36 = vmul.f32 %v937_v31, %v937_v31  ;;  %v2074_v37 = vpop.f32.mrb[13].mxu1  ;;  %v3791_v38 = vpop.f32.mrb[14].mxu0  ;;  %v2747_v39 = vadd.f32 %v2746_v29, %v2684_v27  ;;  %v1476_v40 = vadd.f32 %v1475_v32, %v937_v31  ;;  %v2688_v61 = vmul.f32 %v3870_v30, %v3870_v30 }
 0x110   :  { %v2686_v42 = vmul.f32 %v2074_v37, %v2074_v37  ;;  %v3871_v43 = vpop.f32.mrb[14].mxu1  ;;  %v940_v44 = vpop.f32.mrb[15].mxu0  ;;  %v1611_v45 = vadd.f32 %v1610_v35, %v1548_v33  ;;  %v3305_v46 = vpack.c.bf16 %v3791_v38, %v3790_v26  ;;  %v2613_v49 = vadd.f32 %v2612_v41, %v2074_v37 }
 0x111   :  { %v3465_v47 = vpack.c.bf16 %v3871_v43, %v3870_v30  ;;  %v2077_v48 = vpop.f32.mrb[15].mxu1  ;;  %v2748_v50 = vadd.f32 %v2747_v39, %v2685_v34  ;;  %v3300_v51 = vpack.c.bf16 %v940_v44, %v937_v31  ;;  %v1477_v53 = vadd.f32 %v1476_v40, %v940_v44 }
 0x112   :  { %v1612_v52 = vadd.f32 %v1611_v45, %v1549_v36  ;;  %3624 = vst [vmem:[%s4644_s6 + $0x38] sm:$0xff] %v3305_v46   ;;  %v1550_v54 = vmul.f32 %v940_v44, %v940_v44  ;;  %v3460_v55 = vpack.c.bf16 %v2077_v48, %v2074_v37  ;;  %v2614_v56 = vadd.f32 %v2613_v49, %v2077_v48 }
 0x113   :  { %3655 = vst [vmem:[%s4645_s9 + $0x38] sm:$0xff] %v3465_v47   ;;  %v2749_v13 = vadd.f32 %v2748_v50, %v2686_v42  ;;  %3623 = vst [vmem:[%s4644_s6 + $0x30] sm:$0xff] %v3300_v51   ;;  %v2687_v57 = vmul.f32 %v2077_v48, %v2077_v48  ;;  %v1478_v58 = vadd.f32 %v3790_v26, %v1477_v53 }
 0x114   :  { %v1613_v59 = vadd.f32 %v1612_v52, %v1550_v54  ;;  %3654 = vst [vmem:[%s4645_s9 + $0x30] sm:$0xff] %v3460_v55   ;;  %v1552_v62 = vmul.f32 %v3791_v38, %v3791_v38  ;;  %v2615_v63 = vadd.f32 %v3870_v30, %v2614_v56  ;;  %v2689_v3 = vmul.f32 %v3871_v43, %v3871_v43 }
 0x115   :  { %v3794_v60 = vpop.f32.mrb[16].mxu0  ;;  %v2750_v0 = vadd.f32 %v2749_v13, %v2687_v57  ;;  %v1479_v5 = vadd.f32 %v3791_v38, %v1478_v58 }
 0x116   :  { %v3874_v1 = vpop.f32.mrb[16].mxu1  ;;  %v953_v2 = vpop.f32.mrb[17].mxu0  ;;  %v1614_v4 = vadd.f32 %v1613_v59, %v1551_v14  ;;  %v2616_v10 = vadd.f32 %v3871_v43, %v2615_v63  ;;  %v1555_v31 = vmul.f32 %v3794_v60, %v3794_v60 }
 0x117   :  { %v1553_v6 = vmul.f32 %v953_v2, %v953_v2  ;;  %v2090_v7 = vpop.f32.mrb[17].mxu1  ;;  %v3795_v8 = vpop.f32.mrb[18].mxu0  ;;  %v2751_v9 = vadd.f32 %v2750_v0, %v2688_v61  ;;  %v1480_v17 = vadd.f32 %v1479_v5, %v953_v2  ;;  %v2692_v35 = vmul.f32 %v3874_v1, %v3874_v1 }
 0x118   :  { %v2690_v11 = vmul.f32 %v2090_v7, %v2090_v7  ;;  %v3315_v12 = vpack.c.bf16 %v3795_v8, %v3794_v60  ;;  %v3875_v15 = vpop.f32.mrb[18].mxu1  ;;  %v956_v16 = vpop.f32.mrb[19].mxu0  ;;  %v1615_v18 = vadd.f32 %v1614_v4, %v1552_v62  ;;  %v2617_v21 = vadd.f32 %v2616_v10, %v2090_v7 }
 0x119   :  { %v3475_v19 = vpack.c.bf16 %v3875_v15, %v3874_v1  ;;  %v2093_v20 = vpop.f32.mrb[19].mxu1  ;;  %v2752_v22 = vadd.f32 %v2751_v9, %v2689_v3  ;;  %v3310_v23 = vpack.c.bf16 %v956_v16, %v953_v2  ;;  %v1481_v25 = vadd.f32 %v1480_v17, %v956_v16 }
 0x11a   :  { %3626 = vst [vmem:[%s4644_s6 + $0x48] sm:$0xff] %v3315_v12   ;;  %v1616_v24 = vadd.f32 %v1615_v18, %v1553_v6  ;;  %v1554_v26 = vmul.f32 %v956_v16, %v956_v16  ;;  %v3470_v27 = vpack.c.bf16 %v2093_v20, %v2090_v7  ;;  %v2618_v29 = vadd.f32 %v2617_v21, %v2093_v20 }
 0x11b   :  { %3657 = vst [vmem:[%s4645_s9 + $0x48] sm:$0xff] %v3475_v19   ;;  %v2753_v28 = vadd.f32 %v2752_v22, %v2690_v11  ;;  %3625 = vst [vmem:[%s4644_s6 + $0x40] sm:$0xff] %v3310_v23   ;;  %v2691_v30 = vmul.f32 %v2093_v20, %v2093_v20  ;;  %v1482_v32 = vadd.f32 %v3794_v60, %v1481_v25 }
 0x11c   :  { %v1617_v33 = vadd.f32 %v1616_v24, %v1554_v26  ;;  %3656 = vst [vmem:[%s4645_s9 + $0x40] sm:$0xff] %v3470_v27   ;;  %v1556_v36 = vmul.f32 %v3795_v8, %v3795_v8  ;;  %v2619_v37 = vadd.f32 %v3874_v1, %v2618_v29  ;;  %v2693_v41 = vmul.f32 %v3875_v15, %v3875_v15 }
 0x11d   :  { %v3798_v34 = vpop.f32.mrb[20].mxu0  ;;  %v2754_v38 = vadd.f32 %v2753_v28, %v2691_v30  ;;  %v1483_v43 = vadd.f32 %v3795_v8, %v1482_v32 }
 0x11e   :  { %v3878_v39 = vpop.f32.mrb[20].mxu1  ;;  %v969_v40 = vpop.f32.mrb[21].mxu0  ;;  %v1618_v42 = vadd.f32 %v1617_v33, %v1555_v31  ;;  %v2620_v48 = vadd.f32 %v3875_v15, %v2619_v37  ;;  %v1559_v1 = vmul.f32 %v3798_v34, %v3798_v34 }
 0x11f   :  { %v1557_v44 = vmul.f32 %v969_v40, %v969_v40  ;;  %v2106_v45 = vpop.f32.mrb[21].mxu1  ;;  %v3799_v46 = vpop.f32.mrb[22].mxu0  ;;  %v2755_v47 = vadd.f32 %v2754_v38, %v2692_v35  ;;  %v1484_v53 = vadd.f32 %v1483_v43, %v969_v40  ;;  %v2696_v5 = vmul.f32 %v3878_v39, %v3878_v39 }
 0x120   :  { %v2694_v49 = vmul.f32 %v2106_v45, %v2106_v45  ;;  %v3325_v50 = vpack.c.bf16 %v3799_v46, %v3798_v34  ;;  %v3879_v51 = vpop.f32.mrb[22].mxu1  ;;  %v972_v52 = vpop.f32.mrb[23].mxu0  ;;  %v1619_v54 = vadd.f32 %v1618_v42, %v1556_v36  ;;  %v2621_v56 = vadd.f32 %v2620_v48, %v2106_v45 }
 0x121   :  { %v3485_v55 = vpack.c.bf16 %v3879_v51, %v3878_v39  ;;  %v2109_v13 = vpop.f32.mrb[23].mxu1  ;;  %v2756_v57 = vadd.f32 %v2755_v47, %v2693_v41  ;;  %v3320_v14 = vpack.c.bf16 %v972_v52, %v969_v40  ;;  %v1485_v59 = vadd.f32 %v1484_v53, %v972_v52 }
 0x122   :  { %3628 = vst [vmem:[%s4644_s6 + $0x58] sm:$0xff] %v3325_v50   ;;  %v1620_v58 = vadd.f32 %v1619_v54, %v1557_v44  ;;  %v1558_v60 = vmul.f32 %v972_v52, %v972_v52  ;;  %v3480_v61 = vpack.c.bf16 %v2109_v13, %v2106_v45  ;;  %v2622_v63 = vadd.f32 %v2621_v56, %v2109_v13 }
 0x123   :  { %3659 = vst [vmem:[%s4645_s9 + $0x58] sm:$0xff] %v3485_v55   ;;  %v2757_v62 = vadd.f32 %v2756_v57, %v2694_v49  ;;  %3627 = vst [vmem:[%s4644_s6 + $0x50] sm:$0xff] %v3320_v14   ;;  %v2695_v0 = vmul.f32 %v2109_v13, %v2109_v13  ;;  %v1486_v2 = vadd.f32 %v3798_v34, %v1485_v59 }
 0x124   :  { %v1621_v3 = vadd.f32 %v1620_v58, %v1558_v60  ;;  %3658 = vst [vmem:[%s4645_s9 + $0x50] sm:$0xff] %v3480_v61   ;;  %v1560_v6 = vmul.f32 %v3799_v46, %v3799_v46  ;;  %v2623_v7 = vadd.f32 %v3878_v39, %v2622_v63  ;;  %v2697_v11 = vmul.f32 %v3879_v51, %v3879_v51 }
 0x125   :  { %v3802_v4 = vpop.f32.mrb[24].mxu0  ;;  %v2758_v8 = vadd.f32 %v2757_v62, %v2695_v0  ;;  %v1487_v15 = vadd.f32 %v3799_v46, %v1486_v2 }
 0x126   :  { %v3882_v9 = vpop.f32.mrb[24].mxu1  ;;  %v985_v10 = vpop.f32.mrb[25].mxu0  ;;  %v1622_v12 = vadd.f32 %v1621_v3, %v1559_v1  ;;  %v2624_v20 = vadd.f32 %v3879_v51, %v2623_v7  ;;  %v1563_v39 = vmul.f32 %v3802_v4, %v3802_v4 }
 0x127   :  { %v1561_v16 = vmul.f32 %v985_v10, %v985_v10  ;;  %v2122_v17 = vpop.f32.mrb[25].mxu1  ;;  %v3803_v18 = vpop.f32.mrb[26].mxu0  ;;  %v2759_v19 = vadd.f32 %v2758_v8, %v2696_v5  ;;  %v1488_v25 = vadd.f32 %v1487_v15, %v985_v10  ;;  %v2700_v43 = vmul.f32 %v3882_v9, %v3882_v9 }
 0x128   :  { %v2698_v21 = vmul.f32 %v2122_v17, %v2122_v17  ;;  %v3335_v22 = vpack.c.bf16 %v3803_v18, %v3802_v4  ;;  %v3883_v23 = vpop.f32.mrb[26].mxu1  ;;  %v988_v24 = vpop.f32.mrb[27].mxu0  ;;  %v1623_v26 = vadd.f32 %v1622_v12, %v1560_v6  ;;  %v2625_v29 = vadd.f32 %v2624_v20, %v2122_v17 }
 0x129   :  { %v3495_v27 = vpack.c.bf16 %v3883_v23, %v3882_v9  ;;  %v2125_v28 = vpop.f32.mrb[27].mxu1  ;;  %v2760_v30 = vadd.f32 %v2759_v19, %v2697_v11  ;;  %v3330_v31 = vpack.c.bf16 %v988_v24, %v985_v10  ;;  %v1489_v33 = vadd.f32 %v1488_v25, %v988_v24 }
 0x12a   :  { %3630 = vst [vmem:[%s4644_s6 + $0x68] sm:$0xff] %v3335_v22   ;;  %v1624_v32 = vadd.f32 %v1623_v26, %v1561_v16  ;;  %v1562_v34 = vmul.f32 %v988_v24, %v988_v24  ;;  %v3490_v35 = vpack.c.bf16 %v2125_v28, %v2122_v17  ;;  %v2626_v37 = vadd.f32 %v2625_v29, %v2125_v28 }
 0x12b   :  { %3661 = vst [vmem:[%s4645_s9 + $0x68] sm:$0xff] %v3495_v27   ;;  %v2761_v36 = vadd.f32 %v2760_v30, %v2698_v21  ;;  %3629 = vst [vmem:[%s4644_s6 + $0x60] sm:$0xff] %v3330_v31   ;;  %v2699_v38 = vmul.f32 %v2125_v28, %v2125_v28  ;;  %v1490_v40 = vadd.f32 %v3802_v4, %v1489_v33 }
 0x12c   :  { %v1625_v41 = vadd.f32 %v1624_v32, %v1562_v34  ;;  %3660 = vst [vmem:[%s4645_s9 + $0x60] sm:$0xff] %v3490_v35   ;;  %v1564_v44 = vmul.f32 %v3803_v18, %v3803_v18  ;;  %v2627_v45 = vadd.f32 %v3882_v9, %v2626_v37  ;;  %v2701_v49 = vmul.f32 %v3883_v23, %v3883_v23 }
 0x12d   :  { %v3806_v42 = vpop.f32.mrb[28].mxu0  ;;  %v2762_v46 = vadd.f32 %v2761_v36, %v2699_v38  ;;  %v1491_v51 = vadd.f32 %v3803_v18, %v1490_v40 }
 0x12e   :  { %v3886_v47 = vpop.f32.mrb[28].mxu1  ;;  %v1001_v48 = vpop.f32.mrb[29].mxu0  ;;  %v1626_v50 = vadd.f32 %v1625_v41, %v1563_v39  ;;  %v2628_v13 = vadd.f32 %v3883_v23, %v2627_v45  ;;  %v1567_v9 = vmul.f32 %v3806_v42, %v3806_v42 }
 0x12f   :  { %v1565_v52 = vmul.f32 %v1001_v48, %v1001_v48  ;;  %v2138_v53 = vpop.f32.mrb[29].mxu1  ;;  %v3807_v54 = vpop.f32.mrb[30].mxu0  ;;  %v2763_v55 = vadd.f32 %v2762_v46, %v2700_v43  ;;  %v1492_v59 = vadd.f32 %v1491_v51, %v1001_v48  ;;  %v2704_v15 = vmul.f32 %v3886_v47, %v3886_v47 }
 0x130   :  { %v2702_v56 = vmul.f32 %v2138_v53, %v2138_v53  ;;  %v3345_v57 = vpack.c.bf16 %v3807_v54, %v3806_v42  ;;  %v3887_v14 = vpop.f32.mrb[30].mxu1  ;;  %v1004_v58 = vpop.f32.mrb[31].mxu0  ;;  %v1627_v60 = vadd.f32 %v1626_v50, %v1564_v44  ;;  %v2629_v63 = vadd.f32 %v2628_v13, %v2138_v53 }
 0x131   :  { %v3505_v61 = vpack.c.bf16 %v3887_v14, %v3886_v47  ;;  %v2141_v62 = vpop.f32.mrb[31].mxu1  ;;  %v2764_v0 = vadd.f32 %v2763_v55, %v2701_v49  ;;  %v3340_v1 = vpack.c.bf16 %v1004_v58, %v1001_v48  ;;  %v1493_v3 = vadd.f32 %v1492_v59, %v1004_v58 }
 0x132   :  { %3632 = vst [vmem:[%s4644_s6 + $0x78] sm:$0xff] %v3345_v57   ;;  %v1628_v2 = vadd.f32 %v1627_v60, %v1565_v52  ;;  %v1566_v4 = vmul.f32 %v1004_v58, %v1004_v58  ;;  %v3500_v5 = vpack.c.bf16 %v2141_v62, %v2138_v53  ;;  %v2630_v7 = vadd.f32 %v2629_v63, %v2141_v62 }
 0x133   :  { %3663 = vst [vmem:[%s4645_s9 + $0x78] sm:$0xff] %v3505_v61   ;;  %v2765_v6 = vadd.f32 %v2764_v0, %v2702_v56  ;;  %3631 = vst [vmem:[%s4644_s6 + $0x70] sm:$0xff] %v3340_v1   ;;  %v2703_v8 = vmul.f32 %v2141_v62, %v2141_v62  ;;  %v1494_v10 = vadd.f32 %v3806_v42, %v1493_v3 }
 0x134   :  { %v1629_v11 = vadd.f32 %v1628_v2, %v1566_v4  ;;  %3662 = vst [vmem:[%s4645_s9 + $0x70] sm:$0xff] %v3500_v5   ;;  %v1568_v16 = vmul.f32 %v3807_v54, %v3807_v54  ;;  %v2631_v17 = vadd.f32 %v3886_v47, %v2630_v7  ;;  %v2705_v21 = vmul.f32 %v3887_v14, %v3887_v14 }
 0x135   :  { %v3810_v12 = vpop.f32.mrb[32].mxu0  ;;  %v2766_v18 = vadd.f32 %v2765_v6, %v2703_v8  ;;  %v1495_v23 = vadd.f32 %v3807_v54, %v1494_v10 }
 0x136   :  { %v3890_v19 = vpop.f32.mrb[32].mxu1  ;;  %v1017_v20 = vpop.f32.mrb[33].mxu0  ;;  %v1630_v22 = vadd.f32 %v1629_v11, %v1567_v9  ;;  %v2632_v28 = vadd.f32 %v3887_v14, %v2631_v17  ;;  %v1571_v47 = vmul.f32 %v3810_v12, %v3810_v12 }
 0x137   :  { %v1569_v24 = vmul.f32 %v1017_v20, %v1017_v20  ;;  %v2154_v25 = vpop.f32.mrb[33].mxu1  ;;  %v3811_v26 = vpop.f32.mrb[34].mxu0  ;;  %v2767_v27 = vadd.f32 %v2766_v18, %v2704_v15  ;;  %v1496_v33 = vadd.f32 %v1495_v23, %v1017_v20  ;;  %v2708_v51 = vmul.f32 %v3890_v19, %v3890_v19 }
 0x138   :  { %v2706_v29 = vmul.f32 %v2154_v25, %v2154_v25  ;;  %v3355_v30 = vpack.c.bf16 %v3811_v26, %v3810_v12  ;;  %v3891_v31 = vpop.f32.mrb[34].mxu1  ;;  %v1020_v32 = vpop.f32.mrb[35].mxu0  ;;  %v1631_v34 = vadd.f32 %v1630_v22, %v1568_v16  ;;  %v2633_v37 = vadd.f32 %v2632_v28, %v2154_v25 }
 0x139   :  { %v3515_v35 = vpack.c.bf16 %v3891_v31, %v3890_v19  ;;  %v2157_v36 = vpop.f32.mrb[35].mxu1  ;;  %v2768_v38 = vadd.f32 %v2767_v27, %v2705_v21  ;;  %v3350_v39 = vpack.c.bf16 %v1020_v32, %v1017_v20  ;;  %v1497_v41 = vadd.f32 %v1496_v33, %v1020_v32 }
 0x13a   :  { %3634 = vst [vmem:[%s4644_s6 + $0x88] sm:$0xff] %v3355_v30   ;;  %v1632_v40 = vadd.f32 %v1631_v34, %v1569_v24  ;;  %v1570_v42 = vmul.f32 %v1020_v32, %v1020_v32  ;;  %v3510_v43 = vpack.c.bf16 %v2157_v36, %v2154_v25  ;;  %v2634_v45 = vadd.f32 %v2633_v37, %v2157_v36 }
 0x13b   :  { %3665 = vst [vmem:[%s4645_s9 + $0x88] sm:$0xff] %v3515_v35   ;;  %v2769_v44 = vadd.f32 %v2768_v38, %v2706_v29  ;;  %3633 = vst [vmem:[%s4644_s6 + $0x80] sm:$0xff] %v3350_v39   ;;  %v2707_v46 = vmul.f32 %v2157_v36, %v2157_v36  ;;  %v1498_v48 = vadd.f32 %v3810_v12, %v1497_v41 }
 0x13c   :  { %v1633_v49 = vadd.f32 %v1632_v40, %v1570_v42  ;;  %3664 = vst [vmem:[%s4645_s9 + $0x80] sm:$0xff] %v3510_v43   ;;  %v1572_v52 = vmul.f32 %v3811_v26, %v3811_v26  ;;  %v2635_v53 = vadd.f32 %v3890_v19, %v2634_v45  ;;  %v2709_v56 = vmul.f32 %v3891_v31, %v3891_v31 }
 0x13d   :  { %v3814_v50 = vpop.f32.mrb[36].mxu0  ;;  %v2770_v54 = vadd.f32 %v2769_v44, %v2707_v46  ;;  %v1499_v14 = vadd.f32 %v3811_v26, %v1498_v48 }
 0x13e   :  { %v3894_v55 = vpop.f32.mrb[36].mxu1  ;;  %v1033_v13 = vpop.f32.mrb[37].mxu0  ;;  %v1634_v57 = vadd.f32 %v1633_v49, %v1571_v47  ;;  %v2636_v62 = vadd.f32 %v3891_v31, %v2635_v53  ;;  %v1575_v19 = vmul.f32 %v3814_v50, %v3814_v50 }
 0x13f   :  { %v1573_v58 = vmul.f32 %v1033_v13, %v1033_v13  ;;  %v2170_v59 = vpop.f32.mrb[37].mxu1  ;;  %v3815_v60 = vpop.f32.mrb[38].mxu0  ;;  %v2771_v61 = vadd.f32 %v2770_v54, %v2708_v51  ;;  %v1500_v3 = vadd.f32 %v1499_v14, %v1033_v13  ;;  %v2712_v23 = vmul.f32 %v3894_v55, %v3894_v55 }
 0x140   :  { %v2710_v63 = vmul.f32 %v2170_v59, %v2170_v59  ;;  %v3365_v0 = vpack.c.bf16 %v3815_v60, %v3814_v50  ;;  %v3895_v1 = vpop.f32.mrb[38].mxu1  ;;  %v1036_v2 = vpop.f32.mrb[39].mxu0  ;;  %v1635_v4 = vadd.f32 %v1634_v57, %v1572_v52  ;;  %v2637_v7 = vadd.f32 %v2636_v62, %v2170_v59 }
 0x141   :  { %v3525_v5 = vpack.c.bf16 %v3895_v1, %v3894_v55  ;;  %v2173_v6 = vpop.f32.mrb[39].mxu1  ;;  %v2772_v8 = vadd.f32 %v2771_v61, %v2709_v56  ;;  %v3360_v9 = vpack.c.bf16 %v1036_v2, %v1033_v13  ;;  %v1501_v11 = vadd.f32 %v1500_v3, %v1036_v2 }
 0x142   :  { %3636 = vst [vmem:[%s4644_s6 + $0x98] sm:$0xff] %v3365_v0   ;;  %v1636_v10 = vadd.f32 %v1635_v4, %v1573_v58  ;;  %v1574_v12 = vmul.f32 %v1036_v2, %v1036_v2  ;;  %v3520_v15 = vpack.c.bf16 %v2173_v6, %v2170_v59  ;;  %v2638_v17 = vadd.f32 %v2637_v7, %v2173_v6 }
 0x143   :  { %3667 = vst [vmem:[%s4645_s9 + $0x98] sm:$0xff] %v3525_v5   ;;  %v2773_v16 = vadd.f32 %v2772_v8, %v2710_v63  ;;  %3635 = vst [vmem:[%s4644_s6 + $0x90] sm:$0xff] %v3360_v9   ;;  %v2711_v18 = vmul.f32 %v2173_v6, %v2173_v6  ;;  %v1502_v20 = vadd.f32 %v3814_v50, %v1501_v11 }
 0x144   :  { %v1637_v21 = vadd.f32 %v1636_v10, %v1574_v12  ;;  %3666 = vst [vmem:[%s4645_s9 + $0x90] sm:$0xff] %v3520_v15   ;;  %v1576_v24 = vmul.f32 %v3815_v60, %v3815_v60  ;;  %v2639_v25 = vadd.f32 %v3894_v55, %v2638_v17  ;;  %v2713_v29 = vmul.f32 %v3895_v1, %v3895_v1 }
 0x145   :  { %v3818_v22 = vpop.f32.mrb[40].mxu0  ;;  %v2774_v26 = vadd.f32 %v2773_v16, %v2711_v18  ;;  %v1503_v31 = vadd.f32 %v3815_v60, %v1502_v20 }
 0x146   :  { %v3898_v27 = vpop.f32.mrb[40].mxu1  ;;  %v1049_v28 = vpop.f32.mrb[41].mxu0  ;;  %v1638_v30 = vadd.f32 %v1637_v21, %v1575_v19  ;;  %v2640_v36 = vadd.f32 %v3895_v1, %v2639_v25  ;;  %v1579_v55 = vmul.f32 %v3818_v22, %v3818_v22 }
 0x147   :  { %v1577_v32 = vmul.f32 %v1049_v28, %v1049_v28  ;;  %v2186_v33 = vpop.f32.mrb[41].mxu1  ;;  %v3819_v34 = vpop.f32.mrb[42].mxu0  ;;  %v2775_v35 = vadd.f32 %v2774_v26, %v2712_v23  ;;  %v1504_v41 = vadd.f32 %v1503_v31, %v1049_v28  ;;  %v2716_v14 = vmul.f32 %v3898_v27, %v3898_v27 }
 0x148   :  { %v2714_v37 = vmul.f32 %v2186_v33, %v2186_v33  ;;  %v3375_v38 = vpack.c.bf16 %v3819_v34, %v3818_v22  ;;  %v3899_v39 = vpop.f32.mrb[42].mxu1  ;;  %v1052_v40 = vpop.f32.mrb[43].mxu0  ;;  %v1639_v42 = vadd.f32 %v1638_v30, %v1576_v24  ;;  %v2641_v45 = vadd.f32 %v2640_v36, %v2186_v33 }
 0x149   :  { %v3535_v43 = vpack.c.bf16 %v3899_v39, %v3898_v27  ;;  %v2189_v44 = vpop.f32.mrb[43].mxu1  ;;  %v2776_v46 = vadd.f32 %v2775_v35, %v2713_v29  ;;  %v3370_v47 = vpack.c.bf16 %v1052_v40, %v1049_v28  ;;  %v1505_v49 = vadd.f32 %v1504_v41, %v1052_v40 }
 0x14a   :  { %3638 = vst [vmem:[%s4644_s6 + $0xa8] sm:$0xff] %v3375_v38   ;;  %v1640_v48 = vadd.f32 %v1639_v42, %v1577_v32  ;;  %v1578_v50 = vmul.f32 %v1052_v40, %v1052_v40  ;;  %v3530_v51 = vpack.c.bf16 %v2189_v44, %v2186_v33  ;;  %v2642_v53 = vadd.f32 %v2641_v45, %v2189_v44 }
 0x14b   :  { %3669 = vst [vmem:[%s4645_s9 + $0xa8] sm:$0xff] %v3535_v43   ;;  %v2777_v52 = vadd.f32 %v2776_v46, %v2714_v37  ;;  %3637 = vst [vmem:[%s4644_s6 + $0xa0] sm:$0xff] %v3370_v47   ;;  %v2715_v54 = vmul.f32 %v2189_v44, %v2189_v44  ;;  %v1506_v13 = vadd.f32 %v3818_v22, %v1505_v49 }
 0x14c   :  { %v1641_v56 = vadd.f32 %v1640_v48, %v1578_v50  ;;  %3668 = vst [vmem:[%s4645_s9 + $0xa0] sm:$0xff] %v3530_v51   ;;  %v1580_v58 = vmul.f32 %v3819_v34, %v3819_v34  ;;  %v2643_v59 = vadd.f32 %v3898_v27, %v2642_v53  ;;  %v2717_v63 = vmul.f32 %v3899_v39, %v3899_v39 }
 0x14d   :  { %v3822_v57 = vpop.f32.mrb[44].mxu0  ;;  %v2778_v60 = vadd.f32 %v2777_v52, %v2715_v54  ;;  %v1507_v1 = vadd.f32 %v3819_v34, %v1506_v13 }
 0x14e   :  { %v3902_v61 = vpop.f32.mrb[44].mxu1  ;;  %v1065_v62 = vpop.f32.mrb[45].mxu0  ;;  %v1642_v0 = vadd.f32 %v1641_v56, %v1579_v55  ;;  %v2644_v6 = vadd.f32 %v3899_v39, %v2643_v59  ;;  %v1583_v27 = vmul.f32 %v3822_v57, %v3822_v57 }
 0x14f   :  { %v1581_v2 = vmul.f32 %v1065_v62, %v1065_v62  ;;  %v2202_v3 = vpop.f32.mrb[45].mxu1  ;;  %v3823_v4 = vpop.f32.mrb[46].mxu0  ;;  %v2779_v5 = vadd.f32 %v2778_v60, %v2716_v14  ;;  %v1508_v11 = vadd.f32 %v1507_v1, %v1065_v62  ;;  %v2720_v31 = vmul.f32 %v3902_v61, %v3902_v61 }
 0x150   :  { %v2718_v7 = vmul.f32 %v2202_v3, %v2202_v3  ;;  %v3385_v8 = vpack.c.bf16 %v3823_v4, %v3822_v57  ;;  %v3903_v9 = vpop.f32.mrb[46].mxu1  ;;  %v1068_v10 = vpop.f32.mrb[47].mxu0  ;;  %v1643_v12 = vadd.f32 %v1642_v0, %v1580_v58  ;;  %v2645_v17 = vadd.f32 %v2644_v6, %v2202_v3 }
 0x151   :  { %v3545_v15 = vpack.c.bf16 %v3903_v9, %v3902_v61  ;;  %v2205_v16 = vpop.f32.mrb[47].mxu1  ;;  %v2780_v18 = vadd.f32 %v2779_v5, %v2717_v63  ;;  %v3380_v19 = vpack.c.bf16 %v1068_v10, %v1065_v62  ;;  %v1509_v21 = vadd.f32 %v1508_v11, %v1068_v10 }
 0x152   :  { %3640 = vst [vmem:[%s4644_s6 + $0xb8] sm:$0xff] %v3385_v8   ;;  %v1644_v20 = vadd.f32 %v1643_v12, %v1581_v2  ;;  %v1582_v22 = vmul.f32 %v1068_v10, %v1068_v10  ;;  %v3540_v23 = vpack.c.bf16 %v2205_v16, %v2202_v3  ;;  %v2646_v25 = vadd.f32 %v2645_v17, %v2205_v16 }
 0x153   :  { %3671 = vst [vmem:[%s4645_s9 + $0xb8] sm:$0xff] %v3545_v15   ;;  %v2781_v24 = vadd.f32 %v2780_v18, %v2718_v7  ;;  %3639 = vst [vmem:[%s4644_s6 + $0xb0] sm:$0xff] %v3380_v19   ;;  %v2719_v26 = vmul.f32 %v2205_v16, %v2205_v16  ;;  %v1510_v28 = vadd.f32 %v3822_v57, %v1509_v21 }
 0x154   :  { %v1645_v29 = vadd.f32 %v1644_v20, %v1582_v22  ;;  %3670 = vst [vmem:[%s4645_s9 + $0xb0] sm:$0xff] %v3540_v23   ;;  %v1584_v32 = vmul.f32 %v3823_v4, %v3823_v4  ;;  %v2647_v33 = vadd.f32 %v3902_v61, %v2646_v25  ;;  %v2721_v37 = vmul.f32 %v3903_v9, %v3903_v9 }
 0x155   :  { %v3826_v30 = vpop.f32.mrb[48].mxu0  ;;  %v2782_v34 = vadd.f32 %v2781_v24, %v2719_v26  ;;  %v1511_v39 = vadd.f32 %v3823_v4, %v1510_v28 }
 0x156   :  { %v3906_v35 = vpop.f32.mrb[48].mxu1  ;;  %v1081_v36 = vpop.f32.mrb[49].mxu0  ;;  %v1646_v38 = vadd.f32 %v1645_v29, %v1583_v27  ;;  %v2648_v44 = vadd.f32 %v3903_v9, %v2647_v33  ;;  %v1587_v61 = vmul.f32 %v3826_v30, %v3826_v30 }
 0x157   :  { %v1585_v40 = vmul.f32 %v1081_v36, %v1081_v36  ;;  %v2218_v41 = vpop.f32.mrb[49].mxu1  ;;  %v3827_v42 = vpop.f32.mrb[50].mxu0  ;;  %v2783_v43 = vadd.f32 %v2782_v34, %v2720_v31  ;;  %v1512_v49 = vadd.f32 %v1511_v39, %v1081_v36  ;;  %v2724_v1 = vmul.f32 %v3906_v35, %v3906_v35 }
 0x158   :  { %v2722_v45 = vmul.f32 %v2218_v41, %v2218_v41  ;;  %v3395_v46 = vpack.c.bf16 %v3827_v42, %v3826_v30  ;;  %v3907_v47 = vpop.f32.mrb[50].mxu1  ;;  %v1084_v48 = vpop.f32.mrb[51].mxu0  ;;  %v1647_v50 = vadd.f32 %v1646_v38, %v1584_v32  ;;  %v2649_v53 = vadd.f32 %v2648_v44, %v2218_v41 }
 0x159   :  { %v3555_v51 = vpack.c.bf16 %v3907_v47, %v3906_v35  ;;  %v2221_v52 = vpop.f32.mrb[51].mxu1  ;;  %v2784_v54 = vadd.f32 %v2783_v43, %v2721_v37  ;;  %v3390_v55 = vpack.c.bf16 %v1084_v48, %v1081_v36  ;;  %v1513_v56 = vadd.f32 %v1512_v49, %v1084_v48 }
 0x15a   :  { %3642 = vst [vmem:[%s4644_s6 + $0xc8] sm:$0xff] %v3395_v46   ;;  %v1648_v13 = vadd.f32 %v1647_v50, %v1585_v40  ;;  %v1586_v57 = vmul.f32 %v1084_v48, %v1084_v48  ;;  %v3550_v14 = vpack.c.bf16 %v2221_v52, %v2218_v41  ;;  %v2650_v59 = vadd.f32 %v2649_v53, %v2221_v52 }
 0x15b   :  { %3673 = vst [vmem:[%s4645_s9 + $0xc8] sm:$0xff] %v3555_v51   ;;  %v2785_v58 = vadd.f32 %v2784_v54, %v2722_v45  ;;  %3641 = vst [vmem:[%s4644_s6 + $0xc0] sm:$0xff] %v3390_v55   ;;  %v2723_v60 = vmul.f32 %v2221_v52, %v2221_v52  ;;  %v1514_v62 = vadd.f32 %v3826_v30, %v1513_v56 }
 0x15c   :  { %v1649_v63 = vadd.f32 %v1648_v13, %v1586_v57  ;;  %3672 = vst [vmem:[%s4645_s9 + $0xc0] sm:$0xff] %v3550_v14   ;;  %v1588_v2 = vmul.f32 %v3827_v42, %v3827_v42  ;;  %v2651_v3 = vadd.f32 %v3906_v35, %v2650_v59  ;;  %v2725_v7 = vmul.f32 %v3907_v47, %v3907_v47 }
 0x15d   :  { %v3830_v0 = vpop.f32.mrb[52].mxu0  ;;  %v2786_v4 = vadd.f32 %v2785_v58, %v2723_v60  ;;  %v1515_v9 = vadd.f32 %v3827_v42, %v1514_v62 }
 0x15e   :  { %v3910_v5 = vpop.f32.mrb[52].mxu1  ;;  %v1097_v6 = vpop.f32.mrb[53].mxu0  ;;  %v1650_v8 = vadd.f32 %v1649_v63, %v1587_v61  ;;  %v2652_v16 = vadd.f32 %v3907_v47, %v2651_v3  ;;  %v1591_v35 = vmul.f32 %v3830_v0, %v3830_v0 }
 0x15f   :  { %v1589_v10 = vmul.f32 %v1097_v6, %v1097_v6  ;;  %v2234_v11 = vpop.f32.mrb[53].mxu1  ;;  %v3831_v12 = vpop.f32.mrb[54].mxu0  ;;  %v2787_v15 = vadd.f32 %v2786_v4, %v2724_v1  ;;  %v1516_v21 = vadd.f32 %v1515_v9, %v1097_v6  ;;  %v2728_v39 = vmul.f32 %v3910_v5, %v3910_v5 }
 0x160   :  { %v2726_v17 = vmul.f32 %v2234_v11, %v2234_v11  ;;  %v3405_v18 = vpack.c.bf16 %v3831_v12, %v3830_v0  ;;  %v3911_v19 = vpop.f32.mrb[54].mxu1  ;;  %v1100_v20 = vpop.f32.mrb[55].mxu0  ;;  %v1651_v22 = vadd.f32 %v1650_v8, %v1588_v2  ;;  %v2653_v25 = vadd.f32 %v2652_v16, %v2234_v11 }
 0x161   :  { %v3565_v23 = vpack.c.bf16 %v3911_v19, %v3910_v5  ;;  %v2237_v24 = vpop.f32.mrb[55].mxu1  ;;  %v2788_v26 = vadd.f32 %v2787_v15, %v2725_v7  ;;  %v3400_v27 = vpack.c.bf16 %v1100_v20, %v1097_v6  ;;  %v1517_v29 = vadd.f32 %v1516_v21, %v1100_v20 }
 0x162   :  { %3644 = vst [vmem:[%s4644_s6 + $0xd8] sm:$0xff] %v3405_v18   ;;  %v1652_v28 = vadd.f32 %v1651_v22, %v1589_v10  ;;  %v1590_v30 = vmul.f32 %v1100_v20, %v1100_v20  ;;  %v3560_v31 = vpack.c.bf16 %v2237_v24, %v2234_v11  ;;  %v2654_v33 = vadd.f32 %v2653_v25, %v2237_v24 }
 0x163   :  { %3675 = vst [vmem:[%s4645_s9 + $0xd8] sm:$0xff] %v3565_v23   ;;  %v2789_v32 = vadd.f32 %v2788_v26, %v2726_v17  ;;  %3643 = vst [vmem:[%s4644_s6 + $0xd0] sm:$0xff] %v3400_v27   ;;  %v2727_v34 = vmul.f32 %v2237_v24, %v2237_v24  ;;  %v1518_v36 = vadd.f32 %v3830_v0, %v1517_v29 }
 0x164   :  { %v1653_v37 = vadd.f32 %v1652_v28, %v1590_v30  ;;  %3674 = vst [vmem:[%s4645_s9 + $0xd0] sm:$0xff] %v3560_v31   ;;  %v1592_v40 = vmul.f32 %v3831_v12, %v3831_v12  ;;  %v2655_v41 = vadd.f32 %v3910_v5, %v2654_v33  ;;  %v2729_v45 = vmul.f32 %v3911_v19, %v3911_v19 }
 0x165   :  { %v3834_v38 = vpop.f32.mrb[56].mxu0  ;;  %v2790_v42 = vadd.f32 %v2789_v32, %v2727_v34  ;;  %v1519_v47 = vadd.f32 %v3831_v12, %v1518_v36 }
 0x166   :  { %v3914_v43 = vpop.f32.mrb[56].mxu1  ;;  %v1113_v44 = vpop.f32.mrb[57].mxu0  ;;  %v1654_v46 = vadd.f32 %v1653_v37, %v1591_v35  ;;  %v2656_v52 = vadd.f32 %v3911_v19, %v2655_v41  ;;  %v1595_v5 = vmul.f32 %v3834_v38, %v3834_v38 }
 0x167   :  { %v1593_v48 = vmul.f32 %v1113_v44, %v1113_v44  ;;  %v2250_v49 = vpop.f32.mrb[57].mxu1  ;;  %v3835_v50 = vpop.f32.mrb[58].mxu0  ;;  %v2791_v51 = vadd.f32 %v2790_v42, %v2728_v39  ;;  %v1520_v56 = vadd.f32 %v1519_v47, %v1113_v44  ;;  %v2732_v9 = vmul.f32 %v3914_v43, %v3914_v43 }
 0x168   :  { %v2730_v53 = vmul.f32 %v2250_v49, %v2250_v49  ;;  %v3415_v54 = vpack.c.bf16 %v3835_v50, %v3834_v38  ;;  %v3915_v55 = vpop.f32.mrb[58].mxu1  ;;  %v1116_v13 = vpop.f32.mrb[59].mxu0  ;;  %v1655_v57 = vadd.f32 %v1654_v46, %v1592_v40  ;;  %v2657_v59 = vadd.f32 %v2656_v52, %v2250_v49 }
 0x169   :  { %v3575_v14 = vpack.c.bf16 %v3915_v55, %v3914_v43  ;;  %v2253_v58 = vpop.f32.mrb[59].mxu1  ;;  %v2792_v60 = vadd.f32 %v2791_v51, %v2729_v45  ;;  %v3410_v61 = vpack.c.bf16 %v1116_v13, %v1113_v44  ;;  %v1521_v63 = vadd.f32 %v1520_v56, %v1116_v13 }
 0x16a   :  { %3646 = vst [vmem:[%s4644_s6 + $0xe8] sm:$0xff] %v3415_v54   ;;  %v1656_v62 = vadd.f32 %v1655_v57, %v1593_v48  ;;  %v1594_v0 = vmul.f32 %v1116_v13, %v1116_v13  ;;  %v3570_v1 = vpack.c.bf16 %v2253_v58, %v2250_v49  ;;  %v2658_v3 = vadd.f32 %v2657_v59, %v2253_v58 }
 0x16b   :  { %3677 = vst [vmem:[%s4645_s9 + $0xe8] sm:$0xff] %v3575_v14   ;;  %v2793_v2 = vadd.f32 %v2792_v60, %v2730_v53  ;;  %3645 = vst [vmem:[%s4644_s6 + $0xe0] sm:$0xff] %v3410_v61   ;;  %v2731_v4 = vmul.f32 %v2253_v58, %v2253_v58  ;;  %v1522_v6 = vadd.f32 %v3834_v38, %v1521_v63 }
 0x16c   :  { %v1657_v7 = vadd.f32 %v1656_v62, %v1594_v0  ;;  %3676 = vst [vmem:[%s4645_s9 + $0xe0] sm:$0xff] %v3570_v1   ;;  %v1596_v10 = vmul.f32 %v3835_v50, %v3835_v50  ;;  %v2659_v11 = vadd.f32 %v3914_v43, %v2658_v3  ;;  %v2733_v17 = vmul.f32 %v3915_v55, %v3915_v55 }
 0x16d   :  { %v3838_v8 = vpop.f32.mrb[60].mxu0  ;;  %v2794_v12 = vadd.f32 %v2793_v2, %v2731_v4  ;;  %v1523_v19 = vadd.f32 %v3835_v50, %v1522_v6 }
 0x16e   :  { %v3918_v15 = vpop.f32.mrb[60].mxu1  ;;  %v1129_v16 = vpop.f32.mrb[61].mxu0  ;;  %v1658_v18 = vadd.f32 %v1657_v7, %v1595_v5  ;;  %v2660_v24 = vadd.f32 %v3915_v55, %v2659_v11  ;;  %v1599_v43 = vmul.f32 %v3838_v8, %v3838_v8  ;;  %v1464_v7 = vld [vmem:[%s4642_s7] sm:$0x1] }
 0x16f   :  { %v1597_v20 = vmul.f32 %v1129_v16, %v1129_v16  ;;  %v2266_v21 = vpop.f32.mrb[61].mxu1  ;;  %v3839_v22 = vpop.f32.mrb[62].mxu0  ;;  %v2795_v23 = vadd.f32 %v2794_v12, %v2732_v9  ;;  %v1524_v29 = vadd.f32 %v1523_v19, %v1129_v16  ;;  %v2736_v46 = vmul.f32 %v3918_v15, %v3918_v15  ;;  %v2601_v12 = vld [vmem:[%s4646_s10] sm:$0x1] }
 0x170   :  { %v2734_v25 = vmul.f32 %v2266_v21, %v2266_v21  ;;  %v3425_v26 = vpack.c.bf16 %v3839_v22, %v3838_v8  ;;  %v3919_v27 = vpop.f32.mrb[62].mxu1  ;;  %v1132_v28 = vpop.f32.mrb[63].mxu0  ;;  %v1659_v30 = vadd.f32 %v1658_v18, %v1596_v10  ;;  %v2661_v33 = vadd.f32 %v2660_v24, %v2266_v21 }
 0x171   :  { %v3585_v31 = vpack.c.bf16 %v3919_v27, %v3918_v15  ;;  %v2269_v32 = vpop.f32.mrb[63].mxu1  ;;  %v2796_v34 = vadd.f32 %v2795_v23, %v2733_v17  ;;  %v3420_v35 = vpack.c.bf16 %v1132_v28, %v1129_v16  ;;  %v1525_v37 = vadd.f32 %v1524_v29, %v1132_v28 }
 0x172   :  { %3648 = vst [vmem:[%s4644_s6 + $0xf8] sm:$0xff] %v3425_v26   ;;  %v1660_v36 = vadd.f32 %v1659_v30, %v1597_v20  ;;  %v1598_v38 = vmul.f32 %v1132_v28, %v1132_v28  ;;  %v3580_v39 = vpack.c.bf16 %v2269_v32, %v2266_v21  ;;  %v2662_v41 = vadd.f32 %v2661_v33, %v2269_v32  ;;  %v2673_v20 = vld [vmem:[%s4647_s11] sm:$0x1] }
 0x173   :  { %3679 = vst [vmem:[%s4645_s9 + $0xf8] sm:$0xff] %v3585_v31   ;;  %v2797_v40 = vadd.f32 %v2796_v34, %v2734_v25  ;;  %3647 = vst [vmem:[%s4644_s6 + $0xf0] sm:$0xff] %v3420_v35   ;;  %v2735_v42 = vmul.f32 %v2269_v32, %v2269_v32  ;;  %v1526_v44 = vadd.f32 %v3838_v8, %v1525_v37 }
 0x174   :  { %v1661_v45 = vadd.f32 %v1660_v36, %v1598_v38  ;;  %3678 = vst [vmem:[%s4645_s9 + $0xf0] sm:$0xff] %v3580_v39   ;;  %v2663_v47 = vadd.f32 %v3918_v15, %v2662_v41  ;;  %v1600_v49 = vmul.f32 %v3839_v22, %v3839_v22  ;;  %v2737_v52 = vmul.f32 %v3919_v27, %v3919_v27  ;;  %v1536_v15 = vld [vmem:[%s4643_s8] sm:$0x1] }
 0x175   :  { %v2798_v48 = vadd.f32 %v2797_v40, %v2735_v42  ;;  %v1527_v50 = vadd.f32 %v3839_v22, %v1526_v44 }
 0x176   :  { %v1662_v51 = vadd.f32 %v1661_v45, %v1599_v43  ;;  %v2664_v53 = vadd.f32 %v3919_v27, %v2663_v47 }
 0x177   :  { %v2799_v54 = vadd.f32 %v2798_v48, %v2736_v46  ;;  %v1528_v55 = vrot.slane %v1527_v50, 4 }
 0x178   :  { %v1663_v13 = vadd.f32 %v1662_v51, %v1600_v49  ;;  %v2665_v56 = vrot.slane %v2664_v53, 4 }
 0x179   :  { %v2800_v57 = vadd.f32 %v2799_v54, %v2737_v52  ;;  %v1529_v14 = vadd.f32 %v1528_v55, %v1527_v50 }
 0x17a   :  { %v1664_v58 = vrot.slane %v1663_v13, 4  ;;  %v2666_v59 = vadd.f32 %v2665_v56, %v2664_v53 }
 0x17b   :  { %v2801_v60 = vrot.slane %v2800_v57, 4  ;;  %v1530_v61 = vrot.slane %v1529_v14, 2 }
 0x17c   :  { %v1665_v62 = vadd.f32 %v1664_v58, %v1663_v13  ;;  %v2667_v63 = vrot.slane %v2666_v59, 2 }
 0x17d   :  { %v2802_v0 = vadd.f32 %v2801_v60, %v2800_v57  ;;  %v1531_v1 = vadd.f32 %v1530_v61, %v1529_v14 }
 0x17e   :  { %v1666_v2 = vrot.slane %v1665_v62, 2  ;;  %v2668_v3 = vadd.f32 %v2667_v63, %v2666_v59 }
 0x17f   :  { %v2803_v4 = vrot.slane %v2802_v0, 2  ;;  %v1532_v5 = vrot.slane %v1531_v1, 1 }
 0x180   :  { %v1667_v6 = vadd.f32 %v1666_v2, %v1665_v62  ;;  %v2669_v8 = vrot.slane %v2668_v3, 1 }
 0x181   :  { %v2804_v9 = vadd.f32 %v2803_v4, %v2802_v0  ;;  %v1533_v10 = vadd.f32 %v1532_v5, %v1531_v1 }
 0x182   :  { %v1668_v11 = vrot.slane %v1667_v6, 1  ;;  %v2670_v16 = vadd.f32 %v2669_v8, %v2668_v3 }
 0x183   :  { %v2805_v17 = vrot.slane %v2804_v9, 1  ;;  %v1534_v18 = vadd.f32 %v1533_v10, %v1464_v7 }
 0x184   :  { %v1669_v19 = vadd.f32 %v1668_v11, %v1667_v6  ;;  %v2671_v21 = vadd.f32 %v2670_v16, %v2601_v12 }
 0x185   :  { %v2806_v22 = vadd.f32 %v2805_v17, %v2804_v9  ;;  %1535 = vst [vmem:[%s4642_s7] sm:$0x1] %v1534_v18 }
 0x186   :  { %v1670_v23 = vadd.f32 %v1669_v19, %v1536_v15  ;;  %2672 = vst [vmem:[%s4646_s10] sm:$0x1] %v2671_v21 }
 0x187   :  { %v2807_v24 = vadd.f32 %v2806_v22, %v2673_v20 }
 0x188   :  { %1671 = vst [vmem:[%s4643_s8] sm:$0x1] %v1670_v23 }
 0x189   :  { %2808 = vst [vmem:[%s4647_s11] sm:$0x1] %v2807_v24 }

// kernel: bottleneck_block_forward.5
= control target key start
LH: loop header
LB: loop body
LE: loop exit
PB: predicated region body
PF: predicated region fallthrough
CT: control target
= control target key end

     0   :  { %s6145_s21 = smov 0   ;;  %s6909_s0 = inlined_call_operand.vmem [shape: bf16[512,128], index: 0, kind: input, shape index: {}]   ;;  %s6910_s1 = inlined_call_operand.vmem [shape: f32[1,128], index: 1, kind: input, shape index: {}]   ;;  %s6911_s2 = inlined_call_operand.vmem [shape: f32[1,128], index: 2, kind: input, shape index: {}]   ;;  %s6912_s3 = inlined_call_operand.vmem [shape: bf16[3,3,128,128], index: 3, kind: input, shape index: {}]   ;;  %s6913_s4 = inlined_call_operand.vmem [shape: bf16[512,128], index: 4, kind: output, shape index: {0}]   ;;  %s6914_s5 = inlined_call_operand.vmem [shape: f32[1,128], index: 5, kind: output, shape index: {1}]   ;;  %s6915_s6 = inlined_call_operand.vmem [shape: f32[1,128], index: 6, kind: output, shape index: {2}]  }
   0x1 LB: > { %s4636_s22 = sadd.s32 4294967295, %s6106_s21   ;;  %p4640_p0 = scmp.ge.s32.totalorder %s6106_s21, 1  ;;  %s6106_s21 = sphi %s6145_s21, %s17_s21  }
   0x2   : > { %p208_p1 = scmp.lt.s32.totalorder %s6106_s21, 3 }
   0x4   : > { %p209_p2 = pnand %p4640_p0, %p208_p1 }
   0x6   : > { %212 = sbr.rel (%p209_p2) target bundleno = 605 (0x25d), region = 36 }
   0xd   : > { %s4641_s23 = sshll.u32 %s4636_s22, 5  ;;  %p4645_p4 = scmp.ne.s32.totalorder %s4636_s22, 0 }
   0xe   : > { %p239_p3 = scmp.lt.s32.totalorder %s4641_s23, 63  ;;  %v6108_v0 = vmov (!%p4645_p4), 0.0   ;;  %v6109_v1 = vmov (!%p4645_p4), 0  }
   0xf   : > { %254 = sbr.rel (%p4645_p4) target bundleno = 34 (0x22), region = 40  ;;  %255 = vst [vmem:[%s6914_s5] sm:$0x1] (!%p4645_p4), %v6108_v0  ;;  %256 = vst [vmem:[%s6915_s6] sm:$0x1] (!%p4645_p4), %v6108_v0 }
  0x10   : > { %s6944_s23 = smov (!%p239_p3, %s4641_s23), 63  ;;  %257 = vst [vmem:[#allocation2] sm:$0xff] (!%p4645_p4), %v6109_v1  ;;  %258 = vst [vmem:[#allocation2 + $0x8] sm:$0xff] (!%p4645_p4), %v6109_v1 }
  0x11   : > { %s4642_s24 = sshll.u32 %s6944_s23, 2  ;;  %259 = vst [vmem:[#allocation2 + $0x10] sm:$0xff] (!%p4645_p4), %v6109_v1  ;;  %260 = vst [vmem:[#allocation2 + $0x18] sm:$0xff] (!%p4645_p4), %v6109_v1 }
  0x12   : > { %s6156_s27 = scalar_lea.vmem %s6909_s0, %s4642_s24  ;;  %s6161_s30 = scalar_lea.vmem %s6913_s4, %s4642_s24  ;;  %261 = vst [vmem:[#allocation2 + $0x20] sm:$0xff] (!%p4645_p4), %v6109_v1  ;;  %262 = vst [vmem:[#allocation2 + $0x28] sm:$0xff] (!%p4645_p4), %v6109_v1 }
  0x13   : > { %263 = vst [vmem:[#allocation2 + $0x30] sm:$0xff] (!%p4645_p4), %v6109_v1  ;;  %264 = vst [vmem:[#allocation2 + $0x38] sm:$0xff] (!%p4645_p4), %v6109_v1 }
  0x14   : > { %265 = vst [vmem:[#allocation2 + $0x40] sm:$0xff] (!%p4645_p4), %v6109_v1  ;;  %266 = vst [vmem:[#allocation2 + $0x48] sm:$0xff] (!%p4645_p4), %v6109_v1 }
  0x15   : > { %267 = vst [vmem:[#allocation2 + $0x50] sm:$0xff] (!%p4645_p4), %v6109_v1  ;;  %268 = vst [vmem:[#allocation2 + $0x58] sm:$0xff] (!%p4645_p4), %v6109_v1 }
  0x16   : > { %269 = vst [vmem:[#allocation2 + $0x60] sm:$0xff] %v6109_v1  ;;  %270 = vst [vmem:[#allocation2 + $0x68] sm:$0xff] %v6109_v1 }
  0x17   : > { %271 = vst [vmem:[#allocation2 + $0x70] sm:$0xff] %v6109_v1  ;;  %272 = vst [vmem:[#allocation2 + $0x78] sm:$0xff] %v6109_v1 }
  0x18   : > { %273 = vst [vmem:[#allocation2 + $0x80] sm:$0xff] %v6109_v1  ;;  %274 = vst [vmem:[#allocation2 + $0x88] sm:$0xff] %v6109_v1 }
  0x19   : > { %275 = vst [vmem:[#allocation2 + $0x90] sm:$0xff] %v6109_v1  ;;  %276 = vst [vmem:[#allocation2 + $0x98] sm:$0xff] %v6109_v1 }
  0x1a   : > { %277 = vst [vmem:[#allocation2 + $0xa0] sm:$0xff] %v6109_v1  ;;  %278 = vst [vmem:[#allocation2 + $0xa8] sm:$0xff] %v6109_v1 }
  0x1b   : > { %279 = vst [vmem:[#allocation2 + $0xb0] sm:$0xff] %v6109_v1  ;;  %280 = vst [vmem:[#allocation2 + $0xb8] sm:$0xff] %v6109_v1 }
  0x1c   : > { %281 = vst [vmem:[#allocation2 + $0xc0] sm:$0xff] %v6109_v1  ;;  %282 = vst [vmem:[#allocation2 + $0xc8] sm:$0xff] %v6109_v1 }
  0x1d   : > { %283 = vst [vmem:[#allocation2 + $0xd0] sm:$0xff] %v6109_v1  ;;  %284 = vst [vmem:[#allocation2 + $0xd8] sm:$0xff] %v6109_v1 }
  0x1e   : > { %285 = vst [vmem:[#allocation2 + $0xe0] sm:$0xff] %v6109_v1  ;;  %286 = vst [vmem:[#allocation2 + $0xe8] sm:$0xff] %v6109_v1 }
  0x1f   : > { %287 = vst [vmem:[#allocation2 + $0xf0] sm:$0xff] %v6109_v1  ;;  %288 = vst [vmem:[#allocation2 + $0xf8] sm:$0xff] %v6109_v1 }
  0x20   : > { %289 = vst [vmem:[#allocation2 + $0x100] sm:$0xff] %v6109_v1  ;;  %290 = vst [vmem:[#allocation2 + $0x108] sm:$0xff] %v6109_v1 }
  0x21   : > { %291 = vst [vmem:[#allocation2 + $0x110] sm:$0xff] %v6109_v1  ;;  %292 = vst [vmem:[#allocation2 + $0x118] sm:$0xff] %v6109_v1 }
  0x22 PF: > { %v6018_v2 = vld [vmem:[%s6912_s3] sm:$0xff]   ;;  %v6020_v4 = vld [vmem:[%s6912_s3 + $0x8] sm:$0xff]   ;;  %v6022_v6 = vld [vmem:[%s6912_s3 + $0x10] sm:$0xff]   ;;  %vm600_vm0 = vsmask.f32 4352  ;;  %vm1898_vm1 = vcmask 1043456  }
  0x23   : > { %v6019_v3 = vld [vmem:[%s6912_s3 + $0x100] sm:$0xff]   ;;  %5304 = vmatprep.subr.bf16.mxu1 %v6018_v2  ;;  %v6021_v5 = vld [vmem:[%s6912_s3 + $0x108] sm:$0xff]   ;;  %v6023_v7 = vld [vmem:[%s6912_s3 + $0x110] sm:$0xff]   ;;  %vm2973_vm2 = vsmask.f32 3328 }
  0x24   : > { %5496 = vmatprep.subr.bf16.mxu0 %v6019_v3  ;;  %5305 = vmatpush3.bf16.msra.mxu1 %v6018_v2  ;;  %v6024_v8 = vld [vmem:[%s6912_s3 + $0x18] sm:$0xff]   ;;  %v6026_v10 = vld [vmem:[%s6912_s3 + $0x20] sm:$0xff]   ;;  %v6028_v12 = vld [vmem:[%s6912_s3 + $0x28] sm:$0xff]  }
  0x25   : > { %5497 = vmatpush3.bf16.msra.mxu0 %v6019_v3  ;;  %5306 = vmatprep.subr.bf16.mxu1 %v6020_v4  ;;  %v6025_v9 = vld [vmem:[%s6912_s3 + $0x118] sm:$0xff]   ;;  %v6027_v11 = vld [vmem:[%s6912_s3 + $0x120] sm:$0xff]   ;;  %v565_v14 = vld [vmem:[#allocation2 + $0x8] sm:$0xf] }
  0x26   : > { %5498 = vmatprep.subr.bf16.mxu0 %v6021_v5  ;;  %v564_v13 = vld [vmem:[#allocation2] sm:$0xf8]  ;;  %v6029_v15 = vld [vmem:[%s6912_s3 + $0x128] sm:$0xff]   ;;  %v610_v18 = vshrl.u32 %v565_v14, 16  ;;  %v613_v19 = vshll.u32 %v565_v14, 16  ;;  %v6030_v21 = vld [vmem:[%s6912_s3 + $0x30] sm:$0xff]  }
  0x27   : > { %v602_v16 = vshrl.u32 %v564_v13, 16  ;;  %v605_v17 = vshll.u32 %v564_v13, 16  ;;  %v4915_v20 = vld [vmem:[%s6156_s27] sm:$0xff]   ;;  %v5058_v32 = vld [vmem:[%s6156_s27 + $0x8] sm:$0xff]   ;;  %v6031_v33 = vld [vmem:[%s6912_s3 + $0x130] sm:$0xff]  }
  0x28   : > { %5307 = vmatpush3.bf16.msra.mxu1 %v6020_v4  ;;  %v4916_v22 = vunpack.c.l.bf16 %v4915_v20  ;;  %v4917_v23 = vunpack.c.h.bf16 %v4915_v20  ;;  %v6212_v24 = vld [vmem:[%s6910_s1] ss:$0 sm:$0xff]  ;;  %v612_v28 = vrot.slane %v610_v18, 3  ;;  %v615_v29 = vrot.slane %v613_v19, 4  ;;  %v5059_v40 = vld [vmem:[%s6156_s27 + $0x10] sm:$0xff]   ;;  %v6032_v41 = vld [vmem:[%s6912_s3 + $0x38] sm:$0xff]  }
  0x29   : > { %5499 = vmatpush3.bf16.msra.mxu0 %v6021_v5  ;;  %5308 = vmatprep.subr.bf16.mxu1 %v6022_v6  ;;  %v6217_v25 = vld [vmem:[%s6911_s2] ss:$0 sm:$0xff]  ;;  %v604_v26 = vrot.slane %v602_v16, 3  ;;  %v607_v27 = vrot.slane %v605_v17, 4  ;;  %v4920_v36 = vunpack.c.l.bf16 %v5058_v32  ;;  %v4921_v37 = vunpack.c.h.bf16 %v5058_v32  ;;  %v5060_v46 = vld [vmem:[%s6156_s27 + $0x18] sm:$0xff]   ;;  %v5062_v0 = vld [vmem:[%s6156_s27 + $0x28] sm:$0xff]  }
  0x2a   : > { %5500 = vmatprep.subr.bf16.mxu0 %v6023_v7  ;;  %v364_v30 = vmul.f32 %v4916_v22, %v6212_v24  ;;  %v365_v31 = vmul.f32 %v4917_v23, %v6212_v24  ;;  %v616_v35 = vor.u32 %v615_v29, %v612_v28  ;;  %v4924_v45 = vunpack.c.l.bf16 %v5059_v40  ;;  %v6033_v51 = vld [vmem:[%s6912_s3 + $0x138] sm:$0xff]   ;;  %v5061_v59 = vld [vmem:[%s6156_s27 + $0x20] sm:$0xff]  }
  0x2b   : > { %v608_v34 = vor.u32 %v607_v27, %v604_v26  ;;  %v366_v43 = vmul.f32 %v4920_v36, %v6212_v24  ;;  %v367_v44 = vmul.f32 %v4921_v37, %v6212_v24  ;;  %v4925_v49 = vunpack.c.h.bf16 %v5059_v40  ;;  %v6250_v2 = vld [vmem:[%s6912_s3 + $0xc0] sm:$0xff]  }
  0x2c   : > { %5309 = vmatpush3.bf16.msra.mxu1 %v6022_v6  ;;  %v403_v38 = vadd.f32 %v6217_v25, %v364_v30  ;;  %v404_v39 = vadd.f32 %v6217_v25, %v365_v31  ;;  %v4928_v50 = vunpack.c.l.bf16 %v5060_v46  ;;  %v368_v54 = vmul.f32 %v4924_v45, %v6212_v24  ;;  %v6270_v30 = vld [vmem:[%s6156_s27 + $0x38] sm:$0xff]   ;;  %v6273_v31 = vld [vmem:[%s6156_s27 + $0x40] sm:$0xff]  }
  0x2d   : > { %5501 = vmatpush3.bf16.msra.mxu0 %v6023_v7  ;;  %5310 = vmatprep.subr.bf16.mxu1 %v6024_v8  ;;  %v617_v42 = vsel %vm600_vm0, %v608_v34, %v616_v35  ;;  %v405_v52 = vadd.f32 %v6217_v25, %v366_v43  ;;  %v406_v53 = vadd.f32 %v6217_v25, %v367_v44  ;;  %v4929_v55 = vunpack.c.h.bf16 %v5060_v46  ;;  %v6257_v7 = vld [vmem:[%s6912_s3 + $0x1c0] sm:$0xff]  }
  0x2e   : > { %5502 = vmatprep.subr.bf16.mxu0 %v6025_v9  ;;  %v435_v47 = vmax.f32 %v403_v38, 0.0  ;;  %v436_v48 = vmax.f32 %v404_v39, 0.0  ;;  %5320 = vmatprep.mubr.bf16.mxu1 %v617_v42  ;;  %v369_v57 = vmul.f32 %v4925_v49, %v6212_v24  ;;  %v370_v58 = vmul.f32 %v4928_v50, %v6212_v24 }
  0x2f   : > { %v437_v60 = vmax.f32 %v405_v52, 0.0  ;;  %v438_v61 = vmax.f32 %v406_v53, 0.0  ;;  %v407_v62 = vadd.f32 %v6217_v25, %v368_v54  ;;  %v371_v63 = vmul.f32 %v4929_v55, %v6212_v24 }
  0x30   : > { %5311 = vmatpush3.bf16.msra.mxu1 %v6024_v8  ;;  %v467_v56 = vpack.c.bf16 %v436_v48, %v435_v47  ;;  %v408_v3 = vadd.f32 %v6217_v25, %v369_v57  ;;  %v409_v4 = vadd.f32 %v6217_v25, %v370_v58  ;;  %v4932_v5 = vunpack.c.l.bf16 %v5061_v59 }
  0x31   : > { %5503 = vmatpush3.bf16.msra.mxu0 %v6025_v9  ;;  %5312 = vmatprep.subr.bf16.mxu1 %v6026_v10  ;;  %v468_v6 = vpack.c.bf16 %v438_v61, %v437_v60  ;;  %v439_v8 = vmax.f32 %v407_v62, 0.0  ;;  %v410_v9 = vadd.f32 %v6217_v25, %v371_v63  ;;  %v4936_v14 = vunpack.c.l.bf16 %v5062_v0 }
  0x32   : > { %5504 = vmatprep.subr.bf16.mxu0 %v6027_v11  ;;  %v499_v1 = vrot.slane %v467_v56, 4  ;;  %v372_v13 = vmul.f32 %v4932_v5, %v6212_v24  ;;  %v4937_v19 = vunpack.c.h.bf16 %v5062_v0  ;;  %v4944_v42 = vunpack.c.l.bf16 %v6270_v30 }
  0x33   : > { %v500_v16 = vrot.slane %v468_v6, 4  ;;  %v442_v17 = vmax.f32 %v410_v9, 0.0  ;;  %v374_v22 = vmul.f32 %v4936_v14, %v6212_v24  ;;  %v4945_v43 = vunpack.c.h.bf16 %v6270_v30  ;;  %v6037_v14 = vld [vmem:[%s6912_s3 + $0xc8] sm:$0xff]   ;;  %v5067_v30 = vld [vmem:[%s6156_s27 + $0x50] sm:$0xff]  }
  0x34   : > { %5313 = vmatpush3.bf16.msra.mxu1 %v6026_v10  ;;  %v4933_v10 = vunpack.c.h.bf16 %v5061_v59  ;;  %532 = vst [vmem:[#allocation2 + $0x18] ss:$-4 sps:$4 sm:$0xff] %v499_v1   ;;  %v375_v28 = vmul.f32 %v4937_v19, %v6212_v24  ;;  %v4948_v49 = vunpack.c.l.bf16 %v6273_v31  ;;  %v4949_v50 = vunpack.c.h.bf16 %v6273_v31  ;;  %v6036_v1 = vld [vmem:[%s6912_s3 + $0x1c8] sm:$0xff]  }
  0x35   : > { %5505 = vmatpush3.bf16.msra.mxu0 %v6027_v11  ;;  %5314 = vmatprep.subr.bf16.mxu1 %v6028_v12  ;;  %v440_v11 = vmax.f32 %v408_v3, 0.0  ;;  %534 = vst [vmem:[#allocation2 + $0x28] ss:$-4 sps:$4 sm:$0xff] %v500_v16   ;;  %v413_v34 = vadd.f32 %v6217_v25, %v374_v22  ;;  %v6296_v3 = vmul.f32 %v4944_v42, %v6212_v24 }
  0x36   : > { %5506 = vmatprep.subr.bf16.mxu0 %v6029_v15  ;;  %v373_v18 = vmul.f32 %v4933_v10, %v6212_v24  ;;  %v414_v38 = vadd.f32 %v6217_v25, %v375_v28 }
  0x37   : > { %v469_v20 = vpack.c.bf16 %v440_v11, %v439_v8  ;;  %v445_v40 = vmax.f32 %v413_v34, 0.0 }
  0x38   : > { %5315 = vmatpush3.bf16.msra.mxu1 %v6028_v12  ;;  %v441_v12 = vmax.f32 %v409_v4, 0.0  ;;  %v412_v27 = vadd.f32 %v6217_v25, %v373_v18  ;;  %v446_v59 = vmax.f32 %v414_v38, 0.0 }
  0x39   : > { %5507 = vmatpush3.bf16.msra.mxu0 %v6029_v15  ;;  %5316 = vmatprep.subr.bf16.mxu1 %v6030_v21  ;;  %v5063_v15 = vld [vmem:[%s6156_s27 + $0x30] sm:$0xff]   ;;  %v501_v32 = vrot.slane %v469_v20, 4 }
  0x3a   : > { %5508 = vmatprep.subr.bf16.mxu0 %v6031_v33  ;;  %v4940_v23 = vunpack.c.l.bf16 %v5063_v15  ;;  %v470_v26 = vpack.c.bf16 %v442_v17, %v441_v12  ;;  %v4941_v29 = vunpack.c.h.bf16 %v5063_v15  ;;  %v444_v37 = vmax.f32 %v412_v27, 0.0 }
  0x3b   : > { %536 = vst [vmem:[#allocation2 + $0x38] ss:$-4 sps:$4 sm:$0xff] %v501_v32   ;;  %v1828_v44 = vld [vmem:[#allocation2 + $0x10] sm:$0xf0]  ;;  %v1829_v45 = vld [vmem:[#allocation2 + $0x18] sm:$0xf]  ;;  %v6302_v15 = vpack.c.bf16 %v446_v59, %v445_v40 }
  0x3c   : > { %5317 = vmatpush3.bf16.msra.mxu1 %v6030_v21  ;;  %v411_v21 = vadd.f32 %v6217_v25, %v372_v13  ;;  %v376_v35 = vmul.f32 %v4940_v23, %v6212_v24  ;;  %v502_v36 = vrot.slane %v470_v26, 4  ;;  %v377_v39 = vmul.f32 %v4941_v29, %v6212_v24  ;;  %v566_v46 = vld [vmem:[#allocation2 + $0x10] sm:$0xf8]  ;;  %v567_v53 = vld [vmem:[#allocation2 + $0x18] sm:$0xf] }
  0x3d   : > { %5509 = vmatpush3.bf16.msra.mxu0 %v6031_v33  ;;  %5318 = vmatprep.subr.bf16.mxu1 %v6032_v41  ;;  %v1903_v52 = vrot.slane %v1829_v45, 4  ;;  %v619_v54 = vshrl.u32 %v566_v46, 16  ;;  %v622_v55 = vshll.u32 %v566_v46, 16  ;;  %v627_v56 = vshrl.u32 %v567_v53, 16  ;;  %v1830_v63 = vld [vmem:[#allocation2 + $0x20] sm:$0xf0] }
  0x3e   : > { %5510 = vmatprep.subr.bf16.mxu0 %v6033_v51  ;;  %v443_v33 = vmax.f32 %v411_v21, 0.0  ;;  %538 = vst [vmem:[#allocation2 + $0x48] ss:$-4 sps:$4 sm:$0xff] %v502_v36   ;;  %v6285_v48 = vadd.f32 %v6217_v25, %v377_v39  ;;  %v630_v57 = vshll.u32 %v567_v53, 16  ;;  %v1831_v0 = vld [vmem:[#allocation2 + $0x28] sm:$0xf] }
  0x3f   : > { %v621_v61 = vrot.slane %v619_v54, 3  ;;  %v624_v62 = vrot.slane %v622_v55, 4  ;;  %v629_v4 = vrot.slane %v627_v56, 3  ;;  %v1905_v6 = vrot.slane %v1830_v63, 4  ;;  %v568_v9 = vld [vmem:[#allocation2 + $0x20] sm:$0xf8] }
  0x40   : > { %5319 = vmatpush3.bf16.msra.mxu1 %v6032_v41  ;;  %v6280_v41 = vadd.f32 %v6217_v25, %v376_v35  ;;  %v471_v47 = vpack.c.bf16 %v444_v37, %v443_v33  ;;  %v632_v5 = vrot.slane %v630_v57, 4  ;;  %v1906_v8 = vrot.slane %v1831_v0, 4  ;;  %v569_v11 = vld [vmem:[#allocation2 + $0x28] sm:$0xf]  ;;  %v6038_v36 = vld [vmem:[%s6912_s3 + $0x1d0] sm:$0xff]   ;;  %v6039_v59 = vld [vmem:[%s6912_s3 + $0x1d8] sm:$0xff]  }
  0x41   : > { %5511 = vmatpush3.bf16.msra.mxu0 %v6033_v51  ;;  %5352 = vmatprep.subr.bf16.mxu1 %v6250_v2  ;;  %v1902_v51 = vrot.slane %v1828_v44, 4  ;;  %v625_v10 = vor.u32 %v624_v62, %v621_v61  ;;  %v636_v12 = vshrl.u32 %v568_v9, 16  ;;  %v639_v13 = vshll.u32 %v568_v9, 16 }
  0x42   : > { %5544 = vmatprep.subr.bf16.mxu0 %v6257_v7  ;;  %v503_v58 = vrot.slane %v471_v47, 4  ;;  %v633_v16 = vor.u32 %v632_v5, %v629_v4  ;;  %v6305_v17 = vsel %vm1898_vm1, %v1905_v6, %v1906_v8  ;;  %v644_v18 = vshrl.u32 %v569_v11, 16  ;;  %v1832_v20 = vld [vmem:[#allocation2 + $0x30] sm:$0xf0]  ;;  %v1833_v21 = vld [vmem:[#allocation2 + $0x38] sm:$0xf] }
  0x43   : > { %v6290_v60 = vsel %vm1898_vm1, %v1902_v51, %v1903_v52  ;;  %v647_v19 = vshll.u32 %v569_v11, 16  ;;  %v638_v22 = vrot.slane %v636_v12, 3  ;;  %v641_v23 = vrot.slane %v639_v13, 4  ;;  %v570_v28 = vld [vmem:[#allocation2 + $0x30] sm:$0xf8] }
  0x44   : > { %5512 = vmatprep.mubr.bf16.mxu0 %v6290_v60  ;;  %540 = vst [vmem:[#allocation2 + $0x58] ss:$-4 sps:$4 sm:$0xff] %v503_v58   ;;  %v1908_v26 = vrot.slane %v1832_v20, 4  ;;  %v1909_v27 = vrot.slane %v1833_v21, 4  ;;  %v6309_v29 = vsel %vm600_vm0, %v625_v10, %v633_v16  ;;  %v646_v32 = vrot.slane %v644_v18, 3  ;;  %v6040_v52 = vld [vmem:[%s6912_s3 + $0xd0] sm:$0xff]  }
  0x45   : > { %5513 = vmatmul.mubr.bf16.vlgmr.msra.gmra.mrb[0].mxu0 %v6305_v17  ;;  %v649_v33 = vrot.slane %v647_v19, 4  ;;  %v571_v34 = vld [vmem:[#allocation2 + $0x38] sm:$0xf]  ;;  %v653_v35 = vshrl.u32 %v570_v28, 16  ;;  %5321 = vmatmul.mubr.bf16.vlgmr.msra.gmra.mrb[0].mxu1 %v6309_v29  ;;  %v642_v37 = vor.u32 %v641_v23, %v638_v22  ;;  %v656_v39 = vshll.u32 %v570_v28, 16 }
  0x46   : > { %5545 = vmatpush3.bf16.msra.mxu0 %v6257_v7  ;;  %v6317_v38 = vsel %vm1898_vm1, %v1908_v26, %v1909_v27  ;;  %v661_v40 = vshrl.u32 %v571_v34, 16  ;;  %v1834_v42 = vld [vmem:[#allocation2 + $0x40] sm:$0xf0]  ;;  %v1835_v44 = vld [vmem:[#allocation2 + $0x48] sm:$0xf]  ;;  %5353 = vmatpush3.bf16.msra.mxu1 %v6250_v2  ;;  %v664_v46 = vshll.u32 %v571_v34, 16 }
  0x47   : > { %5546 = vmatprep.subr.bf16.mxu0 %v6036_v1  ;;  %v650_v7 = vor.u32 %v649_v33, %v646_v32  ;;  %5516 = vmatprep.mubr.bf16.mxu0 %v6317_v38  ;;  %v655_v45 = vrot.slane %v653_v35, 3  ;;  %v1911_v47 = vrot.slane %v1834_v42, 4  ;;  %v572_v51 = vld [vmem:[#allocation2 + $0x40] sm:$0xf8]  ;;  %v658_v53 = vrot.slane %v656_v39, 4  ;;  %v6043_v16 = vld [vmem:[%s6912_s3 + $0xd8] sm:$0xff]  }
  0x48   : > { %v663_v54 = vrot.slane %v661_v40, 3  ;;  %5354 = vmatprep.subr.bf16.mxu1 %v6037_v14  ;;  %v1912_v55 = vrot.slane %v1835_v44, 4  ;;  %v573_v56 = vld [vmem:[#allocation2 + $0x48] sm:$0xf]  ;;  %v670_v57 = vshrl.u32 %v572_v51, 16  ;;  %v666_v58 = vrot.slane %v664_v46, 4 }
  0x49   : > { %v6325_v2 = vsel %vm600_vm0, %v642_v37, %v650_v7  ;;  %v673_v61 = vshll.u32 %v572_v51, 16  ;;  %v678_v62 = vshrl.u32 %v573_v56, 16  ;;  %v659_v0 = vor.u32 %v658_v53, %v655_v45  ;;  %v6041_v34 = vld [vmem:[%s6912_s3 + $0x1e0] sm:$0xff]   ;;  %v5066_v35 = vld [vmem:[%s6156_s27 + $0x48] sm:$0xff]  }
  0x4a   : > { %5547 = vmatpush3.bf16.msra.mxu0 %v6036_v1  ;;  %5324 = vmatprep.mubr.bf16.mxu1 %v6325_v2  ;;  %v6332_v4 = vsel %vm1898_vm1, %v1911_v47, %v1912_v55  ;;  %v672_v5 = vrot.slane %v670_v57, 3  ;;  %v681_v1 = vshll.u32 %v573_v56, 16  ;;  %v667_v9 = vor.u32 %v666_v58, %v663_v54  ;;  %v6042_v7 = vld [vmem:[%s6912_s3 + $0x1e8] sm:$0xff]   ;;  %v6385_v58 = vld [vmem:[%s6156_s27 + $0x58] sm:$0xff]  }
  0x4b   : > { %v1836_v63 = vld [vmem:[#allocation2 + $0x50] sm:$0xf0]  ;;  %5548 = vmatprep.subr.bf16.mxu0 %v6038_v36  ;;  %v1837_v6 = vld [vmem:[#allocation2 + $0x58] sm:$0xf]  ;;  %5355 = vmatpush3.bf16.msra.mxu1 %v6037_v14  ;;  %v675_v10 = vrot.slane %v673_v61, 4  ;;  %v680_v11 = vrot.slane %v678_v62, 3  ;;  %v379_v46 = vmul.f32 %v4945_v43, %v6212_v24  ;;  %v417_v47 = vadd.f32 %v6217_v25, %v6296_v3 }
  0x4c   : > { %v574_v8 = vld [vmem:[#allocation2 + $0x50] sm:$0xf8]  ;;  %v1914_v12 = vrot.slane %v1836_v63, 4  ;;  %v575_v13 = vld [vmem:[#allocation2 + $0x58] sm:$0xf]  ;;  %v683_v18 = vrot.slane %v681_v1, 4  ;;  %5356 = vmatprep.subr.bf16.mxu1 %v6040_v52  ;;  %v6339_v22 = vsel %vm600_vm0, %v659_v0, %v667_v9  ;;  %v4952_v51 = vunpack.c.l.bf16 %v5066_v35 }
  0x4d   : > { %5517 = vmatmul.mubr.bf16.gmra.mrb[4].mxu0 %v6332_v4  ;;  %v1915_v19 = vrot.slane %v1837_v6, 4  ;;  %v687_v20 = vshrl.u32 %v574_v8, 16  ;;  %v690_v21 = vshll.u32 %v574_v8, 16  ;;  %v676_v14 = vor.u32 %v675_v10, %v672_v5  ;;  %5325 = vmatmul.mubr.bf16.gmra.mrb[4].mxu1 %v6339_v22  ;;  %v6048_v55 = vld [vmem:[%s6912_s3 + $0xe8] sm:$0xff]   ;;  %v6391_v1 = vld [vmem:[%s6156_s27 + $0x60] sm:$0xff]   ;;  %v6044_v8 = vld [vmem:[%s6912_s3 + $0x1f0] sm:$0xff]  }
  0x4e   : > { %5549 = vmatpush3.bf16.msra.mxu0 %v6038_v36  ;;  %v695_v23 = vshrl.u32 %v575_v13, 16  ;;  %v698_v26 = vshll.u32 %v575_v13, 16  ;;  %v684_v27 = vor.u32 %v683_v18, %v680_v11  ;;  %v504_v39 = vrot.slane %v6302_v15, 4  ;;  %v6046_v15 = vld [vmem:[%s6912_s3 + $0xe0] sm:$0xff]  }
  0x4f   : > { %5550 = vmatprep.subr.bf16.mxu0 %v6039_v59  ;;  %v6343_v28 = vsel %vm1898_vm1, %v1914_v12, %v1915_v19  ;;  %v689_v32 = vrot.slane %v687_v20, 3  ;;  %v692_v33 = vrot.slane %v690_v21, 4  ;;  %5357 = vmatpush3.bf16.msra.mxu1 %v6040_v52  ;;  %v447_v40 = vmax.f32 %v6280_v41, 0.0  ;;  %v6050_v19 = vld [vmem:[%s6912_s3 + $0xf0] sm:$0xff]  }
  0x50   : > { %5520 = vmatprep.mubr.bf16.mxu0 %v6343_v28  ;;  %v697_v36 = vrot.slane %v695_v23, 3  ;;  %v700_v37 = vrot.slane %v698_v26, 4  ;;  %v6353_v42 = vsel %vm600_vm0, %v676_v14, %v684_v27  ;;  %v448_v45 = vmax.f32 %v6285_v48, 0.0  ;;  %5358 = vmatprep.subr.bf16.mxu1 %v6043_v16  ;;  %542 = vst [vmem:[#allocation2 + $0x68] ss:$-4 sps:$4 sm:$0xff] %v504_v39  }
  0x51   : > { %v693_v44 = vor.u32 %v692_v33, %v689_v32  ;;  %5328 = vmatprep.mubr.bf16.mxu1 %v6353_v42  ;;  %v380_v48 = vmul.f32 %v4948_v49, %v6212_v24  ;;  %v418_v52 = vadd.f32 %v6217_v25, %v379_v46  ;;  %v381_v53 = vmul.f32 %v4949_v50, %v6212_v24 }
  0x52   : > { %5551 = vmatpush3.bf16.msra.mxu0 %v6039_v59  ;;  %v701_v41 = vor.u32 %v700_v37, %v697_v36  ;;  %v473_v43 = vpack.c.bf16 %v448_v45, %v447_v40  ;;  %v4953_v54 = vunpack.c.h.bf16 %v5066_v35  ;;  %v449_v49 = vmax.f32 %v417_v47, 0.0  ;;  %v6045_v45 = vld [vmem:[%s6912_s3 + $0x1f8] sm:$0xff]  }
  0x53   : > { %5552 = vmatprep.subr.bf16.mxu0 %v6041_v34  ;;  %5359 = vmatpush3.bf16.msra.mxu1 %v6043_v16  ;;  %v419_v56 = vadd.f32 %v6217_v25, %v380_v48  ;;  %v382_v57 = vmul.f32 %v4952_v51, %v6212_v24  ;;  %v450_v31 = vmax.f32 %v418_v52, 0.0  ;;  %v420_v50 = vadd.f32 %v6217_v25, %v381_v53 }
  0x54   : > { %v6380_v3 = vsel %vm600_vm0, %v693_v44, %v701_v41  ;;  %v505_v59 = vrot.slane %v473_v43, 4  ;;  %5360 = vmatprep.subr.bf16.mxu1 %v6046_v15  ;;  %v383_v61 = vmul.f32 %v4953_v54, %v6212_v24  ;;  %v4956_v0 = vunpack.c.l.bf16 %v5067_v30 }
  0x55   : > { %v451_v62 = vmax.f32 %v419_v56, 0.0  ;;  %v421_v63 = vadd.f32 %v6217_v25, %v382_v57  ;;  %v4957_v5 = vunpack.c.h.bf16 %v5067_v30  ;;  %5329 = vmatmul.mubr.bf16.gmra.mrb[8].mxu1 %v6380_v3  ;;  %v474_v6 = vpack.c.bf16 %v450_v31, %v449_v49 }
  0x56   : > { %5553 = vmatpush3.bf16.msra.mxu0 %v6041_v34  ;;  %544 = vst [vmem:[#allocation2 + $0x78] ss:$-4 sps:$4 sm:$0xff] %v505_v59   ;;  %v452_v9 = vmax.f32 %v420_v50, 0.0  ;;  %v422_v10 = vadd.f32 %v6217_v25, %v383_v61  ;;  %v4960_v11 = vunpack.c.l.bf16 %v6385_v58  ;;  %v384_v13 = vmul.f32 %v4956_v0, %v6212_v24 }
  0x57   : > { %5554 = vmatprep.subr.bf16.mxu0 %v6042_v7  ;;  %5361 = vmatpush3.bf16.msra.mxu1 %v6046_v15  ;;  %v453_v12 = vmax.f32 %v421_v63, 0.0  ;;  %v385_v16 = vmul.f32 %v4957_v5, %v6212_v24  ;;  %v4961_v18 = vunpack.c.h.bf16 %v6385_v58  ;;  %v1838_v20 = vld [vmem:[#allocation2 + $0x60] sm:$0xf0]  ;;  %v1839_v21 = vld [vmem:[#allocation2 + $0x68] sm:$0xf]  ;;  %v4964_v27 = vunpack.c.l.bf16 %v6391_v1 }
  0x58   : > { %v576_v14 = vld [vmem:[#allocation2 + $0x60] sm:$0xf8]  ;;  %v475_v23 = vpack.c.bf16 %v452_v9, %v451_v62  ;;  %5362 = vmatprep.subr.bf16.mxu1 %v6048_v55  ;;  %v386_v26 = vmul.f32 %v4960_v11, %v6212_v24  ;;  %v4965_v32 = vunpack.c.h.bf16 %v6391_v1  ;;  %v1917_v33 = vrot.slane %v1838_v20, 4  ;;  %v577_v35 = vld [vmem:[#allocation2 + $0x68] sm:$0xf] }
  0x59   : > { %v1918_v34 = vrot.slane %v1839_v21, 4  ;;  %v704_v36 = vshrl.u32 %v576_v14, 16  ;;  %v707_v37 = vshll.u32 %v576_v14, 16  ;;  %v712_v39 = vshrl.u32 %v577_v35, 16  ;;  %v6427_v63 = vld [vmem:[%s6912_s3 + $0x80] sm:$0xff]  }
  0x5a   : > { %5555 = vmatpush3.bf16.msra.mxu0 %v6042_v7  ;;  %v715_v40 = vshll.u32 %v577_v35, 16  ;;  %v506_v44 = vrot.slane %v474_v6, 4  ;;  %v507_v46 = vrot.slane %v475_v23, 4  ;;  %v454_v48 = vmax.f32 %v422_v10, 0.0  ;;  %v6052_v7 = vld [vmem:[%s6912_s3 + $0xf8] sm:$0xff]  }
  0x5b   : > { %5556 = vmatprep.subr.bf16.mxu0 %v6044_v8  ;;  %v6412_v15 = vsel %vm1898_vm1, %v1917_v33, %v1918_v34  ;;  %v706_v41 = vrot.slane %v704_v36, 3  ;;  %v709_v47 = vrot.slane %v707_v37, 4  ;;  %5363 = vmatpush3.bf16.msra.mxu1 %v6048_v55  ;;  %v714_v51 = vrot.slane %v712_v39, 3 }
  0x5c   : > { %5521 = vmatmul.mubr.bf16.gmra.mrb[8].mxu0 %v6412_v15  ;;  %v717_v30 = vrot.slane %v715_v40, 4  ;;  %546 = vst [vmem:[#allocation2 + $0x88] ss:$-4 sps:$4 sm:$0xff] %v506_v44   ;;  %548 = vst [vmem:[#allocation2 + $0x98] ss:$-4 sps:$4 sm:$0xff] %v507_v46   ;;  %v423_v43 = vadd.f32 %v6217_v25, %v384_v13  ;;  %v424_v52 = vadd.f32 %v6217_v25, %v385_v16  ;;  %5364 = vmatprep.subr.bf16.mxu1 %v6050_v19  ;;  %v6436_v13 = vld [vmem:[%s6156_s27 + $0x68] sm:$0xff]  }
  0x5d   : > { %v710_v53 = vor.u32 %v709_v47, %v706_v41  ;;  %v1840_v54 = vld [vmem:[#allocation2 + $0x70] sm:$0xf0]  ;;  %v1841_v49 = vld [vmem:[#allocation2 + $0x78] sm:$0xf]  ;;  %v476_v55 = vpack.c.bf16 %v454_v48, %v453_v12  ;;  %v387_v57 = vmul.f32 %v4961_v18, %v6212_v24  ;;  %v6422_v58 = vadd.f32 %v6217_v25, %v386_v26  ;;  %v6441_v16 = vld [vmem:[%s6912_s3 + $0x180] sm:$0xff]  }
  0x5e   : > { %v578_v56 = vld [vmem:[#allocation2 + $0x70] sm:$0xf8]  ;;  %5557 = vmatpush3.bf16.msra.mxu0 %v6044_v8  ;;  %v718_v59 = vor.u32 %v717_v30, %v714_v51  ;;  %v1920_v31 = vrot.slane %v1840_v54, 4  ;;  %v1921_v50 = vrot.slane %v1841_v49, 4  ;;  %v579_v61 = vld [vmem:[#allocation2 + $0x78] sm:$0xf]  ;;  %v388_v26 = vmul.f32 %v4964_v27, %v6212_v24 }
  0x5f   : > { %v721_v62 = vshrl.u32 %v578_v56, 16  ;;  %5558 = vmatprep.subr.bf16.mxu0 %v6045_v45  ;;  %v724_v0 = vshll.u32 %v578_v56, 16  ;;  %v729_v5 = vshrl.u32 %v579_v61, 16  ;;  %v732_v6 = vshll.u32 %v579_v61, 16  ;;  %5365 = vmatpush3.bf16.msra.mxu1 %v6050_v19 }
  0x60   : > { %v508_v8 = vrot.slane %v476_v55, 4  ;;  %v6430_v9 = vsel %vm600_vm0, %v710_v53, %v718_v59  ;;  %v6433_v10 = vsel %vm1898_vm1, %v1920_v31, %v1921_v50  ;;  %v455_v12 = vmax.f32 %v423_v43, 0.0  ;;  %5366 = vmatprep.subr.bf16.mxu1 %v6052_v7 }
  0x61   : > { %v723_v11 = vrot.slane %v721_v62, 3  ;;  %5332 = vmatprep.mubr.bf16.mxu1 %v6430_v9  ;;  %5524 = vmatprep.mubr.bf16.mxu0 %v6433_v10  ;;  %v726_v18 = vrot.slane %v724_v0, 4  ;;  %v731_v19 = vrot.slane %v729_v5, 3  ;;  %v734_v20 = vrot.slane %v732_v6, 4 }
  0x62   : > { %550 = vst [vmem:[#allocation2 + $0xa8] ss:$-4 sps:$4 sm:$0xff] %v508_v8   ;;  %v456_v21 = vmax.f32 %v424_v52, 0.0  ;;  %5559 = vmatpush3.bf16.msra.mxu0 %v6045_v45  ;;  %v6446_v14 = vadd.f32 %v6217_v25, %v387_v57  ;;  %v457_v23 = vmax.f32 %v6422_v58, 0.0  ;;  %v389_v33 = vmul.f32 %v4965_v32, %v6212_v24 }
  0x63   : > { %v727_v34 = vor.u32 %v726_v18, %v723_v11  ;;  %v735_v35 = vor.u32 %v734_v20, %v731_v19  ;;  %v1842_v36 = vld [vmem:[#allocation2 + $0x80] sm:$0xf0]  ;;  %v1843_v37 = vld [vmem:[#allocation2 + $0x88] sm:$0xf]  ;;  %5592 = vmatprep.subr.bf16.mxu0 %v6427_v63  ;;  %v4968_v44 = vunpack.c.l.bf16 %v6436_v13  ;;  %5367 = vmatpush3.bf16.msra.mxu1 %v6052_v7  ;;  %v582_v51 = vld [vmem:[#allocation2 + $0x90] sm:$0xf8]  ;;  %v427_v43 = vadd.f32 %v6217_v25, %v388_v26 }
  0x64   : > { %v580_v39 = vld [vmem:[#allocation2 + $0x80] sm:$0xf8]  ;;  %v477_v40 = vpack.c.bf16 %v456_v21, %v455_v12  ;;  %v1923_v45 = vrot.slane %v1842_v36, 4  ;;  %v1924_v46 = vrot.slane %v1843_v37, 4  ;;  %v581_v41 = vld [vmem:[#allocation2 + $0x88] sm:$0xf]  ;;  %5400 = vmatprep.subr.bf16.mxu1 %v6441_v16  ;;  %v428_v0 = vadd.f32 %v6217_v25, %v389_v33 }
  0x65   : > { %v738_v47 = vshrl.u32 %v580_v39, 16  ;;  %v741_v27 = vshll.u32 %v580_v39, 16  ;;  %v6459_v1 = vsel %vm600_vm0, %v727_v34, %v735_v35  ;;  %v746_v32 = vshrl.u32 %v581_v41, 16  ;;  %v583_v30 = vld [vmem:[#allocation2 + $0x98] sm:$0xf] }
  0x66   : > { %v749_v48 = vshll.u32 %v581_v41, 16  ;;  %5333 = vmatmul.mubr.bf16.gmra.mrb[12].mxu1 %v6459_v1  ;;  %v6464_v7 = vsel %vm1898_vm1, %v1923_v45, %v1924_v46  ;;  %v755_v54 = vshrl.u32 %v582_v51, 16  ;;  %v758_v55 = vshll.u32 %v582_v51, 16  ;;  %v5071_v45 = vld [vmem:[%s6156_s27 + $0x70] sm:$0xff]   ;;  %v6049_v46 = vld [vmem:[%s6912_s3 + $0x88] sm:$0xff]  }
  0x67   : > { %v740_v52 = vrot.slane %v738_v47, 3  ;;  %v743_v53 = vrot.slane %v741_v27, 4  ;;  %5525 = vmatmul.mubr.bf16.gmra.mrb[12].mxu0 %v6464_v7  ;;  %v748_v49 = vrot.slane %v746_v32, 3  ;;  %v763_v57 = vshrl.u32 %v583_v30, 16 }
  0x68   : > { %v751_v56 = vrot.slane %v749_v48, 4  ;;  %5560 = vmatprep.mubr.bf16.mxu0 %v6305_v17  ;;  %v757_v31 = vrot.slane %v755_v54, 3  ;;  %v766_v50 = vshll.u32 %v583_v30, 16  ;;  %v760_v6 = vrot.slane %v758_v55, 4  ;;  %v5072_v55 = vld [vmem:[%s6156_s27 + $0x78] sm:$0xff]  }
  0x69   : > { %v744_v59 = vor.u32 %v743_v53, %v740_v52  ;;  %v584_v61 = vld [vmem:[#allocation2 + $0xa0] sm:$0xf8]  ;;  %v585_v62 = vld [vmem:[#allocation2 + $0xa8] sm:$0xf]  ;;  %v765_v8 = vrot.slane %v763_v57, 3  ;;  %v509_v35 = vrot.slane %v477_v40, 4  ;;  %v4969_v32 = vunpack.c.h.bf16 %v6436_v13 }
  0x6a   : > { %v752_v5 = vor.u32 %v751_v56, %v748_v49  ;;  %v772_v11 = vshrl.u32 %v584_v61, 16  ;;  %v768_v12 = vrot.slane %v766_v50, 4  ;;  %v775_v18 = vshll.u32 %v584_v61, 16  ;;  %v6051_v49 = vld [vmem:[%s6912_s3 + $0x90] sm:$0xff]  }
  0x6b   : > { %v780_v19 = vshrl.u32 %v585_v62, 16  ;;  %v783_v20 = vshll.u32 %v585_v62, 16  ;;  %v761_v26 = vor.u32 %v760_v6, %v757_v31  ;;  %552 = vst [vmem:[#allocation2 + $0xb8] ss:$-4 sps:$4 sm:$0xff] %v509_v35   ;;  %v458_v41 = vmax.f32 %v6446_v14, 0.0 }
  0x6c   : > { %v6470_v21 = vsel %vm600_vm0, %v744_v59, %v752_v5  ;;  %v774_v34 = vrot.slane %v772_v11, 3  ;;  %v769_v36 = vor.u32 %v768_v12, %v765_v8  ;;  %v777_v37 = vrot.slane %v775_v18, 4 }
  0x6d   : > { %5336 = vmatprep.mubr.bf16.mxu1 %v6470_v21  ;;  %v782_v33 = vrot.slane %v780_v19, 3  ;;  %v785_v39 = vrot.slane %v783_v20, 4  ;;  %v459_v47 = vmax.f32 %v427_v43, 0.0  ;;  %v460_v27 = vmax.f32 %v428_v0, 0.0 }
  0x6e   : > { %v6480_v40 = vsel %vm600_vm0, %v761_v26, %v769_v36  ;;  %v778_v48 = vor.u32 %v777_v37, %v774_v34  ;;  %v390_v30 = vmul.f32 %v4968_v44, %v6212_v24  ;;  %v478_v52 = vpack.c.bf16 %v458_v41, %v457_v23 }
  0x6f   : > { %v786_v51 = vor.u32 %v785_v39, %v782_v33  ;;  %5337 = vmatmul.mubr.bf16.gmra.mrb[16].mxu1 %v6480_v40  ;;  %5561 = vmatmul.mubr.bf16.vlgmr.msra.gmra.mrb[0].mxu0 %v6317_v38  ;;  %v479_v14 = vpack.c.bf16 %v460_v27, %v459_v47  ;;  %v391_v43 = vmul.f32 %v4969_v32, %v6212_v24  ;;  %v4972_v53 = vunpack.c.l.bf16 %v5071_v45  ;;  %v6512_v32 = vld [vmem:[#allocation2 + $0x90] sm:$0xf0] }
  0x70   : > { %5593 = vmatpush3.bf16.msra.mxu0 %v6427_v63  ;;  %5564 = vmatprep.mubr.bf16.mxu0 %v6332_v4  ;;  %v429_v44 = vadd.f32 %v6217_v25, %v390_v30  ;;  %v4973_v54 = vunpack.c.h.bf16 %v5071_v45  ;;  %v510_v58 = vrot.slane %v478_v52, 4  ;;  %v4976_v5 = vunpack.c.l.bf16 %v5072_v55  ;;  %v6055_v45 = vld [vmem:[%s6912_s3 + $0xa0] sm:$0xff]  }
  0x71   : > { %v6490_v13 = vsel %vm600_vm0, %v778_v48, %v786_v51  ;;  %5594 = vmatprep.subr.bf16.mxu0 %v6049_v46  ;;  %v511_v23 = vrot.slane %v479_v14, 4  ;;  %v430_v56 = vadd.f32 %v6217_v25, %v391_v43  ;;  %v392_v63 = vmul.f32 %v4972_v53, %v6212_v24  ;;  %v6090_v48 = vld [vmem:[%s6910_s1] ss:$0 sm:$0xff] }
  0x72   : > { %5340 = vmatprep.mubr.bf16.mxu1 %v6490_v13  ;;  %v461_v57 = vmax.f32 %v429_v44, 0.0  ;;  %v393_v59 = vmul.f32 %v4973_v54, %v6212_v24  ;;  %554 = vst [vmem:[#allocation2 + $0xc8] ss:$-4 sps:$4 sm:$0xff] %v510_v58   ;;  %v586_v61 = vld [vmem:[#allocation2 + $0xb0] sm:$0xf8]  ;;  %v6053_v24 = vld [vmem:[%s6912_s3 + $0x98] sm:$0xff]   ;;  %v4977_v26 = vunpack.c.h.bf16 %v5072_v55  ;;  %v394_v51 = vmul.f32 %v6090_v48, %v4976_v5 }
  0x73   : > { %556 = vst [vmem:[#allocation2 + $0xd8] ss:$-4 sps:$4 sm:$0xff] %v511_v23   ;;  %v462_v31 = vmax.f32 %v430_v56, 0.0  ;;  %v431_v50 = vadd.f32 %v6217_v25, %v392_v63  ;;  %v587_v62 = vld [vmem:[#allocation2 + $0xb8] sm:$0xf]  ;;  %v789_v6 = vshrl.u32 %v586_v61, 16 }
  0x74   : > { %5595 = vmatpush3.bf16.msra.mxu0 %v6049_v46  ;;  %v432_v0 = vadd.f32 %v6217_v25, %v393_v59  ;;  %v792_v8 = vshll.u32 %v586_v61, 16  ;;  %v797_v11 = vshrl.u32 %v587_v62, 16  ;;  %v800_v12 = vshll.u32 %v587_v62, 16  ;;  %v6057_v54 = vld [vmem:[%s6912_s3 + $0xa8] sm:$0xff]   ;;  %v1845_v63 = vld [vmem:[#allocation2 + $0x98] sm:$0xf] }
  0x75   : > { %5596 = vmatprep.subr.bf16.mxu0 %v6051_v49  ;;  %v480_v18 = vpack.c.bf16 %v462_v31, %v461_v57  ;;  %v463_v19 = vmax.f32 %v431_v50, 0.0  ;;  %v791_v34 = vrot.slane %v789_v6, 3  ;;  %v395_v30 = vmul.f32 %v6090_v48, %v4977_v26  ;;  %v1846_v50 = vld [vmem:[#allocation2 + $0xa0] sm:$0xf0]  ;;  %v1847_v6 = vld [vmem:[#allocation2 + $0xa8] sm:$0xf] }
  0x76   : > { %v464_v20 = vmax.f32 %v432_v0, 0.0  ;;  %v794_v35 = vrot.slane %v792_v8, 4  ;;  %v799_v36 = vrot.slane %v797_v11, 3  ;;  %v802_v37 = vrot.slane %v800_v12, 4 }
  0x77   : > { %5565 = vmatmul.mubr.bf16.gmra.mrb[4].mxu0 %v6343_v28  ;;  %v512_v25 = vrot.slane %v480_v18, 4  ;;  %v1926_v18 = vrot.slane %v6512_v32, 4  ;;  %v1929_v26 = vrot.slane %v1846_v50, 4  ;;  %v1848_v32 = vld [vmem:[#allocation2 + $0xb0] sm:$0xf0] }
  0x78   : > { %5568 = vmatprep.mubr.bf16.mxu0 %v6412_v15  ;;  %5597 = vmatpush3.bf16.msra.mxu0 %v6051_v49  ;;  %v795_v33 = vor.u32 %v794_v35, %v791_v34  ;;  %v803_v39 = vor.u32 %v802_v37, %v799_v36  ;;  %v481_v27 = vpack.c.bf16 %v464_v20, %v463_v19  ;;  %v1927_v20 = vrot.slane %v1845_v63, 4 }
  0x79   : > { %5598 = vmatprep.subr.bf16.mxu0 %v6053_v24  ;;  %v588_v46 = vld [vmem:[#allocation2 + $0xc0] sm:$0xf8]  ;;  %v589_v41 = vld [vmem:[#allocation2 + $0xc8] sm:$0xf]  ;;  %558 = vst [vmem:[#allocation2 + $0xe8] ss:$-4 sps:$4 sm:$0xff] %v512_v25  }
  0x7a   : > { %v590_v47 = vld [vmem:[#allocation2 + $0xd0] sm:$0xf8]  ;;  %v6518_v52 = vsel %vm600_vm0, %v795_v33, %v803_v39  ;;  %v806_v14 = vshrl.u32 %v588_v46, 16  ;;  %v809_v43 = vshll.u32 %v588_v46, 16  ;;  %v814_v53 = vshrl.u32 %v589_v41, 16 }
  0x7b   : > { %v591_v44 = vld [vmem:[#allocation2 + $0xd8] sm:$0xf]  ;;  %5341 = vmatmul.mubr.bf16.gmra.mrb[20].mxu1 %v6518_v52  ;;  %v817_v58 = vshll.u32 %v589_v41, 16  ;;  %v823_v23 = vshrl.u32 %v590_v47, 16  ;;  %v826_v49 = vshll.u32 %v590_v47, 16  ;;  %v513_v12 = vrot.slane %v481_v27, 4 }
  0x7c   : > { %v831_v56 = vshrl.u32 %v591_v44, 16  ;;  %5599 = vmatpush3.bf16.msra.mxu0 %v6053_v24  ;;  %v808_v55 = vrot.slane %v806_v14, 3  ;;  %v811_v57 = vrot.slane %v809_v43, 4  ;;  %v816_v59 = vrot.slane %v814_v53, 3  ;;  %v6059_v25 = vld [vmem:[%s6912_s3 + $0xb0] sm:$0xff]  }
  0x7d   : > { %v834_v31 = vshll.u32 %v591_v44, 16  ;;  %5600 = vmatprep.subr.bf16.mxu0 %v6055_v45  ;;  %v819_v61 = vrot.slane %v817_v58, 4  ;;  %v825_v62 = vrot.slane %v823_v23, 3  ;;  %v828_v0 = vrot.slane %v826_v49, 4  ;;  %560 = vst [vmem:[#allocation2 + $0xf8] ss:$-4 sps:$4 sm:$0xff] %v513_v12  }
  0x7e   : > { %v833_v5 = vrot.slane %v831_v56, 3  ;;  %v812_v8 = vor.u32 %v811_v57, %v808_v55  ;;  %v1930_v37 = vrot.slane %v1847_v6, 4  ;;  %v6091_v33 = vld [vmem:[%s6911_s2] ss:$0 sm:$0xff]  ;;  %v1849_v43 = vld [vmem:[#allocation2 + $0xb8] sm:$0xf] }
  0x7f   : > { %v836_v11 = vrot.slane %v834_v31, 4  ;;  %5569 = vmatmul.mubr.bf16.gmra.mrb[8].mxu0 %v6433_v10  ;;  %v820_v19 = vor.u32 %v819_v61, %v816_v59  ;;  %v829_v24 = vor.u32 %v828_v0, %v825_v62  ;;  %v433_v39 = vadd.f32 %v6091_v33, %v394_v51  ;;  %v1850_v58 = vld [vmem:[#allocation2 + $0xc0] sm:$0xf0]  ;;  %v1851_v56 = vld [vmem:[#allocation2 + $0xc8] sm:$0xf]  ;;  %v6061_v57 = vld [vmem:[%s6912_s3 + $0xb8] sm:$0xff]  }
  0x80   : > { %5572 = vmatprep.mubr.bf16.mxu0 %v6464_v7  ;;  %5601 = vmatpush3.bf16.msra.mxu0 %v6055_v45  ;;  %v592_v35 = vld [vmem:[#allocation2 + $0xe0] sm:$0xf8]  ;;  %v593_v36 = vld [vmem:[#allocation2 + $0xe8] sm:$0xf]  ;;  %v434_v46 = vadd.f32 %v6091_v33, %v395_v30  ;;  %v6542_v30 = vsel %vm1898_vm1, %v1926_v18, %v1927_v20  ;;  %v6545_v49 = vsel %vm1898_vm1, %v1929_v26, %v1930_v37  ;;  %v1932_v50 = vrot.slane %v1848_v32, 4 }
  0x81   : > { %v837_v34 = vor.u32 %v836_v11, %v833_v5  ;;  %5602 = vmatprep.subr.bf16.mxu0 %v6057_v54  ;;  %v6534_v41 = vsel %vm600_vm0, %v812_v8, %v820_v19  ;;  %v840_v45 = vshrl.u32 %v592_v35, 16  ;;  %v843_v47 = vshll.u32 %v592_v35, 16  ;;  %6929 = vst [vmem:[#allocation4_spill] sm:$0xff] %v6545_v49  ;;  %v6558_v19 = vld [vmem:[%s6912_s3 + $0x140] sm:$0xff]  }
  0x82   : > { %v848_v27 = vshrl.u32 %v593_v36, 16  ;;  %5344 = vmatprep.mubr.bf16.mxu1 %v6534_v41  ;;  %v851_v14 = vshll.u32 %v593_v36, 16  ;;  %v465_v63 = vmax.f32 %v433_v39, 0.0  ;;  %v466_v55 = vmax.f32 %v434_v46, 0.0  ;;  %v1852_v39 = vld [vmem:[#allocation2 + $0xd0] sm:$0xf0] }
  0x83   : > { %v6538_v48 = vsel %vm600_vm0, %v829_v24, %v837_v34  ;;  %v842_v53 = vrot.slane %v840_v45, 3  ;;  %v845_v44 = vrot.slane %v843_v47, 4  ;;  %v1933_v61 = vrot.slane %v1849_v43, 4  ;;  %v1853_v46 = vld [vmem:[#allocation2 + $0xd8] sm:$0xf] }
  0x84   : > { %5345 = vmatmul.mubr.bf16.gmra.mrb[24].mxu1 %v6538_v48  ;;  %v850_v51 = vrot.slane %v848_v27, 3  ;;  %5603 = vmatpush3.bf16.msra.mxu0 %v6057_v54  ;;  %v853_v23 = vrot.slane %v851_v14, 4  ;;  %v482_v62 = vpack.c.bf16 %v466_v55, %v465_v63  ;;  %v594_v54 = vld [vmem:[#allocation2 + $0xf0] sm:$0xf8]  ;;  %v595_v0 = vld [vmem:[#allocation2 + $0xf8] sm:$0xf] }
  0x85   : > { %5604 = vmatprep.subr.bf16.mxu0 %v6059_v25  ;;  %v846_v59 = vor.u32 %v845_v44, %v842_v53  ;;  %v1935_v5 = vrot.slane %v1850_v58, 4  ;;  %v1936_v6 = vrot.slane %v1851_v56, 4  ;;  %v857_v11 = vshrl.u32 %v594_v54, 16  ;;  %v1854_v47 = vld [vmem:[#allocation2 + $0xe0] sm:$0xf0] }
  0x86   : > { %v854_v31 = vor.u32 %v853_v23, %v850_v51  ;;  %v860_v12 = vshll.u32 %v594_v54, 16  ;;  %v865_v18 = vshrl.u32 %v595_v0, 16  ;;  %v868_v24 = vshll.u32 %v595_v0, 16  ;;  %v1855_v27 = vld [vmem:[#allocation2 + $0xe8] sm:$0xf] }
  0x87   : > { %5573 = vmatmul.mubr.bf16.gmra.mrb[12].mxu0 %v6542_v30  ;;  %v514_v20 = vrot.slane %v482_v62, 4  ;;  %v859_v26 = vrot.slane %v857_v11, 3  ;;  %v6562_v37 = vsel %vm1898_vm1, %v1932_v50, %v1933_v61  ;;  %v6565_v33 = vsel %vm1898_vm1, %v1935_v5, %v1936_v6  ;;  %v1856_v23 = vld [vmem:[#allocation2 + $0xf0] sm:$0xf0]  ;;  %v1857_v56 = vld [vmem:[#allocation2 + $0xf8] sm:$0xf] }
  0x88   : > { %5576 = vmatprep.mubr.bf16.mxu0 %v6545_v49  ;;  %5605 = vmatpush3.bf16.msra.mxu0 %v6059_v25  ;;  %v6553_v8 = vsel %vm600_vm0, %v846_v59, %v854_v31  ;;  %v862_v34 = vrot.slane %v860_v12, 4  ;;  %v867_v35 = vrot.slane %v865_v18, 3  ;;  %v870_v36 = vrot.slane %v868_v24, 4  ;;  %6930 = vst [vmem:[#allocation5_spill] sm:$0xff] %v6562_v37  ;;  %6931 = vst [vmem:[#allocation6_spill] sm:$0xff] %v6565_v33  ;;  %v6056_v31 = vld [vmem:[%s6912_s3 + $0x188] sm:$0xff]  }
  0x89   : > { %5606 = vmatprep.subr.bf16.mxu0 %v6061_v57  ;;  %5348 = vmatprep.mubr.bf16.mxu1 %v6553_v8  ;;  %562 = vst [vmem:[#allocation2 + $0x108] ss:$-4 sps:$4 sm:$0xff] %v514_v20   ;;  %v1938_v14 = vrot.slane %v1852_v39, 4  ;;  %v1939_v43 = vrot.slane %v1853_v46, 4  ;;  %v1941_v53 = vrot.slane %v1854_v47, 4  ;;  %v1942_v44 = vrot.slane %v1855_v27, 4 }
  0x8a   : > { %v863_v25 = vor.u32 %v862_v34, %v859_v26  ;;  %v871_v45 = vor.u32 %v870_v36, %v867_v35  ;;  %v2937_v63 = vld [vmem:[#allocation2] sm:$0xf0]  ;;  %v2938_v59 = vld [vmem:[#allocation2 + $0x8] sm:$0x1f]  ;;  %v1945_v50 = vrot.slane %v1857_v56, 4  ;;  %v6058_v11 = vld [vmem:[%s6912_s3 + $0x190] sm:$0xff]  }
  0x8b   : > { %v6576_v51 = vsel %vm1898_vm1, %v1938_v14, %v1939_v43  ;;  %v6579_v58 = vsel %vm1898_vm1, %v1941_v53, %v1942_v44  ;;  %v2975_v61 = vshrl.u32 %v2937_v63, 16  ;;  %v2978_v62 = vshll.u32 %v2937_v63, 16  ;;  %v1860_v12 = vld [vmem:[#allocation2 + $0x110] sm:$0xf0]  ;;  %v1861_v18 = vld [vmem:[#allocation2 + $0x118] sm:$0xf] }
  0x8c   : > { %5607 = vmatpush3.bf16.msra.mxu0 %v6061_v57  ;;  %v6570_v32 = vsel %vm600_vm0, %v863_v25, %v871_v45  ;;  %6932 = vst [vmem:[#allocation7_spill] sm:$0xff] %v6576_v51  ;;  %6933 = vst [vmem:[#allocation8_spill] sm:$0xff] %v6579_v58  ;;  %v2983_v5 = vshrl.u32 %v2938_v59, 16  ;;  %v2986_v6 = vshll.u32 %v2938_v59, 16  ;;  %v2939_v24 = vld [vmem:[#allocation2 + $0x10] sm:$0xf0] }
  0x8d   : > { %5640 = vmatprep.subr.bf16.mxu0 %v6558_v19  ;;  %5349 = vmatmul.mubr.bf16.gmra.mrb[28].mxu1 %v6570_v32  ;;  %v2940_v20 = vld [vmem:[#allocation2 + $0x18] sm:$0x1f]  ;;  %v2977_v34 = vrot.slane %v2975_v61, 4  ;;  %v2941_v35 = vld [vmem:[#allocation2 + $0x20] sm:$0xf0]  ;;  %v2992_v45 = vshrl.u32 %v2939_v24, 16 }
  0x8e   : > { %5368 = vmatprep.mubr.bf16.mxu1 %v6309_v29  ;;  %v1944_v29 = vrot.slane %v1856_v23, 4  ;;  %v2985_v25 = vrot.slane %v2983_v5, 4  ;;  %v2988_v39 = vrot.slane %v2986_v6, 5  ;;  %v2942_v46 = vld [vmem:[#allocation2 + $0x28] sm:$0x1f]  ;;  %v2995_v47 = vshll.u32 %v2939_v24, 16 }
  0x8f   : > { %5577 = vmatmul.mubr.bf16.gmra.mrb[16].mxu0 %v6562_v37  ;;  %v6060_v27 = vld [vmem:[%s6912_s3 + $0x198] sm:$0xff]   ;;  %v3000_v14 = vshrl.u32 %v2940_v20, 16  ;;  %v3003_v43 = vshll.u32 %v2940_v20, 16  ;;  %v3009_v53 = vshrl.u32 %v2941_v35, 16  ;;  %v3012_v44 = vshll.u32 %v2941_v35, 16 }
  0x90   : > { %5580 = vmatprep.mubr.bf16.mxu0 %v6565_v33  ;;  %v1858_v55 = vld [vmem:[#allocation2 + $0x100] sm:$0xf0]  ;;  %v1859_v57 = vld [vmem:[#allocation2 + $0x108] sm:$0xf]  ;;  %v6593_v26 = vsel %vm1898_vm1, %v1944_v29, %v1945_v50  ;;  %v1950_v23 = vrot.slane %v1860_v12, 4  ;;  %v1951_v56 = vrot.slane %v1861_v18, 4  ;;  %v2989_v59 = vor.u32 %v2988_v39, %v2985_v25 }
  0x91   : > { %v1947_v54 = vrot.slane %v1858_v55, 4  ;;  %v1948_v0 = vrot.slane %v1859_v57, 4  ;;  %6934 = vst [vmem:[#allocation9_spill] sm:$0xff] %v6593_v26  ;;  %v3017_v63 = vshrl.u32 %v2942_v46, 16  ;;  %v3020_v55 = vshll.u32 %v2942_v46, 16  ;;  %v6064_v46 = vld [vmem:[%s6912_s3 + $0x1a8] sm:$0xff]  }
  0x92   : > { %v2994_v29 = vrot.slane %v2992_v45, 4  ;;  %v2997_v50 = vrot.slane %v2995_v47, 5  ;;  %v3002_v61 = vrot.slane %v3000_v14, 4  ;;  %v2943_v5 = vld [vmem:[#allocation2 + $0x30] sm:$0xf0]  ;;  %v1952_v6 = vsel %vm1898_vm1, %v1950_v23, %v1951_v56 }
  0x93   : > { %v6596_v36 = vsel %vm1898_vm1, %v1947_v54, %v1948_v0  ;;  %v3011_v54 = vrot.slane %v3009_v53, 4  ;;  %v3014_v0 = vrot.slane %v3012_v44, 5  ;;  %v3019_v12 = vrot.slane %v3017_v63, 4  ;;  %v2944_v24 = vld [vmem:[#allocation2 + $0x38] sm:$0x1f]  ;;  %v6066_v56 = vld [vmem:[%s6912_s3 + $0x1b0] sm:$0xff]  }
  0x94   : > { %6935 = vst [vmem:[#allocation10_spill] sm:$0xff] %v6596_v36  ;;  %v3022_v18 = vrot.slane %v3020_v55, 5  ;;  %v2998_v35 = vor.u32 %v2997_v50, %v2994_v29  ;;  %v3029_v45 = vshll.u32 %v2943_v5, 16  ;;  %v3034_v47 = vshrl.u32 %v2944_v24, 16  ;;  %v2947_v63 = vld [vmem:[#allocation2 + $0x50] sm:$0xf0] }
  0x95   : > { %5369 = vmatmul.mubr.bf16.vlgmr.msra.gmra.mrb[0].mxu1 %v6325_v2  ;;  %v3015_v39 = vor.u32 %v3014_v0, %v3011_v54  ;;  %v2948_v55 = vld [vmem:[#allocation2 + $0x58] sm:$0x1f]  ;;  %v6065_v29 = vld [vmem:[%s6912_s3 + $0x148] sm:$0xff]   ;;  %v2949_v50 = vld [vmem:[#allocation2 + $0x60] sm:$0xf0] }
  0x96   : > { %5401 = vmatpush3.bf16.msra.mxu1 %v6441_v16  ;;  %5372 = vmatprep.mubr.bf16.mxu1 %v6339_v22  ;;  %v2980_v16 = vrot.slane %v2978_v62, 5  ;;  %v3005_v62 = vrot.slane %v3003_v43, 5  ;;  %v3023_v14 = vor.u32 %v3022_v18, %v3019_v12  ;;  %v3037_v43 = vshll.u32 %v2944_v24, 16  ;;  %v2950_v18 = vld [vmem:[#allocation2 + $0x68] sm:$0x1f] }
  0x97   : > { %5581 = vmatmul.mubr.bf16.gmra.mrb[20].mxu0 %v6576_v51  ;;  %5402 = vmatprep.subr.bf16.mxu1 %v6056_v31  ;;  %v3036_v54 = vrot.slane %v3034_v47, 4  ;;  %v3060_v24 = vshrl.u32 %v2947_v63, 16 }
  0x98   : > { %5584 = vmatprep.mubr.bf16.mxu0 %v6579_v58  ;;  %v2981_v57 = vor.u32 %v2980_v16, %v2977_v34  ;;  %v2946_v34 = vld [vmem:[#allocation2 + $0x48] sm:$0x1f]  ;;  %v3026_v16 = vshrl.u32 %v2943_v5, 16  ;;  %v3006_v25 = vor.u32 %v3005_v62, %v3002_v61  ;;  %v6625_v62 = vsel %vm2973_vm2, %v3015_v39, %v3023_v14  ;;  %v6067_v39 = vld [vmem:[%s6912_s3 + $0x150] sm:$0xff]  }
  0x99   : > { %v3054_v23 = vshll.u32 %v2946_v34, 16  ;;  %v3039_v0 = vrot.slane %v3037_v43, 5  ;;  %v3085_v43 = vshrl.u32 %v2950_v18, 16 }
  0x9a   : > { %5403 = vmatpush3.bf16.msra.mxu1 %v6056_v31  ;;  %v6062_v31 = vld [vmem:[%s6912_s3 + $0x1a0] sm:$0xff]   ;;  %v2990_v20 = vsel %vm2973_vm2, %v2981_v57, %v2989_v59  ;;  %v3028_v57 = vrot.slane %v3026_v16, 4  ;;  %v3031_v59 = vrot.slane %v3029_v45, 5  ;;  %v6622_v61 = vsel %vm2973_vm2, %v2998_v35, %v3006_v25  ;;  %v6068_v35 = vld [vmem:[%s6912_s3 + $0x1b8] sm:$0xff]  }
  0x9b   : > { %5404 = vmatprep.subr.bf16.mxu1 %v6058_v11  ;;  %v3056_v12 = vrot.slane %v3054_v23, 5  ;;  %v3040_v25 = vor.u32 %v3039_v0, %v3036_v54  ;;  %v3080_v45 = vshll.u32 %v2949_v50, 16  ;;  %v2953_v54 = vld [vmem:[#allocation2 + $0x80] sm:$0xf0] }
  0x9c   : > { %v3032_v16 = vor.u32 %v3031_v59, %v3028_v57  ;;  %v2952_v57 = vld [vmem:[#allocation2 + $0x78] sm:$0x1f] }
  0x9d   : > { %5373 = vmatmul.mubr.bf16.gmra.mrb[4].mxu1 %v6353_v42  ;;  %v3082_v0 = vrot.slane %v3080_v45, 5 }
  0x9e   : > { %5376 = vmatprep.mubr.bf16.mxu1 %v6380_v3  ;;  %5405 = vmatpush3.bf16.msra.mxu1 %v6058_v11  ;;  %v2945_v11 = vld [vmem:[#allocation2 + $0x40] sm:$0xf0]  ;;  %v6644_v59 = vsel %vm2973_vm2, %v3032_v16, %v3040_v25  ;;  %v3111_v16 = vshrl.u32 %v2953_v54, 16  ;;  %v3114_v25 = vshll.u32 %v2953_v54, 16 }
  0x9f   : > { %5585 = vmatmul.mubr.bf16.gmra.mrb[24].mxu0 %v6593_v26  ;;  %5406 = vmatprep.subr.bf16.mxu1 %v6060_v27  ;;  %v3043_v53 = vshrl.u32 %v2945_v11, 16  ;;  %v3046_v44 = vshll.u32 %v2945_v11, 16  ;;  %v3068_v11 = vshrl.u32 %v2948_v55, 16 }
  0xa0   : > { %5588 = vmatprep.mubr.bf16.mxu0 %v6596_v36  ;;  %v3116_v54 = vrot.slane %v3114_v25, 5 }
  0xa1   : > { %v3045_v5 = vrot.slane %v3043_v53, 4  ;;  %v3088_v53 = vshll.u32 %v2950_v18, 16 }
  0xa2   : > { %5407 = vmatpush3.bf16.msra.mxu1 %v6060_v27  ;;  %v3051_v27 = vshrl.u32 %v2946_v34, 16  ;;  %v3071_v34 = vshll.u32 %v2948_v55, 16 }
  0xa3   : > { %5408 = vmatprep.subr.bf16.mxu1 %v6062_v31 }
  0xa4   : > { %v3073_v55 = vrot.slane %v3071_v34, 5  ;;  %v3105_v34 = vshll.u32 %v2952_v57, 16 }
  0xa5   : > { %5377 = vmatmul.mubr.bf16.gmra.mrb[8].mxu1 %v6430_v9 }
  0xa6   : > { %5380 = vmatprep.mubr.bf16.mxu1 %v6459_v1  ;;  %5409 = vmatpush3.bf16.msra.mxu1 %v6062_v31  ;;  %v3048_v31 = vrot.slane %v3046_v44, 5  ;;  %v6641_v44 = vld [vmem:[%s6912_s3 + $0x40] sm:$0xff]  }
  0xa7   : > { %5589 = vmatmul.mubr.bf16.gmra.mrb[28].mxu0 %v1952_v6  ;;  %5410 = vmatprep.subr.bf16.mxu1 %v6064_v46  ;;  %v3053_v6 = vrot.slane %v3051_v27, 4  ;;  %v3062_v27 = vrot.slane %v3060_v24, 4 }
  0xa8   : > { %5608 = vmatprep.mubr.bf16.mxu0 %v2990_v20  ;;  %v3063_v20 = vshll.u32 %v2947_v63, 16  ;;  %v3049_v47 = vor.u32 %v3048_v31, %v3045_v5  ;;  %v3070_v63 = vrot.slane %v3068_v11, 4  ;;  %v3087_v5 = vrot.slane %v3085_v43, 4  ;;  %v2955_v43 = vld [vmem:[#allocation2 + $0x90] sm:$0xf0] }
  0xa9   : > { %v3057_v14 = vor.u32 %v3056_v12, %v3053_v6  ;;  %v3090_v31 = vrot.slane %v3088_v53, 5  ;;  %v6069_v6 = vld [vmem:[%s6912_s3 + $0x158] sm:$0xff]   ;;  %v2954_v12 = vld [vmem:[#allocation2 + $0x88] sm:$0x1f]  ;;  %v3102_v11 = vshrl.u32 %v2952_v57, 16  ;;  %v3107_v57 = vrot.slane %v3105_v34, 5 }
  0xaa   : > { %5411 = vmatpush3.bf16.msra.mxu1 %v6064_v46  ;;  %v3077_v46 = vshrl.u32 %v2949_v50, 16  ;;  %v3065_v23 = vrot.slane %v3063_v20, 5  ;;  %v3074_v24 = vor.u32 %v3073_v55, %v3070_v63  ;;  %v3119_v45 = vshrl.u32 %v2954_v12, 16  ;;  %v2956_v53 = vld [vmem:[#allocation2 + $0x98] sm:$0x1f] }
  0xab   : > { %5412 = vmatprep.subr.bf16.mxu1 %v6066_v56  ;;  %v597_v63 = vld [vmem:[#allocation2 + $0x108] sm:$0xf]  ;;  %v3104_v55 = vrot.slane %v3102_v11, 4  ;;  %v3139_v36 = vshll.u32 %v2956_v53, 16 }
  0xac   : > { %v3079_v50 = vrot.slane %v3077_v46, 4  ;;  %v3066_v18 = vor.u32 %v3065_v23, %v3062_v27  ;;  %v2958_v11 = vld [vmem:[#allocation2 + $0xa8] sm:$0x1f]  ;;  %v885_v25 = vshll.u32 %v597_v63, 16 }
  0xad   : > { %5381 = vmatmul.mubr.bf16.gmra.mrb[12].mxu1 %v6470_v21  ;;  %v3153_v58 = vshrl.u32 %v2958_v11, 16 }
  0xae   : > { %5384 = vmatprep.mubr.bf16.mxu1 %v6480_v40  ;;  %5413 = vmatpush3.bf16.msra.mxu1 %v6066_v56  ;;  %v6647_v56 = vsel %vm2973_vm2, %v3049_v47, %v3057_v14  ;;  %v3083_v46 = vor.u32 %v3082_v0, %v3079_v50  ;;  %v3122_v47 = vshll.u32 %v2954_v12, 16  ;;  %v6071_v14 = vld [vmem:[%s6912_s3 + $0x160] sm:$0xff]   ;;  %v3113_v50 = vrot.slane %v3111_v16, 4 }
  0xaf   : > { %5609 = vmatmul.mubr.bf16.vlgmr.msra.gmra.mrb[0].mxu0 %v6622_v61  ;;  %5414 = vmatprep.subr.bf16.mxu1 %v6068_v35  ;;  %v2957_v12 = vld [vmem:[#allocation2 + $0xa0] sm:$0xf0]  ;;  %v882_v16 = vshrl.u32 %v597_v63, 16  ;;  %v3155_v33 = vrot.slane %v3153_v58, 4 }
  0xb0   : > { %5641 = vmatpush3.bf16.msra.mxu0 %v6558_v19  ;;  %5612 = vmatprep.mubr.bf16.mxu0 %v6625_v62  ;;  %v2951_v19 = vld [vmem:[#allocation2 + $0x70] sm:$0xf0] }
  0xb1   : > { %5642 = vmatprep.subr.bf16.mxu0 %v6065_v29  ;;  %v3097_v20 = vshll.u32 %v2951_v19, 16 }
  0xb2   : > { %5415 = vmatpush3.bf16.msra.mxu1 %v6068_v35  ;;  %v3091_v35 = vor.u32 %v3090_v31, %v3087_v5  ;;  %v3121_v5 = vrot.slane %v3119_v45, 4  ;;  %v3124_v31 = vrot.slane %v3122_v47, 5  ;;  %v3117_v45 = vor.u32 %v3116_v54, %v3113_v50 }
  0xb3   : > { %5448 = vmatprep.subr.bf16.mxu1 %v6641_v44  ;;  %v3099_v23 = vrot.slane %v3097_v20, 5  ;;  %v3136_v20 = vshrl.u32 %v2956_v53, 16  ;;  %v3145_v47 = vshrl.u32 %v2957_v12, 16  ;;  %v3156_v53 = vshll.u32 %v2958_v11, 16 }
  0xb4   : > { %5643 = vmatpush3.bf16.msra.mxu0 %v6065_v29  ;;  %v3094_v29 = vshrl.u32 %v2951_v19, 16  ;;  %v596_v19 = vld [vmem:[#allocation2 + $0x100] sm:$0xf8]  ;;  %v6664_v0 = vsel %vm2973_vm2, %v3083_v46, %v3091_v35  ;;  %v3108_v35 = vor.u32 %v3107_v57, %v3104_v55  ;;  %v3125_v26 = vor.u32 %v3124_v31, %v3121_v5  ;;  %v2959_v55 = vld [vmem:[#allocation2 + $0xb0] sm:$0xf0] }
  0xb5   : > { %5644 = vmatprep.subr.bf16.mxu0 %v6067_v39  ;;  %5385 = vmatmul.mubr.bf16.gmra.mrb[16].mxu1 %v6490_v13  ;;  %v877_v34 = vshll.u32 %v596_v19, 16  ;;  %v3147_v5 = vrot.slane %v3145_v47, 4  ;;  %v2961_v31 = vld [vmem:[#allocation2 + $0xc0] sm:$0xf0]  ;;  %v3158_v37 = vrot.slane %v3156_v53, 5 }
  0xb6   : > { %5388 = vmatprep.mubr.bf16.mxu1 %v6518_v52  ;;  %v3096_v27 = vrot.slane %v3094_v29, 4  ;;  %v3131_v29 = vshll.u32 %v2955_v43, 16  ;;  %v3179_v58 = vshrl.u32 %v2961_v31, 16 }
  0xb7   : > { %5613 = vmatmul.mubr.bf16.gmra.mrb[4].mxu0 %v6644_v59  ;;  %v879_v50 = vrot.slane %v877_v34, 4 }
  0xb8   : > { %5616 = vmatprep.mubr.bf16.mxu0 %v6647_v56  ;;  %5645 = vmatpush3.bf16.msra.mxu0 %v6067_v39  ;;  %v6661_v39 = vsel %vm2973_vm2, %v3066_v18, %v3074_v24  ;;  %v6073_v18 = vld [vmem:[%s6912_s3 + $0x168] sm:$0xff]   ;;  %v3128_v24 = vshrl.u32 %v2955_v43, 16  ;;  %v3100_v46 = vor.u32 %v3099_v23, %v3096_v27  ;;  %v3148_v43 = vshll.u32 %v2957_v12, 16 }
  0xb9   : > { %5646 = vmatprep.subr.bf16.mxu0 %v6069_v6  ;;  %v3133_v51 = vrot.slane %v3131_v29, 5  ;;  %v3138_v27 = vrot.slane %v3136_v20, 4  ;;  %v3141_v23 = vrot.slane %v3139_v36, 5  ;;  %v6680_v12 = vsel %vm2973_vm2, %v3117_v45, %v3125_v26  ;;  %v6077_v36 = vld [vmem:[%s6912_s3 + $0x178] sm:$0xff]  }
  0xba   : > { %v3130_v63 = vrot.slane %v3128_v24, 4  ;;  %v6677_v54 = vsel %vm2973_vm2, %v3100_v46, %v3108_v35  ;;  %v3150_v11 = vrot.slane %v3148_v43, 5  ;;  %v2962_v24 = vld [vmem:[#allocation2 + $0xc8] sm:$0x1f]  ;;  %v884_v29 = vrot.slane %v882_v16, 3 }
  0xbb   : > { %v887_v20 = vrot.slane %v885_v25, 4  ;;  %v3142_v34 = vor.u32 %v3141_v23, %v3138_v27  ;;  %v3165_v46 = vshll.u32 %v2959_v55, 16  ;;  %v3182_v45 = vshll.u32 %v2961_v31, 16  ;;  %v2963_v31 = vld [vmem:[#allocation2 + $0xd0] sm:$0xf0] }
  0xbc   : > { %5647 = vmatpush3.bf16.msra.mxu0 %v6069_v6  ;;  %v874_v6 = vshrl.u32 %v596_v19, 16  ;;  %v6075_v19 = vld [vmem:[%s6912_s3 + $0x170] sm:$0xff]   ;;  %v3187_v47 = vshrl.u32 %v2962_v24, 16  ;;  %v3190_v43 = vshll.u32 %v2962_v24, 16  ;;  %v3151_v53 = vor.u32 %v3150_v11, %v3147_v5  ;;  %v2964_v24 = vld [vmem:[#allocation2 + $0xd8] sm:$0x1f] }
  0xbd   : > { %5648 = vmatprep.subr.bf16.mxu0 %v6071_v14  ;;  %5389 = vmatmul.mubr.bf16.gmra.mrb[20].mxu1 %v6534_v41  ;;  %v3159_v16 = vor.u32 %v3158_v37, %v3155_v33  ;;  %v3181_v5 = vrot.slane %v3179_v58, 4  ;;  %v3184_v37 = vrot.slane %v3182_v45, 5 }
  0xbe   : > { %5392 = vmatprep.mubr.bf16.mxu1 %v6538_v48  ;;  %v876_v57 = vrot.slane %v874_v6, 3  ;;  %v3134_v6 = vor.u32 %v3133_v51, %v3130_v63  ;;  %v6691_v51 = vld [vmem:[%s6912_s3 + $0x200] sm:$0xff]   ;;  %v888_v63 = vor.u32 %v887_v20, %v884_v29  ;;  %v3189_v33 = vrot.slane %v3187_v47, 4  ;;  %v2966_v29 = vld [vmem:[#allocation2 + $0xe8] sm:$0x1f] }
  0xbf   : > { %5617 = vmatmul.mubr.bf16.gmra.mrb[8].mxu0 %v6661_v39  ;;  %v3192_v11 = vrot.slane %v3190_v43, 5  ;;  %v6698_v49 = vsel %vm2973_vm2, %v3151_v53, %v3159_v16  ;;  %v3196_v20 = vshrl.u32 %v2963_v31, 16  ;;  %v3221_v47 = vshrl.u32 %v2966_v29, 16 }
  0xc0   : > { %5620 = vmatprep.mubr.bf16.mxu0 %v6664_v0  ;;  %5649 = vmatpush3.bf16.msra.mxu0 %v6071_v14  ;;  %v2960_v14 = vld [vmem:[#allocation2 + $0xb8] sm:$0x1f]  ;;  %v880_v25 = vor.u32 %v879_v50, %v876_v57  ;;  %v6695_v27 = vsel %vm2973_vm2, %v3134_v6, %v3142_v34  ;;  %v2965_v50 = vld [vmem:[#allocation2 + $0xe0] sm:$0xf0]  ;;  %v3199_v6 = vshll.u32 %v2963_v31, 16  ;;  %v3204_v34 = vshrl.u32 %v2964_v24, 16 }
  0xc1   : > { %5650 = vmatprep.subr.bf16.mxu0 %v6073_v18  ;;  %v3170_v35 = vshrl.u32 %v2960_v14, 16  ;;  %v3173_v26 = vshll.u32 %v2960_v14, 16  ;;  %v3213_v58 = vshrl.u32 %v2965_v50, 16  ;;  %v3216_v45 = vshll.u32 %v2965_v50, 16 }
  0xc2   : > { %v6702_v57 = vsel %vm600_vm0, %v880_v25, %v888_v63  ;;  %v3224_v43 = vshll.u32 %v2966_v29, 16  ;;  %v3198_v53 = vrot.slane %v3196_v20, 4  ;;  %v3201_v16 = vrot.slane %v3199_v6, 5 }
  0xc3   : > { %v3175_v14 = vrot.slane %v3173_v26, 5  ;;  %v3193_v26 = vor.u32 %v3192_v11, %v3189_v33  ;;  %v3206_v25 = vrot.slane %v3204_v34, 4  ;;  %v2968_v33 = vld [vmem:[#allocation2 + $0xf8] sm:$0x1f] }
  0xc4   : > { %5651 = vmatpush3.bf16.msra.mxu0 %v6073_v18  ;;  %v3162_v18 = vshrl.u32 %v2959_v55, 16  ;;  %v3167_v55 = vrot.slane %v3165_v46, 5  ;;  %v3202_v11 = vor.u32 %v3201_v16, %v3198_v53  ;;  %v3238_v20 = vshrl.u32 %v2968_v33, 16  ;;  %v6080_v16 = vld [vmem:[%s6912_s3 + $0x68] sm:$0xff]  }
  0xc5   : > { %5652 = vmatprep.subr.bf16.mxu0 %v6075_v19  ;;  %5393 = vmatmul.mubr.bf16.gmra.mrb[24].mxu1 %v6553_v8  ;;  %v3241_v6 = vshll.u32 %v2968_v33, 16 }
  0xc6   : > { %5396 = vmatprep.mubr.bf16.mxu1 %v6570_v32  ;;  %v3164_v23 = vrot.slane %v3162_v18, 4  ;;  %v3207_v18 = vshll.u32 %v2964_v24, 16 }
  0xc7   : > { %5621 = vmatmul.mubr.bf16.gmra.mrb[12].mxu0 %v6677_v54 }
  0xc8   : > { %5624 = vmatprep.mubr.bf16.mxu0 %v6680_v12  ;;  %5653 = vmatpush3.bf16.msra.mxu0 %v6075_v19  ;;  %v3172_v19 = vrot.slane %v3170_v35, 4  ;;  %v3168_v46 = vor.u32 %v3167_v55, %v3164_v23  ;;  %v3185_v35 = vor.u32 %v3184_v37, %v3181_v5  ;;  %v3209_v63 = vrot.slane %v3207_v18, 5  ;;  %v2967_v55 = vld [vmem:[#allocation2 + $0xf0] sm:$0xf0] }
  0xc9   : > { %5654 = vmatprep.subr.bf16.mxu0 %v6077_v36  ;;  %v3223_v5 = vrot.slane %v3221_v47, 4  ;;  %v3226_v37 = vrot.slane %v3224_v43, 5  ;;  %v3230_v50 = vshrl.u32 %v2967_v55, 16  ;;  %v3233_v29 = vshll.u32 %v2967_v55, 16  ;;  %v6078_v43 = vld [vmem:[%s6912_s3 + $0x60] sm:$0xff]  }
  0xca   : > { %v6712_v23 = vsel %vm2973_vm2, %v3185_v35, %v3193_v26  ;;  %v3210_v24 = vor.u32 %v3209_v63, %v3206_v25  ;;  %v598_v25 = vld [vmem:[#allocation2 + $0x110] sm:$0xf8]  ;;  %v599_v63 = vld [vmem:[#allocation2 + $0x118] sm:$0xf] }
  0xcb   : > { %v3227_v18 = vor.u32 %v3226_v37, %v3223_v5  ;;  %v3232_v35 = vrot.slane %v3230_v50, 4  ;;  %v3235_v26 = vrot.slane %v3233_v29, 5  ;;  %v894_v55 = vshll.u32 %v598_v25, 16  ;;  %v6089_v5 = vld [vmem:[%s6912_s3 + $0x238] sm:$0xff]  }
  0xcc   : > { %5655 = vmatpush3.bf16.msra.mxu0 %v6077_v36  ;;  %v3176_v36 = vor.u32 %v3175_v14, %v3172_v19  ;;  %v3215_v19 = vrot.slane %v3213_v58, 4  ;;  %v3218_v14 = vrot.slane %v3216_v45, 5  ;;  %v3240_v58 = vrot.slane %v3238_v20, 4 }
  0xcd   : > { %5688 = vmatprep.subr.bf16.mxu0 %v6691_v51  ;;  %5397 = vmatmul.mubr.bf16.gmra.mrb[28].mxu1 %v6702_v57  ;;  %v3243_v45 = vrot.slane %v3241_v6, 5  ;;  %v896_v33 = vrot.slane %v894_v55, 4 }
  0xce   : > { %5416 = vmatprep.mubr.bf16.mxu1 %v6325_v2  ;;  %v6709_v31 = vsel %vm2973_vm2, %v3168_v46, %v3176_v36  ;;  %v6072_v2 = vld [vmem:[%s6912_s3 + $0x48] sm:$0xff]   ;;  %v3219_v34 = vor.u32 %v3218_v14, %v3215_v19  ;;  %v6074_v46 = vld [vmem:[%s6912_s3 + $0x50] sm:$0xff]   ;;  %v6726_v36 = vsel %vm2973_vm2, %v3202_v11, %v3210_v24  ;;  %v899_v19 = vshrl.u32 %v599_v63, 16  ;;  %v1826_v11 = vld [vmem:[#allocation2] sm:$0xf0] }
  0xcf   : > { %5625 = vmatmul.mubr.bf16.gmra.mrb[16].mxu0 %v6695_v27  ;;  %v3244_v47 = vor.u32 %v3243_v45, %v3240_v58  ;;  %v902_v14 = vshll.u32 %v599_v63, 16  ;;  %v1827_v24 = vld [vmem:[#allocation2 + $0x8] sm:$0xf]  ;;  %v1899_v29 = vrot.slane %v1826_v11, 4 }
  0xd0   : > { %5628 = vmatprep.mubr.bf16.mxu0 %v6698_v49  ;;  %v1900_v20 = vrot.slane %v1827_v24, 4  ;;  %v6093_v58 = vld [vmem:[%s6912_s3 + $0x108] sm:$0xff]  }
  0xd5   : > { %5417 = vmatmul.mubr.bf16.vlgmr.msra.gmra.mrb[0].mxu1 %v6339_v22  ;;  %v6729_v22 = vsel %vm2973_vm2, %v3219_v34, %v3227_v18  ;;  %v1901_v34 = vsel %vm1898_vm1, %v1899_v29, %v1900_v20  ;;  %v2969_v18 = vld [vmem:[#allocation2 + $0x100] sm:$0xf0] }
  0xd6   : > { %5449 = vmatpush3.bf16.msra.mxu1 %v6641_v44  ;;  %5420 = vmatprep.mubr.bf16.mxu1 %v6353_v42  ;;  %v6076_v42 = vld [vmem:[%s6912_s3 + $0x58] sm:$0xff]   ;;  %v3236_v44 = vor.u32 %v3235_v26, %v3232_v35 }
  0xd7   : > { %5629 = vmatmul.mubr.bf16.gmra.mrb[20].mxu0 %v6709_v31  ;;  %5450 = vmatprep.subr.bf16.mxu1 %v6072_v2 }
  0xd8   : > { %5632 = vmatprep.mubr.bf16.mxu0 %v6712_v23  ;;  %v6742_v53 = vsel %vm2973_vm2, %v3236_v44, %v3244_v47 }
  0xda   : > { %5451 = vmatpush3.bf16.msra.mxu1 %v6072_v2  ;;  %v904_v2 = vrot.slane %v902_v14, 4 }
  0xdb   : > { %5452 = vmatprep.subr.bf16.mxu1 %v6074_v46 }
  0xdd   : > { %5421 = vmatmul.mubr.bf16.gmra.mrb[4].mxu1 %v6380_v3  ;;  %v6082_v3 = vld [vmem:[%s6912_s3 + $0x70] sm:$0xff]  }
  0xde   : > { %5424 = vmatprep.mubr.bf16.mxu1 %v6430_v9  ;;  %5453 = vmatpush3.bf16.msra.mxu1 %v6074_v46  ;;  %v6081_v9 = vld [vmem:[%s6912_s3 + $0x208] sm:$0xff]   ;;  %v3250_v46 = vshll.u32 %v2969_v18, 16 }
  0xdf   : > { %5633 = vmatmul.mubr.bf16.gmra.mrb[24].mxu0 %v6726_v36  ;;  %5454 = vmatprep.subr.bf16.mxu1 %v6076_v42 }
  0xe0   : > { %5636 = vmatprep.mubr.bf16.mxu0 %v6729_v22 }
  0xe2   : > { %5455 = vmatpush3.bf16.msra.mxu1 %v6076_v42  ;;  %v3252_v42 = vrot.slane %v3250_v46, 5 }
  0xe3   : > { %5456 = vmatprep.subr.bf16.mxu1 %v6078_v43 }
  0xe5   : > { %5425 = vmatmul.mubr.bf16.gmra.mrb[8].mxu1 %v6459_v1  ;;  %v6084_v1 = vld [vmem:[%s6912_s3 + $0x78] sm:$0xff]  }
  0xe6   : > { %5428 = vmatprep.mubr.bf16.mxu1 %v6470_v21  ;;  %5457 = vmatpush3.bf16.msra.mxu1 %v6078_v43  ;;  %v6083_v21 = vld [vmem:[%s6912_s3 + $0x210] sm:$0xff]  }
  0xe7   : > { %5637 = vmatmul.mubr.bf16.gmra.mrb[28].mxu0 %v6742_v53  ;;  %5458 = vmatprep.subr.bf16.mxu1 %v6080_v16  ;;  %v6094_v43 = vld [vmem:[%s6912_s3 + $0x110] sm:$0xff]  }
  0xe8   : > { %5656 = vmatprep.mubr.bf16.mxu0 %v6622_v61  ;;  %v6085_v61 = vld [vmem:[%s6912_s3 + $0x218] sm:$0xff]  }
  0xea   : > { %5459 = vmatpush3.bf16.msra.mxu1 %v6080_v16  ;;  %v6095_v16 = vld [vmem:[%s6912_s3 + $0x118] sm:$0xff]  }
  0xeb   : > { %5460 = vmatprep.subr.bf16.mxu1 %v6082_v3 }
  0xed   : > { %5429 = vmatmul.mubr.bf16.gmra.mrb[12].mxu1 %v6480_v40  ;;  %v6092_v40 = vld [vmem:[%s6912_s3 + $0x100] sm:$0xff]  }
  0xee   : > { %5432 = vmatprep.mubr.bf16.mxu1 %v6490_v13  ;;  %5461 = vmatpush3.bf16.msra.mxu1 %v6082_v3  ;;  %v6086_v13 = vld [vmem:[%s6912_s3 + $0x220] sm:$0xff]  }
  0xef   : > { %5657 = vmatmul.mubr.bf16.vlgmr.msra.gmra.mrb[0].mxu0 %v6625_v62  ;;  %5462 = vmatprep.subr.bf16.mxu1 %v6084_v1 }
  0xf0   : > { %5689 = vmatpush3.bf16.msra.mxu0 %v6691_v51  ;;  %5660 = vmatprep.mubr.bf16.mxu0 %v6644_v59  ;;  %v6087_v51 = vld [vmem:[%s6912_s3 + $0x228] sm:$0xff]  }
  0xf1   : > { %5690 = vmatprep.subr.bf16.mxu0 %v6081_v9 }
  0xf2   : > { %5463 = vmatpush3.bf16.msra.mxu1 %v6084_v1 }
  0xf3   : > { %5736 = vmatprep.subr.bf16.mxu1 %v6092_v40 }
  0xf4   : > { %5691 = vmatpush3.bf16.msra.mxu0 %v6081_v9  ;;  %v6096_v9 = vld [vmem:[%s6912_s3 + $0x120] sm:$0xff]  }
  0xf5   : > { %5692 = vmatprep.subr.bf16.mxu0 %v6083_v21  ;;  %5433 = vmatmul.mubr.bf16.gmra.mrb[16].mxu1 %v6518_v52  ;;  %v6088_v52 = vld [vmem:[%s6912_s3 + $0x230] sm:$0xff]  }
  0xf6   : > { %5436 = vmatprep.mubr.bf16.mxu1 %v6534_v41  ;;  %v891_v41 = vshrl.u32 %v598_v25, 16 }
  0xf7   : > { %5661 = vmatmul.mubr.bf16.gmra.mrb[4].mxu0 %v6647_v56 }
  0xf8   : > { %5664 = vmatprep.mubr.bf16.mxu0 %v6661_v39  ;;  %5693 = vmatpush3.bf16.msra.mxu0 %v6083_v21  ;;  %v893_v37 = vrot.slane %v891_v41, 3 }
  0xf9   : > { %5694 = vmatprep.subr.bf16.mxu0 %v6085_v61 }
  0xfc   : > { %5695 = vmatpush3.bf16.msra.mxu0 %v6085_v61 }
  0xfd   : > { %5696 = vmatprep.subr.bf16.mxu0 %v6086_v13  ;;  %5437 = vmatmul.mubr.bf16.gmra.mrb[20].mxu1 %v6538_v48  ;;  %v901_v48 = vrot.slane %v899_v19, 3 }
  0xfe   : > { %5440 = vmatprep.mubr.bf16.mxu1 %v6553_v8  ;;  %v897_v8 = vor.u32 %v896_v33, %v893_v37 }
  0xff   : > { %5665 = vmatmul.mubr.bf16.gmra.mrb[8].mxu0 %v6664_v0  ;;  %v905_v50 = vor.u32 %v904_v2, %v901_v48 }
 0x100   : > { %5668 = vmatprep.mubr.bf16.mxu0 %v6677_v54  ;;  %5697 = vmatpush3.bf16.msra.mxu0 %v6086_v13 }
 0x101   : > { %5698 = vmatprep.subr.bf16.mxu0 %v6087_v51  ;;  %v906_v6 = vsel %vm600_vm0, %v897_v8, %v905_v50 }
 0x104   : > { %5699 = vmatpush3.bf16.msra.mxu0 %v6087_v51 }
 0x105   : > { %5700 = vmatprep.subr.bf16.mxu0 %v6088_v52  ;;  %5441 = vmatmul.mubr.bf16.gmra.mrb[24].mxu1 %v6570_v32  ;;  %v2970_v32 = vld [vmem:[#allocation2 + $0x108] sm:$0x1f] }
 0x106   : > { %5444 = vmatprep.mubr.bf16.mxu1 %v6702_v57  ;;  %v3247_v57 = vshrl.u32 %v2969_v18, 16  ;;  %v3255_v35 = vshrl.u32 %v2970_v32, 16  ;;  %v3258_v26 = vshll.u32 %v2970_v32, 16 }
 0x107   : > { %5669 = vmatmul.mubr.bf16.gmra.mrb[12].mxu0 %v6680_v12 }
 0x108   : > { %5672 = vmatprep.mubr.bf16.mxu0 %v6695_v27  ;;  %5701 = vmatpush3.bf16.msra.mxu0 %v6088_v52  ;;  %v3249_v45 = vrot.slane %v3247_v57, 4  ;;  %v3257_v44 = vrot.slane %v3255_v35, 4  ;;  %v3260_v47 = vrot.slane %v3258_v26, 5 }
 0x109   : > { %5702 = vmatprep.subr.bf16.mxu0 %v6089_v5 }
 0x10c   : > { %5703 = vmatpush3.bf16.msra.mxu0 %v6089_v5 }
 0x10d   : > { %5445 = vmatmul.mubr.bf16.gmra.mrb[28].mxu1 %v906_v6 }
 0x10e   : > { %5464 = vmatprep.mubr.bf16.mxu1 %v1901_v34 }
 0x10f   : > { %5673 = vmatmul.mubr.bf16.gmra.mrb[16].mxu0 %v6698_v49 }
 0x110   : > { %5676 = vmatprep.mubr.bf16.mxu0 %v6709_v31 }
 0x115   : > { %5465 = vmatmul.mubr.bf16.vlgmr.msra.gmra.mrb[0].mxu1 %v6290_v60  ;;  %v3253_v60 = vor.u32 %v3252_v42, %v3249_v45 }
 0x116   : > { %5744 = vmatpush3.bf16.msra.mxu1 %v6092_v40  ;;  %5468 = vmatprep.mubr.bf16.mxu1 %v6305_v17  ;;  %v3261_v17 = vor.u32 %v3260_v47, %v3257_v44 }
 0x117   : > { %5677 = vmatmul.mubr.bf16.gmra.mrb[20].mxu0 %v6712_v23  ;;  %5737 = vmatprep.subr.bf16.mxu1 %v6093_v58 }
 0x118   : > { %5680 = vmatprep.mubr.bf16.mxu0 %v6726_v36  ;;  %v3262_v3 = vsel %vm2973_vm2, %v3253_v60, %v3261_v17 }
 0x11a   : > { %5745 = vmatpush3.bf16.msra.mxu1 %v6093_v58 }
 0x11b   : > { %5738 = vmatprep.subr.bf16.mxu1 %v6094_v43 }
 0x11d   : > { %5469 = vmatmul.mubr.bf16.gmra.mrb[4].mxu1 %v6317_v38  ;;  %v6097_v38 = vld [vmem:[%s6912_s3 + $0x128] sm:$0xff]  }
 0x11e   : > { %5472 = vmatprep.mubr.bf16.mxu1 %v6332_v4  ;;  %5746 = vmatpush3.bf16.msra.mxu1 %v6094_v43  ;;  %v6098_v4 = vld [vmem:[%s6912_s3 + $0x130] sm:$0xff]  }
 0x11f   : > { %5681 = vmatmul.mubr.bf16.gmra.mrb[24].mxu0 %v6729_v22  ;;  %5739 = vmatprep.subr.bf16.mxu1 %v6095_v16 }
 0x120   : > { %5684 = vmatprep.mubr.bf16.mxu0 %v6742_v53 }
 0x122   : > { %5747 = vmatpush3.bf16.msra.mxu1 %v6095_v16 }
 0x123   : > { %5740 = vmatprep.subr.bf16.mxu1 %v6096_v9 }
 0x125   : > { %5473 = vmatmul.mubr.bf16.gmra.mrb[8].mxu1 %v6343_v28  ;;  %v6099_v28 = vld [vmem:[%s6912_s3 + $0x138] sm:$0xff]  }
 0x126   : > { %5476 = vmatprep.mubr.bf16.mxu1 %v6412_v15  ;;  %5748 = vmatpush3.bf16.msra.mxu1 %v6096_v9  ;;  %v6936_v15 = vld [vmem:[#allocation4_spill] sm:$0xff] }
 0x127   : > { %5685 = vmatmul.mubr.bf16.gmra.mrb[28].mxu0 %v3262_v3  ;;  %5741 = vmatprep.subr.bf16.mxu1 %v6097_v38 }
 0x128   : > { %5704 = vmatprep.mubr.bf16.mxu0 %v6625_v62  ;;  %v6939_v62 = vld [vmem:[#allocation7_spill] sm:$0xff] }
 0x12a   : > { %5749 = vmatpush3.bf16.msra.mxu1 %v6097_v38 }
 0x12b   : > { %5742 = vmatprep.subr.bf16.mxu1 %v6098_v4 }
 0x12d   : > { %5477 = vmatmul.mubr.bf16.gmra.mrb[12].mxu1 %v6433_v10  ;;  %v6937_v10 = vld [vmem:[#allocation5_spill] sm:$0xff] }
 0x12e   : > { %5480 = vmatprep.mubr.bf16.mxu1 %v6464_v7  ;;  %5750 = vmatpush3.bf16.msra.mxu1 %v6098_v4  ;;  %v6938_v7 = vld [vmem:[#allocation6_spill] sm:$0xff] }
 0x12f   : > { %5705 = vmatmul.mubr.bf16.vlgmr.msra.gmra.mrb[0].mxu0 %v6644_v59  ;;  %5743 = vmatprep.subr.bf16.mxu1 %v6099_v28  ;;  %v6940_v59 = vld [vmem:[#allocation8_spill] sm:$0xff] }
 0x130   : > { %5708 = vmatprep.mubr.bf16.mxu0 %v6647_v56  ;;  %v6941_v56 = vld [vmem:[#allocation9_spill] sm:$0xff] }
 0x132   : > { %5751 = vmatpush3.bf16.msra.mxu1 %v6099_v28 }
 0x135   : > { %5481 = vmatmul.mubr.bf16.gmra.mrb[16].mxu1 %v6542_v30 }
 0x136   : > { %5484 = vmatprep.mubr.bf16.mxu1 %v6936_v15 }
 0x137   : > { %5709 = vmatmul.mubr.bf16.gmra.mrb[4].mxu0 %v6661_v39  ;;  %v2971_v39 = vld [vmem:[#allocation2 + $0x110] sm:$0xf0] }
 0x138   : > { %5712 = vmatprep.mubr.bf16.mxu0 %v6664_v0  ;;  %v2972_v0 = vld [vmem:[#allocation2 + $0x118] sm:$0x1f] }
 0x13d   : > { %5485 = vmatmul.mubr.bf16.gmra.mrb[20].mxu1 %v6937_v10 }
 0x13e   : > { %5488 = vmatprep.mubr.bf16.mxu1 %v6938_v7 }
 0x13f   : > { %5713 = vmatmul.mubr.bf16.gmra.mrb[8].mxu0 %v6677_v54  ;;  %v3264_v54 = vshrl.u32 %v2971_v39, 16 }
 0x140   : > { %5716 = vmatprep.mubr.bf16.mxu0 %v6680_v12  ;;  %v3272_v12 = vshrl.u32 %v2972_v0, 16 }
 0x142   : > { %v3274_v1 = vrot.slane %v3272_v12, 4 }
 0x145   : > { %5489 = vmatmul.mubr.bf16.gmra.mrb[24].mxu1 %v6939_v62 }
 0x146   : > { %5492 = vmatprep.mubr.bf16.mxu1 %v6940_v59 }
 0x147   : > { %5717 = vmatmul.mubr.bf16.gmra.mrb[12].mxu0 %v6695_v27  ;;  %v3275_v27 = vshll.u32 %v2972_v0, 16 }
 0x148   : > { %5720 = vmatprep.mubr.bf16.mxu0 %v6698_v49  ;;  %v3267_v49 = vshll.u32 %v2971_v39, 16 }
 0x149   : > { %v3277_v21 = vrot.slane %v3275_v27, 5 }
 0x14b   : > { %v3278_v61 = vor.u32 %v3277_v21, %v3274_v1 }
 0x14d   : > { %5493 = vmatmul.mubr.bf16.gmra.mrb[28].mxu1 %v6941_v56 }
 0x14e   : > { %5528 = vmatprep.mubr.bf16.mxu1 %v6542_v30 }
 0x14f   : > { %5721 = vmatmul.mubr.bf16.gmra.mrb[16].mxu0 %v6709_v31  ;;  %v3266_v31 = vrot.slane %v3264_v54, 4 }
 0x150   : > { %5724 = vmatprep.mubr.bf16.mxu0 %v6712_v23  ;;  %v3269_v23 = vrot.slane %v3267_v49, 5 }
 0x152   : > { %v3270_v30 = vor.u32 %v3269_v23, %v3266_v31 }
 0x155   : > { %5529 = vmatmul.mubr.bf16.vlgmr.msra.gmra.mrb[16].mxu1 %v6936_v15 }
 0x156   : > { %5532 = vmatprep.mubr.bf16.mxu1 %v6937_v10 }
 0x157   : > { %5725 = vmatmul.mubr.bf16.gmra.mrb[20].mxu0 %v6726_v36  ;;  %v3279_v36 = vsel %vm2973_vm2, %v3270_v30, %v3278_v61 }
 0x158   : > { %5728 = vmatprep.mubr.bf16.mxu0 %v6729_v22  ;;  %v6942_v22 = vld [vmem:[#allocation10_spill] sm:$0xff] }
 0x15d   : > { %5533 = vmatmul.mubr.bf16.gmra.mrb[20].mxu1 %v6938_v7 }
 0x15e   : > { %5536 = vmatprep.mubr.bf16.mxu1 %v6939_v62 }
 0x15f   : > { %5729 = vmatmul.mubr.bf16.gmra.mrb[24].mxu0 %v6742_v53 }
 0x160   : > { %5732 = vmatprep.mubr.bf16.mxu0 %v3262_v3 }
 0x165   : > { %5537 = vmatmul.mubr.bf16.gmra.mrb[24].mxu1 %v6940_v59 }
 0x166   : > { %5540 = vmatprep.mubr.bf16.mxu1 %v6941_v56 }
 0x167   : > { %5733 = vmatmul.mubr.bf16.gmra.mrb[28].mxu0 %v3279_v36 }
 0x16d   : > { %5541 = vmatmul.mubr.bf16.gmra.mrb[28].mxu1 %v6942_v22 }
 0x1e8   : > { %v5466_v40 = vpop.f32.mrb[0].mxu1 }
 0x1e9   : > { %v2070_v13 = vpop.f32.mrb[1].mxu1 }
 0x1ea   : > { %v5467_v51 = vpop.f32.mrb[2].mxu1 }
 0x1eb   : > { %v2073_v53 = vpop.f32.mrb[3].mxu1 }
 0x1f0   : > { %v5470_v25 = vpop.f32.mrb[4].mxu1 }
 0x1f1   : > { %v2086_v63 = vpop.f32.mrb[5].mxu1 }
 0x1f2   : > { %v5471_v52 = vpop.f32.mrb[6].mxu1 }
 0x1f3   : > { %v2089_v41 = vpop.f32.mrb[7].mxu1 }
 0x1f8   : > { %v5474_v55 = vpop.f32.mrb[8].mxu1 }
 0x1f9   : > { %v2102_v19 = vpop.f32.mrb[9].mxu1 }
 0x1fa   : > { %v5475_v14 = vpop.f32.mrb[10].mxu1 }
 0x1fb   : > { %v2105_v5 = vpop.f32.mrb[11].mxu1 }
 0x200   : > { %v6866_v2 = vpop.f32.mrb[12].mxu1 }
 0x201   : > { %v6868_v8 = vpop.f32.mrb[13].mxu1 }
 0x202   : > { %v5706_v37 = vpop.f32.mrb[0].mxu0  ;;  %v6870_v20 = vpop.f32.mrb[14].mxu1 }
 0x203   : > { %v5752_v33 = vadd.f32 %v5706_v37, %v5466_v40  ;;  %v4041_v48 = vpop.f32.mrb[1].mxu0  ;;  %v6872_v34 = vpop.f32.mrb[15].mxu1 }
 0x204   : > { %v5753_v11 = vadd.f32 %v4041_v48, %v2070_v13  ;;  %v5707_v24 = vpop.f32.mrb[2].mxu0 }
 0x205   : > { %v5754_v50 = vadd.f32 %v5707_v24, %v5467_v51  ;;  %v4044_v29 = vpop.f32.mrb[3].mxu0  ;;  %v4499_v26 = vmul.f32 %v5752_v33, %v5752_v33 }
 0x206   : > { %v5755_v6 = vadd.f32 %v4044_v29, %v2073_v53  ;;  %v4497_v32 = vmul.f32 %v5753_v11, %v5753_v11 }
 0x207   : > { %v4986_v18 = vpack.c.bf16 %v5754_v50, %v5752_v33  ;;  %v4500_v43 = vmul.f32 %v5754_v50, %v5754_v50 }
 0x208   : > { %v4981_v57 = vpack.c.bf16 %v5755_v6, %v5753_v11  ;;  %v4457_v46 = vadd.f32 %v5755_v6, %v5753_v11  ;;  %v4498_v35 = vmul.f32 %v5755_v6, %v5755_v6 }
 0x209   : > { %5073 = vst [vmem:[%s6161_s30 + $0x8] sm:$0xff] %v4986_v18  }
 0x20a   : > { %4982 = vst [vmem:[%s6161_s30] sm:$0xff] %v4981_v57   ;;  %v4458_v58 = vadd.f32 %v5752_v33, %v4457_v46  ;;  %v4529_v45 = vadd.f32 %v4498_v35, %v4497_v32  ;;  %v5710_v42 = vpop.f32.mrb[4].mxu0 }
 0x20b   : > { %v5756_v44 = vadd.f32 %v5710_v42, %v5470_v25  ;;  %v4057_v47 = vpop.f32.mrb[5].mxu0 }
 0x20c   : > { %v4530_v60 = vadd.f32 %v4529_v45, %v4499_v26  ;;  %v5757_v17 = vadd.f32 %v4057_v47, %v2086_v63  ;;  %v4459_v16 = vadd.f32 %v5754_v50, %v4458_v58  ;;  %v5711_v3 = vpop.f32.mrb[6].mxu0 }
 0x20d   : > { %v5758_v9 = vadd.f32 %v5711_v3, %v5471_v52  ;;  %v4060_v38 = vpop.f32.mrb[7].mxu0  ;;  %v4503_v0 = vmul.f32 %v5756_v44, %v5756_v44 }
 0x20e   : > { %v4460_v4 = vadd.f32 %v5757_v17, %v4459_v16  ;;  %v4501_v28 = vmul.f32 %v5757_v17, %v5757_v17  ;;  %v4531_v15 = vadd.f32 %v4530_v60, %v4500_v43  ;;  %v5759_v10 = vadd.f32 %v4060_v38, %v2089_v41 }
 0x20f   : > { %v4996_v7 = vpack.c.bf16 %v5758_v9, %v5756_v44  ;;  %v4504_v23 = vmul.f32 %v5758_v9, %v5758_v9 }
 0x210   : > { %v4532_v62 = vadd.f32 %v4531_v15, %v4501_v28  ;;  %v4991_v59 = vpack.c.bf16 %v5759_v10, %v5757_v17  ;;  %v4461_v56 = vadd.f32 %v5759_v10, %v4460_v4  ;;  %v4502_v39 = vmul.f32 %v5759_v10, %v5759_v10 }
 0x211   : > { %5075 = vst [vmem:[%s6161_s30 + $0x18] sm:$0xff] %v4996_v7  }
 0x212   : > { %5074 = vst [vmem:[%s6161_s30 + $0x10] sm:$0xff] %v4991_v59   ;;  %v4462_v54 = vadd.f32 %v5756_v44, %v4461_v56  ;;  %v4533_v49 = vadd.f32 %v4532_v62, %v4502_v39  ;;  %v5714_v12 = vpop.f32.mrb[8].mxu0 }
 0x213   : > { %v5760_v27 = vadd.f32 %v5714_v12, %v5474_v55  ;;  %v4073_v31 = vpop.f32.mrb[9].mxu0 }
 0x214   : > { %v4534_v1 = vadd.f32 %v4533_v49, %v4503_v0  ;;  %v5761_v21 = vadd.f32 %v4073_v31, %v2102_v19  ;;  %v4463_v30 = vadd.f32 %v5758_v9, %v4462_v54  ;;  %v5715_v61 = vpop.f32.mrb[10].mxu0 }
 0x215   : > { %v5762_v36 = vadd.f32 %v5715_v61, %v5475_v14  ;;  %v4076_v22 = vpop.f32.mrb[11].mxu0  ;;  %v4507_v55 = vmul.f32 %v5760_v27, %v5760_v27 }
 0x216   : > { %v4464_v40 = vadd.f32 %v5761_v21, %v4463_v30  ;;  %v4505_v13 = vmul.f32 %v5761_v21, %v5761_v21  ;;  %v4535_v51 = vadd.f32 %v4534_v1, %v4504_v23  ;;  %v5763_v53 = vadd.f32 %v4076_v22, %v2105_v5 }
 0x217   : > { %v5006_v25 = vpack.c.bf16 %v5762_v36, %v5760_v27  ;;  %v4508_v14 = vmul.f32 %v5762_v36, %v5762_v36 }
 0x218   : > { %v4536_v63 = vadd.f32 %v4535_v51, %v4505_v13  ;;  %v5001_v52 = vpack.c.bf16 %v5763_v53, %v5761_v21  ;;  %v4465_v41 = vadd.f32 %v5763_v53, %v4464_v40  ;;  %v4506_v37 = vmul.f32 %v5763_v53, %v5763_v53 }
 0x219   : > { %5077 = vst [vmem:[%s6161_s30 + $0x28] sm:$0xff] %v5006_v25  }
 0x21a   : > { %5076 = vst [vmem:[%s6161_s30 + $0x20] sm:$0xff] %v5001_v52   ;;  %v4466_v33 = vadd.f32 %v5760_v27, %v4465_v41  ;;  %v4537_v48 = vadd.f32 %v4536_v63, %v4506_v37  ;;  %v5718_v19 = vpop.f32.mrb[12].mxu0 }
 0x21b   : > { %v5764_v11 = vadd.f32 %v5718_v19, %v6866_v2  ;;  %v4089_v24 = vpop.f32.mrb[13].mxu0 }
 0x21c   : > { %v4538_v50 = vadd.f32 %v4537_v48, %v4507_v55  ;;  %v5765_v29 = vadd.f32 %v4089_v24, %v6868_v8  ;;  %v4467_v5 = vadd.f32 %v5762_v36, %v4466_v33  ;;  %v5719_v6 = vpop.f32.mrb[14].mxu0 }
 0x21d   : > { %v5766_v18 = vadd.f32 %v5719_v6, %v6870_v20  ;;  %v4092_v32 = vpop.f32.mrb[15].mxu0  ;;  %v4511_v47 = vmul.f32 %v5764_v11, %v5764_v11 }
 0x21e   : > { %v4468_v57 = vadd.f32 %v5765_v29, %v4467_v5  ;;  %v4509_v46 = vmul.f32 %v5765_v29, %v5765_v29  ;;  %v4539_v35 = vadd.f32 %v4538_v50, %v4508_v14  ;;  %v5767_v26 = vadd.f32 %v4092_v32, %v6872_v34 }
 0x21f   : > { %v5016_v58 = vpack.c.bf16 %v5766_v18, %v5764_v11  ;;  %v4512_v16 = vmul.f32 %v5766_v18, %v5766_v18 }
 0x220   : > { %v4540_v45 = vadd.f32 %v4539_v35, %v4509_v46  ;;  %v5011_v2 = vpack.c.bf16 %v5767_v26, %v5765_v29  ;;  %v4469_v42 = vadd.f32 %v5767_v26, %v4468_v57  ;;  %v4510_v44 = vmul.f32 %v5767_v26, %v5767_v26 }
 0x221   : > { %5079 = vst [vmem:[%s6161_s30 + $0x38] sm:$0xff] %v5016_v58  }
 0x222   : > { %5078 = vst [vmem:[%s6161_s30 + $0x30] sm:$0xff] %v5011_v2   ;;  %v4470_v8 = vadd.f32 %v5764_v11, %v4469_v42  ;;  %v4541_v43 = vadd.f32 %v4540_v45, %v4510_v44  ;;  %v5722_v60 = vpop.f32.mrb[16].mxu0 }
 0x223   : > { %v4105_v17 = vpop.f32.mrb[17].mxu0 }
 0x224   : > { %v4542_v20 = vadd.f32 %v4541_v43, %v4511_v47  ;;  %v4471_v3 = vadd.f32 %v5766_v18, %v4470_v8  ;;  %v5723_v9 = vpop.f32.mrb[18].mxu0 }
 0x225   : > { %v4108_v38 = vpop.f32.mrb[19].mxu0 }
 0x226   : > { %v4543_v4 = vadd.f32 %v4542_v20, %v4512_v16 }
 0x228   : > { %v5530_v15 = vpop.f32.mrb[16].mxu1 }
 0x229   : > { %v5768_v7 = vadd.f32 %v5722_v60, %v5530_v15  ;;  %v2456_v62 = vpop.f32.mrb[17].mxu1 }
 0x22a   : > { %v5726_v28 = vpop.f32.mrb[20].mxu0  ;;  %v5769_v56 = vadd.f32 %v4105_v17, %v2456_v62  ;;  %v5531_v39 = vpop.f32.mrb[18].mxu1 }
 0x22b   : > { %v4121_v34 = vpop.f32.mrb[21].mxu0  ;;  %v5770_v0 = vadd.f32 %v5723_v9, %v5531_v39  ;;  %v2459_v54 = vpop.f32.mrb[19].mxu1  ;;  %v4515_v22 = vmul.f32 %v5768_v7, %v5768_v7 }
 0x22c   : > { %v5727_v10 = vpop.f32.mrb[22].mxu0  ;;  %v4472_v49 = vadd.f32 %v5769_v56, %v4471_v3  ;;  %v4513_v12 = vmul.f32 %v5769_v56, %v5769_v56  ;;  %v5771_v27 = vadd.f32 %v4108_v38, %v2459_v54 }
 0x22d   : > { %v4124_v59 = vpop.f32.mrb[23].mxu0  ;;  %v5026_v31 = vpack.c.bf16 %v5770_v0, %v5768_v7  ;;  %v4516_v41 = vmul.f32 %v5770_v0, %v5770_v0 }
 0x22e   : > { %v4544_v23 = vadd.f32 %v4543_v4, %v4513_v12  ;;  %v5021_v1 = vpack.c.bf16 %v5771_v27, %v5769_v56  ;;  %v4473_v21 = vadd.f32 %v5771_v27, %v4472_v49  ;;  %v4514_v30 = vmul.f32 %v5771_v27, %v5771_v27 }
 0x22f   : > { %5081 = vst [vmem:[%s6161_s30 + $0x48] sm:$0xff] %v5026_v31  }
 0x230   : > { %5080 = vst [vmem:[%s6161_s30 + $0x40] sm:$0xff] %v5021_v1   ;;  %v4474_v40 = vadd.f32 %v5768_v7, %v4473_v21  ;;  %v4545_v13 = vadd.f32 %v4544_v23, %v4514_v30  ;;  %v5534_v51 = vpop.f32.mrb[20].mxu1 }
 0x231   : > { %v5772_v25 = vadd.f32 %v5726_v28, %v5534_v51  ;;  %v2472_v63 = vpop.f32.mrb[21].mxu1 }
 0x232   : > { %v5730_v61 = vpop.f32.mrb[24].mxu0  ;;  %v4546_v37 = vadd.f32 %v4545_v13, %v4515_v22  ;;  %v5773_v55 = vadd.f32 %v4121_v34, %v2472_v63  ;;  %v4475_v33 = vadd.f32 %v5770_v0, %v4474_v40  ;;  %v5535_v48 = vpop.f32.mrb[22].mxu1 }
 0x233   : > { %v4137_v36 = vpop.f32.mrb[25].mxu0  ;;  %v5774_v19 = vadd.f32 %v5727_v10, %v5535_v48  ;;  %v2475_v11 = vpop.f32.mrb[23].mxu1  ;;  %v4519_v26 = vmul.f32 %v5772_v25, %v5772_v25 }
 0x234   : > { %v5731_v53 = vpop.f32.mrb[26].mxu0  ;;  %v4476_v24 = vadd.f32 %v5773_v55, %v4475_v33  ;;  %v4517_v14 = vmul.f32 %v5773_v55, %v5773_v55  ;;  %v4547_v50 = vadd.f32 %v4546_v37, %v4516_v41  ;;  %v5775_v29 = vadd.f32 %v4124_v59, %v2475_v11 }
 0x235   : > { %v4140_v52 = vpop.f32.mrb[27].mxu0  ;;  %v5036_v5 = vpack.c.bf16 %v5774_v19, %v5772_v25  ;;  %v4520_v43 = vmul.f32 %v5774_v19, %v5774_v19 }
 0x236   : > { %v4548_v6 = vadd.f32 %v4547_v50, %v4517_v14  ;;  %v5031_v18 = vpack.c.bf16 %v5775_v29, %v5773_v55  ;;  %v4477_v32 = vadd.f32 %v5775_v29, %v4476_v24  ;;  %v4518_v57 = vmul.f32 %v5775_v29, %v5775_v29 }
 0x237   : > { %5083 = vst [vmem:[%s6161_s30 + $0x58] sm:$0xff] %v5036_v5  }
 0x238   : > { %5082 = vst [vmem:[%s6161_s30 + $0x50] sm:$0xff] %v5031_v18   ;;  %v4478_v58 = vadd.f32 %v5772_v25, %v4477_v32  ;;  %v4549_v45 = vadd.f32 %v4548_v6, %v4518_v57  ;;  %v5538_v2 = vpop.f32.mrb[24].mxu1 }
 0x239   : > { %v5776_v44 = vadd.f32 %v5730_v61, %v5538_v2  ;;  %v2488_v47 = vpop.f32.mrb[25].mxu1 }
 0x23a   : > { %v5734_v46 = vpop.f32.mrb[28].mxu0  ;;  %v4550_v60 = vadd.f32 %v4549_v45, %v4519_v26  ;;  %v5777_v17 = vadd.f32 %v4137_v36, %v2488_v47  ;;  %v4479_v16 = vadd.f32 %v5774_v19, %v4478_v58  ;;  %v5539_v20 = vpop.f32.mrb[26].mxu1  ;;  %v4496_v58 = vld [vmem:[%s6915_s6] sm:$0x1] }
 0x23b   : > { %v4153_v35 = vpop.f32.mrb[29].mxu0  ;;  %v5778_v3 = vadd.f32 %v5731_v53, %v5539_v20  ;;  %v2491_v9 = vpop.f32.mrb[27].mxu1  ;;  %v4523_v56 = vmul.f32 %v5776_v44, %v5776_v44 }
 0x23c   : > { %v5735_v42 = vpop.f32.mrb[30].mxu0  ;;  %v4480_v38 = vadd.f32 %v5777_v17, %v4479_v16  ;;  %v4521_v4 = vmul.f32 %v5777_v17, %v5777_v17  ;;  %v4551_v28 = vadd.f32 %v4550_v60, %v4520_v43  ;;  %v5779_v34 = vadd.f32 %v4140_v52, %v2491_v9 }
 0x23d   : > { %v4156_v8 = vpop.f32.mrb[31].mxu0  ;;  %v5046_v15 = vpack.c.bf16 %v5778_v3, %v5776_v44  ;;  %v4524_v27 = vmul.f32 %v5778_v3, %v5778_v3 }
 0x23e   : > { %v4552_v10 = vadd.f32 %v4551_v28, %v4521_v4  ;;  %v5041_v7 = vpack.c.bf16 %v5779_v34, %v5777_v17  ;;  %v4481_v62 = vadd.f32 %v5779_v34, %v4480_v38  ;;  %v4522_v59 = vmul.f32 %v5779_v34, %v5779_v34 }
 0x23f   : > { %5085 = vst [vmem:[%s6161_s30 + $0x68] sm:$0xff] %v5046_v15  }
 0x240   : > { %5084 = vst [vmem:[%s6161_s30 + $0x60] sm:$0xff] %v5041_v7   ;;  %v4482_v39 = vadd.f32 %v5776_v44, %v4481_v62  ;;  %v4553_v0 = vadd.f32 %v4552_v10, %v4522_v59  ;;  %v5542_v54 = vpop.f32.mrb[28].mxu1 }
 0x241   : > { %v5780_v49 = vadd.f32 %v5734_v46, %v5542_v54  ;;  %v2504_v12 = vpop.f32.mrb[29].mxu1  ;;  %v4456_v46 = vld [vmem:[%s6914_s5] sm:$0x1] }
 0x242   : > { %v4554_v31 = vadd.f32 %v4553_v0, %v4523_v56  ;;  %v5781_v23 = vadd.f32 %v4153_v35, %v2504_v12  ;;  %v4483_v1 = vadd.f32 %v5778_v3, %v4482_v39  ;;  %v5543_v21 = vpop.f32.mrb[30].mxu1 }
 0x243   : > { %v5782_v30 = vadd.f32 %v5735_v42, %v5543_v21  ;;  %v2507_v61 = vpop.f32.mrb[31].mxu1  ;;  %v4527_v41 = vmul.f32 %v5780_v49, %v5780_v49 }
 0x244   : > { %v4484_v36 = vadd.f32 %v5781_v23, %v4483_v1  ;;  %v4525_v22 = vmul.f32 %v5781_v23, %v5781_v23  ;;  %v4555_v40 = vadd.f32 %v4554_v31, %v4524_v27  ;;  %v5783_v13 = vadd.f32 %v4156_v8, %v2507_v61 }
 0x245   : > { %v5056_v51 = vpack.c.bf16 %v5782_v30, %v5780_v49  ;;  %v4528_v33 = vmul.f32 %v5782_v30, %v5782_v30 }
 0x246   : > { %v4556_v53 = vadd.f32 %v4555_v40, %v4525_v22  ;;  %v5051_v25 = vpack.c.bf16 %v5783_v13, %v5781_v23  ;;  %v4485_v63 = vadd.f32 %v5783_v13, %v4484_v36  ;;  %v4526_v52 = vmul.f32 %v5783_v13, %v5783_v13 }
 0x247   : > { %5087 = vst [vmem:[%s6161_s30 + $0x78] sm:$0xff] %v5056_v51  }
 0x248   : > { %5086 = vst [vmem:[%s6161_s30 + $0x70] sm:$0xff] %v5051_v25   ;;  %v4486_v37 = vadd.f32 %v5780_v49, %v4485_v63  ;;  %v4557_v55 = vadd.f32 %v4556_v53, %v4526_v52 }
 0x24a   : > { %v4487_v48 = vadd.f32 %v5782_v30, %v4486_v37  ;;  %v4558_v19 = vadd.f32 %v4557_v55, %v4527_v41 }
 0x24c   : > { %v4488_v11 = vrot.slane %v4487_v48, 4  ;;  %v4559_v24 = vadd.f32 %v4558_v19, %v4528_v33 }
 0x24e   : > { %v4489_v14 = vadd.f32 %v4488_v11, %v4487_v48  ;;  %v4560_v50 = vrot.slane %v4559_v24, 4 }
 0x250   : > { %v4490_v29 = vrot.slane %v4489_v14, 2  ;;  %v4561_v5 = vadd.f32 %v4560_v50, %v4559_v24 }
 0x252   : > { %v4491_v6 = vadd.f32 %v4490_v29, %v4489_v14  ;;  %v4562_v18 = vrot.slane %v4561_v5, 2 }
 0x254   : > { %v4492_v32 = vrot.slane %v4491_v6, 1  ;;  %v4563_v57 = vadd.f32 %v4562_v18, %v4561_v5 }
 0x256   : > { %v4493_v35 = vadd.f32 %v4492_v32, %v4491_v6  ;;  %v4564_v26 = vrot.slane %v4563_v57, 1 }
 0x258   : > { %v4494_v45 = vadd.f32 %v4493_v35, %v4456_v46  ;;  %v4565_v2 = vadd.f32 %v4564_v26, %v4563_v57 }
 0x25a   : > { %4495 = vst [vmem:[%s6914_s5] sm:$0x1] %v4494_v45  ;;  %v4566_v42 = vadd.f32 %v4565_v2, %v4496_v58 }
 0x25c   : > { %4567 = vst [vmem:[%s6915_s6] sm:$0x1] %v4566_v42 }
 0x25d PF: > { %s17_s21 = sadd.s32 1, %s6106_s21  }
 0x25e   : > { %p14_p5 = scmp.ge.s32.totalorder %s17_s21, 4  }
 0x260   :  { %16 = sbr.rel (!%p14_p5) target bundleno = 1 (0x1), region = 95 }

</bundles_post_ra>
